<compile_context>
chip_gen: v7x
topology: tpu7x:2x2x1
jax: 0.10.0
libtpu: 0.0.40
codegen_flags: <defaults>
</compile_context>

<pallas_src>
import functools

import jax
import jax.numpy as jnp
from jax import lax
from jax.experimental import pallas as pl
from jax.experimental.pallas import tpu as pltpu


def _group_attention_kernel(x_ref, wq_ref, wk_ref, wv_ref, wp_ref, b_ref, o_ref,
                            *, num_heads, scale, gb, seq):
    """One grid step = Gb windows (gb*seq token rows), all heads."""
    x = x_ref[...]                                   # (Gb*S, C) f32
    m, c = x.shape
    hd = c // num_heads
    dn = (((1,), (1,)), ((), ()))                    # contract both operands' last axis

    acc = jnp.zeros((m, c), jnp.float32)
    for h in range(num_heads):                       # static unroll; head select = leading-axis weight index
        qh = lax.dot_general(x, wq_ref[h], dn,
                             preferred_element_type=jnp.float32) * scale      # (M, hd)
        kh = lax.dot_general(x, wk_ref[h], dn, preferred_element_type=jnp.float32)
        vh = lax.dot_general(x, wv_ref[h], dn, preferred_element_type=jnp.float32)

        q3 = qh.reshape(gb, seq, hd)                 # leading-dim-only reshapes (last dim unchanged)
        k3 = kh.reshape(gb, seq, hd)
        v3 = vh.reshape(gb, seq, hd)

        # attn[g, i, j] = (q_i . k_j) * scale  (per window g, this head) -> (Gb, S_q, S_k)
        s = jnp.einsum("gqd,gkd->gqk", q3, k3, preferred_element_type=jnp.float32)

        # PyTorch softmax(dim=-2): normalize over the QUERY axis (axis=1 here).
        mx = jnp.max(s, axis=1, keepdims=True)
        e = jnp.exp(s - mx)
        p = e * pl.reciprocal(jnp.sum(e, axis=1, keepdims=True), approx=True)

        oh = jnp.einsum("gqk,gkd->gqd", p, v3, preferred_element_type=jnp.float32)  # (Gb, S, hd)

        # Fold the output projection: acc += out_h @ Wp[:, h*hd:(h+1)*hd]^T  (no concat needed)
        acc = acc + lax.dot_general(oh.reshape(m, hd), wp_ref[h], dn,
                                    preferred_element_type=jnp.float32)

    o_ref[...] = (acc + b_ref[...]).astype(o_ref.dtype)


def _pick_windows_per_step(total_windows, seq, target_rows=512):
    """Largest divisor of total_windows whose row count (gb*seq) fits the target tile."""
    best = 1
    for gb in range(1, total_windows + 1):
        if total_windows % gb == 0 and gb * seq <= target_rows:
            best = gb
    return best


def group_attention_pallas(x, wqkv, wproj, bproj, H, W, ws, num_heads):
    """x: (B, N, C) with N = H*W.  wqkv: (3C, C), wproj: (C, C), bproj: (C,)
    (PyTorch nn.Linear conventions, qkv has no bias)."""
    B, N, C = x.shape
    assert N == H * W and C % num_heads == 0
    hg, wg = H // ws, W // ws
    G = hg * wg
    S = ws * ws
    hd = C // num_heads
    scale = hd ** (-0.5)

    # Window extraction: (B, N, C) -> (B*G*S, C) token rows, windows contiguous.
    x6 = x.reshape(B, hg, ws, wg, ws, C)
    xg = jnp.transpose(x6, (0, 1, 3, 2, 4, 5)).reshape(B * G * S, C)

    # Per-head weight views (leading head axis -> no lane slicing inside the kernel).
    wq_h, wk_h, wv_h = wqkv.reshape(3, num_heads, hd, C)          # each (nh, hd, C)
    wp_h = wproj.reshape(C, num_heads, hd).transpose(1, 0, 2)     # (nh, C, hd)
    b2 = bproj.reshape(1, C)

    gb = _pick_windows_per_step(B * G, S)
    nblk = (B * G) // gb
    rows = gb * S
    assert rows % 8 == 0 or nblk == 1, "block rows must be a multiple of 8"

    kernel = functools.partial(_group_attention_kernel,
                               num_heads=num_heads, scale=scale, gb=gb, seq=S)

    out = pl.pallas_call(
        kernel,
        out_shape=jax.ShapeDtypeStruct((B * G * S, C), x.dtype),
        grid_spec=pltpu.PrefetchScalarGridSpec(
            num_scalar_prefetch=0,
            grid=(nblk,),
            in_specs=[
                pl.BlockSpec((rows, C), lambda g: (g, 0)),              # Gb windows of tokens
                pl.BlockSpec((num_heads, hd, C), lambda g: (0, 0, 0)),  # q weights (resident)
                pl.BlockSpec((num_heads, hd, C), lambda g: (0, 0, 0)),  # k weights (resident)
                pl.BlockSpec((num_heads, hd, C), lambda g: (0, 0, 0)),  # v weights (resident)
                pl.BlockSpec((num_heads, C, hd), lambda g: (0, 0, 0)),  # proj weights (resident)
                pl.BlockSpec((1, C), lambda g: (0, 0)),                 # proj bias
            ],
            out_specs=pl.BlockSpec((rows, C), lambda g: (g, 0)),
        ),
        compiler_params=pltpu.CompilerParams(
            dimension_semantics=("parallel",)),
    )(xg, wq_h, wk_h, wv_h, wp_h, b2)

    # Window re-assembly: (B*G*S, C) -> (B, N, C)
    out6 = out.reshape(B, hg, wg, ws, ws, C)
    return jnp.transpose(out6, (0, 1, 3, 2, 4, 5)).reshape(B, N, C)


def group_attention_ref(x, wqkv, wproj, bproj, H, W, ws, num_heads):
    """Pure-JAX mirror of the PyTorch forward (for verification)."""
    B, N, C = x.shape
    hg, wg = H // ws, W // ws
    G = hg * wg
    hd = C // num_heads
    scale = hd ** (-0.5)

    xg = jnp.transpose(x.reshape(B, hg, ws, wg, ws, C), (0, 1, 3, 2, 4, 5))
    qkv = jnp.einsum("bhwijc,oc->bhwijo", xg, wqkv)
    qkv = qkv.reshape(B, G, ws * ws, 3, num_heads, hd)
    qkv = jnp.transpose(qkv, (3, 0, 1, 4, 2, 5))              # (3, B, G, nh, S, hd)
    q, k, v = qkv[0], qkv[1], qkv[2]
    attn = jnp.einsum("bgnqd,bgnkd->bgnqk", q, k) * scale
    attn = jax.nn.softmax(attn, axis=-2)                       # softmax over query axis
    out = jnp.einsum("bgnqk,bgnkd->bgnqd", attn, v)
    out = jnp.transpose(out, (0, 1, 3, 2, 4)).reshape(B, hg, wg, ws, ws, C)
    out = jnp.transpose(out, (0, 1, 3, 2, 4, 5)).reshape(B, N, C)
    return jnp.einsum("bnc,oc->bno", out, wproj) + bproj


if __name__ == "__main__":
    B, C, H, W, ws, num_heads = 2, 32, 8, 8, 4, 8
    N = H * W

    key = jax.random.PRNGKey(0)
    k1, k2, k3, k4 = jax.random.split(key, 4)
    x = jax.random.normal(k1, (B, N, C), jnp.float32)
    # nn.Linear(dim, dim*3, bias=False): weight (3C, C)
    wqkv = jax.random.normal(k2, (3 * C, C), jnp.float32) * 0.05
    # nn.Linear(dim, dim): weight (C, C), bias (C,)
    wproj = jax.random.normal(k3, (C, C), jnp.float32) * 0.05
    bproj = jax.random.normal(k4, (C,), jnp.float32) * 0.05
    # TODO(synk): attn_drop / proj_drop are identity in eval mode (p=0.0), omitted.

    out = group_attention_pallas(x, wqkv, wproj, bproj, H, W, ws, num_heads)
    out = jax.block_until_ready(out)

    ref = group_attention_ref(x, wqkv, wproj, bproj, H, W, ws, num_heads)
    assert out.shape == (B, N, C)
    # tolerance loosened slightly for pl.reciprocal(..., approx=True) in the softmax
    assert jnp.allclose(out, ref, atol=5e-3, rtol=5e-3), "mismatch vs reference"

    print("KERNEL_OK")
</pallas_src>

<mosaic_0001>
module attributes {stable_mosaic.version = 11 : i64} {
  func.func @_group_attention_kernel(%arg0: i32, %arg1: memref<128x32xf32, #tpu.memory_space<vmem>>, %arg2: memref<8x4x32xf32, #tpu.memory_space<vmem>>, %arg3: memref<8x4x32xf32, #tpu.memory_space<vmem>>, %arg4: memref<8x4x32xf32, #tpu.memory_space<vmem>>, %arg5: memref<8x32x4xf32, #tpu.memory_space<vmem>>, %arg6: memref<1x32xf32, #tpu.memory_space<vmem>>, %arg7: memref<128x32xf32, #tpu.memory_space<vmem>>) attributes {dimension_semantics = [#tpu.dimension_semantics<parallel>], iteration_bounds = array<i64: 1>, scalar_prefetch = 0 : i64, scratch_operands = 0 : i64, tpu.core_type = #tpu.core_type<tc>, window_params = [{transform_indices = @transform_0, window_bounds = array<i64: 128, 32>}, {pipeline_mode = #tpu.pipeline_mode<synchronous>, transform_indices = @transform_1, window_bounds = array<i64: 8, 4, 32>}, {pipeline_mode = #tpu.pipeline_mode<synchronous>, transform_indices = @transform_2, window_bounds = array<i64: 8, 4, 32>}, {pipeline_mode = #tpu.pipeline_mode<synchronous>, transform_indices = @transform_3, window_bounds = array<i64: 8, 4, 32>}, {pipeline_mode = #tpu.pipeline_mode<synchronous>, transform_indices = @transform_4, window_bounds = array<i64: 8, 32, 4>}, {pipeline_mode = #tpu.pipeline_mode<synchronous>, transform_indices = @transform_5, window_bounds = array<i64: 1, 32>}, {transform_indices = @transform_6, window_bounds = array<i64: 128, 32>}]} {
    %c0 = arith.constant 0 : index
    %c0_0 = arith.constant 0 : index
    %0 = vector.load %arg1[%c0, %c0_0] : memref<128x32xf32, #tpu.memory_space<vmem>>, vector<128x32xf32>
    %cst = arith.constant 0.000000e+00 : f32
    %1 = vector.broadcast %cst : f32 to vector<128x32xf32>
    %c0_1 = arith.constant 0 : index
    %c0_2 = arith.constant 0 : index
    %c0_3 = arith.constant 0 : index
    %2 = vector.load %arg2[%c0_1, %c0_2, %c0_3] : memref<8x4x32xf32, #tpu.memory_space<vmem>>, vector<1x4x32xf32>
    %3 = vector.shape_cast %2 : vector<1x4x32xf32> to vector<4x32xf32>
    %cst_4 = arith.constant dense<0.000000e+00> : vector<128x4xf32>
    %4 = tpu.matmul %0, %3, %cst_4 {dimension_numbers = #tpu.dot_dimension_numbers<[1], [1], [0], [0], [0, 0, 1, 0], [], []>} : vector<128x32xf32>, vector<4x32xf32>, vector<128x4xf32> -> vector<128x4xf32>
    %cst_5 = arith.constant 5.000000e-01 : f32
    %5 = vector.broadcast %cst_5 : f32 to vector<128x4xf32>
    %6 = arith.mulf %4, %5 : vector<128x4xf32>
    %c0_6 = arith.constant 0 : index
    %c0_7 = arith.constant 0 : index
    %c0_8 = arith.constant 0 : index
    %7 = vector.load %arg3[%c0_6, %c0_7, %c0_8] : memref<8x4x32xf32, #tpu.memory_space<vmem>>, vector<1x4x32xf32>
    %8 = vector.shape_cast %7 : vector<1x4x32xf32> to vector<4x32xf32>
    %cst_9 = arith.constant dense<0.000000e+00> : vector<128x4xf32>
    %9 = tpu.matmul %0, %8, %cst_9 {dimension_numbers = #tpu.dot_dimension_numbers<[1], [1], [0], [0], [0, 0, 1, 0], [], []>} : vector<128x32xf32>, vector<4x32xf32>, vector<128x4xf32> -> vector<128x4xf32>
    %c0_10 = arith.constant 0 : index
    %c0_11 = arith.constant 0 : index
    %c0_12 = arith.constant 0 : index
    %10 = vector.load %arg4[%c0_10, %c0_11, %c0_12] : memref<8x4x32xf32, #tpu.memory_space<vmem>>, vector<1x4x32xf32>
    %11 = vector.shape_cast %10 : vector<1x4x32xf32> to vector<4x32xf32>
    %cst_13 = arith.constant dense<0.000000e+00> : vector<128x4xf32>
    %12 = tpu.matmul %0, %11, %cst_13 {dimension_numbers = #tpu.dot_dimension_numbers<[1], [1], [0], [0], [0, 0, 1, 0], [], []>} : vector<128x32xf32>, vector<4x32xf32>, vector<128x4xf32> -> vector<128x4xf32>
    %13 = vector.shape_cast %6 : vector<128x4xf32> to vector<8x16x4xf32>
    %14 = vector.shape_cast %9 : vector<128x4xf32> to vector<8x16x4xf32>
    %15 = vector.shape_cast %12 : vector<128x4xf32> to vector<8x16x4xf32>
    "tpu.trace_start"() <{level = 10 : i32, message = "gqd,gkd->gqk"}> : () -> ()
    %cst_14 = arith.constant dense<0.000000e+00> : vector<8x16x16xf32>
    %16 = tpu.matmul %13, %14, %cst_14 {dimension_numbers = #tpu.dot_dimension_numbers<[2], [2], [1], [1], [0, 0, 0, 1, 1, 1], [0], [0]>} : vector<8x16x4xf32>, vector<8x16x4xf32>, vector<8x16x16xf32> -> vector<8x16x16xf32>
    "tpu.trace_stop"() : () -> ()
    %cst_15 = arith.constant dense<0xFF800000> : vector<8x16xf32>
    %17 = vector.multi_reduction <maximumf>, %16, %cst_15 [1] : vector<8x16x16xf32> to vector<8x16xf32>
    %18 = vector.shape_cast %17 : vector<8x16xf32> to vector<8x1x16xf32>
    %19 = vector.broadcast %18 : vector<8x1x16xf32> to vector<8x16x16xf32>
    %20 = arith.subf %16, %19 : vector<8x16x16xf32>
    %21 = math.exp %20 : vector<8x16x16xf32>
    %cst_16 = arith.constant dense<0.000000e+00> : vector<8x16xf32>
    %22 = vector.multi_reduction <add>, %21, %cst_16 [1] : vector<8x16x16xf32> to vector<8x16xf32>
    %23 = vector.shape_cast %22 : vector<8x16xf32> to vector<8x1x16xf32>
    %24 = tpu.reciprocal %23 {approx = true} : vector<8x1x16xf32> -> vector<8x1x16xf32>
    %25 = vector.broadcast %24 : vector<8x1x16xf32> to vector<8x16x16xf32>
    %26 = arith.mulf %21, %25 : vector<8x16x16xf32>
    "tpu.trace_start"() <{level = 10 : i32, message = "gqk,gkd->gqd"}> : () -> ()
    %cst_17 = arith.constant dense<0.000000e+00> : vector<8x16x4xf32>
    %27 = tpu.matmul %26, %15, %cst_17 {dimension_numbers = #tpu.dot_dimension_numbers<[2], [1], [1], [2], [0, 0, 0, 1, 1, 2], [0], [0]>} : vector<8x16x16xf32>, vector<8x16x4xf32>, vector<8x16x4xf32> -> vector<8x16x4xf32>
    "tpu.trace_stop"() : () -> ()
    %28 = vector.shape_cast %27 : vector<8x16x4xf32> to vector<128x4xf32>
    %c0_18 = arith.constant 0 : index
    %c0_19 = arith.constant 0 : index
    %c0_20 = arith.constant 0 : index
    %29 = vector.load %arg5[%c0_18, %c0_19, %c0_20] : memref<8x32x4xf32, #tpu.memory_space<vmem>>, vector<1x32x4xf32>
    %30 = vector.shape_cast %29 : vector<1x32x4xf32> to vector<32x4xf32>
    %cst_21 = arith.constant dense<0.000000e+00> : vector<128x32xf32>
    %31 = tpu.matmul %28, %30, %cst_21 {dimension_numbers = #tpu.dot_dimension_numbers<[1], [1], [0], [0], [0, 0, 1, 0], [], []>} : vector<128x4xf32>, vector<32x4xf32>, vector<128x32xf32> -> vector<128x32xf32>
    %32 = arith.addf %1, %31 : vector<128x32xf32>
    %c1 = arith.constant 1 : index
    %c0_22 = arith.constant 0 : index
    %c0_23 = arith.constant 0 : index
    %33 = vector.load %arg2[%c1, %c0_22, %c0_23] : memref<8x4x32xf32, #tpu.memory_space<vmem>>, vector<1x4x32xf32>
    %34 = vector.shape_cast %33 : vector<1x4x32xf32> to vector<4x32xf32>
    %cst_24 = arith.constant dense<0.000000e+00> : vector<128x4xf32>
    %35 = tpu.matmul %0, %34, %cst_24 {dimension_numbers = #tpu.dot_dimension_numbers<[1], [1], [0], [0], [0, 0, 1, 0], [], []>} : vector<128x32xf32>, vector<4x32xf32>, vector<128x4xf32> -> vector<128x4xf32>
    %cst_25 = arith.constant 5.000000e-01 : f32
    %36 = vector.broadcast %cst_25 : f32 to vector<128x4xf32>
    %37 = arith.mulf %35, %36 : vector<128x4xf32>
    %c1_26 = arith.constant 1 : index
    %c0_27 = arith.constant 0 : index
    %c0_28 = arith.constant 0 : index
    %38 = vector.load %arg3[%c1_26, %c0_27, %c0_28] : memref<8x4x32xf32, #tpu.memory_space<vmem>>, vector<1x4x32xf32>
    %39 = vector.shape_cast %38 : vector<1x4x32xf32> to vector<4x32xf32>
    %cst_29 = arith.constant dense<0.000000e+00> : vector<128x4xf32>
    %40 = tpu.matmul %0, %39, %cst_29 {dimension_numbers = #tpu.dot_dimension_numbers<[1], [1], [0], [0], [0, 0, 1, 0], [], []>} : vector<128x32xf32>, vector<4x32xf32>, vector<128x4xf32> -> vector<128x4xf32>
    %c1_30 = arith.constant 1 : index
    %c0_31 = arith.constant 0 : index
    %c0_32 = arith.constant 0 : index
    %41 = vector.load %arg4[%c1_30, %c0_31, %c0_32] : memref<8x4x32xf32, #tpu.memory_space<vmem>>, vector<1x4x32xf32>
    %42 = vector.shape_cast %41 : vector<1x4x32xf32> to vector<4x32xf32>
    %cst_33 = arith.constant dense<0.000000e+00> : vector<128x4xf32>
    %43 = tpu.matmul %0, %42, %cst_33 {dimension_numbers = #tpu.dot_dimension_numbers<[1], [1], [0], [0], [0, 0, 1, 0], [], []>} : vector<128x32xf32>, vector<4x32xf32>, vector<128x4xf32> -> vector<128x4xf32>
    %44 = vector.shape_cast %37 : vector<128x4xf32> to vector<8x16x4xf32>
    %45 = vector.shape_cast %40 : vector<128x4xf32> to vector<8x16x4xf32>
    %46 = vector.shape_cast %43 : vector<128x4xf32> to vector<8x16x4xf32>
    "tpu.trace_start"() <{level = 10 : i32, message = "gqd,gkd->gqk"}> : () -> ()
    %cst_34 = arith.constant dense<0.000000e+00> : vector<8x16x16xf32>
    %47 = tpu.matmul %44, %45, %cst_34 {dimension_numbers = #tpu.dot_dimension_numbers<[2], [2], [1], [1], [0, 0, 0, 1, 1, 1], [0], [0]>} : vector<8x16x4xf32>, vector<8x16x4xf32>, vector<8x16x16xf32> -> vector<8x16x16xf32>
    "tpu.trace_stop"() : () -> ()
    %cst_35 = arith.constant dense<0xFF800000> : vector<8x16xf32>
    %48 = vector.multi_reduction <maximumf>, %47, %cst_35 [1] : vector<8x16x16xf32> to vector<8x16xf32>
    %49 = vector.shape_cast %48 : vector<8x16xf32> to vector<8x1x16xf32>
    %50 = vector.broadcast %49 : vector<8x1x16xf32> to vector<8x16x16xf32>
    %51 = arith.subf %47, %50 : vector<8x16x16xf32>
    %52 = math.exp %51 : vector<8x16x16xf32>
    %cst_36 = arith.constant dense<0.000000e+00> : vector<8x16xf32>
    %53 = vector.multi_reduction <add>, %52, %cst_36 [1] : vector<8x16x16xf32> to vector<8x16xf32>
    %54 = vector.shape_cast %53 : vector<8x16xf32> to vector<8x1x16xf32>
    %55 = tpu.reciprocal %54 {approx = true} : vector<8x1x16xf32> -> vector<8x1x16xf32>
    %56 = vector.broadcast %55 : vector<8x1x16xf32> to vector<8x16x16xf32>
    %57 = arith.mulf %52, %56 : vector<8x16x16xf32>
    "tpu.trace_start"() <{level = 10 : i32, message = "gqk,gkd->gqd"}> : () -> ()
    %cst_37 = arith.constant dense<0.000000e+00> : vector<8x16x4xf32>
    %58 = tpu.matmul %57, %46, %cst_37 {dimension_numbers = #tpu.dot_dimension_numbers<[2], [1], [1], [2], [0, 0, 0, 1, 1, 2], [0], [0]>} : vector<8x16x16xf32>, vector<8x16x4xf32>, vector<8x16x4xf32> -> vector<8x16x4xf32>
    "tpu.trace_stop"() : () -> ()
    %59 = vector.shape_cast %58 : vector<8x16x4xf32> to vector<128x4xf32>
    %c1_38 = arith.constant 1 : index
    %c0_39 = arith.constant 0 : index
    %c0_40 = arith.constant 0 : index
    %60 = vector.load %arg5[%c1_38, %c0_39, %c0_40] : memref<8x32x4xf32, #tpu.memory_space<vmem>>, vector<1x32x4xf32>
    %61 = vector.shape_cast %60 : vector<1x32x4xf32> to vector<32x4xf32>
    %cst_41 = arith.constant dense<0.000000e+00> : vector<128x32xf32>
    %62 = tpu.matmul %59, %61, %cst_41 {dimension_numbers = #tpu.dot_dimension_numbers<[1], [1], [0], [0], [0, 0, 1, 0], [], []>} : vector<128x4xf32>, vector<32x4xf32>, vector<128x32xf32> -> vector<128x32xf32>
    %63 = arith.addf %32, %62 : vector<128x32xf32>
    %c2 = arith.constant 2 : index
    %c0_42 = arith.constant 0 : index
    %c0_43 = arith.constant 0 : index
    %64 = vector.load %arg2[%c2, %c0_42, %c0_43] : memref<8x4x32xf32, #tpu.memory_space<vmem>>, vector<1x4x32xf32>
    %65 = vector.shape_cast %64 : vector<1x4x32xf32> to vector<4x32xf32>
    %cst_44 = arith.constant dense<0.000000e+00> : vector<128x4xf32>
    %66 = tpu.matmul %0, %65, %cst_44 {dimension_numbers = #tpu.dot_dimension_numbers<[1], [1], [0], [0], [0, 0, 1, 0], [], []>} : vector<128x32xf32>, vector<4x32xf32>, vector<128x4xf32> -> vector<128x4xf32>
    %cst_45 = arith.constant 5.000000e-01 : f32
    %67 = vector.broadcast %cst_45 : f32 to vector<128x4xf32>
    %68 = arith.mulf %66, %67 : vector<128x4xf32>
    %c2_46 = arith.constant 2 : index
    %c0_47 = arith.constant 0 : index
    %c0_48 = arith.constant 0 : index
    %69 = vector.load %arg3[%c2_46, %c0_47, %c0_48] : memref<8x4x32xf32, #tpu.memory_space<vmem>>, vector<1x4x32xf32>
    %70 = vector.shape_cast %69 : vector<1x4x32xf32> to vector<4x32xf32>
    %cst_49 = arith.constant dense<0.000000e+00> : vector<128x4xf32>
    %71 = tpu.matmul %0, %70, %cst_49 {dimension_numbers = #tpu.dot_dimension_numbers<[1], [1], [0], [0], [0, 0, 1, 0], [], []>} : vector<128x32xf32>, vector<4x32xf32>, vector<128x4xf32> -> vector<128x4xf32>
    %c2_50 = arith.constant 2 : index
    %c0_51 = arith.constant 0 : index
    %c0_52 = arith.constant 0 : index
    %72 = vector.load %arg4[%c2_50, %c0_51, %c0_52] : memref<8x4x32xf32, #tpu.memory_space<vmem>>, vector<1x4x32xf32>
    %73 = vector.shape_cast %72 : vector<1x4x32xf32> to vector<4x32xf32>
    %cst_53 = arith.constant dense<0.000000e+00> : vector<128x4xf32>
    %74 = tpu.matmul %0, %73, %cst_53 {dimension_numbers = #tpu.dot_dimension_numbers<[1], [1], [0], [0], [0, 0, 1, 0], [], []>} : vector<128x32xf32>, vector<4x32xf32>, vector<128x4xf32> -> vector<128x4xf32>
    %75 = vector.shape_cast %68 : vector<128x4xf32> to vector<8x16x4xf32>
    %76 = vector.shape_cast %71 : vector<128x4xf32> to vector<8x16x4xf32>
    %77 = vector.shape_cast %74 : vector<128x4xf32> to vector<8x16x4xf32>
    "tpu.trace_start"() <{level = 10 : i32, message = "gqd,gkd->gqk"}> : () -> ()
    %cst_54 = arith.constant dense<0.000000e+00> : vector<8x16x16xf32>
    %78 = tpu.matmul %75, %76, %cst_54 {dimension_numbers = #tpu.dot_dimension_numbers<[2], [2], [1], [1], [0, 0, 0, 1, 1, 1], [0], [0]>} : vector<8x16x4xf32>, vector<8x16x4xf32>, vector<8x16x16xf32> -> vector<8x16x16xf32>
    "tpu.trace_stop"() : () -> ()
    %cst_55 = arith.constant dense<0xFF800000> : vector<8x16xf32>
    %79 = vector.multi_reduction <maximumf>, %78, %cst_55 [1] : vector<8x16x16xf32> to vector<8x16xf32>
    %80 = vector.shape_cast %79 : vector<8x16xf32> to vector<8x1x16xf32>
    %81 = vector.broadcast %80 : vector<8x1x16xf32> to vector<8x16x16xf32>
    %82 = arith.subf %78, %81 : vector<8x16x16xf32>
    %83 = math.exp %82 : vector<8x16x16xf32>
    %cst_56 = arith.constant dense<0.000000e+00> : vector<8x16xf32>
    %84 = vector.multi_reduction <add>, %83, %cst_56 [1] : vector<8x16x16xf32> to vector<8x16xf32>
    %85 = vector.shape_cast %84 : vector<8x16xf32> to vector<8x1x16xf32>
    %86 = tpu.reciprocal %85 {approx = true} : vector<8x1x16xf32> -> vector<8x1x16xf32>
    %87 = vector.broadcast %86 : vector<8x1x16xf32> to vector<8x16x16xf32>
    %88 = arith.mulf %83, %87 : vector<8x16x16xf32>
    "tpu.trace_start"() <{level = 10 : i32, message = "gqk,gkd->gqd"}> : () -> ()
    %cst_57 = arith.constant dense<0.000000e+00> : vector<8x16x4xf32>
    %89 = tpu.matmul %88, %77, %cst_57 {dimension_numbers = #tpu.dot_dimension_numbers<[2], [1], [1], [2], [0, 0, 0, 1, 1, 2], [0], [0]>} : vector<8x16x16xf32>, vector<8x16x4xf32>, vector<8x16x4xf32> -> vector<8x16x4xf32>
    "tpu.trace_stop"() : () -> ()
    %90 = vector.shape_cast %89 : vector<8x16x4xf32> to vector<128x4xf32>
    %c2_58 = arith.constant 2 : index
    %c0_59 = arith.constant 0 : index
    %c0_60 = arith.constant 0 : index
    %91 = vector.load %arg5[%c2_58, %c0_59, %c0_60] : memref<8x32x4xf32, #tpu.memory_space<vmem>>, vector<1x32x4xf32>
    %92 = vector.shape_cast %91 : vector<1x32x4xf32> to vector<32x4xf32>
    %cst_61 = arith.constant dense<0.000000e+00> : vector<128x32xf32>
    %93 = tpu.matmul %90, %92, %cst_61 {dimension_numbers = #tpu.dot_dimension_numbers<[1], [1], [0], [0], [0, 0, 1, 0], [], []>} : vector<128x4xf32>, vector<32x4xf32>, vector<128x32xf32> -> vector<128x32xf32>
    %94 = arith.addf %63, %93 : vector<128x32xf32>
    %c3 = arith.constant 3 : index
    %c0_62 = arith.constant 0 : index
    %c0_63 = arith.constant 0 : index
    %95 = vector.load %arg2[%c3, %c0_62, %c0_63] : memref<8x4x32xf32, #tpu.memory_space<vmem>>, vector<1x4x32xf32>
    %96 = vector.shape_cast %95 : vector<1x4x32xf32> to vector<4x32xf32>
    %cst_64 = arith.constant dense<0.000000e+00> : vector<128x4xf32>
    %97 = tpu.matmul %0, %96, %cst_64 {dimension_numbers = #tpu.dot_dimension_numbers<[1], [1], [0], [0], [0, 0, 1, 0], [], []>} : vector<128x32xf32>, vector<4x32xf32>, vector<128x4xf32> -> vector<128x4xf32>
    %cst_65 = arith.constant 5.000000e-01 : f32
    %98 = vector.broadcast %cst_65 : f32 to vector<128x4xf32>
    %99 = arith.mulf %97, %98 : vector<128x4xf32>
    %c3_66 = arith.constant 3 : index
    %c0_67 = arith.constant 0 : index
    %c0_68 = arith.constant 0 : index
    %100 = vector.load %arg3[%c3_66, %c0_67, %c0_68] : memref<8x4x32xf32, #tpu.memory_space<vmem>>, vector<1x4x32xf32>
    %101 = vector.shape_cast %100 : vector<1x4x32xf32> to vector<4x32xf32>
    %cst_69 = arith.constant dense<0.000000e+00> : vector<128x4xf32>
    %102 = tpu.matmul %0, %101, %cst_69 {dimension_numbers = #tpu.dot_dimension_numbers<[1], [1], [0], [0], [0, 0, 1, 0], [], []>} : vector<128x32xf32>, vector<4x32xf32>, vector<128x4xf32> -> vector<128x4xf32>
    %c3_70 = arith.constant 3 : index
    %c0_71 = arith.constant 0 : index
    %c0_72 = arith.constant 0 : index
    %103 = vector.load %arg4[%c3_70, %c0_71, %c0_72] : memref<8x4x32xf32, #tpu.memory_space<vmem>>, vector<1x4x32xf32>
    %104 = vector.shape_cast %103 : vector<1x4x32xf32> to vector<4x32xf32>
    %cst_73 = arith.constant dense<0.000000e+00> : vector<128x4xf32>
    %105 = tpu.matmul %0, %104, %cst_73 {dimension_numbers = #tpu.dot_dimension_numbers<[1], [1], [0], [0], [0, 0, 1, 0], [], []>} : vector<128x32xf32>, vector<4x32xf32>, vector<128x4xf32> -> vector<128x4xf32>
    %106 = vector.shape_cast %99 : vector<128x4xf32> to vector<8x16x4xf32>
    %107 = vector.shape_cast %102 : vector<128x4xf32> to vector<8x16x4xf32>
    %108 = vector.shape_cast %105 : vector<128x4xf32> to vector<8x16x4xf32>
    "tpu.trace_start"() <{level = 10 : i32, message = "gqd,gkd->gqk"}> : () -> ()
    %cst_74 = arith.constant dense<0.000000e+00> : vector<8x16x16xf32>
    %109 = tpu.matmul %106, %107, %cst_74 {dimension_numbers = #tpu.dot_dimension_numbers<[2], [2], [1], [1], [0, 0, 0, 1, 1, 1], [0], [0]>} : vector<8x16x4xf32>, vector<8x16x4xf32>, vector<8x16x16xf32> -> vector<8x16x16xf32>
    "tpu.trace_stop"() : () -> ()
    %cst_75 = arith.constant dense<0xFF800000> : vector<8x16xf32>
    %110 = vector.multi_reduction <maximumf>, %109, %cst_75 [1] : vector<8x16x16xf32> to vector<8x16xf32>
    %111 = vector.shape_cast %110 : vector<8x16xf32> to vector<8x1x16xf32>
    %112 = vector.broadcast %111 : vector<8x1x16xf32> to vector<8x16x16xf32>
    %113 = arith.subf %109, %112 : vector<8x16x16xf32>
    %114 = math.exp %113 : vector<8x16x16xf32>
    %cst_76 = arith.constant dense<0.000000e+00> : vector<8x16xf32>
    %115 = vector.multi_reduction <add>, %114, %cst_76 [1] : vector<8x16x16xf32> to vector<8x16xf32>
    %116 = vector.shape_cast %115 : vector<8x16xf32> to vector<8x1x16xf32>
    %117 = tpu.reciprocal %116 {approx = true} : vector<8x1x16xf32> -> vector<8x1x16xf32>
    %118 = vector.broadcast %117 : vector<8x1x16xf32> to vector<8x16x16xf32>
    %119 = arith.mulf %114, %118 : vector<8x16x16xf32>
    "tpu.trace_start"() <{level = 10 : i32, message = "gqk,gkd->gqd"}> : () -> ()
    %cst_77 = arith.constant dense<0.000000e+00> : vector<8x16x4xf32>
    %120 = tpu.matmul %119, %108, %cst_77 {dimension_numbers = #tpu.dot_dimension_numbers<[2], [1], [1], [2], [0, 0, 0, 1, 1, 2], [0], [0]>} : vector<8x16x16xf32>, vector<8x16x4xf32>, vector<8x16x4xf32> -> vector<8x16x4xf32>
    "tpu.trace_stop"() : () -> ()
    %121 = vector.shape_cast %120 : vector<8x16x4xf32> to vector<128x4xf32>
    %c3_78 = arith.constant 3 : index
    %c0_79 = arith.constant 0 : index
    %c0_80 = arith.constant 0 : index
    %122 = vector.load %arg5[%c3_78, %c0_79, %c0_80] : memref<8x32x4xf32, #tpu.memory_space<vmem>>, vector<1x32x4xf32>
    %123 = vector.shape_cast %122 : vector<1x32x4xf32> to vector<32x4xf32>
    %cst_81 = arith.constant dense<0.000000e+00> : vector<128x32xf32>
    %124 = tpu.matmul %121, %123, %cst_81 {dimension_numbers = #tpu.dot_dimension_numbers<[1], [1], [0], [0], [0, 0, 1, 0], [], []>} : vector<128x4xf32>, vector<32x4xf32>, vector<128x32xf32> -> vector<128x32xf32>
    %125 = arith.addf %94, %124 : vector<128x32xf32>
    %c4 = arith.constant 4 : index
    %c0_82 = arith.constant 0 : index
    %c0_83 = arith.constant 0 : index
    %126 = vector.load %arg2[%c4, %c0_82, %c0_83] : memref<8x4x32xf32, #tpu.memory_space<vmem>>, vector<1x4x32xf32>
    %127 = vector.shape_cast %126 : vector<1x4x32xf32> to vector<4x32xf32>
    %cst_84 = arith.constant dense<0.000000e+00> : vector<128x4xf32>
    %128 = tpu.matmul %0, %127, %cst_84 {dimension_numbers = #tpu.dot_dimension_numbers<[1], [1], [0], [0], [0, 0, 1, 0], [], []>} : vector<128x32xf32>, vector<4x32xf32>, vector<128x4xf32> -> vector<128x4xf32>
    %cst_85 = arith.constant 5.000000e-01 : f32
    %129 = vector.broadcast %cst_85 : f32 to vector<128x4xf32>
    %130 = arith.mulf %128, %129 : vector<128x4xf32>
    %c4_86 = arith.constant 4 : index
    %c0_87 = arith.constant 0 : index
    %c0_88 = arith.constant 0 : index
    %131 = vector.load %arg3[%c4_86, %c0_87, %c0_88] : memref<8x4x32xf32, #tpu.memory_space<vmem>>, vector<1x4x32xf32>
    %132 = vector.shape_cast %131 : vector<1x4x32xf32> to vector<4x32xf32>
    %cst_89 = arith.constant dense<0.000000e+00> : vector<128x4xf32>
    %133 = tpu.matmul %0, %132, %cst_89 {dimension_numbers = #tpu.dot_dimension_numbers<[1], [1], [0], [0], [0, 0, 1, 0], [], []>} : vector<128x32xf32>, vector<4x32xf32>, vector<128x4xf32> -> vector<128x4xf32>
    %c4_90 = arith.constant 4 : index
    %c0_91 = arith.constant 0 : index
    %c0_92 = arith.constant 0 : index
    %134 = vector.load %arg4[%c4_90, %c0_91, %c0_92] : memref<8x4x32xf32, #tpu.memory_space<vmem>>, vector<1x4x32xf32>
    %135 = vector.shape_cast %134 : vector<1x4x32xf32> to vector<4x32xf32>
    %cst_93 = arith.constant dense<0.000000e+00> : vector<128x4xf32>
    %136 = tpu.matmul %0, %135, %cst_93 {dimension_numbers = #tpu.dot_dimension_numbers<[1], [1], [0], [0], [0, 0, 1, 0], [], []>} : vector<128x32xf32>, vector<4x32xf32>, vector<128x4xf32> -> vector<128x4xf32>
    %137 = vector.shape_cast %130 : vector<128x4xf32> to vector<8x16x4xf32>
    %138 = vector.shape_cast %133 : vector<128x4xf32> to vector<8x16x4xf32>
    %139 = vector.shape_cast %136 : vector<128x4xf32> to vector<8x16x4xf32>
    "tpu.trace_start"() <{level = 10 : i32, message = "gqd,gkd->gqk"}> : () -> ()
    %cst_94 = arith.constant dense<0.000000e+00> : vector<8x16x16xf32>
    %140 = tpu.matmul %137, %138, %cst_94 {dimension_numbers = #tpu.dot_dimension_numbers<[2], [2], [1], [1], [0, 0, 0, 1, 1, 1], [0], [0]>} : vector<8x16x4xf32>, vector<8x16x4xf32>, vector<8x16x16xf32> -> vector<8x16x16xf32>
    "tpu.trace_stop"() : () -> ()
    %cst_95 = arith.constant dense<0xFF800000> : vector<8x16xf32>
    %141 = vector.multi_reduction <maximumf>, %140, %cst_95 [1] : vector<8x16x16xf32> to vector<8x16xf32>
    %142 = vector.shape_cast %141 : vector<8x16xf32> to vector<8x1x16xf32>
    %143 = vector.broadcast %142 : vector<8x1x16xf32> to vector<8x16x16xf32>
    %144 = arith.subf %140, %143 : vector<8x16x16xf32>
    %145 = math.exp %144 : vector<8x16x16xf32>
    %cst_96 = arith.constant dense<0.000000e+00> : vector<8x16xf32>
    %146 = vector.multi_reduction <add>, %145, %cst_96 [1] : vector<8x16x16xf32> to vector<8x16xf32>
    %147 = vector.shape_cast %146 : vector<8x16xf32> to vector<8x1x16xf32>
    %148 = tpu.reciprocal %147 {approx = true} : vector<8x1x16xf32> -> vector<8x1x16xf32>
    %149 = vector.broadcast %148 : vector<8x1x16xf32> to vector<8x16x16xf32>
    %150 = arith.mulf %145, %149 : vector<8x16x16xf32>
    "tpu.trace_start"() <{level = 10 : i32, message = "gqk,gkd->gqd"}> : () -> ()
    %cst_97 = arith.constant dense<0.000000e+00> : vector<8x16x4xf32>
    %151 = tpu.matmul %150, %139, %cst_97 {dimension_numbers = #tpu.dot_dimension_numbers<[2], [1], [1], [2], [0, 0, 0, 1, 1, 2], [0], [0]>} : vector<8x16x16xf32>, vector<8x16x4xf32>, vector<8x16x4xf32> -> vector<8x16x4xf32>
    "tpu.trace_stop"() : () -> ()
    %152 = vector.shape_cast %151 : vector<8x16x4xf32> to vector<128x4xf32>
    %c4_98 = arith.constant 4 : index
    %c0_99 = arith.constant 0 : index
    %c0_100 = arith.constant 0 : index
    %153 = vector.load %arg5[%c4_98, %c0_99, %c0_100] : memref<8x32x4xf32, #tpu.memory_space<vmem>>, vector<1x32x4xf32>
    %154 = vector.shape_cast %153 : vector<1x32x4xf32> to vector<32x4xf32>
    %cst_101 = arith.constant dense<0.000000e+00> : vector<128x32xf32>
    %155 = tpu.matmul %152, %154, %cst_101 {dimension_numbers = #tpu.dot_dimension_numbers<[1], [1], [0], [0], [0, 0, 1, 0], [], []>} : vector<128x4xf32>, vector<32x4xf32>, vector<128x32xf32> -> vector<128x32xf32>
    %156 = arith.addf %125, %155 : vector<128x32xf32>
    %c5 = arith.constant 5 : index
    %c0_102 = arith.constant 0 : index
    %c0_103 = arith.constant 0 : index
    %157 = vector.load %arg2[%c5, %c0_102, %c0_103] : memref<8x4x32xf32, #tpu.memory_space<vmem>>, vector<1x4x32xf32>
    %158 = vector.shape_cast %157 : vector<1x4x32xf32> to vector<4x32xf32>
    %cst_104 = arith.constant dense<0.000000e+00> : vector<128x4xf32>
    %159 = tpu.matmul %0, %158, %cst_104 {dimension_numbers = #tpu.dot_dimension_numbers<[1], [1], [0], [0], [0, 0, 1, 0], [], []>} : vector<128x32xf32>, vector<4x32xf32>, vector<128x4xf32> -> vector<128x4xf32>
    %cst_105 = arith.constant 5.000000e-01 : f32
    %160 = vector.broadcast %cst_105 : f32 to vector<128x4xf32>
    %161 = arith.mulf %159, %160 : vector<128x4xf32>
    %c5_106 = arith.constant 5 : index
    %c0_107 = arith.constant 0 : index
    %c0_108 = arith.constant 0 : index
    %162 = vector.load %arg3[%c5_106, %c0_107, %c0_108] : memref<8x4x32xf32, #tpu.memory_space<vmem>>, vector<1x4x32xf32>
    %163 = vector.shape_cast %162 : vector<1x4x32xf32> to vector<4x32xf32>
    %cst_109 = arith.constant dense<0.000000e+00> : vector<128x4xf32>
    %164 = tpu.matmul %0, %163, %cst_109 {dimension_numbers = #tpu.dot_dimension_numbers<[1], [1], [0], [0], [0, 0, 1, 0], [], []>} : vector<128x32xf32>, vector<4x32xf32>, vector<128x4xf32> -> vector<128x4xf32>
    %c5_110 = arith.constant 5 : index
    %c0_111 = arith.constant 0 : index
    %c0_112 = arith.constant 0 : index
    %165 = vector.load %arg4[%c5_110, %c0_111, %c0_112] : memref<8x4x32xf32, #tpu.memory_space<vmem>>, vector<1x4x32xf32>
    %166 = vector.shape_cast %165 : vector<1x4x32xf32> to vector<4x32xf32>
    %cst_113 = arith.constant dense<0.000000e+00> : vector<128x4xf32>
    %167 = tpu.matmul %0, %166, %cst_113 {dimension_numbers = #tpu.dot_dimension_numbers<[1], [1], [0], [0], [0, 0, 1, 0], [], []>} : vector<128x32xf32>, vector<4x32xf32>, vector<128x4xf32> -> vector<128x4xf32>
    %168 = vector.shape_cast %161 : vector<128x4xf32> to vector<8x16x4xf32>
    %169 = vector.shape_cast %164 : vector<128x4xf32> to vector<8x16x4xf32>
    %170 = vector.shape_cast %167 : vector<128x4xf32> to vector<8x16x4xf32>
    "tpu.trace_start"() <{level = 10 : i32, message = "gqd,gkd->gqk"}> : () -> ()
    %cst_114 = arith.constant dense<0.000000e+00> : vector<8x16x16xf32>
    %171 = tpu.matmul %168, %169, %cst_114 {dimension_numbers = #tpu.dot_dimension_numbers<[2], [2], [1], [1], [0, 0, 0, 1, 1, 1], [0], [0]>} : vector<8x16x4xf32>, vector<8x16x4xf32>, vector<8x16x16xf32> -> vector<8x16x16xf32>
    "tpu.trace_stop"() : () -> ()
    %cst_115 = arith.constant dense<0xFF800000> : vector<8x16xf32>
    %172 = vector.multi_reduction <maximumf>, %171, %cst_115 [1] : vector<8x16x16xf32> to vector<8x16xf32>
    %173 = vector.shape_cast %172 : vector<8x16xf32> to vector<8x1x16xf32>
    %174 = vector.broadcast %173 : vector<8x1x16xf32> to vector<8x16x16xf32>
    %175 = arith.subf %171, %174 : vector<8x16x16xf32>
    %176 = math.exp %175 : vector<8x16x16xf32>
    %cst_116 = arith.constant dense<0.000000e+00> : vector<8x16xf32>
    %177 = vector.multi_reduction <add>, %176, %cst_116 [1] : vector<8x16x16xf32> to vector<8x16xf32>
    %178 = vector.shape_cast %177 : vector<8x16xf32> to vector<8x1x16xf32>
    %179 = tpu.reciprocal %178 {approx = true} : vector<8x1x16xf32> -> vector<8x1x16xf32>
    %180 = vector.broadcast %179 : vector<8x1x16xf32> to vector<8x16x16xf32>
    %181 = arith.mulf %176, %180 : vector<8x16x16xf32>
    "tpu.trace_start"() <{level = 10 : i32, message = "gqk,gkd->gqd"}> : () -> ()
    %cst_117 = arith.constant dense<0.000000e+00> : vector<8x16x4xf32>
    %182 = tpu.matmul %181, %170, %cst_117 {dimension_numbers = #tpu.dot_dimension_numbers<[2], [1], [1], [2], [0, 0, 0, 1, 1, 2], [0], [0]>} : vector<8x16x16xf32>, vector<8x16x4xf32>, vector<8x16x4xf32> -> vector<8x16x4xf32>
    "tpu.trace_stop"() : () -> ()
    %183 = vector.shape_cast %182 : vector<8x16x4xf32> to vector<128x4xf32>
    %c5_118 = arith.constant 5 : index
    %c0_119 = arith.constant 0 : index
    %c0_120 = arith.constant 0 : index
    %184 = vector.load %arg5[%c5_118, %c0_119, %c0_120] : memref<8x32x4xf32, #tpu.memory_space<vmem>>, vector<1x32x4xf32>
    %185 = vector.shape_cast %184 : vector<1x32x4xf32> to vector<32x4xf32>
    %cst_121 = arith.constant dense<0.000000e+00> : vector<128x32xf32>
    %186 = tpu.matmul %183, %185, %cst_121 {dimension_numbers = #tpu.dot_dimension_numbers<[1], [1], [0], [0], [0, 0, 1, 0], [], []>} : vector<128x4xf32>, vector<32x4xf32>, vector<128x32xf32> -> vector<128x32xf32>
    %187 = arith.addf %156, %186 : vector<128x32xf32>
    %c6 = arith.constant 6 : index
    %c0_122 = arith.constant 0 : index
    %c0_123 = arith.constant 0 : index
    %188 = vector.load %arg2[%c6, %c0_122, %c0_123] : memref<8x4x32xf32, #tpu.memory_space<vmem>>, vector<1x4x32xf32>
    %189 = vector.shape_cast %188 : vector<1x4x32xf32> to vector<4x32xf32>
    %cst_124 = arith.constant dense<0.000000e+00> : vector<128x4xf32>
    %190 = tpu.matmul %0, %189, %cst_124 {dimension_numbers = #tpu.dot_dimension_numbers<[1], [1], [0], [0], [0, 0, 1, 0], [], []>} : vector<128x32xf32>, vector<4x32xf32>, vector<128x4xf32> -> vector<128x4xf32>
    %cst_125 = arith.constant 5.000000e-01 : f32
    %191 = vector.broadcast %cst_125 : f32 to vector<128x4xf32>
    %192 = arith.mulf %190, %191 : vector<128x4xf32>
    %c6_126 = arith.constant 6 : index
    %c0_127 = arith.constant 0 : index
    %c0_128 = arith.constant 0 : index
    %193 = vector.load %arg3[%c6_126, %c0_127, %c0_128] : memref<8x4x32xf32, #tpu.memory_space<vmem>>, vector<1x4x32xf32>
    %194 = vector.shape_cast %193 : vector<1x4x32xf32> to vector<4x32xf32>
    %cst_129 = arith.constant dense<0.000000e+00> : vector<128x4xf32>
    %195 = tpu.matmul %0, %194, %cst_129 {dimension_numbers = #tpu.dot_dimension_numbers<[1], [1], [0], [0], [0, 0, 1, 0], [], []>} : vector<128x32xf32>, vector<4x32xf32>, vector<128x4xf32> -> vector<128x4xf32>
    %c6_130 = arith.constant 6 : index
    %c0_131 = arith.constant 0 : index
    %c0_132 = arith.constant 0 : index
    %196 = vector.load %arg4[%c6_130, %c0_131, %c0_132] : memref<8x4x32xf32, #tpu.memory_space<vmem>>, vector<1x4x32xf32>
    %197 = vector.shape_cast %196 : vector<1x4x32xf32> to vector<4x32xf32>
    %cst_133 = arith.constant dense<0.000000e+00> : vector<128x4xf32>
    %198 = tpu.matmul %0, %197, %cst_133 {dimension_numbers = #tpu.dot_dimension_numbers<[1], [1], [0], [0], [0, 0, 1, 0], [], []>} : vector<128x32xf32>, vector<4x32xf32>, vector<128x4xf32> -> vector<128x4xf32>
    %199 = vector.shape_cast %192 : vector<128x4xf32> to vector<8x16x4xf32>
    %200 = vector.shape_cast %195 : vector<128x4xf32> to vector<8x16x4xf32>
    %201 = vector.shape_cast %198 : vector<128x4xf32> to vector<8x16x4xf32>
    "tpu.trace_start"() <{level = 10 : i32, message = "gqd,gkd->gqk"}> : () -> ()
    %cst_134 = arith.constant dense<0.000000e+00> : vector<8x16x16xf32>
    %202 = tpu.matmul %199, %200, %cst_134 {dimension_numbers = #tpu.dot_dimension_numbers<[2], [2], [1], [1], [0, 0, 0, 1, 1, 1], [0], [0]>} : vector<8x16x4xf32>, vector<8x16x4xf32>, vector<8x16x16xf32> -> vector<8x16x16xf32>
    "tpu.trace_stop"() : () -> ()
    %cst_135 = arith.constant dense<0xFF800000> : vector<8x16xf32>
    %203 = vector.multi_reduction <maximumf>, %202, %cst_135 [1] : vector<8x16x16xf32> to vector<8x16xf32>
    %204 = vector.shape_cast %203 : vector<8x16xf32> to vector<8x1x16xf32>
    %205 = vector.broadcast %204 : vector<8x1x16xf32> to vector<8x16x16xf32>
    %206 = arith.subf %202, %205 : vector<8x16x16xf32>
    %207 = math.exp %206 : vector<8x16x16xf32>
    %cst_136 = arith.constant dense<0.000000e+00> : vector<8x16xf32>
    %208 = vector.multi_reduction <add>, %207, %cst_136 [1] : vector<8x16x16xf32> to vector<8x16xf32>
    %209 = vector.shape_cast %208 : vector<8x16xf32> to vector<8x1x16xf32>
    %210 = tpu.reciprocal %209 {approx = true} : vector<8x1x16xf32> -> vector<8x1x16xf32>
    %211 = vector.broadcast %210 : vector<8x1x16xf32> to vector<8x16x16xf32>
    %212 = arith.mulf %207, %211 : vector<8x16x16xf32>
    "tpu.trace_start"() <{level = 10 : i32, message = "gqk,gkd->gqd"}> : () -> ()
    %cst_137 = arith.constant dense<0.000000e+00> : vector<8x16x4xf32>
    %213 = tpu.matmul %212, %201, %cst_137 {dimension_numbers = #tpu.dot_dimension_numbers<[2], [1], [1], [2], [0, 0, 0, 1, 1, 2], [0], [0]>} : vector<8x16x16xf32>, vector<8x16x4xf32>, vector<8x16x4xf32> -> vector<8x16x4xf32>
    "tpu.trace_stop"() : () -> ()
    %214 = vector.shape_cast %213 : vector<8x16x4xf32> to vector<128x4xf32>
    %c6_138 = arith.constant 6 : index
    %c0_139 = arith.constant 0 : index
    %c0_140 = arith.constant 0 : index
    %215 = vector.load %arg5[%c6_138, %c0_139, %c0_140] : memref<8x32x4xf32, #tpu.memory_space<vmem>>, vector<1x32x4xf32>
    %216 = vector.shape_cast %215 : vector<1x32x4xf32> to vector<32x4xf32>
    %cst_141 = arith.constant dense<0.000000e+00> : vector<128x32xf32>
    %217 = tpu.matmul %214, %216, %cst_141 {dimension_numbers = #tpu.dot_dimension_numbers<[1], [1], [0], [0], [0, 0, 1, 0], [], []>} : vector<128x4xf32>, vector<32x4xf32>, vector<128x32xf32> -> vector<128x32xf32>
    %218 = arith.addf %187, %217 : vector<128x32xf32>
    %c7 = arith.constant 7 : index
    %c0_142 = arith.constant 0 : index
    %c0_143 = arith.constant 0 : index
    %219 = vector.load %arg2[%c7, %c0_142, %c0_143] : memref<8x4x32xf32, #tpu.memory_space<vmem>>, vector<1x4x32xf32>
    %220 = vector.shape_cast %219 : vector<1x4x32xf32> to vector<4x32xf32>
    %cst_144 = arith.constant dense<0.000000e+00> : vector<128x4xf32>
    %221 = tpu.matmul %0, %220, %cst_144 {dimension_numbers = #tpu.dot_dimension_numbers<[1], [1], [0], [0], [0, 0, 1, 0], [], []>} : vector<128x32xf32>, vector<4x32xf32>, vector<128x4xf32> -> vector<128x4xf32>
    %cst_145 = arith.constant 5.000000e-01 : f32
    %222 = vector.broadcast %cst_145 : f32 to vector<128x4xf32>
    %223 = arith.mulf %221, %222 : vector<128x4xf32>
    %c7_146 = arith.constant 7 : index
    %c0_147 = arith.constant 0 : index
    %c0_148 = arith.constant 0 : index
    %224 = vector.load %arg3[%c7_146, %c0_147, %c0_148] : memref<8x4x32xf32, #tpu.memory_space<vmem>>, vector<1x4x32xf32>
    %225 = vector.shape_cast %224 : vector<1x4x32xf32> to vector<4x32xf32>
    %cst_149 = arith.constant dense<0.000000e+00> : vector<128x4xf32>
    %226 = tpu.matmul %0, %225, %cst_149 {dimension_numbers = #tpu.dot_dimension_numbers<[1], [1], [0], [0], [0, 0, 1, 0], [], []>} : vector<128x32xf32>, vector<4x32xf32>, vector<128x4xf32> -> vector<128x4xf32>
    %c7_150 = arith.constant 7 : index
    %c0_151 = arith.constant 0 : index
    %c0_152 = arith.constant 0 : index
    %227 = vector.load %arg4[%c7_150, %c0_151, %c0_152] : memref<8x4x32xf32, #tpu.memory_space<vmem>>, vector<1x4x32xf32>
    %228 = vector.shape_cast %227 : vector<1x4x32xf32> to vector<4x32xf32>
    %cst_153 = arith.constant dense<0.000000e+00> : vector<128x4xf32>
    %229 = tpu.matmul %0, %228, %cst_153 {dimension_numbers = #tpu.dot_dimension_numbers<[1], [1], [0], [0], [0, 0, 1, 0], [], []>} : vector<128x32xf32>, vector<4x32xf32>, vector<128x4xf32> -> vector<128x4xf32>
    %230 = vector.shape_cast %223 : vector<128x4xf32> to vector<8x16x4xf32>
    %231 = vector.shape_cast %226 : vector<128x4xf32> to vector<8x16x4xf32>
    %232 = vector.shape_cast %229 : vector<128x4xf32> to vector<8x16x4xf32>
    "tpu.trace_start"() <{level = 10 : i32, message = "gqd,gkd->gqk"}> : () -> ()
    %cst_154 = arith.constant dense<0.000000e+00> : vector<8x16x16xf32>
    %233 = tpu.matmul %230, %231, %cst_154 {dimension_numbers = #tpu.dot_dimension_numbers<[2], [2], [1], [1], [0, 0, 0, 1, 1, 1], [0], [0]>} : vector<8x16x4xf32>, vector<8x16x4xf32>, vector<8x16x16xf32> -> vector<8x16x16xf32>
    "tpu.trace_stop"() : () -> ()
    %cst_155 = arith.constant dense<0xFF800000> : vector<8x16xf32>
    %234 = vector.multi_reduction <maximumf>, %233, %cst_155 [1] : vector<8x16x16xf32> to vector<8x16xf32>
    %235 = vector.shape_cast %234 : vector<8x16xf32> to vector<8x1x16xf32>
    %236 = vector.broadcast %235 : vector<8x1x16xf32> to vector<8x16x16xf32>
    %237 = arith.subf %233, %236 : vector<8x16x16xf32>
    %238 = math.exp %237 : vector<8x16x16xf32>
    %cst_156 = arith.constant dense<0.000000e+00> : vector<8x16xf32>
    %239 = vector.multi_reduction <add>, %238, %cst_156 [1] : vector<8x16x16xf32> to vector<8x16xf32>
    %240 = vector.shape_cast %239 : vector<8x16xf32> to vector<8x1x16xf32>
    %241 = tpu.reciprocal %240 {approx = true} : vector<8x1x16xf32> -> vector<8x1x16xf32>
    %242 = vector.broadcast %241 : vector<8x1x16xf32> to vector<8x16x16xf32>
    %243 = arith.mulf %238, %242 : vector<8x16x16xf32>
    "tpu.trace_start"() <{level = 10 : i32, message = "gqk,gkd->gqd"}> : () -> ()
    %cst_157 = arith.constant dense<0.000000e+00> : vector<8x16x4xf32>
    %244 = tpu.matmul %243, %232, %cst_157 {dimension_numbers = #tpu.dot_dimension_numbers<[2], [1], [1], [2], [0, 0, 0, 1, 1, 2], [0], [0]>} : vector<8x16x16xf32>, vector<8x16x4xf32>, vector<8x16x4xf32> -> vector<8x16x4xf32>
    "tpu.trace_stop"() : () -> ()
    %245 = vector.shape_cast %244 : vector<8x16x4xf32> to vector<128x4xf32>
    %c7_158 = arith.constant 7 : index
    %c0_159 = arith.constant 0 : index
    %c0_160 = arith.constant 0 : index
    %246 = vector.load %arg5[%c7_158, %c0_159, %c0_160] : memref<8x32x4xf32, #tpu.memory_space<vmem>>, vector<1x32x4xf32>
    %247 = vector.shape_cast %246 : vector<1x32x4xf32> to vector<32x4xf32>
    %cst_161 = arith.constant dense<0.000000e+00> : vector<128x32xf32>
    %248 = tpu.matmul %245, %247, %cst_161 {dimension_numbers = #tpu.dot_dimension_numbers<[1], [1], [0], [0], [0, 0, 1, 0], [], []>} : vector<128x4xf32>, vector<32x4xf32>, vector<128x32xf32> -> vector<128x32xf32>
    %249 = arith.addf %218, %248 : vector<128x32xf32>
    %c0_162 = arith.constant 0 : index
    %c0_163 = arith.constant 0 : index
    %250 = vector.load %arg6[%c0_162, %c0_163] : memref<1x32xf32, #tpu.memory_space<vmem>>, vector<1x32xf32>
    %251 = vector.broadcast %250 : vector<1x32xf32> to vector<128x32xf32>
    %252 = arith.addf %249, %251 : vector<128x32xf32>
    %c0_164 = arith.constant 0 : index
    %c0_165 = arith.constant 0 : index
    %253 = vector.load %arg7[%c0_164, %c0_165] : memref<128x32xf32, #tpu.memory_space<vmem>>, vector<128x32xf32>
    tpu.vector_store %arg7[%c0_164, %c0_165], %252 {strides = array<i32>} : memref<128x32xf32, #tpu.memory_space<vmem>>, vector<128x32xf32>,
    return
  }
  func.func @transform_0(%arg0: i32) -> (i32, i32) {
    %c0_i32 = arith.constant 0 : i32
    %c0_i32_0 = arith.constant 0 : i32
    return %arg0, %c0_i32 : i32, i32
  }
  func.func @transform_1(%arg0: i32) -> (i32, i32, i32) {
    %c0_i32 = arith.constant 0 : i32
    %c0_i32_0 = arith.constant 0 : i32
    %c0_i32_1 = arith.constant 0 : i32
    %c0_i32_2 = arith.constant 0 : i32
    return %c0_i32, %c0_i32_0, %c0_i32_1 : i32, i32, i32
  }
  func.func @transform_2(%arg0: i32) -> (i32, i32, i32) {
    %c0_i32 = arith.constant 0 : i32
    %c0_i32_0 = arith.constant 0 : i32
    %c0_i32_1 = arith.constant 0 : i32
    %c0_i32_2 = arith.constant 0 : i32
    return %c0_i32, %c0_i32_0, %c0_i32_1 : i32, i32, i32
  }
  func.func @transform_3(%arg0: i32) -> (i32, i32, i32) {
    %c0_i32 = arith.constant 0 : i32
    %c0_i32_0 = arith.constant 0 : i32
    %c0_i32_1 = arith.constant 0 : i32
    %c0_i32_2 = arith.constant 0 : i32
    return %c0_i32, %c0_i32_0, %c0_i32_1 : i32, i32, i32
  }
  func.func @transform_4(%arg0: i32) -> (i32, i32, i32) {
    %c0_i32 = arith.constant 0 : i32
    %c0_i32_0 = arith.constant 0 : i32
    %c0_i32_1 = arith.constant 0 : i32
    %c0_i32_2 = arith.constant 0 : i32
    return %c0_i32, %c0_i32_0, %c0_i32_1 : i32, i32, i32
  }
  func.func @transform_5(%arg0: i32) -> (i32, i32) {
    %c0_i32 = arith.constant 0 : i32
    %c0_i32_0 = arith.constant 0 : i32
    %c0_i32_1 = arith.constant 0 : i32
    return %c0_i32, %c0_i32_0 : i32, i32
  }
  func.func @transform_6(%arg0: i32) -> (i32, i32) {
    %c0_i32 = arith.constant 0 : i32
    %c0_i32_0 = arith.constant 0 : i32
    return %arg0, %c0_i32 : i32, i32
  }
}

</mosaic_0001>

<bundles_post_ra>
// kernel: tpu_custom_call.1
= control target key start
LH: loop header
LB: loop body
LE: loop exit
PB: predicated region body
PF: predicated region fallthrough
CT: control target
= control target key end

     0   :  { %vm40_vm0 = vcmask 261120   ;;  %vm551_vm1 = vcmask 31744   ;;  %vm1248_vm3 = vcmask 130048   ;;  %s26971_s1 = inlined_call_operand.vmem [shape: f32[8,4,32], index: 1, kind: input, shape index: {}]   ;;  %s26972_s0 = inlined_call_operand.vmem [shape: f32[128,32], index: 0, kind: input, shape index: {}]   ;;  %s26973_s2 = inlined_call_operand.vmem [shape: f32[8,4,32], index: 2, kind: input, shape index: {}]   ;;  %s26974_s3 = inlined_call_operand.vmem [shape: f32[8,4,32], index: 3, kind: input, shape index: {}]   ;;  %s26975_s4 = inlined_call_operand.vmem [shape: f32[8,32,4], index: 4, kind: input, shape index: {}]   ;;  %s26976_s5 = inlined_call_operand.vmem [shape: f32[1,32], index: 5, kind: input, shape index: {}]   ;;  %s26977_s6 = inlined_call_operand.vmem [shape: f32[128,32], index: 6, kind: output, shape index: {}]  }
   0x1   :  { %v39_v0 = vld [vmem:[%s26971_s1] sm:$0xf]  ;;  %v23326_v1 = vld [vmem:[%s26972_s0 + $0x30] sm:$0xff]  ;;  %v23335_v2 = vld [vmem:[%s26972_s0 + $0x38] sm:$0xff] }
   0x2   :  { %22707 = vmatprep.subr.msk.mxu1 %vm40_vm0, %v39_v0  ;;  %20206 = vmatprep.mubr.msk.f32.mxu1 %vm40_vm0, %v23326_v1  ;;  %v23341_v3 = vld [vmem:[%s26972_s0 + $0x40] sm:$0xff]  ;;  %v23362_v6 = vld [vmem:[%s26972_s0 + $0x48] sm:$0xff]  ;;  %v23376_v9 = vld [vmem:[%s26972_s0 + $0x50] sm:$0xff] }
   0x3   :  { %22708 = vmatpush3.xpose.msk.msra.mxu1 %vm40_vm0, %v39_v0  ;;  %20195 = vmatprep.subr.msk.mxu0 %vm40_vm0, %v39_v0  ;;  %v253_v4 = vld [vmem:[%s26973_s2] sm:$0xf]  ;;  %v23368_v7 = vld [vmem:[%s26972_s0 + $0x8] sm:$0xff]  ;;  %v23381_v10 = vld [vmem:[%s26972_s0 + $0x10] sm:$0xff] }
   0x4   :  { %20196 = vmatpush3.xpose.msk.msra.mxu0 %vm40_vm0, %v39_v0  ;;  %20221 = vmatprep.subr.msk.mxu1 %vm40_vm0, %v253_v4  ;;  %v23351_v5 = vld [vmem:[%s26972_s0] sm:$0xff]  ;;  %v23396_v11 = vld [vmem:[%s26972_s0 + $0x58] sm:$0xff]  ;;  %v23424_v15 = vld [vmem:[%s26972_s0 + $0x68] sm:$0xff] }
   0x5   :  { %20197 = vmatprep.mubr.msk.f32.mxu0 %vm40_vm0, %v23351_v5  ;;  %v402_v8 = vld [vmem:[%s26974_s3] sm:$0xf]  ;;  %v23401_v12 = vld [vmem:[%s26972_s0 + $0x18] sm:$0xff]  ;;  %v23429_v16 = vld [vmem:[%s26972_s0 + $0x28] sm:$0xff] }
   0x6   :  { %20207 = vmatmul.mubr.msk.f32.vlgmr.msra.gmra.mrb[0].mxu1 %vm40_vm0, %v23335_v2  ;;  %20247 = vmatprep.subr.msk.mxu0 %vm40_vm0, %v402_v8  ;;  %v23406_v13 = vld [vmem:[%s26972_s0 + $0x60] sm:$0xff]  ;;  %v23434_v17 = vld [vmem:[%s26972_s0 + $0x70] sm:$0xff]  ;;  %v23447_v18 = vld [vmem:[%s26972_s0 + $0x78] sm:$0xff] }
   0x7   :  { %20209 = vmatprep.mubr.msk.f32.mxu1 %vm40_vm0, %v23341_v3  ;;  %20222 = vmatpush3.xpose.msk.msra.mxu1 %vm40_vm0, %v253_v4  ;;  %v23411_v14 = vld [vmem:[%s26972_s0 + $0x20] sm:$0xff]  ;;  %vm23529_vm2 = vmpackc.low %vm551_vm1, %vm551_vm1 }
   0x8   :  { %20198 = vmatmul.mubr.msk.f32.vlgmr.msra.gmra.mrb[0].mxu0 %vm40_vm0, %v23368_v7 }
   0x9   :  { %20200 = vmatprep.mubr.msk.f32.mxu0 %vm40_vm0, %v23381_v10  ;;  %20248 = vmatpush3.xpose.msk.msra.mxu0 %vm40_vm0, %v402_v8 }
   0xa   :  { %20210 = vmatmul.mubr.msk.f32.gmra.mrb[2].mxu1 %vm40_vm0, %v23362_v6 }
   0xb   :  { %20212 = vmatprep.mubr.msk.f32.mxu1 %vm40_vm0, %v23376_v9 }
   0xc   :  { %20201 = vmatmul.mubr.msk.f32.gmra.mrb[2].mxu0 %vm40_vm0, %v23401_v12 }
   0xd   :  { %20203 = vmatprep.mubr.msk.f32.mxu0 %vm40_vm0, %v23411_v14 }
   0xe   :  { %20213 = vmatmul.mubr.msk.f32.gmra.mrb[4].mxu1 %vm40_vm0, %v23396_v11 }
   0xf   :  { %20215 = vmatprep.mubr.msk.f32.mxu1 %vm40_vm0, %v23406_v13 }
  0x10   :  { %20204 = vmatmul.mubr.msk.f32.gmra.mrb[4].mxu0 %vm40_vm0, %v23429_v16 }
  0x11   :  { %20249 = vmatprep.mubr.msk.f32.mxu0 %vm40_vm0, %v23351_v5 }
  0x12   :  { %20216 = vmatmul.mubr.msk.f32.gmra.mrb[6].mxu1 %vm40_vm0, %v23424_v15 }
  0x13   :  { %20218 = vmatprep.mubr.msk.f32.mxu1 %vm40_vm0, %v23434_v17 }
  0x14   :  { %20250 = vmatmul.mubr.msk.f32.vlgmr.msra.gmra.mrb[6].mxu0 %vm40_vm0, %v23368_v7 }
  0x15   :  { %20252 = vmatprep.mubr.msk.f32.mxu0 %vm40_vm0, %v23381_v10 }
  0x16   :  { %20219 = vmatmul.mubr.msk.f32.gmra.mrb[8].mxu1 %vm40_vm0, %v23447_v18 }
  0x17   :  { %20223 = vmatprep.mubr.msk.f32.mxu1 %vm40_vm0, %v23351_v5 }
  0x18   :  { %20253 = vmatmul.mubr.msk.f32.gmra.mrb[8].mxu0 %vm40_vm0, %v23401_v12 }
  0x19   :  { %20255 = vmatprep.mubr.msk.f32.mxu0 %vm40_vm0, %v23411_v14 }
  0x1a   :  { %20224 = vmatmul.mubr.msk.f32.vlgmr.msra.gmra.mrb[10].mxu1 %vm40_vm0, %v23368_v7 }
  0x1b   :  { %20226 = vmatprep.mubr.msk.f32.mxu1 %vm40_vm0, %v23381_v10 }
  0x1c   :  { %20256 = vmatmul.mubr.msk.f32.gmra.mrb[10].mxu0 %vm40_vm0, %v23429_v16 }
  0x1d   :  { %20258 = vmatprep.mubr.msk.f32.mxu0 %vm40_vm0, %v23326_v1 }
  0x1e   :  { %20227 = vmatmul.mubr.msk.f32.gmra.mrb[12].mxu1 %vm40_vm0, %v23401_v12 }
  0x1f   :  { %20229 = vmatprep.mubr.msk.f32.mxu1 %vm40_vm0, %v23411_v14 }
  0x20   :  { %20259 = vmatmul.mubr.msk.f32.gmra.mrb[12].mxu0 %vm40_vm0, %v23335_v2 }
  0x21   :  { %20261 = vmatprep.mubr.msk.f32.mxu0 %vm40_vm0, %v23341_v3 }
  0x22   :  { %20230 = vmatmul.mubr.msk.f32.gmra.mrb[14].mxu1 %vm40_vm0, %v23429_v16 }
  0x23   :  { %20232 = vmatprep.mubr.msk.f32.mxu1 %vm40_vm0, %v23326_v1 }
  0x24   :  { %20262 = vmatmul.mubr.msk.f32.gmra.mrb[14].mxu0 %vm40_vm0, %v23362_v6 }
  0x25   :  { %20264 = vmatprep.mubr.msk.f32.mxu0 %vm40_vm0, %v23376_v9 }
  0x26   :  { %20233 = vmatmul.mubr.msk.f32.gmra.mrb[16].mxu1 %vm40_vm0, %v23335_v2 }
  0x27   :  { %20235 = vmatprep.mubr.msk.f32.mxu1 %vm40_vm0, %v23341_v3 }
  0x28   :  { %20265 = vmatmul.mubr.msk.f32.gmra.mrb[16].mxu0 %vm40_vm0, %v23396_v11 }
  0x29   :  { %20267 = vmatprep.mubr.msk.f32.mxu0 %vm40_vm0, %v23406_v13 }
  0x2a   :  { %20236 = vmatmul.mubr.msk.f32.gmra.mrb[18].mxu1 %vm40_vm0, %v23362_v6 }
  0x2b   :  { %20238 = vmatprep.mubr.msk.f32.mxu1 %vm40_vm0, %v23376_v9 }
  0x2c   :  { %20268 = vmatmul.mubr.msk.f32.gmra.mrb[18].mxu0 %vm40_vm0, %v23424_v15 }
  0x2d   :  { %20270 = vmatprep.mubr.msk.f32.mxu0 %vm40_vm0, %v23434_v17 }
  0x2e   :  { %20239 = vmatmul.mubr.msk.f32.gmra.mrb[20].mxu1 %vm40_vm0, %v23396_v11 }
  0x2f   :  { %20241 = vmatprep.mubr.msk.f32.mxu1 %vm40_vm0, %v23406_v13 }
  0x30   :  { %20271 = vmatmul.mubr.msk.f32.gmra.mrb[20].mxu0 %vm40_vm0, %v23447_v18 }
  0x32   :  { %20242 = vmatmul.mubr.msk.f32.gmra.mrb[22].mxu1 %vm40_vm0, %v23424_v15 }
  0x33   :  { %20244 = vmatprep.mubr.msk.f32.mxu1 %vm40_vm0, %v23434_v17 }
  0x36   :  { %20245 = vmatmul.mubr.msk.f32.gmra.mrb[24].mxu1 %vm40_vm0, %v23447_v18 }
  0xd9   :  { %v23513_v19 = vpop.f32.mrb[0].mxu1 }
  0xda   :  { %v188_v20 = vpop.f32.mrb[1].mxu1 }
  0xdb   :  { %v20199_v21 = vpop.f32.mrb[0].mxu0  ;;  %v243_v8 = vmul.f32 0.5, %v188_v20  ;;  %v244_v20 = vmul.f32 0.5, %v23513_v19 }
  0xdc   :  { %v158_v22 = vpop.f32.mrb[1].mxu0  ;;  %v238_v45 = vmul.f32 0.5, %v20199_v21 }
  0xdd   :  { %v20211_v23 = vpop.f32.mrb[2].mxu1  ;;  %v237_v24 = vmul.f32 0.5, %v158_v22 }
  0xde   :  { %v198_v25 = vpop.f32.mrb[3].mxu1  ;;  %v246_v0 = vmul.f32 0.5, %v20211_v23 }
  0xdf   :  { %v245_v26 = vmul.f32 0.5, %v198_v25  ;;  %20277 = vmatprep.mubr.msk.f32.mxu1 %vm551_vm1, %v237_v24  ;;  %v20202_v27 = vpop.f32.mrb[2].mxu0 }
  0xe0   :  { %v168_v28 = vpop.f32.mrb[3].mxu0  ;;  %v240_v53 = vmul.f32 0.5, %v20202_v27 }
  0xe1   :  { %v23516_v29 = vpop.f32.mrb[4].mxu1  ;;  %20305 = vmatprep.mubr.msk.f32.mxu0 %vm551_vm1, %v245_v26  ;;  %v239_v48 = vmul.f32 0.5, %v168_v28 }
  0xe2   :  { %v23519_v30 = vpop.f32.mrb[5].mxu1  ;;  %v248_v27 = vmul.f32 0.5, %v23516_v29 }
  0xe3   :  { %v20205_v31 = vpop.f32.mrb[4].mxu0  ;;  %v247_v26 = vmul.f32 0.5, %v23519_v30 }
  0xe4   :  { %v178_v32 = vpop.f32.mrb[5].mxu0  ;;  %v242_v61 = vmul.f32 0.5, %v20205_v31 }
  0xe5   :  { %v20217_v33 = vpop.f32.mrb[6].mxu1  ;;  %v241_v57 = vmul.f32 0.5, %v178_v32 }
  0xe6   :  { %v218_v34 = vpop.f32.mrb[7].mxu1  ;;  %v250_v25 = vmul.f32 0.5, %v20217_v33 }
  0xe7   :  { %v23521_v35 = vpop.f32.mrb[6].mxu0  ;;  %v249_v22 = vmul.f32 0.5, %v218_v34 }
  0xe8   :  { %v472_v30 = vpop.f32.mrb[7].mxu0 }
  0xe9   :  { %v23523_v36 = vpop.f32.mrb[8].mxu1  ;;  %v22019_v31 = vpack.c.bf16 %v23521_v35, %v472_v30 }
  0xea   :  { %v23525_v37 = vpop.f32.mrb[9].mxu1  ;;  %v252_v19 = vmul.f32 0.5, %v23523_v36 }
  0xeb   :  { %v251_v28 = vmul.f32 0.5, %v23525_v37  ;;  %v20254_v32 = vpop.f32.mrb[8].mxu0 }
  0xec   :  { %v482_v33 = vpop.f32.mrb[9].mxu0 }
  0xed   :  { %v20225_v38 = vpop.f32.mrb[10].mxu1 }
  0xee   :  { %v323_v39 = vpop.f32.mrb[11].mxu1 }
  0xef   :  { %v21971_v41 = vpack.c.bf16 %v20225_v38, %v323_v39  ;;  %v20257_v29 = vpop.f32.mrb[10].mxu0 }
  0xf0   :  { %v492_v34 = vpop.f32.mrb[11].mxu0 }
  0xf1   :  { %21973 = vmatprep.subr.msk.bf16.mxu1 %vm23529_vm2, %v21971_v41  ;;  %v20228_v42 = vpop.f32.mrb[12].mxu1  ;;  %v23585_v35 = vpack.c.bf16 %v20257_v29, %v492_v34 }
  0xf2   :  { %21976 = vmatpush3.bf16.xpose.msk.msra.mxu1 %vm23529_vm2, %v21971_v41  ;;  %v333_v43 = vpop.f32.mrb[13].mxu1 }
  0xf3   :  { %v21977_v44 = vpack.c.bf16 %v20228_v42, %v333_v43  ;;  %v20260_v37 = vpop.f32.mrb[12].mxu0 }
  0xf4   :  { %v502_v38 = vpop.f32.mrb[13].mxu0 }
  0xf5   :  { %21979 = vmatprep.subr.msk.bf16.mxu1 %vm23529_vm2, %v21977_v44  ;;  %v20231_v46 = vpop.f32.mrb[14].mxu1 }
  0xf6   :  { %v343_v47 = vpop.f32.mrb[15].mxu1 }
  0xf7   :  { %v21983_v49 = vpack.c.bf16 %v20231_v46, %v343_v47  ;;  %v20263_v39 = vpop.f32.mrb[14].mxu0 }
  0xf8   :  { %v512_v41 = vpop.f32.mrb[15].mxu0 }
  0xf9   :  { %20278 = vmatmul.mubr.msk.f32.vlgmr.msra.gmra.mrb[26].mxu1 %vm551_vm1, %v238_v45  ;;  %v20234_v50 = vpop.f32.mrb[16].mxu1 }
  0xfa   :  { %21982 = vmatpush3.bf16.xpose.msk.msra.mxu1 %vm23529_vm2, %v21977_v44  ;;  %v353_v51 = vpop.f32.mrb[17].mxu1  ;;  %20284 = vmatprep.mubr.msk.f32.mxu1 %vm551_vm1, %v239_v48  ;;  %v22023_v44 = vpack.c.bf16 %v20254_v32, %v482_v33  ;;  %v23588_v48 = vpack.c.bf16 %v20260_v37, %v502_v38 }
  0xfb   :  { %v21989_v52 = vpack.c.bf16 %v20234_v50, %v353_v51  ;;  %21985 = vmatprep.subr.msk.bf16.mxu1 %vm23529_vm2, %v21983_v49  ;;  %v20266_v42 = vpop.f32.mrb[16].mxu0 }
  0xfc   :  { %v522_v43 = vpop.f32.mrb[17].mxu0 }
  0xfd   :  { %v20237_v54 = vpop.f32.mrb[18].mxu1  ;;  %v23593_v50 = vpack.c.bf16 %v20266_v42, %v522_v43 }
  0xfe   :  { %v363_v55 = vpop.f32.mrb[19].mxu1 }
  0xff   :  { %v21995_v56 = vpack.c.bf16 %v20237_v54, %v363_v55  ;;  %v20269_v45 = vpop.f32.mrb[18].mxu0 }
 0x100   :  { %v532_v36 = vpop.f32.mrb[19].mxu0 }
 0x101   :  { %20285 = vmatmul.mubr.msk.f32.vlgmr.msra.gmra.mrb[28].mxu1 %vm551_vm1, %v240_v53  ;;  %21997 = vmatprep.subr.msk.bf16.mxu0 %vm23529_vm2, %v21995_v56  ;;  %v20240_v58 = vpop.f32.mrb[20].mxu1  ;;  %v23595_v51 = vpack.c.bf16 %v20269_v45, %v532_v36 }
 0x102   :  { %21988 = vmatpush3.bf16.xpose.msk.msra.mxu1 %vm23529_vm2, %v21983_v49  ;;  %22000 = vmatpush3.bf16.xpose.msk.msra.mxu0 %vm23529_vm2, %v21995_v56  ;;  %v373_v59 = vpop.f32.mrb[21].mxu1  ;;  %v23591_v49 = vpack.c.bf16 %v20263_v39, %v512_v41 }
 0x103   :  { %v22001_v60 = vpack.c.bf16 %v20240_v58, %v373_v59  ;;  %20291 = vmatprep.mubr.msk.f32.mxu1 %vm551_vm1, %v241_v57  ;;  %21991 = vmatprep.subr.msk.bf16.mxu1 %vm23529_vm2, %v21989_v52  ;;  %v20272_v46 = vpop.f32.mrb[20].mxu0 }
 0x104   :  { %v542_v47 = vpop.f32.mrb[21].mxu0 }
 0x105   :  { %v20243_v62 = vpop.f32.mrb[22].mxu1 }
 0x106   :  { %v383_v63 = vpop.f32.mrb[23].mxu1 }
 0x107   :  { %v22007_v4 = vpack.c.bf16 %v20243_v62, %v383_v63 }
 0x109   :  { %20292 = vmatmul.mubr.msk.f32.vlgmr.msra.gmra.mrb[30].mxu1 %vm551_vm1, %v242_v61  ;;  %20306 = vmatmul.mubr.msk.f32.vlgmr.msra.gmra.mrb[22].mxu0 %vm551_vm1, %v246_v0  ;;  %v20246_v21 = vpop.f32.mrb[24].mxu1 }
 0x10a   :  { %22009 = vmatprep.subr.msk.bf16.mxu0 %vm23529_vm2, %v22007_v4  ;;  %21994 = vmatpush3.bf16.xpose.msk.msra.mxu1 %vm23529_vm2, %v21989_v52  ;;  %v393_v24 = vpop.f32.mrb[25].mxu1  ;;  %v23597_v52 = vpack.c.bf16 %v20272_v46, %v542_v47 }
 0x10b   :  { %20298 = vmatprep.mubr.msk.f32.mxu1 %vm551_vm1, %v243_v8  ;;  %22012 = vmatpush3.bf16.xpose.msk.msra.mxu0 %vm23529_vm2, %v22007_v4  ;;  %v22013_v23 = vpack.c.bf16 %v20246_v21, %v393_v24 }
 0x10c   :  { %20319 = vmatprep.mubr.msk.f32.mxu0 %vm551_vm1, %v249_v22  ;;  %22003 = vmatprep.subr.msk.bf16.mxu1 %vm23529_vm2, %v22001_v60 }
 0x10d   :  { %22020 = vmatprep.subr.bf16.mxu0 %v22019_v31 }
 0x111   :  { %20299 = vmatmul.mubr.msk.f32.vlgmr.msra.gmra.mrb[32].mxu1 %vm551_vm1, %v244_v20 }
 0x112   :  { %20320 = vmatmul.mubr.msk.f32.vlgmr.msra.gmra.mrb[24].mxu0 %vm551_vm1, %v250_v25  ;;  %22006 = vmatpush3.bf16.xpose.msk.msra.mxu1 %vm23529_vm2, %v22001_v60 }
 0x113   :  { %20312 = vmatprep.mubr.msk.f32.mxu1 %vm551_vm1, %v247_v26  ;;  %22015 = vmatprep.subr.msk.bf16.mxu1 %vm23529_vm2, %v22013_v23 }
 0x114   :  { %22022 = vmatpush3.bf16.msra.mxu0 %v22019_v31 }
 0x115   :  { %22028 = vmatprep.subr.bf16.mxu0 %v23585_v35 }
 0x119   :  { %20313 = vmatmul.mubr.msk.f32.vlgmr.msra.gmra.mrb[34].mxu1 %vm551_vm1, %v248_v27 }
 0x11a   :  { %22018 = vmatpush3.bf16.xpose.msk.msra.mxu1 %vm23529_vm2, %v22013_v23  ;;  %20326 = vmatprep.mubr.msk.f32.mxu1 %vm551_vm1, %v251_v28 }
 0x11b   :  { %22024 = vmatprep.subr.bf16.mxu1 %v22023_v44 }
 0x121   :  { %20327 = vmatmul.mubr.msk.f32.vlgmr.msra.gmra.mrb[36].mxu1 %vm551_vm1, %v252_v19 }
 0x122   :  { %22026 = vmatpush3.bf16.msra.mxu1 %v22023_v44 }
 0x123   :  { %22032 = vmatprep.subr.bf16.mxu1 %v23588_v48 }
 0x1cc   :  { %v20279_v53 = vpop.f32.mrb[26].mxu1 }
 0x1cd   :  { %v1250_v54 = vsel %vm1248_vm3, %v20279_v53, -inf  ;;  %v630_v55 = vpop.f32.mrb[27].mxu1 }
 0x1ce   :  { %v1249_v56 = vsel %vm1248_vm3, %v630_v55, -inf }
 0x1cf   :  { %v1251_v57 = vmax.f32 %v1249_v56, %v1250_v54 }
 0x1d1   :  { %v1252_v58 = vrot.slane %v1251_v57, 4 }
 0x1d3   :  { %v1253_v59 = vmax.f32 %v1251_v57, %v1252_v58 }
 0x1d4   :  { %v20286_v60 = vpop.f32.mrb[28].mxu1 }
 0x1d5   :  { %v1254_v61 = vrot.slane %v1253_v59, 2  ;;  %v1259_v62 = vsel %vm1248_vm3, %v20286_v60, -inf  ;;  %v717_v63 = vpop.f32.mrb[29].mxu1 }
 0x1d6   :  { %v1258_v0 = vsel %vm1248_vm3, %v717_v63, -inf }
 0x1d7   :  { %v1255_v4 = vmax.f32 %v1253_v59, %v1254_v61  ;;  %v1260_v8 = vmax.f32 %v1258_v0, %v1259_v62 }
 0x1d9   :  { %v1256_v21 = vrot.slane %v1255_v4, 1  ;;  %v1261_v22 = vrot.slane %v1260_v8, 4 }
 0x1db   :  { %v1257_v24 = vmax.f32 %v1255_v4, %v1256_v21  ;;  %v1262_v23 = vmax.f32 %v1260_v8, %v1261_v22 }
 0x1dc   :  { %v23603_v20 = vpop.f32.mrb[30].mxu1  ;;  %v23605_v25 = vpop.f32.mrb[22].mxu0 }
 0x1dd   :  { %v1321_v26 = vsub.f32 %v630_v55, %v1257_v24  ;;  %v1322_v27 = vsub.f32 %v20279_v53, %v1257_v24  ;;  %v1263_v28 = vrot.slane %v1262_v23, 2  ;;  %v1268_v19 = vsel %vm1248_vm3, %v23603_v20, -inf  ;;  %v804_v30 = vpop.f32.mrb[31].mxu1  ;;  %v978_v31 = vpop.f32.mrb[23].mxu0 }
 0x1de   :  { %v1286_v32 = vsel %vm1248_vm3, %v23605_v25, -inf  ;;  %v1267_v33 = vsel %vm1248_vm3, %v804_v30, -inf  ;;  %v1285_v29 = vsel %vm1248_vm3, %v978_v31, -inf }
 0x1df   :  { %v1337_v34 = vmul.f32 1.442695, %v1321_v26  ;;  %v1339_v37 = vmul.f32 1.442695, %v1322_v27  ;;  %v1264_v38 = vmax.f32 %v1262_v23, %v1263_v28  ;;  %v1269_v39 = vmax.f32 %v1267_v33, %v1268_v19 }
 0x1e0   :  { %v1287_v41 = vmax.f32 %v1285_v29, %v1286_v32 }
 0x1e1   :  { %22821 = vpow2.f32 %v1337_v34  ;;  %v1265_v42 = vrot.slane %v1264_v38, 1  ;;  %v1270_v43 = vrot.slane %v1269_v39, 4 }
 0x1e2   :  { %22823 = vpow2.f32 %v1339_v37  ;;  %v1288_v44 = vrot.slane %v1287_v41, 4 }
 0x1e3   :  { %v1266_v45 = vmax.f32 %v1264_v38, %v1265_v42  ;;  %v1271_v36 = vmax.f32 %v1269_v39, %v1270_v43 }
 0x1e4   :  { %v1289_v46 = vmax.f32 %v1287_v41, %v1288_v44  ;;  %v23613_v47 = vpop.f32.mrb[32].mxu1 }
 0x1e5   :  { %v1323_v53 = vsub.f32 %v717_v63, %v1266_v45  ;;  %v1324_v54 = vsub.f32 %v20286_v60, %v1266_v45  ;;  %v1272_v55 = vrot.slane %v1271_v36, 2  ;;  %v1277_v56 = vsel %vm1248_vm3, %v23613_v47, -inf  ;;  %v23617_v57 = vpop.f32.mrb[24].mxu0  ;;  %v23619_v58 = vpop.f32.mrb[33].mxu1 }
 0x1e6   :  { %v1290_v59 = vrot.slane %v1289_v46, 2  ;;  %v1304_v61 = vsel %vm1248_vm3, %v23617_v57, -inf  ;;  %v1276_v62 = vsel %vm1248_vm3, %v23619_v58, -inf  ;;  %v23625_v0 = vpop.f32.mrb[25].mxu0 }
 0x1e7   :  { %v1341_v4 = vmul.f32 1.442695, %v1323_v53  ;;  %v1343_v63 = vmul.f32 1.442695, %v1324_v54  ;;  %v1273_v60 = vmax.f32 %v1271_v36, %v1272_v55  ;;  %v1278_v8 = vmax.f32 %v1276_v62, %v1277_v56 }
 0x1e8   :  { %v1291_v21 = vmax.f32 %v1289_v46, %v1290_v59  ;;  %v1303_v22 = vsel %vm1248_vm3, %v23625_v0, -inf }
 0x1e9   :  { %22825 = vpow2.f32 %v1341_v4  ;;  %v1274_v24 = vrot.slane %v1273_v60, 1  ;;  %v1279_v23 = vrot.slane %v1278_v8, 4  ;;  %v1305_v26 = vmax.f32 %v1303_v22, %v1304_v61 }
 0x1ea   :  { %22827 = vpow2.f32 %v1343_v63  ;;  %v1292_v27 = vrot.slane %v1291_v21, 1 }
 0x1eb   :  { %v23629_v28 = vpop.eup %22821  ;;  %v1275_v19 = vmax.f32 %v1273_v60, %v1274_v24  ;;  %v1280_v32 = vmax.f32 %v1278_v8, %v1279_v23  ;;  %v1306_v33 = vrot.slane %v1305_v26, 4 }
 0x1ec   :  { %v23631_v29 = vpop.eup %22823  ;;  %v1369_v34 = vsel %vm1248_vm3, %v23629_v28, 0.0  ;;  %v1293_v37 = vmax.f32 %v1291_v21, %v1292_v27  ;;  %v23635_v38 = vpop.f32.mrb[34].mxu1 }
 0x1ed   :  { %v1370_v39 = vsel %vm1248_vm3, %v23631_v29, 0.0  ;;  %v1325_v41 = vsub.f32 %v804_v30, %v1275_v19  ;;  %v1326_v42 = vsub.f32 %v23603_v20, %v1275_v19  ;;  %v1281_v43 = vrot.slane %v1280_v32, 2  ;;  %v23640_v44 = vpop.f32.mrb[35].mxu1 }
 0x1ee   :  { %v1371_v45 = vadd.f32 %v1370_v39, %v1369_v34  ;;  %v1329_v36 = vsub.f32 %v978_v31, %v1293_v37  ;;  %v1330_v46 = vsub.f32 %v23605_v25, %v1293_v37  ;;  %v1307_v53 = vmax.f32 %v1305_v26, %v1306_v33 }
 0x1ef   :  { %v1345_v54 = vmul.f32 1.442695, %v1325_v41  ;;  %v1347_v55 = vmul.f32 1.442695, %v1326_v42  ;;  %v1282_v56 = vmax.f32 %v1280_v32, %v1281_v43  ;;  %v1295_v59 = vsel %vm1248_vm3, %v23635_v38, -inf }
 0x1f0   :  { %v1372_v61 = vrot.slane %v1371_v45, 4  ;;  %v1353_v62 = vmul.f32 1.442695, %v1329_v36  ;;  %v1355_v4 = vmul.f32 1.442695, %v1330_v46  ;;  %v1308_v30 = vrot.slane %v1307_v53, 2 }
 0x1f1   :  { %22829 = vpow2.f32 %v1345_v54  ;;  %v1283_v20 = vrot.slane %v1282_v56, 1  ;;  %v1294_v63 = vsel %vm1248_vm3, %v23640_v44, -inf }
 0x1f2   :  { %v1373_v60 = vadd.f32 %v1372_v61, %v1371_v45  ;;  %22831 = vpow2.f32 %v1347_v55  ;;  %v1309_v31 = vmax.f32 %v1307_v53, %v1308_v30  ;;  %v1296_v25 = vmax.f32 %v1294_v63, %v1295_v59 }
 0x1f3   :  { %v23647_v8 = vpop.eup %22825  ;;  %22833 = vpow2.f32 %v1353_v62  ;;  %v1284_v21 = vmax.f32 %v1282_v56, %v1283_v20 }
 0x1f4   :  { %v23649_v22 = vpop.eup %22827  ;;  %v1374_v24 = vrot.slane %v1373_v60, 2  ;;  %v1378_v23 = vsel %vm1248_vm3, %v23647_v8, 0.0  ;;  %22835 = vpow2.f32 %v1355_v4  ;;  %v1310_v26 = vrot.slane %v1309_v31, 1  ;;  %v23653_v27 = vpop.f32.mrb[36].mxu1 }
 0x1f5   :  { %v1379_v19 = vsel %vm1248_vm3, %v23649_v22, 0.0  ;;  %v1327_v32 = vsub.f32 %v23619_v58, %v1284_v21  ;;  %v1328_v33 = vsub.f32 %v23613_v47, %v1284_v21  ;;  %v1297_v34 = vrot.slane %v1296_v25, 4  ;;  %v23659_v37 = vpop.f32.mrb[37].mxu1 }
 0x1f6   :  { %v1380_v39 = vadd.f32 %v1379_v19, %v1378_v23  ;;  %v1311_v41 = vmax.f32 %v1309_v31, %v1310_v26  ;;  %v1313_v42 = vsel %vm1248_vm3, %v23653_v27, -inf  ;;  %v1312_v43 = vsel %vm1248_vm3, %v23659_v37, -inf }
 0x1f7   :  { %v1349_v45 = vmul.f32 1.442695, %v1327_v32  ;;  %v1351_v36 = vmul.f32 1.442695, %v1328_v33  ;;  %v1298_v46 = vmax.f32 %v1296_v25, %v1297_v34  ;;  %v1314_v53 = vmax.f32 %v1312_v43, %v1313_v42 }
 0x1f8   :  { %v1381_v54 = vrot.slane %v1380_v39, 4  ;;  %v1333_v58 = vsub.f32 %v23625_v0, %v1311_v41  ;;  %v1334_v47 = vsub.f32 %v23617_v57, %v1311_v41  ;;  %v1375_v55 = vadd.f32 %v1374_v24, %v1373_v60 }
 0x1f9   :  { %22837 = vpow2.f32 %v1349_v45  ;;  %v1299_v56 = vrot.slane %v1298_v46, 2  ;;  %v1315_v59 = vrot.slane %v1314_v53, 4 }
 0x1fa   :  { %v1382_v61 = vadd.f32 %v1381_v54, %v1380_v39  ;;  %22839 = vpow2.f32 %v1351_v36  ;;  %v1361_v62 = vmul.f32 1.442695, %v1333_v58  ;;  %v1363_v4 = vmul.f32 1.442695, %v1334_v47 }
 0x1fb   :  { %v23667_v30 = vpop.eup %22829  ;;  %v1300_v20 = vmax.f32 %v1298_v46, %v1299_v56  ;;  %v1316_v63 = vmax.f32 %v1314_v53, %v1315_v59  ;;  %v1376_v31 = vrot.slane %v1375_v55, 1 }
 0x1fc   :  { %v23669_v25 = vpop.eup %22831  ;;  %v1383_v21 = vrot.slane %v1382_v61, 2  ;;  %v1387_v0 = vsel %vm1248_vm3, %v23667_v30, 0.0  ;;  %22841 = vpow2.f32 %v1361_v62 }
 0x1fd   :  { %v23673_v57 = vpop.eup %22833  ;;  %v1388_v60 = vsel %vm1248_vm3, %v23669_v25, 0.0  ;;  %22843 = vpow2.f32 %v1363_v4  ;;  %v1301_v24 = vrot.slane %v1300_v20, 1  ;;  %v1317_v23 = vrot.slane %v1316_v63, 2 }
 0x1fe   :  { %v23677_v26 = vpop.eup %22835  ;;  %v1389_v19 = vadd.f32 %v1388_v60, %v1387_v0  ;;  %v1405_v32 = vsel %vm1248_vm3, %v23673_v57, 0.0  ;;  %v1377_v33 = vadd.f32 %v1376_v31, %v1375_v55  ;;  %v1384_v34 = vadd.f32 %v1383_v21, %v1382_v61 }
 0x1ff   :  { %v1406_v39 = vsel %vm1248_vm3, %v23677_v26, 0.0  ;;  %v1302_v41 = vmax.f32 %v1300_v20, %v1301_v24  ;;  %v1318_v42 = vmax.f32 %v1316_v63, %v1317_v23 }
 0x200   :  { %v1390_v43 = vrot.slane %v1389_v19, 4  ;;  %v1407_v45 = vadd.f32 %v1406_v39, %v1405_v32  ;;  %22845 = vrcp.f32 %v1377_v33  ;;  %v1385_v36 = vrot.slane %v1384_v34, 1 }
 0x201   :  { %v1331_v46 = vsub.f32 %v23640_v44, %v1302_v41  ;;  %v1332_v53 = vsub.f32 %v23635_v38, %v1302_v41  ;;  %v1319_v54 = vrot.slane %v1318_v42, 1 }
 0x202   :  { %v1391_v58 = vadd.f32 %v1390_v43, %v1389_v19  ;;  %v1408_v47 = vrot.slane %v1407_v45, 4  ;;  %v1386_v56 = vadd.f32 %v1385_v36, %v1384_v34 }
 0x203   :  { %v23685_v59 = vpop.eup %22837  ;;  %v1357_v55 = vmul.f32 1.442695, %v1331_v46  ;;  %v1359_v61 = vmul.f32 1.442695, %v1332_v53  ;;  %v1320_v62 = vmax.f32 %v1318_v42, %v1319_v54 }
 0x204   :  { %v23687_v4 = vpop.eup %22839  ;;  %v1392_v20 = vrot.slane %v1391_v58, 2  ;;  %v1409_v63 = vadd.f32 %v1408_v47, %v1407_v45  ;;  %v1396_v31 = vsel %vm1248_vm3, %v23685_v59, 0.0  ;;  %22847 = vrcp.f32 %v1386_v56 }
 0x205   :  { %v1397_v38 = vsel %vm1248_vm3, %v23687_v4, 0.0  ;;  %22849 = vpow2.f32 %v1357_v55  ;;  %v1335_v44 = vsub.f32 %v23659_v37, %v1320_v62  ;;  %v1336_v21 = vsub.f32 %v23653_v27, %v1320_v62 }
 0x206   :  { %v23695_v0 = vpop.eup %22841  ;;  %v1410_v60 = vrot.slane %v1409_v63, 2  ;;  %v1398_v24 = vadd.f32 %v1397_v38, %v1396_v31  ;;  %22851 = vpow2.f32 %v1359_v61  ;;  %v1393_v23 = vadd.f32 %v1392_v20, %v1391_v58 }
 0x207   :  { %v23697_v19 = vpop.eup %22843  ;;  %v1423_v32 = vsel %vm1248_vm3, %v23695_v0, 0.0  ;;  %v1365_v33 = vmul.f32 1.442695, %v1335_v44  ;;  %v1367_v34 = vmul.f32 1.442695, %v1336_v21 }
 0x208   :  { %v1411_v39 = vadd.f32 %v1410_v60, %v1409_v63  ;;  %v1399_v41 = vrot.slane %v1398_v24, 4  ;;  %v1424_v37 = vsel %vm1248_vm3, %v23697_v19, 0.0  ;;  %v1394_v42 = vrot.slane %v1393_v23, 1 }
 0x209   :  { %v1425_v27 = vadd.f32 %v1424_v37, %v1423_v32  ;;  %22853 = vpow2.f32 %v1365_v33 }
 0x20a   :  { %v22846_v43 = vpop.eup %22845  ;;  %v1412_v45 = vrot.slane %v1411_v39, 1  ;;  %v1400_v36 = vadd.f32 %v1399_v41, %v1398_v24  ;;  %22855 = vpow2.f32 %v1367_v34  ;;  %v1395_v46 = vadd.f32 %v1394_v42, %v1393_v23 }
 0x20b   :  { %v1426_v53 = vrot.slane %v1425_v27, 4  ;;  %v1449_v54 = vmul.f32 %v22846_v43, %v23629_v28  ;;  %v1450_v58 = vmul.f32 %v22846_v43, %v23631_v29 }
 0x20c   :  { %v1401_v47 = vrot.slane %v1400_v36, 2  ;;  %22857 = vrcp.f32 %v1395_v46  ;;  %v1413_v56 = vadd.f32 %v1412_v45, %v1411_v39 }
 0x20d   :  { %v1427_v55 = vadd.f32 %v1426_v53, %v1425_v27  ;;  %20333 = vmatprep.mubr.msk.f32.mxu0 %vm1248_vm3, %v1449_v54 }
 0x20e   :  { %v22848_v61 = vpop.eup %22847  ;;  %20334 = vmatmul.mubr.msk.f32.vlgmr.msra.gmra.mrb[26].mxu0 %vm1248_vm3, %v1450_v58  ;;  %22859 = vrcp.f32 %v1413_v56  ;;  %v1402_v62 = vadd.f32 %v1401_v47, %v1400_v36  ;;  %v18212_v47 = vld [vmem:[%s26971_s1 + $0x4] sm:$0xf] }
 0x20f   :  { %v23707_v20 = vpop.eup %22849  ;;  %v1428_v63 = vrot.slane %v1427_v55, 2  ;;  %22030 = vmatpush3.bf16.msra.mxu0 %v23585_v35  ;;  %v1451_v28 = vmul.f32 %v22848_v61, %v23647_v8  ;;  %v1452_v29 = vmul.f32 %v22848_v61, %v23649_v22 }
 0x210   :  { %v23712_v31 = vpop.eup %22851  ;;  %v1414_v38 = vsel %vm1248_vm3, %v23707_v20, 0.0  ;;  %22036 = vmatprep.subr.bf16.mxu0 %v23591_v49  ;;  %v1403_v44 = vrot.slane %v1402_v62, 1 }
 0x211   :  { %v1429_v21 = vadd.f32 %v1428_v63, %v1427_v55  ;;  %v1415_v60 = vsel %vm1248_vm3, %v23712_v31, 0.0  ;;  %20340 = vmatprep.mubr.msk.f32.mxu1 %vm1248_vm3, %v1451_v28 }
 0x212   :  { %v1416_v24 = vadd.f32 %v1415_v60, %v1414_v38  ;;  %20341 = vmatmul.mubr.msk.f32.vlgmr.msra.gmra.mrb[38].mxu1 %vm1248_vm3, %v1452_v29  ;;  %v1404_v35 = vadd.f32 %v1403_v44, %v1402_v62 }
 0x213   :  { %v23721_v8 = vpop.eup %22853  ;;  %v1430_v22 = vrot.slane %v1429_v21, 1  ;;  %22034 = vmatpush3.bf16.msra.mxu1 %v23588_v48 }
 0x214   :  { %v22856_v23 = vpop.eup %22855  ;;  %v1417_v32 = vrot.slane %v1416_v24, 4  ;;  %v1432_v33 = vsel %vm1248_vm3, %v23721_v8, 0.0  ;;  %22040 = vmatprep.subr.bf16.mxu1 %v23593_v50  ;;  %22861 = vrcp.f32 %v1404_v35 }
 0x215   :  { %v1433_v34 = vsel %vm1248_vm3, %v22856_v23, 0.0  ;;  %v1431_v39 = vadd.f32 %v1430_v22, %v1429_v21 }
 0x216   :  { %v22858_v41 = vpop.eup %22857  ;;  %v1418_v37 = vadd.f32 %v1417_v32, %v1416_v24  ;;  %v1434_v42 = vadd.f32 %v1433_v34, %v1432_v33 }
 0x217   :  { %v1453_v27 = vmul.f32 %v22858_v41, %v23667_v30  ;;  %v1454_v43 = vmul.f32 %v22858_v41, %v23669_v25  ;;  %22863 = vrcp.f32 %v1431_v39 }
 0x218   :  { %v22860_v48 = vpop.eup %22859  ;;  %v1419_v45 = vrot.slane %v1418_v37, 2  ;;  %v1435_v36 = vrot.slane %v1434_v42, 4 }
 0x219   :  { %20347 = vmatprep.mubr.msk.f32.mxu0 %vm1248_vm3, %v1453_v27  ;;  %v1457_v46 = vmul.f32 %v22860_v48, %v23673_v57  ;;  %v1458_v53 = vmul.f32 %v22860_v48, %v23677_v26 }
 0x21a   :  { %v1436_v54 = vadd.f32 %v1435_v36, %v1434_v42  ;;  %20348 = vmatmul.mubr.msk.f32.vlgmr.msra.gmra.mrb[28].mxu0 %vm1248_vm3, %v1454_v43  ;;  %v1420_v58 = vadd.f32 %v1419_v45, %v1418_v37 }
 0x21b   :  { %22038 = vmatpush3.bf16.msra.mxu0 %v23591_v49  ;;  %20361 = vmatprep.mubr.msk.f32.mxu0 %vm1248_vm3, %v1457_v46 }
 0x21c   :  { %v1437_v30 = vrot.slane %v1436_v54, 2  ;;  %22044 = vmatprep.subr.bf16.mxu0 %v23595_v51  ;;  %v1421_v25 = vrot.slane %v1420_v58, 1 }
 0x21e   :  { %v22862_v56 = vpop.eup %22861  ;;  %20362 = vmatmul.mubr.msk.f32.vlgmr.msra.gmra.mrb[30].mxu0 %vm1248_vm3, %v1458_v53  ;;  %v1422_v57 = vadd.f32 %v1421_v25, %v1420_v58  ;;  %v1438_v26 = vadd.f32 %v1437_v30, %v1436_v54 }
 0x21f   :  { %22046 = vmatpush3.bf16.msra.mxu0 %v23595_v51  ;;  %v1455_v55 = vmul.f32 %v22862_v56, %v23685_v59  ;;  %v1456_v49 = vmul.f32 %v22862_v56, %v23687_v4 }
 0x220   :  { %22865 = vrcp.f32 %v1422_v57  ;;  %v1439_v61 = vrot.slane %v1438_v26, 1  ;;  %20385 = vmatprep.subr.msk.mxu0 %vm40_vm0, %v18212_v47 }
 0x221   :  { %v22864_v62 = vpop.eup %22863  ;;  %20354 = vmatprep.mubr.msk.f32.mxu1 %vm1248_vm3, %v1455_v55 }
 0x222   :  { %v1461_v63 = vmul.f32 %v22864_v62, %v23695_v0  ;;  %20355 = vmatmul.mubr.msk.f32.vlgmr.msra.gmra.mrb[40].mxu1 %vm1248_vm3, %v1456_v49  ;;  %v1462_v28 = vmul.f32 %v22864_v62, %v23697_v19  ;;  %v1440_v29 = vadd.f32 %v1439_v61, %v1438_v26 }
 0x223   :  { %22042 = vmatpush3.bf16.msra.mxu1 %v23593_v50  ;;  %v18230_v50 = vld [vmem:[%s26973_s2 + $0x4] sm:$0xf] }
 0x224   :  { %20375 = vmatprep.mubr.msk.f32.mxu0 %vm1248_vm3, %v1461_v63  ;;  %22048 = vmatprep.subr.bf16.mxu1 %v23597_v52  ;;  %22867 = vrcp.f32 %v1440_v29 }
 0x225   :  { %20376 = vmatmul.mubr.msk.f32.vlgmr.msra.gmra.mrb[32].mxu0 %vm1248_vm3, %v1462_v28 }
 0x226   :  { %20387 = vmatprep.mubr.msk.f32.mxu0 %vm40_vm0, %v23351_v5 }
 0x228   :  { %20386 = vmatpush3.xpose.msk.msra.mxu0 %vm40_vm0, %v18212_v47 }
 0x22a   :  { %v22866_v51 = vpop.eup %22865 }
 0x22b   :  { %v1459_v59 = vmul.f32 %v22866_v51, %v23707_v20  ;;  %v1460_v4 = vmul.f32 %v22866_v51, %v23712_v31  ;;  %20388 = vmatmul.mubr.msk.f32.vlgmr.msra.gmra.mrb[34].mxu0 %vm40_vm0, %v23368_v7 }
 0x22c   :  { %20390 = vmatprep.mubr.msk.f32.mxu0 %vm40_vm0, %v23381_v10 }
 0x22d   :  { %20368 = vmatprep.mubr.msk.f32.mxu1 %vm1248_vm3, %v1459_v59 }
 0x22e   :  { %v22868_v0 = vpop.eup %22867  ;;  %20369 = vmatmul.mubr.msk.f32.vlgmr.msra.gmra.mrb[42].mxu1 %vm1248_vm3, %v1460_v4 }
 0x22f   :  { %22050 = vmatpush3.bf16.msra.mxu1 %v23597_v52  ;;  %v1463_v19 = vmul.f32 %v22868_v0, %v23721_v8  ;;  %v1464_v20 = vmul.f32 %v22868_v0, %v22856_v23  ;;  %20391 = vmatmul.mubr.msk.f32.gmra.mrb[36].mxu0 %vm40_vm0, %v23401_v12 }
 0x230   :  { %20411 = vmatprep.subr.msk.mxu1 %vm40_vm0, %v18230_v50  ;;  %20393 = vmatprep.mubr.msk.f32.mxu0 %vm40_vm0, %v23411_v14 }
 0x231   :  { %20382 = vmatprep.mubr.msk.f32.mxu1 %vm1248_vm3, %v1463_v19 }
 0x232   :  { %20383 = vmatmul.mubr.msk.f32.vlgmr.msra.gmra.mrb[44].mxu1 %vm1248_vm3, %v1464_v20 }
 0x233   :  { %20413 = vmatprep.mubr.msk.f32.mxu1 %vm40_vm0, %v23351_v5  ;;  %20394 = vmatmul.mubr.msk.f32.gmra.mrb[38].mxu0 %vm40_vm0, %v23429_v16 }
 0x234   :  { %20396 = vmatprep.mubr.msk.f32.mxu0 %vm40_vm0, %v23326_v1 }
 0x237   :  { %20397 = vmatmul.mubr.msk.f32.gmra.mrb[40].mxu0 %vm40_vm0, %v23335_v2 }
 0x238   :  { %20412 = vmatpush3.xpose.msk.msra.mxu1 %vm40_vm0, %v18230_v50  ;;  %20399 = vmatprep.mubr.msk.f32.mxu0 %vm40_vm0, %v23341_v3 }
 0x23b   :  { %20414 = vmatmul.mubr.msk.f32.vlgmr.msra.gmra.mrb[46].mxu1 %vm40_vm0, %v23368_v7  ;;  %20400 = vmatmul.mubr.msk.f32.gmra.mrb[42].mxu0 %vm40_vm0, %v23362_v6 }
 0x23c   :  { %20416 = vmatprep.mubr.msk.f32.mxu1 %vm40_vm0, %v23381_v10  ;;  %20402 = vmatprep.mubr.msk.f32.mxu0 %vm40_vm0, %v23376_v9 }
 0x23f   :  { %20417 = vmatmul.mubr.msk.f32.gmra.mrb[48].mxu1 %vm40_vm0, %v23401_v12  ;;  %20403 = vmatmul.mubr.msk.f32.gmra.mrb[44].mxu0 %vm40_vm0, %v23396_v11 }
 0x240   :  { %20419 = vmatprep.mubr.msk.f32.mxu1 %vm40_vm0, %v23411_v14  ;;  %20405 = vmatprep.mubr.msk.f32.mxu0 %vm40_vm0, %v23406_v13 }
 0x243   :  { %20420 = vmatmul.mubr.msk.f32.gmra.mrb[50].mxu1 %vm40_vm0, %v23429_v16  ;;  %20406 = vmatmul.mubr.msk.f32.gmra.mrb[46].mxu0 %vm40_vm0, %v23424_v15 }
 0x244   :  { %20422 = vmatprep.mubr.msk.f32.mxu1 %vm40_vm0, %v23326_v1  ;;  %20408 = vmatprep.mubr.msk.f32.mxu0 %vm40_vm0, %v23434_v17  ;;  %v18248_v1 = vld [vmem:[%s26974_s3 + $0x4] sm:$0xf] }
 0x245   :  { %20437 = vmatprep.subr.msk.mxu0 %vm40_vm0, %v18248_v1 }
 0x246   :  { %20438 = vmatpush3.xpose.msk.msra.mxu0 %vm40_vm0, %v18248_v1 }
 0x247   :  { %20423 = vmatmul.mubr.msk.f32.gmra.mrb[52].mxu1 %vm40_vm0, %v23335_v2  ;;  %20409 = vmatmul.mubr.msk.f32.gmra.mrb[48].mxu0 %vm40_vm0, %v23447_v18  ;;  %v23851_v2 = vld [vmem:[%s26972_s0 + $0x30] sm:$0xff] }
 0x248   :  { %20425 = vmatprep.mubr.msk.f32.mxu1 %vm40_vm0, %v23341_v3  ;;  %20439 = vmatprep.mubr.msk.f32.mxu0 %vm40_vm0, %v23351_v5  ;;  %v23858_v3 = vld [vmem:[%s26972_s0 + $0x38] sm:$0xff]  ;;  %v23865_v5 = vld [vmem:[%s26972_s0 + $0x40] sm:$0xff] }
 0x24b   :  { %20426 = vmatmul.mubr.msk.f32.gmra.mrb[54].mxu1 %vm40_vm0, %v23362_v6  ;;  %20440 = vmatmul.mubr.msk.f32.vlgmr.msra.gmra.mrb[50].mxu0 %vm40_vm0, %v23368_v7  ;;  %v23872_v6 = vld [vmem:[%s26972_s0 + $0x48] sm:$0xff] }
 0x24c   :  { %20428 = vmatprep.mubr.msk.f32.mxu1 %vm40_vm0, %v23376_v9  ;;  %20442 = vmatprep.mubr.msk.f32.mxu0 %vm40_vm0, %v23381_v10 }
 0x24f   :  { %20429 = vmatmul.mubr.msk.f32.gmra.mrb[56].mxu1 %vm40_vm0, %v23396_v11  ;;  %20443 = vmatmul.mubr.msk.f32.gmra.mrb[52].mxu0 %vm40_vm0, %v23401_v12 }
 0x250   :  { %20431 = vmatprep.mubr.msk.f32.mxu1 %vm40_vm0, %v23406_v13  ;;  %20445 = vmatprep.mubr.msk.f32.mxu0 %vm40_vm0, %v23411_v14 }
 0x253   :  { %20432 = vmatmul.mubr.msk.f32.gmra.mrb[58].mxu1 %vm40_vm0, %v23424_v15  ;;  %20446 = vmatmul.mubr.msk.f32.gmra.mrb[54].mxu0 %vm40_vm0, %v23429_v16 }
 0x254   :  { %20434 = vmatprep.mubr.msk.f32.mxu1 %vm40_vm0, %v23434_v17  ;;  %20448 = vmatprep.mubr.msk.f32.mxu0 %vm40_vm0, %v23851_v2 }
 0x257   :  { %20435 = vmatmul.mubr.msk.f32.gmra.mrb[60].mxu1 %vm40_vm0, %v23447_v18  ;;  %20449 = vmatmul.mubr.msk.f32.gmra.mrb[56].mxu0 %vm40_vm0, %v23858_v3 }
 0x258   :  { %20451 = vmatprep.mubr.msk.f32.mxu0 %vm40_vm0, %v23865_v5 }
 0x25b   :  { %20452 = vmatmul.mubr.msk.f32.gmra.mrb[58].mxu0 %vm40_vm0, %v23872_v6 }
 0x25c   :  { %20454 = vmatprep.mubr.msk.f32.mxu0 %vm40_vm0, %v23376_v9 }
 0x25f   :  { %20455 = vmatmul.mubr.msk.f32.gmra.mrb[60].mxu0 %vm40_vm0, %v23396_v11 }
 0x260   :  { %20457 = vmatprep.mubr.msk.f32.mxu0 %vm40_vm0, %v23406_v13 }
 0x263   :  { %20458 = vmatmul.mubr.msk.f32.gmra.mrb[62].mxu0 %vm40_vm0, %v23424_v15 }
 0x264   :  { %20460 = vmatprep.mubr.msk.f32.mxu0 %vm40_vm0, %v23434_v17 }
 0x267   :  { %20461 = vmatmul.mubr.msk.f32.gmra.mrb[64].mxu0 %vm40_vm0, %v23447_v18 }
 0x2e1   :  { %v23888_v7 = vpop.f32.mrb[26].mxu0 }
 0x2e2   :  { %v23890_v10 = vpop.f32.mrb[27].mxu0 }
 0x2e5   :  { %v23892_v9 = vpop.f32.mrb[38].mxu1 }
 0x2e6   :  { %v23894_v12 = vpop.f32.mrb[39].mxu1 }
 0x2ed   :  { %v23896_v11 = vpop.f32.mrb[28].mxu0 }
 0x2ee   :  { %v23898_v13 = vpop.f32.mrb[29].mxu0 }
 0x2f1   :  { %v23900_v14 = vpop.f32.mrb[30].mxu0 }
 0x2f2   :  { %v23902_v15 = vpop.f32.mrb[31].mxu0 }
 0x2f5   :  { %v23904_v16 = vpop.f32.mrb[40].mxu1 }
 0x2f6   :  { %v23906_v17 = vpop.f32.mrb[41].mxu1 }
 0x2f8   :  { %v23908_v18 = vpop.f32.mrb[32].mxu0 }
 0x2f9   :  { %v23910_v52 = vpop.f32.mrb[33].mxu0 }
 0x2fe   :  { %v20389_v31 = vpop.f32.mrb[34].mxu0 }
 0x2ff   :  { %v2188_v38 = vpop.f32.mrb[35].mxu0  ;;  %v2268_v54 = vmul.f32 0.5, %v20389_v31 }
 0x300   :  { %v2267_v44 = vmul.f32 0.5, %v2188_v38 }
 0x301   :  { %v23912_v21 = vpop.f32.mrb[42].mxu1 }
 0x302   :  { %v23914_v60 = vpop.f32.mrb[43].mxu1  ;;  %20467 = vmatprep.mubr.msk.f32.mxu1 %vm551_vm1, %v2267_v44  ;;  %v20392_v24 = vpop.f32.mrb[36].mxu0 }
 0x303   :  { %v2198_v35 = vpop.f32.mrb[37].mxu0  ;;  %v2270_v63 = vmul.f32 0.5, %v20392_v24 }
 0x304   :  { %v2269_v47 = vmul.f32 0.5, %v2198_v35 }
 0x305   :  { %v23917_v8 = vpop.f32.mrb[44].mxu1 }
 0x306   :  { %v23919_v22 = vpop.f32.mrb[45].mxu1  ;;  %v20395_v23 = vpop.f32.mrb[38].mxu0 }
 0x307   :  { %v2208_v32 = vpop.f32.mrb[39].mxu0  ;;  %v2272_v19 = vmul.f32 0.5, %v20395_v23 }
 0x308   :  { %v2271_v59 = vmul.f32 0.5, %v2208_v32 }
 0x30a   :  { %v23921_v33 = vpop.f32.mrb[40].mxu0 }
 0x30b   :  { %v2218_v34 = vpop.f32.mrb[41].mxu0 }
 0x30c   :  { %v2273_v38 = vmul.f32 0.5, %v2218_v34 }
 0x30e   :  { %v20415_v39 = vpop.f32.mrb[46].mxu1  ;;  %v20401_v41 = vpop.f32.mrb[42].mxu0 }
 0x30f   :  { %v2354_v37 = vpop.f32.mrb[47].mxu1  ;;  %v2228_v42 = vpop.f32.mrb[43].mxu0  ;;  %v2276_v20 = vmul.f32 0.5, %v20401_v41 }
 0x310   :  { %v22051_v27 = vpack.c.bf16 %v20415_v39, %v2354_v37  ;;  %v2275_v43 = vmul.f32 0.5, %v2228_v42  ;;  %v2274_v39 = vmul.f32 0.5, %v23921_v33 }
 0x312   :  { %22053 = vmatprep.subr.msk.bf16.mxu1 %vm23529_vm2, %v22051_v27  ;;  %v20418_v48 = vpop.f32.mrb[48].mxu1  ;;  %20495 = vmatprep.mubr.msk.f32.mxu0 %vm551_vm1, %v2275_v43  ;;  %v20404_v45 = vpop.f32.mrb[44].mxu0 }
 0x313   :  { %22056 = vmatpush3.bf16.xpose.msk.msra.mxu1 %vm23529_vm2, %v22051_v27  ;;  %v2364_v36 = vpop.f32.mrb[49].mxu1  ;;  %v2238_v46 = vpop.f32.mrb[45].mxu0  ;;  %v2278_v42 = vmul.f32 0.5, %v20404_v45 }
 0x314   :  { %v22057_v53 = vpack.c.bf16 %v20418_v48, %v2364_v36  ;;  %v2277_v41 = vmul.f32 0.5, %v2238_v46 }
 0x316   :  { %22059 = vmatprep.subr.msk.bf16.mxu1 %vm23529_vm2, %v22057_v53  ;;  %v20421_v58 = vpop.f32.mrb[50].mxu1  ;;  %v20407_v30 = vpop.f32.mrb[46].mxu0 }
 0x317   :  { %v2374_v25 = vpop.f32.mrb[51].mxu1  ;;  %v2248_v56 = vpop.f32.mrb[47].mxu0  ;;  %v2280_v34 = vmul.f32 0.5, %v20407_v30 }
 0x318   :  { %v22063_v57 = vpack.c.bf16 %v20421_v58, %v2374_v25  ;;  %v2279_v24 = vmul.f32 0.5, %v2248_v56 }
 0x31a   :  { %20468 = vmatmul.mubr.msk.f32.vlgmr.msra.gmra.mrb[62].mxu1 %vm551_vm1, %v2268_v54  ;;  %v20424_v26 = vpop.f32.mrb[52].mxu1  ;;  %v20410_v55 = vpop.f32.mrb[48].mxu0 }
 0x31b   :  { %22062 = vmatpush3.bf16.xpose.msk.msra.mxu1 %vm23529_vm2, %v22057_v53  ;;  %v2384_v49 = vpop.f32.mrb[53].mxu1  ;;  %20474 = vmatprep.mubr.msk.f32.mxu1 %vm551_vm1, %v2269_v47  ;;  %v2258_v61 = vpop.f32.mrb[49].mxu0  ;;  %v2282_v33 = vmul.f32 0.5, %v20410_v55 }
 0x31c   :  { %v22069_v62 = vpack.c.bf16 %v20424_v26, %v2384_v49  ;;  %22065 = vmatprep.subr.msk.bf16.mxu1 %vm23529_vm2, %v22063_v57  ;;  %v2281_v37 = vmul.f32 0.5, %v2258_v61 }
 0x31e   :  { %v20427_v28 = vpop.f32.mrb[54].mxu1  ;;  %v20441_v27 = vpop.f32.mrb[50].mxu0 }
 0x31f   :  { %v2394_v29 = vpop.f32.mrb[55].mxu1  ;;  %v2504_v43 = vpop.f32.mrb[51].mxu0 }
 0x320   :  { %v22075_v51 = vpack.c.bf16 %v20427_v28, %v2394_v29  ;;  %v22099_v48 = vpack.c.bf16 %v20441_v27, %v2504_v43 }
 0x322   :  { %20475 = vmatmul.mubr.msk.f32.vlgmr.msra.gmra.mrb[64].mxu1 %vm551_vm1, %v2270_v63  ;;  %22077 = vmatprep.subr.msk.bf16.mxu0 %vm23529_vm2, %v22075_v51  ;;  %v20430_v4 = vpop.f32.mrb[56].mxu1  ;;  %v20444_v36 = vpop.f32.mrb[52].mxu0 }
 0x323   :  { %22068 = vmatpush3.bf16.xpose.msk.msra.mxu1 %vm23529_vm2, %v22063_v57  ;;  %22080 = vmatpush3.bf16.xpose.msk.msra.mxu0 %vm23529_vm2, %v22075_v51  ;;  %v2404_v50 = vpop.f32.mrb[57].mxu1  ;;  %v2514_v46 = vpop.f32.mrb[53].mxu0 }
 0x324   :  { %v22081_v0 = vpack.c.bf16 %v20430_v4, %v2404_v50  ;;  %20481 = vmatprep.mubr.msk.f32.mxu1 %vm551_vm1, %v2271_v59  ;;  %22071 = vmatprep.subr.msk.bf16.mxu1 %vm23529_vm2, %v22069_v62  ;;  %v22103_v47 = vpack.c.bf16 %v20444_v36, %v2514_v46 }
 0x326   :  { %v20433_v1 = vpop.f32.mrb[58].mxu1  ;;  %v20447_v53 = vpop.f32.mrb[54].mxu0 }
 0x327   :  { %v2414_v31 = vpop.f32.mrb[59].mxu1  ;;  %v2524_v54 = vpop.f32.mrb[55].mxu0 }
 0x328   :  { %v22087_v44 = vpack.c.bf16 %v20433_v1, %v2414_v31  ;;  %v23971_v61 = vpack.c.bf16 %v20447_v53, %v2524_v54 }
 0x32a   :  { %20482 = vmatmul.mubr.msk.f32.vlgmr.msra.gmra.mrb[66].mxu1 %vm551_vm1, %v2272_v19  ;;  %20496 = vmatmul.mubr.msk.f32.vlgmr.msra.gmra.mrb[66].mxu0 %vm551_vm1, %v2276_v20  ;;  %v20436_v35 = vpop.f32.mrb[60].mxu1  ;;  %v20450_v45 = vpop.f32.mrb[56].mxu0 }
 0x32b   :  { %22089 = vmatprep.subr.msk.bf16.mxu0 %vm23529_vm2, %v22087_v44  ;;  %22074 = vmatpush3.bf16.xpose.msk.msra.mxu1 %vm23529_vm2, %v22069_v62  ;;  %v2424_v32 = vpop.f32.mrb[61].mxu1  ;;  %v2534_v58 = vpop.f32.mrb[57].mxu0 }
 0x32c   :  { %22092 = vmatpush3.bf16.xpose.msk.msra.mxu0 %vm23529_vm2, %v22087_v44  ;;  %20488 = vmatprep.mubr.msk.f32.mxu1 %vm551_vm1, %v2273_v38  ;;  %v22093_v23 = vpack.c.bf16 %v20436_v35, %v2424_v32  ;;  %v23974_v63 = vpack.c.bf16 %v20450_v45, %v2534_v58 }
 0x32d   :  { %22083 = vmatprep.subr.msk.bf16.mxu1 %vm23529_vm2, %v22081_v0  ;;  %20509 = vmatprep.mubr.msk.f32.mxu0 %vm551_vm1, %v2279_v24 }
 0x32e   :  { %22100 = vmatprep.subr.bf16.mxu0 %v22099_v48  ;;  %v20453_v30 = vpop.f32.mrb[58].mxu0 }
 0x32f   :  { %v2544_v25 = vpop.f32.mrb[59].mxu0 }
 0x330   :  { %v23977_v28 = vpack.c.bf16 %v20453_v30, %v2544_v25 }
 0x332   :  { %20489 = vmatmul.mubr.msk.f32.vlgmr.msra.gmra.mrb[68].mxu1 %vm551_vm1, %v2274_v39  ;;  %v20456_v56 = vpop.f32.mrb[60].mxu0 }
 0x333   :  { %20510 = vmatmul.mubr.msk.f32.vlgmr.msra.gmra.mrb[68].mxu0 %vm551_vm1, %v2280_v34  ;;  %22086 = vmatpush3.bf16.xpose.msk.msra.mxu1 %vm23529_vm2, %v22081_v0  ;;  %v2554_v57 = vpop.f32.mrb[61].mxu0 }
 0x334   :  { %20502 = vmatprep.mubr.msk.f32.mxu1 %vm551_vm1, %v2277_v41  ;;  %22095 = vmatprep.subr.msk.bf16.mxu1 %vm23529_vm2, %v22093_v23  ;;  %v23979_v29 = vpack.c.bf16 %v20456_v56, %v2554_v57 }
 0x335   :  { %22102 = vmatpush3.bf16.msra.mxu0 %v22099_v48 }
 0x336   :  { %v20459_v26 = vpop.f32.mrb[62].mxu0  ;;  %22108 = vmatprep.subr.bf16.mxu0 %v23971_v61 }
 0x337   :  { %v2564_v55 = vpop.f32.mrb[63].mxu0 }
 0x338   :  { %v23981_v51 = vpack.c.bf16 %v20459_v26, %v2564_v55 }
 0x33a   :  { %20503 = vmatmul.mubr.msk.f32.vlgmr.msra.gmra.mrb[70].mxu1 %vm551_vm1, %v2278_v42  ;;  %v20462_v49 = vpop.f32.mrb[64].mxu0 }
 0x33b   :  { %22098 = vmatpush3.bf16.xpose.msk.msra.mxu1 %vm23529_vm2, %v22093_v23  ;;  %20516 = vmatprep.mubr.msk.f32.mxu1 %vm551_vm1, %v2281_v37  ;;  %v2574_v62 = vpop.f32.mrb[65].mxu0 }
 0x33c   :  { %22104 = vmatprep.subr.bf16.mxu1 %v22103_v47  ;;  %v23983_v59 = vpack.c.bf16 %v20462_v49, %v2574_v62 }
 0x342   :  { %20517 = vmatmul.mubr.msk.f32.vlgmr.msra.gmra.mrb[72].mxu1 %vm551_vm1, %v2282_v33 }
 0x343   :  { %22106 = vmatpush3.bf16.msra.mxu1 %v22103_v47 }
 0x344   :  { %22112 = vmatprep.subr.bf16.mxu1 %v23974_v63 }
 0x3ed   :  { %v20469_v4 = vpop.f32.mrb[62].mxu1 }
 0x3ee   :  { %v3280_v50 = vsel %vm1248_vm3, %v20469_v4, -inf  ;;  %v2661_v0 = vpop.f32.mrb[63].mxu1 }
 0x3ef   :  { %v3279_v19 = vsel %vm1248_vm3, %v2661_v0, -inf }
 0x3f0   :  { %v3281_v20 = vmax.f32 %v3279_v19, %v3280_v50 }
 0x3f2   :  { %v3282_v1 = vrot.slane %v3281_v20, 4 }
 0x3f4   :  { %v3283_v31 = vmax.f32 %v3281_v20, %v3282_v1 }
 0x3f5   :  { %v20476_v38 = vpop.f32.mrb[64].mxu1 }
 0x3f6   :  { %v3284_v44 = vrot.slane %v3283_v31, 2  ;;  %v3289_v24 = vsel %vm1248_vm3, %v20476_v38, -inf  ;;  %v2748_v35 = vpop.f32.mrb[65].mxu1 }
 0x3f7   :  { %v3288_v32 = vsel %vm1248_vm3, %v2748_v35, -inf }
 0x3f8   :  { %v3285_v23 = vmax.f32 %v3283_v31, %v3284_v44  ;;  %v3290_v34 = vmax.f32 %v3288_v32, %v3289_v24 }
 0x3fa   :  { %v3286_v39 = vrot.slane %v3285_v23, 1  ;;  %v3291_v41 = vrot.slane %v3290_v34, 4 }
 0x3fc   :  { %v3287_v37 = vmax.f32 %v3285_v23, %v3286_v39  ;;  %v3292_v42 = vmax.f32 %v3290_v34, %v3291_v41 }
 0x3fd   :  { %v23989_v33 = vpop.f32.mrb[66].mxu1  ;;  %v23991_v27 = vpop.f32.mrb[66].mxu0 }
 0x3fe   :  { %v3351_v43 = vsub.f32 %v2661_v0, %v3287_v37  ;;  %v3352_v48 = vsub.f32 %v20469_v4, %v3287_v37  ;;  %v3293_v36 = vrot.slane %v3292_v42, 2  ;;  %v3298_v46 = vsel %vm1248_vm3, %v23989_v33, -inf  ;;  %v2835_v53 = vpop.f32.mrb[67].mxu1  ;;  %v3009_v54 = vpop.f32.mrb[67].mxu0 }
 0x3ff   :  { %v3316_v45 = vsel %vm1248_vm3, %v23991_v27, -inf  ;;  %v3297_v58 = vsel %vm1248_vm3, %v2835_v53, -inf  ;;  %v3315_v30 = vsel %vm1248_vm3, %v3009_v54, -inf }
 0x400   :  { %v3367_v25 = vmul.f32 1.442695, %v3351_v43  ;;  %v3369_v47 = vmul.f32 1.442695, %v3352_v48  ;;  %v3294_v56 = vmax.f32 %v3292_v42, %v3293_v36  ;;  %v3299_v57 = vmax.f32 %v3297_v58, %v3298_v46 }
 0x401   :  { %v3317_v26 = vmax.f32 %v3315_v30, %v3316_v45 }
 0x402   :  { %22869 = vpow2.f32 %v3367_v25  ;;  %v3295_v55 = vrot.slane %v3294_v56, 1  ;;  %v3300_v49 = vrot.slane %v3299_v57, 4 }
 0x403   :  { %22871 = vpow2.f32 %v3369_v47  ;;  %v3318_v62 = vrot.slane %v3317_v26, 4 }
 0x404   :  { %v3296_v4 = vmax.f32 %v3294_v56, %v3295_v55  ;;  %v3301_v50 = vmax.f32 %v3299_v57, %v3300_v49 }
 0x405   :  { %v3319_v0 = vmax.f32 %v3317_v26, %v3318_v62  ;;  %v23999_v19 = vpop.f32.mrb[68].mxu1 }
 0x406   :  { %v3353_v20 = vsub.f32 %v2748_v35, %v3296_v4  ;;  %v3354_v1 = vsub.f32 %v20476_v38, %v3296_v4  ;;  %v3302_v31 = vrot.slane %v3301_v50, 2  ;;  %v3307_v44 = vsel %vm1248_vm3, %v23999_v19, -inf  ;;  %v24003_v24 = vpop.f32.mrb[68].mxu0  ;;  %v24005_v32 = vpop.f32.mrb[69].mxu1 }
 0x407   :  { %v3320_v23 = vrot.slane %v3319_v0, 2  ;;  %v3334_v34 = vsel %vm1248_vm3, %v24003_v24, -inf  ;;  %v3306_v39 = vsel %vm1248_vm3, %v24005_v32, -inf  ;;  %v24011_v41 = vpop.f32.mrb[69].mxu0 }
 0x408   :  { %v3371_v37 = vmul.f32 1.442695, %v3353_v20  ;;  %v3373_v35 = vmul.f32 1.442695, %v3354_v1  ;;  %v3303_v38 = vmax.f32 %v3301_v50, %v3302_v31  ;;  %v3308_v42 = vmax.f32 %v3306_v39, %v3307_v44 }
 0x409   :  { %v3321_v43 = vmax.f32 %v3319_v0, %v3320_v23  ;;  %v3333_v48 = vsel %vm1248_vm3, %v24011_v41, -inf }
 0x40a   :  { %22873 = vpow2.f32 %v3371_v37  ;;  %v3304_v36 = vrot.slane %v3303_v38, 1  ;;  %v3309_v46 = vrot.slane %v3308_v42, 4  ;;  %v3335_v45 = vmax.f32 %v3333_v48, %v3334_v34 }
 0x40b   :  { %22875 = vpow2.f32 %v3373_v35  ;;  %v3322_v58 = vrot.slane %v3321_v43, 1 }
 0x40c   :  { %v24015_v30 = vpop.eup %22869  ;;  %v3305_v25 = vmax.f32 %v3303_v38, %v3304_v36  ;;  %v3310_v47 = vmax.f32 %v3308_v42, %v3309_v46  ;;  %v3336_v56 = vrot.slane %v3335_v45, 4 }
 0x40d   :  { %v24017_v57 = vpop.eup %22871  ;;  %v3399_v26 = vsel %vm1248_vm3, %v24015_v30, 0.0  ;;  %v3323_v55 = vmax.f32 %v3321_v43, %v3322_v58  ;;  %v24021_v49 = vpop.f32.mrb[70].mxu1 }
 0x40e   :  { %v3400_v62 = vsel %vm1248_vm3, %v24017_v57, 0.0  ;;  %v3355_v4 = vsub.f32 %v2835_v53, %v3305_v25  ;;  %v3356_v50 = vsub.f32 %v23989_v33, %v3305_v25  ;;  %v3311_v0 = vrot.slane %v3310_v47, 2  ;;  %v24026_v20 = vpop.f32.mrb[71].mxu1 }
 0x40f   :  { %v3401_v1 = vadd.f32 %v3400_v62, %v3399_v26  ;;  %v3359_v31 = vsub.f32 %v3009_v54, %v3323_v55  ;;  %v3360_v44 = vsub.f32 %v23991_v27, %v3323_v55  ;;  %v3337_v23 = vmax.f32 %v3335_v45, %v3336_v56 }
 0x410   :  { %v3375_v34 = vmul.f32 1.442695, %v3355_v4  ;;  %v3377_v39 = vmul.f32 1.442695, %v3356_v50  ;;  %v3312_v37 = vmax.f32 %v3310_v47, %v3311_v0  ;;  %v3325_v35 = vsel %vm1248_vm3, %v24021_v49, -inf }
 0x411   :  { %v3402_v38 = vrot.slane %v3401_v1, 4  ;;  %v3383_v42 = vmul.f32 1.442695, %v3359_v31  ;;  %v3385_v43 = vmul.f32 1.442695, %v3360_v44  ;;  %v3338_v53 = vrot.slane %v3337_v23, 2 }
 0x412   :  { %22877 = vpow2.f32 %v3375_v34  ;;  %v3313_v33 = vrot.slane %v3312_v37, 1  ;;  %v3324_v48 = vsel %vm1248_vm3, %v24026_v20, -inf }
 0x413   :  { %v3403_v36 = vadd.f32 %v3402_v38, %v3401_v1  ;;  %22879 = vpow2.f32 %v3377_v39  ;;  %v3339_v54 = vmax.f32 %v3337_v23, %v3338_v53  ;;  %v3326_v27 = vmax.f32 %v3324_v48, %v3325_v35 }
 0x414   :  { %v24033_v46 = vpop.eup %22873  ;;  %22881 = vpow2.f32 %v3383_v42  ;;  %v3314_v45 = vmax.f32 %v3312_v37, %v3313_v33 }
 0x415   :  { %v24035_v58 = vpop.eup %22875  ;;  %v3404_v25 = vrot.slane %v3403_v36, 2  ;;  %v3408_v47 = vsel %vm1248_vm3, %v24033_v46, 0.0  ;;  %22883 = vpow2.f32 %v3385_v43  ;;  %v3340_v56 = vrot.slane %v3339_v54, 1  ;;  %v24039_v26 = vpop.f32.mrb[72].mxu1 }
 0x416   :  { %v3409_v55 = vsel %vm1248_vm3, %v24035_v58, 0.0  ;;  %v3357_v62 = vsub.f32 %v24005_v32, %v3314_v45  ;;  %v3358_v4 = vsub.f32 %v23999_v19, %v3314_v45  ;;  %v3327_v50 = vrot.slane %v3326_v27, 4  ;;  %v24045_v0 = vpop.f32.mrb[73].mxu1 }
 0x417   :  { %v3410_v1 = vadd.f32 %v3409_v55, %v3408_v47  ;;  %v3341_v31 = vmax.f32 %v3339_v54, %v3340_v56  ;;  %v3343_v44 = vsel %vm1248_vm3, %v24039_v26, -inf  ;;  %v3342_v23 = vsel %vm1248_vm3, %v24045_v0, -inf }
 0x418   :  { %v3379_v34 = vmul.f32 1.442695, %v3357_v62  ;;  %v3381_v39 = vmul.f32 1.442695, %v3358_v4  ;;  %v3328_v37 = vmax.f32 %v3326_v27, %v3327_v50  ;;  %v3344_v35 = vmax.f32 %v3342_v23, %v3343_v44 }
 0x419   :  { %v3411_v38 = vrot.slane %v3410_v1, 4  ;;  %v3363_v32 = vsub.f32 %v24011_v41, %v3341_v31  ;;  %v3364_v19 = vsub.f32 %v24003_v24, %v3341_v31  ;;  %v3405_v42 = vadd.f32 %v3404_v25, %v3403_v36 }
 0x41a   :  { %22885 = vpow2.f32 %v3379_v34  ;;  %v3329_v43 = vrot.slane %v3328_v37, 2  ;;  %v3345_v53 = vrot.slane %v3344_v35, 4 }
 0x41b   :  { %v3412_v33 = vadd.f32 %v3411_v38, %v3410_v1  ;;  %22887 = vpow2.f32 %v3381_v39  ;;  %v3391_v48 = vmul.f32 1.442695, %v3363_v32  ;;  %v3393_v54 = vmul.f32 1.442695, %v3364_v19 }
 0x41c   :  { %v24053_v45 = vpop.eup %22877  ;;  %v3330_v47 = vmax.f32 %v3328_v37, %v3329_v43  ;;  %v3346_v56 = vmax.f32 %v3344_v35, %v3345_v53  ;;  %v3406_v55 = vrot.slane %v3405_v42, 1 }
 0x41d   :  { %v24055_v27 = vpop.eup %22879  ;;  %v3413_v62 = vrot.slane %v3412_v33, 2  ;;  %v3417_v41 = vsel %vm1248_vm3, %v24053_v45, 0.0  ;;  %22889 = vpow2.f32 %v3391_v48 }
 0x41e   :  { %v24059_v24 = vpop.eup %22881  ;;  %v3418_v36 = vsel %vm1248_vm3, %v24055_v27, 0.0  ;;  %22891 = vpow2.f32 %v3393_v54  ;;  %v3331_v25 = vrot.slane %v3330_v47, 1  ;;  %v3347_v4 = vrot.slane %v3346_v56, 2 }
 0x41f   :  { %v24063_v50 = vpop.eup %22883  ;;  %v3419_v1 = vadd.f32 %v3418_v36, %v3417_v41  ;;  %v3435_v31 = vsel %vm1248_vm3, %v24059_v24, 0.0  ;;  %v3407_v44 = vadd.f32 %v3406_v55, %v3405_v42  ;;  %v3414_v23 = vadd.f32 %v3413_v62, %v3412_v33 }
 0x420   :  { %v3436_v34 = vsel %vm1248_vm3, %v24063_v50, 0.0  ;;  %v3332_v39 = vmax.f32 %v3330_v47, %v3331_v25  ;;  %v3348_v37 = vmax.f32 %v3346_v56, %v3347_v4 }
 0x421   :  { %v3420_v35 = vrot.slane %v3419_v1, 4  ;;  %v3437_v38 = vadd.f32 %v3436_v34, %v3435_v31  ;;  %22893 = vrcp.f32 %v3407_v44  ;;  %v3415_v32 = vrot.slane %v3414_v23, 1 }
 0x422   :  { %v3361_v19 = vsub.f32 %v24026_v20, %v3332_v39  ;;  %v3362_v43 = vsub.f32 %v24021_v49, %v3332_v39  ;;  %v3349_v53 = vrot.slane %v3348_v37, 1 }
 0x423   :  { %v3421_v48 = vadd.f32 %v3420_v35, %v3419_v1  ;;  %v3438_v54 = vrot.slane %v3437_v38, 4  ;;  %v3416_v41 = vadd.f32 %v3415_v32, %v3414_v23 }
 0x424   :  { %v24071_v36 = vpop.eup %22885  ;;  %v3387_v42 = vmul.f32 1.442695, %v3361_v19  ;;  %v3389_v33 = vmul.f32 1.442695, %v3362_v43  ;;  %v3350_v55 = vmax.f32 %v3348_v37, %v3349_v53 }
 0x425   :  { %v24073_v62 = vpop.eup %22887  ;;  %v3422_v47 = vrot.slane %v3421_v48, 2  ;;  %v3439_v56 = vadd.f32 %v3438_v54, %v3437_v38  ;;  %v3426_v25 = vsel %vm1248_vm3, %v24071_v36, 0.0  ;;  %22895 = vrcp.f32 %v3416_v41 }
 0x426   :  { %v3427_v49 = vsel %vm1248_vm3, %v24073_v62, 0.0  ;;  %22897 = vpow2.f32 %v3387_v42  ;;  %v3365_v20 = vsub.f32 %v24045_v0, %v3350_v55  ;;  %v3366_v4 = vsub.f32 %v24039_v26, %v3350_v55 }
 0x427   :  { %v24081_v1 = vpop.eup %22889  ;;  %v3440_v31 = vrot.slane %v3439_v56, 2  ;;  %v3428_v44 = vadd.f32 %v3427_v49, %v3426_v25  ;;  %22899 = vpow2.f32 %v3389_v33  ;;  %v3423_v23 = vadd.f32 %v3422_v47, %v3421_v48 }
 0x428   :  { %v24083_v34 = vpop.eup %22891  ;;  %v3453_v39 = vsel %vm1248_vm3, %v24081_v1, 0.0  ;;  %v3395_v37 = vmul.f32 1.442695, %v3365_v20  ;;  %v3397_v35 = vmul.f32 1.442695, %v3366_v4 }
 0x429   :  { %v3441_v38 = vadd.f32 %v3440_v31, %v3439_v56  ;;  %v3429_v32 = vrot.slane %v3428_v44, 4  ;;  %v3454_v0 = vsel %vm1248_vm3, %v24083_v34, 0.0  ;;  %v3424_v19 = vrot.slane %v3423_v23, 1 }
 0x42a   :  { %v3455_v26 = vadd.f32 %v3454_v0, %v3453_v39  ;;  %22901 = vpow2.f32 %v3395_v37 }
 0x42b   :  { %v22894_v43 = vpop.eup %22893  ;;  %v3442_v53 = vrot.slane %v3441_v38, 1  ;;  %v3430_v54 = vadd.f32 %v3429_v32, %v3428_v44  ;;  %22903 = vpow2.f32 %v3397_v35  ;;  %v3425_v48 = vadd.f32 %v3424_v19, %v3423_v23 }
 0x42c   :  { %v3456_v41 = vrot.slane %v3455_v26, 4  ;;  %v3479_v42 = vmul.f32 %v22894_v43, %v24015_v30  ;;  %v3480_v33 = vmul.f32 %v22894_v43, %v24017_v57 }
 0x42d   :  { %v3431_v55 = vrot.slane %v3430_v54, 2  ;;  %22905 = vrcp.f32 %v3425_v48  ;;  %v3443_v47 = vadd.f32 %v3442_v53, %v3441_v38 }
 0x42e   :  { %v3457_v56 = vadd.f32 %v3456_v41, %v3455_v26  ;;  %20523 = vmatprep.mubr.msk.f32.mxu0 %vm1248_vm3, %v3479_v42 }
 0x42f   :  { %v22896_v25 = vpop.eup %22895  ;;  %20524 = vmatmul.mubr.msk.f32.vlgmr.msra.gmra.mrb[70].mxu0 %vm1248_vm3, %v3480_v33  ;;  %22907 = vrcp.f32 %v3443_v47  ;;  %v3432_v49 = vadd.f32 %v3431_v55, %v3430_v54 }
 0x430   :  { %v24093_v20 = vpop.eup %22897  ;;  %v3458_v4 = vrot.slane %v3457_v56, 2  ;;  %22110 = vmatpush3.bf16.msra.mxu0 %v23971_v61  ;;  %v3481_v30 = vmul.f32 %v22896_v25, %v24033_v46  ;;  %v3482_v57 = vmul.f32 %v22896_v25, %v24035_v58 }
 0x431   :  { %v24098_v31 = vpop.eup %22899  ;;  %v3444_v44 = vsel %vm1248_vm3, %v24093_v20, 0.0  ;;  %22116 = vmatprep.subr.bf16.mxu0 %v23977_v28  ;;  %v3433_v23 = vrot.slane %v3432_v49, 1 }
 0x432   :  { %v3459_v39 = vadd.f32 %v3458_v4, %v3457_v56  ;;  %v3445_v37 = vsel %vm1248_vm3, %v24098_v31, 0.0  ;;  %20530 = vmatprep.mubr.msk.f32.mxu1 %vm1248_vm3, %v3481_v30  ;;  %v18314_v56 = vld [vmem:[%s26975_s4 + $0x20] sm:$0xff] }
 0x433   :  { %v3446_v35 = vadd.f32 %v3445_v37, %v3444_v44  ;;  %20531 = vmatmul.mubr.msk.f32.vlgmr.msra.gmra.mrb[74].mxu1 %vm1248_vm3, %v3482_v57  ;;  %v3434_v61 = vadd.f32 %v3433_v23, %v3432_v49 }
 0x434   :  { %v24107_v46 = vpop.eup %22901  ;;  %v3460_v58 = vrot.slane %v3459_v39, 1  ;;  %22114 = vmatpush3.bf16.msra.mxu1 %v23974_v63 }
 0x435   :  { %v24110_v38 = vpop.eup %22903  ;;  %v3447_v32 = vrot.slane %v3446_v35, 4  ;;  %v3462_v0 = vsel %vm1248_vm3, %v24107_v46, 0.0  ;;  %22120 = vmatprep.subr.bf16.mxu1 %v23979_v29  ;;  %22909 = vrcp.f32 %v3434_v61 }
 0x436   :  { %v3463_v19 = vsel %vm1248_vm3, %v24110_v38, 0.0  ;;  %v3461_v26 = vadd.f32 %v3460_v58, %v3459_v39 }
 0x437   :  { %v22906_v43 = vpop.eup %22905  ;;  %v3448_v53 = vadd.f32 %v3447_v32, %v3446_v35  ;;  %v3464_v54 = vadd.f32 %v3463_v19, %v3462_v0 }
 0x438   :  { %v3483_v48 = vmul.f32 %v22906_v43, %v24053_v45  ;;  %v3484_v63 = vmul.f32 %v22906_v43, %v24055_v27  ;;  %22911 = vrcp.f32 %v3461_v26  ;;  %v18315_v45 = vld [vmem:[%s26975_s4 + $0x28] sm:$0xff]  ;;  %v23213_v26 = vld [vmem:[%s26972_s0 + $0x20] sm:$0xff] }
 0x439   :  { %v22908_v41 = vpop.eup %22907  ;;  %v3449_v42 = vrot.slane %v3448_v53, 2  ;;  %v3465_v33 = vrot.slane %v3464_v54, 4  ;;  %v23214_v43 = vld [vmem:[%s26972_s0 + $0x28] sm:$0xff] }
 0x43a   :  { %20537 = vmatprep.mubr.msk.f32.mxu0 %vm1248_vm3, %v3483_v48  ;;  %v3487_v55 = vmul.f32 %v22908_v41, %v24059_v24  ;;  %v3488_v47 = vmul.f32 %v22908_v41, %v24063_v50  ;;  %v22131_v50 = vpack.c.bf16 %v18315_v45, %v18314_v56  ;;  %v23217_v48 = vld [vmem:[%s26972_s0 + $0x60] sm:$0xff]  ;;  %v23219_v41 = vld [vmem:[%s26972_s0 + $0x70] sm:$0xff] }
 0x43b   :  { %v3466_v25 = vadd.f32 %v3465_v33, %v3464_v54  ;;  %20538 = vmatmul.mubr.msk.f32.vlgmr.msra.gmra.mrb[72].mxu0 %vm1248_vm3, %v3484_v63  ;;  %v3450_v27 = vadd.f32 %v3449_v42, %v3448_v53  ;;  %v23215_v53 = vld [vmem:[%s26972_s0 + $0x50] sm:$0xff]  ;;  %v23216_v54 = vld [vmem:[%s26972_s0 + $0x58] sm:$0xff]  ;;  %v23218_v63 = vld [vmem:[%s26972_s0 + $0x68] sm:$0xff] }
 0x43c   :  { %22118 = vmatpush3.bf16.msra.mxu0 %v23977_v28  ;;  %20551 = vmatprep.mubr.msk.f32.mxu0 %vm1248_vm3, %v3487_v55  ;;  %v23220_v42 = vld [vmem:[%s26972_s0 + $0x78] sm:$0xff]  ;;  %v18394_v33 = vld [vmem:[%s26974_s3 + $0x8] sm:$0xf]  ;;  %v2113_v55 = vld [vmem:[%s26975_s4] sm:$0xff] }
 0x43d   :  { %v3467_v49 = vrot.slane %v3466_v25, 2  ;;  %22124 = vmatprep.subr.bf16.mxu0 %v23981_v51  ;;  %v3451_v24 = vrot.slane %v3450_v27, 1 }
 0x43f   :  { %v22910_v4 = vpop.eup %22909  ;;  %20552 = vmatmul.mubr.msk.f32.vlgmr.msra.gmra.mrb[74].mxu0 %vm1248_vm3, %v3488_v47  ;;  %v3452_v30 = vadd.f32 %v3451_v24, %v3450_v27  ;;  %v3468_v57 = vadd.f32 %v3467_v49, %v3466_v25  ;;  %v2114_v47 = vld [vmem:[%s26975_s4 + $0x8] sm:$0xff] }
 0x440   :  { %22126 = vmatpush3.bf16.msra.mxu0 %v23981_v51  ;;  %v3485_v44 = vmul.f32 %v22910_v4, %v24071_v36  ;;  %v3486_v23 = vmul.f32 %v22910_v4, %v24073_v62  ;;  %v18316_v51 = vld [vmem:[%s26975_s4 + $0x30] sm:$0xff]  ;;  %v18317_v36 = vld [vmem:[%s26975_s4 + $0x38] sm:$0xff]  ;;  %v22143_v56 = vpack.c.bf16 %v2114_v47, %v2113_v55 }
 0x441   :  { %22913 = vrcp.f32 %v3452_v30  ;;  %v3469_v28 = vrot.slane %v3468_v57, 1  ;;  %22133 = vmatprep.subr.msk.bf16.mxu0 %vm23529_vm2, %v22131_v50  ;;  %v22137_v62 = vpack.c.bf16 %v18317_v36, %v18316_v51 }
 0x442   :  { %v22912_v39 = vpop.eup %22911  ;;  %20544 = vmatprep.mubr.msk.f32.mxu1 %vm1248_vm3, %v3485_v44 }
 0x443   :  { %v3491_v37 = vmul.f32 %v22912_v39, %v24081_v1  ;;  %20545 = vmatmul.mubr.msk.f32.vlgmr.msra.gmra.mrb[76].mxu1 %vm1248_vm3, %v3486_v23  ;;  %v3492_v35 = vmul.f32 %v22912_v39, %v24083_v34  ;;  %v3470_v61 = vadd.f32 %v3469_v28, %v3468_v57 }
 0x444   :  { %22122 = vmatpush3.bf16.msra.mxu1 %v23979_v29  ;;  %v18358_v29 = vld [vmem:[%s26971_s1 + $0x8] sm:$0xf] }
 0x445   :  { %20565 = vmatprep.mubr.msk.f32.mxu0 %vm1248_vm3, %v3491_v37  ;;  %22128 = vmatprep.subr.bf16.mxu1 %v23983_v59  ;;  %22915 = vrcp.f32 %v3470_v61 }
 0x446   :  { %20566 = vmatmul.mubr.msk.f32.vlgmr.msra.gmra.mrb[76].mxu0 %vm1248_vm3, %v3492_v35 }
 0x449   :  { %22136 = vmatpush3.bf16.xpose.msk.msra.mxu0 %vm23529_vm2, %v22131_v50 }
 0x44a   :  { %22139 = vmatprep.subr.msk.bf16.mxu0 %vm23529_vm2, %v22137_v62 }
 0x44b   :  { %v22914_v1 = vpop.eup %22913 }
 0x44c   :  { %v3489_v34 = vmul.f32 %v22914_v1, %v24093_v20  ;;  %v3490_v58 = vmul.f32 %v22914_v1, %v24098_v31  ;;  %v23209_v20 = vld [vmem:[%s26972_s0] sm:$0xff]  ;;  %v23210_v31 = vld [vmem:[%s26972_s0 + $0x8] sm:$0xff] }
 0x44e   :  { %20558 = vmatprep.mubr.msk.f32.mxu1 %vm1248_vm3, %v3489_v34 }
 0x44f   :  { %v22916_v32 = vpop.eup %22915  ;;  %20559 = vmatmul.mubr.msk.f32.vlgmr.msra.gmra.mrb[78].mxu1 %vm1248_vm3, %v3490_v58 }
 0x450   :  { %22130 = vmatpush3.bf16.msra.mxu1 %v23983_v59  ;;  %v3493_v0 = vmul.f32 %v22916_v32, %v24107_v46  ;;  %v3494_v19 = vmul.f32 %v22916_v32, %v24110_v38  ;;  %v18376_v59 = vld [vmem:[%s26973_s2 + $0x8] sm:$0xf]  ;;  %v23211_v46 = vld [vmem:[%s26972_s0 + $0x10] sm:$0xff]  ;;  %v23212_v38 = vld [vmem:[%s26972_s0 + $0x18] sm:$0xff] }
 0x451   :  { %20639 = vmatprep.subr.msk.mxu1 %vm40_vm0, %v18358_v29  ;;  %22142 = vmatpush3.bf16.xpose.msk.msra.mxu0 %vm23529_vm2, %v22137_v62 }
 0x452   :  { %20572 = vmatprep.mubr.msk.f32.mxu1 %vm1248_vm3, %v3493_v0  ;;  %22145 = vmatprep.subr.msk.bf16.mxu0 %vm23529_vm2, %v22143_v56 }
 0x453   :  { %20573 = vmatmul.mubr.msk.f32.vlgmr.msra.gmra.mrb[80].mxu1 %vm1248_vm3, %v3494_v19 }
 0x454   :  { %20641 = vmatprep.mubr.msk.f32.mxu1 %vm40_vm0, %v23209_v20 }
 0x459   :  { %20640 = vmatpush3.xpose.msk.msra.mxu1 %vm40_vm0, %v18358_v29 }
 0x45a   :  { %20665 = vmatprep.subr.msk.mxu1 %vm40_vm0, %v18376_v59 }
 0x45c   :  { %20642 = vmatmul.mubr.msk.f32.vlgmr.msra.gmra.mrb[82].mxu1 %vm40_vm0, %v23210_v31 }
 0x45d   :  { %20644 = vmatprep.mubr.msk.f32.mxu1 %vm40_vm0, %v23211_v46  ;;  %20666 = vmatpush3.xpose.msk.msra.mxu1 %vm40_vm0, %v18376_v59 }
 0x45e   :  { %20691 = vmatprep.subr.msk.mxu1 %vm40_vm0, %v18394_v33 }
 0x460   :  { %20645 = vmatmul.mubr.msk.f32.gmra.mrb[84].mxu1 %vm40_vm0, %v23212_v38 }
 0x461   :  { %20647 = vmatprep.mubr.msk.f32.mxu1 %vm40_vm0, %v23213_v26 }
 0x464   :  { %20648 = vmatmul.mubr.msk.f32.gmra.mrb[86].mxu1 %vm40_vm0, %v23214_v43 }
 0x465   :  { %20650 = vmatprep.mubr.msk.f32.mxu1 %vm40_vm0, %v23851_v2 }
 0x468   :  { %20651 = vmatmul.mubr.msk.f32.gmra.mrb[88].mxu1 %vm40_vm0, %v23858_v3 }
 0x469   :  { %20653 = vmatprep.mubr.msk.f32.mxu1 %vm40_vm0, %v23865_v5 }
 0x46c   :  { %20654 = vmatmul.mubr.msk.f32.gmra.mrb[90].mxu1 %vm40_vm0, %v23872_v6 }
 0x46d   :  { %20656 = vmatprep.mubr.msk.f32.mxu1 %vm40_vm0, %v23215_v53 }
 0x470   :  { %20657 = vmatmul.mubr.msk.f32.gmra.mrb[92].mxu1 %vm40_vm0, %v23216_v54 }
 0x471   :  { %20659 = vmatprep.mubr.msk.f32.mxu1 %vm40_vm0, %v23217_v48 }
 0x474   :  { %20660 = vmatmul.mubr.msk.f32.gmra.mrb[94].mxu1 %vm40_vm0, %v23218_v63 }
 0x475   :  { %20662 = vmatprep.mubr.msk.f32.mxu1 %vm40_vm0, %v23219_v41 }
 0x478   :  { %20663 = vmatmul.mubr.msk.f32.gmra.mrb[96].mxu1 %vm40_vm0, %v23220_v42 }
 0x479   :  { %20667 = vmatprep.mubr.msk.f32.mxu1 %vm40_vm0, %v23209_v20 }
 0x47c   :  { %20668 = vmatmul.mubr.msk.f32.vlgmr.msra.gmra.mrb[98].mxu1 %vm40_vm0, %v23210_v31 }
 0x47d   :  { %20670 = vmatprep.mubr.msk.f32.mxu1 %vm40_vm0, %v23211_v46  ;;  %20692 = vmatpush3.xpose.msk.msra.mxu1 %vm40_vm0, %v18394_v33 }
 0x480   :  { %20671 = vmatmul.mubr.msk.f32.gmra.mrb[100].mxu1 %vm40_vm0, %v23212_v38 }
 0x481   :  { %20673 = vmatprep.mubr.msk.f32.mxu1 %vm40_vm0, %v23213_v26 }
 0x484   :  { %20674 = vmatmul.mubr.msk.f32.gmra.mrb[102].mxu1 %vm40_vm0, %v23214_v43 }
 0x485   :  { %20676 = vmatprep.mubr.msk.f32.mxu1 %vm40_vm0, %v23851_v2 }
 0x488   :  { %20677 = vmatmul.mubr.msk.f32.gmra.mrb[104].mxu1 %vm40_vm0, %v23858_v3 }
 0x489   :  { %20679 = vmatprep.mubr.msk.f32.mxu1 %vm40_vm0, %v23865_v5 }
 0x48c   :  { %20680 = vmatmul.mubr.msk.f32.gmra.mrb[106].mxu1 %vm40_vm0, %v23872_v6 }
 0x48d   :  { %20682 = vmatprep.mubr.msk.f32.mxu1 %vm40_vm0, %v23215_v53 }
 0x490   :  { %20683 = vmatmul.mubr.msk.f32.gmra.mrb[108].mxu1 %vm40_vm0, %v23216_v54 }
 0x491   :  { %20685 = vmatprep.mubr.msk.f32.mxu1 %vm40_vm0, %v23217_v48 }
 0x494   :  { %20686 = vmatmul.mubr.msk.f32.gmra.mrb[110].mxu1 %vm40_vm0, %v23218_v63 }
 0x495   :  { %20688 = vmatprep.mubr.msk.f32.mxu1 %vm40_vm0, %v23219_v41 }
 0x498   :  { %20689 = vmatmul.mubr.msk.f32.gmra.mrb[112].mxu1 %vm40_vm0, %v23220_v42 }
 0x499   :  { %20693 = vmatprep.mubr.msk.f32.mxu1 %vm40_vm0, %v23209_v20 }
 0x49c   :  { %20694 = vmatmul.mubr.msk.f32.vlgmr.msra.gmra.mrb[114].mxu1 %vm40_vm0, %v23210_v31 }
 0x49d   :  { %20696 = vmatprep.mubr.msk.f32.mxu1 %vm40_vm0, %v23211_v46 }
 0x4a0   :  { %20697 = vmatmul.mubr.msk.f32.gmra.mrb[116].mxu1 %vm40_vm0, %v23212_v38 }
 0x4a1   :  { %20699 = vmatprep.mubr.msk.f32.mxu1 %vm40_vm0, %v23213_v26 }
 0x4a4   :  { %20700 = vmatmul.mubr.msk.f32.gmra.mrb[118].mxu1 %vm40_vm0, %v23214_v43 }
 0x4a5   :  { %20702 = vmatprep.mubr.msk.f32.mxu1 %vm40_vm0, %v23851_v2  ;;  %v2115_v2 = vld [vmem:[%s26975_s4 + $0x10] sm:$0xff] }
 0x4a8   :  { %20703 = vmatmul.mubr.msk.f32.gmra.mrb[120].mxu1 %vm40_vm0, %v23858_v3  ;;  %v2116_v3 = vld [vmem:[%s26975_s4 + $0x18] sm:$0xff] }
 0x4a9   :  { %20705 = vmatprep.mubr.msk.f32.mxu1 %vm40_vm0, %v23865_v5  ;;  %v22149_v45 = vpack.c.bf16 %v2116_v3, %v2115_v2 }
 0x4ac   :  { %20706 = vmatmul.mubr.msk.f32.gmra.mrb[122].mxu1 %vm40_vm0, %v23872_v6 }
 0x4ad   :  { %20708 = vmatprep.mubr.msk.f32.mxu1 %vm40_vm0, %v23215_v53 }
 0x4b0   :  { %20709 = vmatmul.mubr.msk.f32.gmra.mrb[124].mxu1 %vm40_vm0, %v23216_v54 }
 0x4b1   :  { %20711 = vmatprep.mubr.msk.f32.mxu1 %vm40_vm0, %v23217_v48 }
 0x4b4   :  { %20712 = vmatmul.mubr.msk.f32.gmra.mrb[126].mxu1 %vm40_vm0, %v23218_v63 }
 0x4b5   :  { %20714 = vmatprep.mubr.msk.f32.mxu1 %vm40_vm0, %v23219_v41 }
 0x4b8   :  { %20715 = vmatmul.mubr.msk.f32.gmra.mrb[128].mxu1 %vm40_vm0, %v23220_v42 }
 0x502   :  { %v20525_v5 = vpop.f32.mrb[70].mxu0 }
 0x503   :  { %v3567_v6 = vpop.f32.mrb[71].mxu0 }
 0x504   :  { %20583 = vmatprep.mubr.msk.f32.mxu0 %vm551_vm1, %v3567_v6 }
 0x505   :  { %20584 = vmatmul.mubr.msk.f32.vlgmr.msra.gmra.mrb[78].mxu0 %vm551_vm1, %v20525_v5 }
 0x506   :  { %v20532_v25 = vpop.f32.mrb[74].mxu1  ;;  %22148 = vmatpush3.bf16.xpose.msk.msra.mxu0 %vm23529_vm2, %v22143_v56 }
 0x507   :  { %v3648_v27 = vpop.f32.mrb[75].mxu1  ;;  %22151 = vmatprep.subr.msk.bf16.mxu0 %vm23529_vm2, %v22149_v45 }
 0x508   :  { %20586 = vmatprep.mubr.msk.f32.mxu0 %vm551_vm1, %v3648_v27 }
 0x509   :  { %20587 = vmatmul.mubr.msk.f32.gmra.mrb[80].mxu0 %vm551_vm1, %v20532_v25 }
 0x50e   :  { %v20539_v49 = vpop.f32.mrb[72].mxu0  ;;  %22154 = vmatpush3.bf16.xpose.msk.msra.mxu0 %vm23529_vm2, %v22149_v45 }
 0x50f   :  { %v3729_v24 = vpop.f32.mrb[73].mxu0 }
 0x510   :  { %20589 = vmatprep.mubr.msk.f32.mxu0 %vm551_vm1, %v3729_v24 }
 0x511   :  { %20590 = vmatmul.mubr.msk.f32.gmra.mrb[82].mxu0 %vm551_vm1, %v20539_v49 }
 0x512   :  { %v20553_v50 = vpop.f32.mrb[74].mxu0 }
 0x513   :  { %v3891_v4 = vpop.f32.mrb[75].mxu0 }
 0x516   :  { %v20546_v30 = vpop.f32.mrb[76].mxu1 }
 0x517   :  { %v3810_v57 = vpop.f32.mrb[77].mxu1 }
 0x518   :  { %20592 = vmatprep.mubr.msk.f32.mxu0 %vm551_vm1, %v3810_v57 }
 0x519   :  { %v20567_v44 = vpop.f32.mrb[76].mxu0  ;;  %20593 = vmatmul.mubr.msk.f32.gmra.mrb[84].mxu0 %vm551_vm1, %v20546_v30 }
 0x51a   :  { %v4053_v23 = vpop.f32.mrb[77].mxu0  ;;  %20595 = vmatprep.mubr.msk.f32.mxu0 %vm551_vm1, %v3891_v4 }
 0x51d   :  { %20596 = vmatmul.mubr.msk.f32.gmra.mrb[86].mxu0 %vm551_vm1, %v20553_v50 }
 0x522   :  { %v20560_v28 = vpop.f32.mrb[78].mxu1 }
 0x523   :  { %v3972_v39 = vpop.f32.mrb[79].mxu1 }
 0x524   :  { %20598 = vmatprep.mubr.msk.f32.mxu0 %vm551_vm1, %v3972_v39 }
 0x525   :  { %20599 = vmatmul.mubr.msk.f32.gmra.mrb[88].mxu0 %vm551_vm1, %v20560_v28 }
 0x526   :  { %20601 = vmatprep.mubr.msk.f32.mxu0 %vm551_vm1, %v4053_v23  ;;  %v20574_v37 = vpop.f32.mrb[80].mxu1 }
 0x527   :  { %v4134_v35 = vpop.f32.mrb[81].mxu1 }
 0x529   :  { %20602 = vmatmul.mubr.msk.f32.gmra.mrb[90].mxu0 %vm551_vm1, %v20567_v44 }
 0x52a   :  { %20604 = vmatprep.mubr.msk.f32.mxu0 %vm551_vm1, %v4134_v35 }
 0x52d   :  { %20605 = vmatmul.mubr.msk.f32.gmra.mrb[92].mxu0 %vm551_vm1, %v20574_v37 }
 0x52e   :  { %20615 = vmatprep.mubr.msk.f32.mxu0 %vm551_vm1, %v23890_v10 }
 0x52f   :  { %v20643_v61 = vpop.f32.mrb[82].mxu1 }
 0x530   :  { %v4629_v51 = vpop.f32.mrb[83].mxu1 }
 0x531   :  { %20616 = vmatmul.mubr.msk.f32.vlgmr.msra.gmra.mrb[78].mxu0 %vm551_vm1, %v23888_v7 }
 0x532   :  { %20618 = vmatprep.mubr.msk.f32.mxu0 %vm551_vm1, %v23894_v12 }
 0x533   :  { %v20646_v36 = vpop.f32.mrb[84].mxu1 }
 0x534   :  { %v4639_v62 = vpop.f32.mrb[85].mxu1  ;;  %v4711_v53 = vmul.f32 0.5, %v20646_v36 }
 0x535   :  { %20619 = vmatmul.mubr.msk.f32.gmra.mrb[80].mxu0 %vm551_vm1, %v23892_v9  ;;  %v4710_v59 = vmul.f32 0.5, %v4639_v62 }
 0x536   :  { %20621 = vmatprep.mubr.msk.f32.mxu0 %vm551_vm1, %v23898_v13 }
 0x537   :  { %v24324_v1 = vpop.f32.mrb[86].mxu1 }
 0x538   :  { %v4649_v34 = vpop.f32.mrb[87].mxu1  ;;  %v4713_v2 = vmul.f32 0.5, %v24324_v1 }
 0x539   :  { %20622 = vmatmul.mubr.msk.f32.gmra.mrb[82].mxu0 %vm551_vm1, %v23896_v11  ;;  %v4712_v48 = vmul.f32 0.5, %v4649_v34 }
 0x53a   :  { %20624 = vmatprep.mubr.msk.f32.mxu0 %vm551_vm1, %v23906_v17 }
 0x53b   :  { %v20652_v7 = vpop.f32.mrb[88].mxu1 }
 0x53c   :  { %v4659_v10 = vpop.f32.mrb[89].mxu1  ;;  %v4715_v42 = vmul.f32 0.5, %v20652_v7 }
 0x53d   :  { %v4714_v12 = vmul.f32 0.5, %v4659_v10  ;;  %20625 = vmatmul.mubr.msk.f32.gmra.mrb[84].mxu0 %vm551_vm1, %v23904_v16 }
 0x53e   :  { %20627 = vmatprep.mubr.msk.f32.mxu0 %vm551_vm1, %v23902_v15 }
 0x53f   :  { %v24334_v9 = vpop.f32.mrb[90].mxu1  ;;  %20742 = vmatprep.mubr.msk.f32.mxu1 %vm551_vm1, %v4714_v12 }
 0x540   :  { %v4669_v13 = vpop.f32.mrb[91].mxu1  ;;  %v4717_v24 = vmul.f32 0.5, %v24334_v9 }
 0x541   :  { %20628 = vmatmul.mubr.msk.f32.gmra.mrb[86].mxu0 %vm551_vm1, %v23900_v14  ;;  %v4716_v5 = vmul.f32 0.5, %v4669_v13 }
 0x542   :  { %20630 = vmatprep.mubr.msk.f32.mxu0 %vm551_vm1, %v23914_v60  ;;  %v4708_v60 = vmul.f32 0.5, %v4629_v51 }
 0x543   :  { %v24341_v11 = vpop.f32.mrb[92].mxu1 }
 0x544   :  { %v4679_v17 = vpop.f32.mrb[93].mxu1  ;;  %v4719_v25 = vmul.f32 0.5, %v24341_v11 }
 0x545   :  { %20631 = vmatmul.mubr.msk.f32.gmra.mrb[88].mxu0 %vm551_vm1, %v23912_v21  ;;  %v4718_v55 = vmul.f32 0.5, %v4679_v17 }
 0x546   :  { %20633 = vmatprep.mubr.msk.f32.mxu0 %vm551_vm1, %v23910_v52 }
 0x547   :  { %v24347_v15 = vpop.f32.mrb[94].mxu1 }
 0x548   :  { %v24349_v16 = vpop.f32.mrb[95].mxu1  ;;  %v4721_v37 = vmul.f32 0.5, %v24347_v15 }
 0x549   :  { %20634 = vmatmul.mubr.msk.f32.gmra.mrb[90].mxu0 %vm551_vm1, %v23908_v18  ;;  %v4720_v50 = vmul.f32 0.5, %v24349_v16 }
 0x54a   :  { %20636 = vmatprep.mubr.msk.f32.mxu0 %vm551_vm1, %v23919_v22 }
 0x54b   :  { %v24355_v14 = vpop.f32.mrb[96].mxu1 }
 0x54c   :  { %v4699_v58 = vpop.f32.mrb[97].mxu1  ;;  %v4723_v44 = vmul.f32 0.5, %v24355_v14 }
 0x54d   :  { %20637 = vmatmul.mubr.msk.f32.gmra.mrb[92].mxu0 %vm551_vm1, %v23917_v8  ;;  %v4709_v8 = vmul.f32 0.5, %v20643_v61  ;;  %v4722_v49 = vmul.f32 0.5, %v4699_v58 }
 0x54e   :  { %20721 = vmatprep.mubr.msk.f32.mxu0 %vm551_vm1, %v4708_v60 }
 0x54f   :  { %v20669_v52 = vpop.f32.mrb[98].mxu1 }
 0x550   :  { %v4795_v21 = vpop.f32.mrb[99].mxu1 }
 0x551   :  { %v22155_v29 = vpack.c.bf16 %v20669_v52, %v4795_v21 }
 0x553   :  { %22157 = vmatprep.subr.msk.bf16.mxu0 %vm23529_vm2, %v22155_v29  ;;  %v20672_v32 = vpop.f32.mrb[100].mxu1 }
 0x554   :  { %22160 = vmatpush3.bf16.xpose.msk.msra.mxu0 %vm23529_vm2, %v22155_v29  ;;  %v4805_v18 = vpop.f32.mrb[101].mxu1 }
 0x555   :  { %v22161_v22 = vpack.c.bf16 %v20672_v32, %v4805_v18 }
 0x557   :  { %v20675_v0 = vpop.f32.mrb[102].mxu1  ;;  %22163 = vmatprep.subr.msk.bf16.mxu0 %vm23529_vm2, %v22161_v22 }
 0x558   :  { %v4815_v19 = vpop.f32.mrb[103].mxu1 }
 0x559   :  { %v22167_v20 = vpack.c.bf16 %v20675_v0, %v4815_v19 }
 0x55b   :  { %v20678_v31 = vpop.f32.mrb[104].mxu1  ;;  %20722 = vmatmul.mubr.msk.f32.vlgmr.msra.gmra.mrb[94].mxu0 %vm551_vm1, %v4709_v8 }
 0x55c   :  { %v4825_v46 = vpop.f32.mrb[105].mxu1  ;;  %22166 = vmatpush3.bf16.xpose.msk.msra.mxu0 %vm23529_vm2, %v22161_v22  ;;  %20728 = vmatprep.mubr.msk.f32.mxu0 %vm551_vm1, %v4710_v59 }
 0x55d   :  { %v22173_v38 = vpack.c.bf16 %v20678_v31, %v4825_v46  ;;  %22169 = vmatprep.subr.msk.bf16.mxu0 %vm23529_vm2, %v22167_v20 }
 0x55f   :  { %22175 = vmatprep.subr.msk.bf16.mxu1 %vm23529_vm2, %v22173_v38  ;;  %v20681_v26 = vpop.f32.mrb[106].mxu1 }
 0x560   :  { %22178 = vmatpush3.bf16.xpose.msk.msra.mxu1 %vm23529_vm2, %v22173_v38  ;;  %v4835_v43 = vpop.f32.mrb[107].mxu1 }
 0x561   :  { %v22179_v54 = vpack.c.bf16 %v20681_v26, %v4835_v43 }
 0x563   :  { %v20684_v63 = vpop.f32.mrb[108].mxu1  ;;  %20729 = vmatmul.mubr.msk.f32.vlgmr.msra.gmra.mrb[96].mxu0 %vm551_vm1, %v4711_v53 }
 0x564   :  { %v4845_v41 = vpop.f32.mrb[109].mxu1  ;;  %22172 = vmatpush3.bf16.xpose.msk.msra.mxu0 %vm23529_vm2, %v22167_v20  ;;  %20735 = vmatprep.mubr.msk.f32.mxu0 %vm551_vm1, %v4712_v48 }
 0x565   :  { %v22185_v33 = vpack.c.bf16 %v20684_v63, %v4845_v41  ;;  %22181 = vmatprep.subr.msk.bf16.mxu0 %vm23529_vm2, %v22179_v54 }
 0x567   :  { %20743 = vmatmul.mubr.msk.f32.vlgmr.msra.gmra.mrb[130].mxu1 %vm551_vm1, %v4715_v42  ;;  %22187 = vmatprep.subr.msk.bf16.mxu1 %vm23529_vm2, %v22185_v33  ;;  %v20687_v47 = vpop.f32.mrb[110].mxu1 }
 0x568   :  { %22190 = vmatpush3.bf16.xpose.msk.msra.mxu1 %vm23529_vm2, %v22185_v33  ;;  %20756 = vmatprep.mubr.msk.f32.mxu1 %vm551_vm1, %v4718_v55  ;;  %v4855_v56 = vpop.f32.mrb[111].mxu1 }
 0x569   :  { %v22191_v3 = vpack.c.bf16 %v20687_v47, %v4855_v56 }
 0x56b   :  { %v20690_v6 = vpop.f32.mrb[112].mxu1  ;;  %20736 = vmatmul.mubr.msk.f32.vlgmr.msra.gmra.mrb[98].mxu0 %vm551_vm1, %v4713_v2 }
 0x56c   :  { %v4865_v45 = vpop.f32.mrb[113].mxu1  ;;  %22184 = vmatpush3.bf16.xpose.msk.msra.mxu0 %vm23529_vm2, %v22179_v54  ;;  %20749 = vmatprep.mubr.msk.f32.mxu0 %vm551_vm1, %v4716_v5 }
 0x56d   :  { %v22197_v27 = vpack.c.bf16 %v20690_v6, %v4865_v45  ;;  %22193 = vmatprep.subr.msk.bf16.mxu0 %vm23529_vm2, %v22191_v3 }
 0x56f   :  { %20757 = vmatmul.mubr.msk.f32.vlgmr.msra.gmra.mrb[132].mxu1 %vm551_vm1, %v4719_v25  ;;  %22199 = vmatprep.subr.msk.bf16.mxu1 %vm23529_vm2, %v22197_v27  ;;  %v20695_v4 = vpop.f32.mrb[114].mxu1 }
 0x570   :  { %22202 = vmatpush3.bf16.xpose.msk.msra.mxu1 %vm23529_vm2, %v22197_v27  ;;  %20770 = vmatprep.mubr.msk.f32.mxu1 %vm551_vm1, %v4722_v49  ;;  %v4945_v30 = vpop.f32.mrb[115].mxu1 }
 0x571   :  { %v22203_v57 = vpack.c.bf16 %v20695_v4, %v4945_v30 }
 0x573   :  { %20750 = vmatmul.mubr.msk.f32.vlgmr.msra.gmra.mrb[100].mxu0 %vm551_vm1, %v4717_v24  ;;  %v20698_v23 = vpop.f32.mrb[116].mxu1 }
 0x574   :  { %22196 = vmatpush3.bf16.xpose.msk.msra.mxu0 %vm23529_vm2, %v22191_v3  ;;  %20763 = vmatprep.mubr.msk.f32.mxu0 %vm551_vm1, %v4720_v50  ;;  %v4955_v28 = vpop.f32.mrb[117].mxu1 }
 0x575   :  { %22204 = vmatprep.subr.bf16.mxu0 %v22203_v57  ;;  %v24410_v39 = vpack.c.bf16 %v20698_v23, %v4955_v28 }
 0x577   :  { %20771 = vmatmul.mubr.msk.f32.vlgmr.msra.gmra.mrb[134].mxu1 %vm551_vm1, %v4723_v44  ;;  %v20701_v35 = vpop.f32.mrb[118].mxu1 }
 0x578   :  { %v4965_v61 = vpop.f32.mrb[119].mxu1 }
 0x579   :  { %v22211_v51 = vpack.c.bf16 %v20701_v35, %v4965_v61 }
 0x57b   :  { %20764 = vmatmul.mubr.msk.f32.vlgmr.msra.gmra.mrb[102].mxu0 %vm551_vm1, %v4721_v37  ;;  %v20704_v36 = vpop.f32.mrb[120].mxu1  ;;  %22212 = vmatprep.subr.bf16.mxu1 %v22211_v51 }
 0x57c   :  { %22206 = vmatpush3.bf16.msra.mxu0 %v22203_v57  ;;  %v4975_v62 = vpop.f32.mrb[121].mxu1  ;;  %22214 = vmatpush3.bf16.msra.mxu1 %v22211_v51 }
 0x57d   :  { %22208 = vmatprep.subr.bf16.mxu0 %v24410_v39  ;;  %v24415_v17 = vpack.c.bf16 %v20704_v36, %v4975_v62 }
 0x57f   :  { %v20707_v1 = vpop.f32.mrb[122].mxu1 }
 0x580   :  { %v4985_v34 = vpop.f32.mrb[123].mxu1 }
 0x581   :  { %v24417_v15 = vpack.c.bf16 %v20707_v1, %v4985_v34 }
 0x583   :  { %v20710_v7 = vpop.f32.mrb[124].mxu1  ;;  %22220 = vmatprep.subr.bf16.mxu1 %v24417_v15 }
 0x584   :  { %v4995_v10 = vpop.f32.mrb[125].mxu1 }
 0x585   :  { %v24420_v16 = vpack.c.bf16 %v20710_v7, %v4995_v10 }
 0x587   :  { %v20713_v12 = vpop.f32.mrb[126].mxu1 }
 0x588   :  { %v5005_v9 = vpop.f32.mrb[127].mxu1 }
 0x589   :  { %v24422_v14 = vpack.c.bf16 %v20713_v12, %v5005_v9 }
 0x58b   :  { %v20716_v13 = vpop.f32.mrb[128].mxu1 }
 0x58c   :  { %v5015_v11 = vpop.f32.mrb[129].mxu1 }
 0x58d   :  { %v24424_v60 = vpack.c.bf16 %v20716_v13, %v5015_v11 }
 0x62e   :  { %v20723_v58 = vpop.f32.mrb[94].mxu0 }
 0x62f   :  { %v5721_v52 = vsel %vm1248_vm3, %v20723_v58, -inf  ;;  %v5102_v21 = vpop.f32.mrb[95].mxu0 }
 0x630   :  { %v5720_v29 = vsel %vm1248_vm3, %v5102_v21, -inf }
 0x631   :  { %v5722_v32 = vmax.f32 %v5720_v29, %v5721_v52 }
 0x633   :  { %v5723_v18 = vrot.slane %v5722_v32, 4 }
 0x635   :  { %v5724_v22 = vmax.f32 %v5722_v32, %v5723_v18 }
 0x636   :  { %v20730_v0 = vpop.f32.mrb[96].mxu0 }
 0x637   :  { %v5725_v19 = vrot.slane %v5724_v22, 2  ;;  %v5730_v8 = vsel %vm1248_vm3, %v20730_v0, -inf  ;;  %v5189_v20 = vpop.f32.mrb[97].mxu0 }
 0x638   :  { %v5729_v59 = vsel %vm1248_vm3, %v5189_v20, -inf }
 0x639   :  { %v5726_v31 = vmax.f32 %v5724_v22, %v5725_v19  ;;  %v5731_v46 = vmax.f32 %v5729_v59, %v5730_v8 }
 0x63a   :  { %v20744_v38 = vpop.f32.mrb[130].mxu1 }
 0x63b   :  { %v5727_v26 = vrot.slane %v5726_v31, 1  ;;  %v5732_v43 = vrot.slane %v5731_v46, 4  ;;  %v5748_v53 = vsel %vm1248_vm3, %v20744_v38, -inf  ;;  %v5363_v54 = vpop.f32.mrb[131].mxu1 }
 0x63c   :  { %v5747_v48 = vsel %vm1248_vm3, %v5363_v54, -inf }
 0x63d   :  { %v5728_v63 = vmax.f32 %v5726_v31, %v5727_v26  ;;  %v5733_v41 = vmax.f32 %v5731_v46, %v5732_v43  ;;  %v5749_v42 = vmax.f32 %v5747_v48, %v5748_v53 }
 0x63e   :  { %v24432_v33 = vpop.f32.mrb[98].mxu0 }
 0x63f   :  { %v5792_v55 = vsub.f32 %v5102_v21, %v5728_v63  ;;  %v5793_v47 = vsub.f32 %v20723_v58, %v5728_v63  ;;  %v5734_v56 = vrot.slane %v5733_v41, 2  ;;  %v5750_v2 = vrot.slane %v5749_v42, 4  ;;  %v24434_v3 = vpop.f32.mrb[99].mxu0 }
 0x640   :  { %v5739_v5 = vsel %vm1248_vm3, %v24432_v33, -inf  ;;  %v5738_v6 = vsel %vm1248_vm3, %v24434_v3, -inf }
 0x641   :  { %v5808_v45 = vmul.f32 1.442695, %v5792_v55  ;;  %v5810_v25 = vmul.f32 1.442695, %v5793_v47  ;;  %v5735_v27 = vmax.f32 %v5733_v41, %v5734_v56  ;;  %v5751_v49 = vmax.f32 %v5749_v42, %v5750_v2 }
 0x642   :  { %v5740_v24 = vmax.f32 %v5738_v6, %v5739_v5  ;;  %v24440_v50 = vpop.f32.mrb[132].mxu1 }
 0x643   :  { %22917 = vpow2.f32 %v5808_v45  ;;  %v5736_v4 = vrot.slane %v5735_v27, 1  ;;  %v5752_v30 = vrot.slane %v5751_v49, 2  ;;  %v5766_v57 = vsel %vm1248_vm3, %v24440_v50, -inf  ;;  %v24444_v44 = vpop.f32.mrb[133].mxu1 }
 0x644   :  { %22919 = vpow2.f32 %v5810_v25  ;;  %v5741_v23 = vrot.slane %v5740_v24, 4  ;;  %v5765_v28 = vsel %vm1248_vm3, %v24444_v44, -inf }
 0x645   :  { %v5737_v37 = vmax.f32 %v5735_v27, %v5736_v4  ;;  %v5753_v35 = vmax.f32 %v5751_v49, %v5752_v30  ;;  %v5767_v61 = vmax.f32 %v5765_v28, %v5766_v57 }
 0x646   :  { %v5742_v51 = vmax.f32 %v5740_v24, %v5741_v23  ;;  %v24448_v36 = vpop.f32.mrb[100].mxu0 }
 0x647   :  { %v5794_v62 = vsub.f32 %v5189_v20, %v5737_v37  ;;  %v5795_v1 = vsub.f32 %v20730_v0, %v5737_v37  ;;  %v5754_v34 = vrot.slane %v5753_v35, 1  ;;  %v5768_v7 = vrot.slane %v5767_v61, 4  ;;  %v24450_v10 = vpop.f32.mrb[101].mxu0 }
 0x648   :  { %v5743_v12 = vrot.slane %v5742_v51, 2  ;;  %v5757_v9 = vsel %vm1248_vm3, %v24448_v36, -inf  ;;  %v5756_v13 = vsel %vm1248_vm3, %v24450_v10, -inf }
 0x649   :  { %v5812_v11 = vmul.f32 1.442695, %v5794_v62  ;;  %v5814_v58 = vmul.f32 1.442695, %v5795_v1  ;;  %v5755_v52 = vmax.f32 %v5753_v35, %v5754_v34  ;;  %v5769_v21 = vmax.f32 %v5767_v61, %v5768_v7 }
 0x64a   :  { %v5744_v29 = vmax.f32 %v5742_v51, %v5743_v12  ;;  %v5758_v32 = vmax.f32 %v5756_v13, %v5757_v9  ;;  %v24456_v18 = vpop.f32.mrb[134].mxu1 }
 0x64b   :  { %22921 = vpow2.f32 %v5812_v11  ;;  %v5798_v22 = vsub.f32 %v5363_v54, %v5755_v52  ;;  %v5799_v0 = vsub.f32 %v20744_v38, %v5755_v52  ;;  %v5770_v19 = vrot.slane %v5769_v21, 2  ;;  %v24458_v8 = vpop.f32.mrb[135].mxu1 }
 0x64c   :  { %22923 = vpow2.f32 %v5814_v58  ;;  %v5745_v20 = vrot.slane %v5744_v29, 1  ;;  %v5759_v59 = vrot.slane %v5758_v32, 4  ;;  %v5784_v31 = vsel %vm1248_vm3, %v24456_v18, -inf }
 0x64d   :  { %v24462_v46 = vpop.eup %22917  ;;  %v5820_v26 = vmul.f32 1.442695, %v5798_v22  ;;  %v5822_v43 = vmul.f32 1.442695, %v5799_v0  ;;  %v5771_v53 = vmax.f32 %v5769_v21, %v5770_v19  ;;  %v5783_v48 = vsel %vm1248_vm3, %v24458_v8, -inf }
 0x64e   :  { %v24466_v63 = vpop.eup %22919  ;;  %v5840_v38 = vsel %vm1248_vm3, %v24462_v46, 0.0  ;;  %v5746_v54 = vmax.f32 %v5744_v29, %v5745_v20  ;;  %v5760_v41 = vmax.f32 %v5758_v32, %v5759_v59  ;;  %v5785_v42 = vmax.f32 %v5783_v48, %v5784_v31  ;;  %v24470_v55 = vpop.f32.mrb[102].mxu0 }
 0x64f   :  { %v5841_v47 = vsel %vm1248_vm3, %v24466_v63, 0.0  ;;  %22925 = vpow2.f32 %v5820_v26  ;;  %v5772_v56 = vrot.slane %v5771_v53, 1  ;;  %v5775_v2 = vsel %vm1248_vm3, %v24470_v55, -inf  ;;  %v24476_v5 = vpop.f32.mrb[103].mxu0 }
 0x650   :  { %v5842_v6 = vadd.f32 %v5841_v47, %v5840_v38  ;;  %22927 = vpow2.f32 %v5822_v43  ;;  %v5796_v45 = vsub.f32 %v24434_v3, %v5746_v54  ;;  %v5797_v25 = vsub.f32 %v24432_v33, %v5746_v54 }
 0x651   :  { %v5773_v27 = vmax.f32 %v5771_v53, %v5772_v56  ;;  %v5761_v49 = vrot.slane %v5760_v41, 2  ;;  %v5786_v24 = vrot.slane %v5785_v42, 4  ;;  %v5774_v4 = vsel %vm1248_vm3, %v24476_v5, -inf }
 0x652   :  { %v5843_v30 = vrot.slane %v5842_v6, 4  ;;  %v5816_v57 = vmul.f32 1.442695, %v5796_v45  ;;  %v5818_v23 = vmul.f32 1.442695, %v5797_v25  ;;  %v5776_v28 = vmax.f32 %v5774_v4, %v5775_v2 }
 0x653   :  { %v5802_v37 = vsub.f32 %v24444_v44, %v5773_v27  ;;  %v5803_v35 = vsub.f32 %v24440_v50, %v5773_v27  ;;  %v5762_v61 = vmax.f32 %v5760_v41, %v5761_v49  ;;  %v5787_v51 = vmax.f32 %v5785_v42, %v5786_v24 }
 0x654   :  { %v5844_v62 = vadd.f32 %v5843_v30, %v5842_v6  ;;  %22929 = vpow2.f32 %v5816_v57  ;;  %v5777_v3 = vrot.slane %v5776_v28, 4 }
 0x655   :  { %v24484_v33 = vpop.eup %22921  ;;  %22931 = vpow2.f32 %v5818_v23  ;;  %v5828_v1 = vmul.f32 1.442695, %v5802_v37  ;;  %v5830_v34 = vmul.f32 1.442695, %v5803_v35  ;;  %v5763_v7 = vrot.slane %v5762_v61, 1 }
 0x656   :  { %v24486_v12 = vpop.eup %22923  ;;  %v5845_v9 = vrot.slane %v5844_v62, 2  ;;  %v5849_v13 = vsel %vm1248_vm3, %v24484_v33, 0.0  ;;  %v5788_v44 = vrot.slane %v5787_v51, 2  ;;  %v5778_v11 = vmax.f32 %v5776_v28, %v5777_v3 }
 0x657   :  { %v5850_v50 = vsel %vm1248_vm3, %v24486_v12, 0.0  ;;  %22933 = vpow2.f32 %v5828_v1  ;;  %v5764_v58 = vmax.f32 %v5762_v61, %v5763_v7 }
 0x658   :  { %v5846_v52 = vadd.f32 %v5845_v9, %v5844_v62  ;;  %v5851_v21 = vadd.f32 %v5850_v50, %v5849_v13  ;;  %22935 = vpow2.f32 %v5830_v34  ;;  %v5789_v29 = vmax.f32 %v5787_v51, %v5788_v44 }
 0x659   :  { %v24492_v32 = vpop.eup %22925  ;;  %v5800_v22 = vsub.f32 %v24450_v10, %v5764_v58  ;;  %v5801_v0 = vsub.f32 %v24448_v36, %v5764_v58  ;;  %v5779_v19 = vrot.slane %v5778_v11, 2 }
 0x65a   :  { %v24496_v20 = vpop.eup %22927  ;;  %v5847_v59 = vrot.slane %v5846_v52, 1  ;;  %v5852_v31 = vrot.slane %v5851_v21, 4  ;;  %v5867_v26 = vsel %vm1248_vm3, %v24492_v32, 0.0  ;;  %v5790_v43 = vrot.slane %v5789_v29, 1 }
 0x65b   :  { %v5868_v53 = vsel %vm1248_vm3, %v24496_v20, 0.0  ;;  %v5824_v48 = vmul.f32 1.442695, %v5800_v22  ;;  %v5826_v38 = vmul.f32 1.442695, %v5801_v0  ;;  %v5780_v54 = vmax.f32 %v5778_v11, %v5779_v19 }
 0x65c   :  { %v5853_v41 = vadd.f32 %v5852_v31, %v5851_v21  ;;  %v5869_v42 = vadd.f32 %v5868_v53, %v5867_v26  ;;  %v5791_v10 = vmax.f32 %v5789_v29, %v5790_v43  ;;  %v5848_v47 = vadd.f32 %v5847_v59, %v5846_v52 }
 0x65d   :  { %22937 = vpow2.f32 %v5824_v48  ;;  %v5781_v36 = vrot.slane %v5780_v54, 1 }
 0x65e   :  { %v24502_v56 = vpop.eup %22929  ;;  %v5854_v2 = vrot.slane %v5853_v41, 2  ;;  %v5870_v6 = vrot.slane %v5869_v42, 4  ;;  %22939 = vpow2.f32 %v5826_v38  ;;  %v5806_v45 = vsub.f32 %v24458_v8, %v5791_v10 }
 0x65f   :  { %v24505_v25 = vpop.eup %22931  ;;  %v5858_v27 = vsel %vm1248_vm3, %v24502_v56, 0.0  ;;  %v5807_v49 = vsub.f32 %v24456_v18, %v5791_v10  ;;  %v5782_v24 = vmax.f32 %v5780_v54, %v5781_v36  ;;  %22941 = vrcp.f32 %v5848_v47 }
 0x660   :  { %v5855_v4 = vadd.f32 %v5854_v2, %v5853_v41  ;;  %v5871_v30 = vadd.f32 %v5870_v6, %v5869_v42  ;;  %v5859_v57 = vsel %vm1248_vm3, %v24505_v25, 0.0  ;;  %v5836_v23 = vmul.f32 1.442695, %v5806_v45 }
 0x661   :  { %v24512_v28 = vpop.eup %22933  ;;  %v5860_v37 = vadd.f32 %v5859_v57, %v5858_v27  ;;  %v5838_v35 = vmul.f32 1.442695, %v5807_v49  ;;  %v5804_v8 = vsub.f32 %v24476_v5, %v5782_v24  ;;  %v5805_v61 = vsub.f32 %v24470_v55, %v5782_v24 }
 0x662   :  { %v24516_v51 = vpop.eup %22935  ;;  %v5856_v62 = vrot.slane %v5855_v4, 1  ;;  %v5872_v18 = vrot.slane %v5871_v30, 2  ;;  %v5885_v3 = vsel %vm1248_vm3, %v24512_v28, 0.0  ;;  %22943 = vpow2.f32 %v5836_v23 }
 0x663   :  { %v5861_v1 = vrot.slane %v5860_v37, 4  ;;  %v5886_v34 = vsel %vm1248_vm3, %v24516_v51, 0.0  ;;  %22945 = vpow2.f32 %v5838_v35  ;;  %v5832_v7 = vmul.f32 1.442695, %v5804_v8 }
 0x664   :  { %v5887_v9 = vadd.f32 %v5886_v34, %v5885_v3  ;;  %v5834_v13 = vmul.f32 1.442695, %v5805_v61  ;;  %v5857_v44 = vadd.f32 %v5856_v62, %v5855_v4  ;;  %v5873_v5 = vadd.f32 %v5872_v18, %v5871_v30 }
 0x665   :  { %v5862_v11 = vadd.f32 %v5861_v1, %v5860_v37  ;;  %22947 = vpow2.f32 %v5832_v7 }
 0x666   :  { %v5888_v55 = vrot.slane %v5887_v9, 4  ;;  %22949 = vpow2.f32 %v5834_v13  ;;  %v5874_v50 = vrot.slane %v5873_v5, 1 }
 0x667   :  { %v24522_v58 = vpop.eup %22937  ;;  %v5863_v52 = vrot.slane %v5862_v11, 2  ;;  %22951 = vrcp.f32 %v5857_v44 }
 0x668   :  { %v24524_v21 = vpop.eup %22939  ;;  %v5889_v29 = vadd.f32 %v5888_v55, %v5887_v9  ;;  %v5876_v22 = vsel %vm1248_vm3, %v24522_v58, 0.0  ;;  %v5875_v0 = vadd.f32 %v5874_v50, %v5873_v5  ;;  %v18460_v50 = vld [vmem:[%s26975_s4 + $0x40] sm:$0xff] }
 0x669   :  { %v22942_v19 = vpop.eup %22941  ;;  %v5864_v59 = vadd.f32 %v5863_v52, %v5862_v11  ;;  %v5877_v31 = vsel %vm1248_vm3, %v24524_v21, 0.0  ;;  %v18461_v52 = vld [vmem:[%s26975_s4 + $0x48] sm:$0xff] }
 0x66a   :  { %v5890_v26 = vrot.slane %v5889_v29, 2  ;;  %v5878_v43 = vadd.f32 %v5877_v31, %v5876_v22  ;;  %v5920_v53 = vmul.f32 %v22942_v19, %v24462_v46  ;;  %v5921_v48 = vmul.f32 %v22942_v19, %v24466_v63 }
 0x66b   :  { %v5865_v38 = vrot.slane %v5864_v59, 1  ;;  %22953 = vrcp.f32 %v5875_v0  ;;  %v22235_v22 = vpack.c.bf16 %v18461_v52, %v18460_v50 }
 0x66c   :  { %v24532_v54 = vpop.eup %22943  ;;  %v5891_v41 = vadd.f32 %v5890_v26, %v5889_v29  ;;  %v5879_v42 = vrot.slane %v5878_v43, 4  ;;  %20777 = vmatprep.mubr.msk.f32.mxu0 %vm1248_vm3, %v5920_v53 }
 0x66d   :  { %v24535_v10 = vpop.eup %22945  ;;  %v5903_v47 = vsel %vm1248_vm3, %v24532_v54, 0.0  ;;  %20778 = vmatmul.mubr.msk.f32.vlgmr.msra.gmra.mrb[104].mxu0 %vm1248_vm3, %v5921_v48  ;;  %v5866_v36 = vadd.f32 %v5865_v38, %v5864_v59  ;;  %v24616_v48 = vld [vmem:[%s26972_s0] sm:$0xff]  ;;  %v24625_v38 = vld [vmem:[%s26972_s0 + $0x8] sm:$0xff] }
 0x66e   :  { %v5892_v2 = vrot.slane %v5891_v41, 1  ;;  %v5880_v46 = vadd.f32 %v5879_v42, %v5878_v43  ;;  %v5904_v63 = vsel %vm1248_vm3, %v24535_v10, 0.0  ;;  %22210 = vmatpush3.bf16.msra.mxu0 %v24410_v39  ;;  %v24649_v42 = vld [vmem:[%s26972_s0 + $0x20] sm:$0xff] }
 0x66f   :  { %v24543_v6 = vpop.eup %22947  ;;  %v5905_v45 = vadd.f32 %v5904_v63, %v5903_v47  ;;  %22216 = vmatprep.subr.bf16.mxu0 %v24415_v17  ;;  %22955 = vrcp.f32 %v5866_v36  ;;  %v24663_v47 = vld [vmem:[%s26972_s0 + $0x30] sm:$0xff]  ;;  %v24670_v36 = vld [vmem:[%s26972_s0 + $0x38] sm:$0xff] }
 0x670   :  { %v24546_v27 = vpop.eup %22949  ;;  %v5881_v49 = vrot.slane %v5880_v46, 2  ;;  %v5894_v24 = vsel %vm1248_vm3, %v24543_v6, 0.0  ;;  %v5893_v4 = vadd.f32 %v5892_v2, %v5891_v41  ;;  %v24642_v41 = vld [vmem:[%s26972_s0 + $0x18] sm:$0xff]  ;;  %v24677_v2 = vld [vmem:[%s26972_s0 + $0x40] sm:$0xff]  ;;  %v24691_v63 = vld [vmem:[%s26972_s0 + $0x50] sm:$0xff] }
 0x671   :  { %v22952_v30 = vpop.eup %22951  ;;  %v5906_v57 = vrot.slane %v5905_v45, 4  ;;  %v5895_v23 = vsel %vm1248_vm3, %v24546_v27, 0.0 }
 0x672   :  { %v5882_v37 = vadd.f32 %v5881_v49, %v5880_v46  ;;  %v5896_v39 = vadd.f32 %v5895_v23, %v5894_v24  ;;  %v5922_v35 = vmul.f32 %v22952_v30, %v24484_v33  ;;  %v5923_v8 = vmul.f32 %v22952_v30, %v24486_v12  ;;  %v24684_v46 = vld [vmem:[%s26972_s0 + $0x48] sm:$0xff]  ;;  %v24719_v49 = vld [vmem:[%s26972_s0 + $0x70] sm:$0xff]  ;;  %v24726_v24 = vld [vmem:[%s26972_s0 + $0x78] sm:$0xff] }
 0x673   :  { %v5907_v61 = vadd.f32 %v5906_v57, %v5905_v45  ;;  %22957 = vrcp.f32 %v5893_v4  ;;  %v24705_v45 = vld [vmem:[%s26972_s0 + $0x60] sm:$0xff]  ;;  %v18520_v4 = vld [vmem:[%s26974_s3 + $0xc] sm:$0xf] }
 0x674   :  { %v5883_v62 = vrot.slane %v5882_v37, 1  ;;  %v5897_v18 = vrot.slane %v5896_v39, 4  ;;  %20784 = vmatprep.mubr.msk.f32.mxu0 %vm1248_vm3, %v5922_v35 }
 0x675   :  { %v22954_v3 = vpop.eup %22953  ;;  %v5908_v1 = vrot.slane %v5907_v61, 2  ;;  %20785 = vmatmul.mubr.msk.f32.vlgmr.msra.gmra.mrb[106].mxu0 %vm1248_vm3, %v5923_v8 }
 0x676   :  { %v5898_v34 = vadd.f32 %v5897_v18, %v5896_v39  ;;  %22218 = vmatpush3.bf16.msra.mxu0 %v24415_v17  ;;  %v5926_v7 = vmul.f32 %v22954_v3, %v24492_v32  ;;  %v5927_v9 = vmul.f32 %v22954_v3, %v24496_v20  ;;  %v5884_v33 = vadd.f32 %v5883_v62, %v5882_v37 }
 0x677   :  { %v5909_v13 = vadd.f32 %v5908_v1, %v5907_v61  ;;  %22224 = vmatprep.subr.bf16.mxu0 %v24420_v16 }
 0x678   :  { %v5899_v12 = vrot.slane %v5898_v34, 2  ;;  %20798 = vmatprep.mubr.msk.f32.mxu0 %vm1248_vm3, %v5926_v7  ;;  %22959 = vrcp.f32 %v5884_v33 }
 0x679   :  { %v22956_v44 = vpop.eup %22955  ;;  %v5910_v5 = vrot.slane %v5909_v13, 1  ;;  %20799 = vmatmul.mubr.msk.f32.vlgmr.msra.gmra.mrb[108].mxu0 %vm1248_vm3, %v5927_v9 }
 0x67a   :  { %v5900_v11 = vadd.f32 %v5899_v12, %v5898_v34  ;;  %22226 = vmatpush3.bf16.msra.mxu0 %v24420_v16  ;;  %v5924_v17 = vmul.f32 %v22956_v44, %v24502_v56  ;;  %v5925_v32 = vmul.f32 %v22956_v44, %v24505_v25 }
 0x67b   :  { %22232 = vmatprep.subr.bf16.mxu0 %v24424_v60  ;;  %v5911_v20 = vadd.f32 %v5910_v5, %v5909_v13 }
 0x67c   :  { %v5901_v55 = vrot.slane %v5900_v11, 1  ;;  %20791 = vmatprep.mubr.msk.f32.mxu1 %vm1248_vm3, %v5924_v17 }
 0x67d   :  { %v22958_v29 = vpop.eup %22957  ;;  %20792 = vmatmul.mubr.msk.f32.vlgmr.msra.gmra.mrb[136].mxu1 %vm1248_vm3, %v5925_v32  ;;  %22961 = vrcp.f32 %v5911_v20 }
 0x67e   :  { %22222 = vmatpush3.bf16.msra.mxu1 %v24417_v15  ;;  %v5930_v16 = vmul.f32 %v22958_v29, %v24512_v28  ;;  %v5931_v56 = vmul.f32 %v22958_v29, %v24516_v51  ;;  %v5902_v25 = vadd.f32 %v5901_v55, %v5900_v11  ;;  %v18484_v28 = vld [vmem:[%s26971_s1 + $0xc] sm:$0xf]  ;;  %v18462_v51 = vld [vmem:[%s26975_s4 + $0x50] sm:$0xff] }
 0x67f   :  { %22228 = vmatprep.subr.bf16.mxu1 %v24422_v14 }
 0x680   :  { %20812 = vmatprep.mubr.msk.f32.mxu0 %vm1248_vm3, %v5930_v16  ;;  %22963 = vrcp.f32 %v5902_v25 }
 0x681   :  { %20813 = vmatmul.mubr.msk.f32.vlgmr.msra.gmra.mrb[110].mxu0 %vm1248_vm3, %v5931_v56 }
 0x682   :  { %v22960_v0 = vpop.eup %22959  ;;  %22234 = vmatpush3.bf16.msra.mxu0 %v24424_v60  ;;  %v18463_v60 = vld [vmem:[%s26975_s4 + $0x58] sm:$0xff] }
 0x683   :  { %v5928_v19 = vmul.f32 %v22960_v0, %v24522_v58  ;;  %v5929_v15 = vmul.f32 %v22960_v0, %v24524_v21  ;;  %22237 = vmatprep.subr.msk.bf16.mxu0 %vm23529_vm2, %v22235_v22  ;;  %v22241_v31 = vpack.c.bf16 %v18463_v60, %v18462_v51 }
 0x685   :  { %20805 = vmatprep.mubr.msk.f32.mxu1 %vm1248_vm3, %v5928_v19 }
 0x686   :  { %20806 = vmatmul.mubr.msk.f32.vlgmr.msra.gmra.mrb[138].mxu1 %vm1248_vm3, %v5929_v15 }
 0x687   :  { %v22962_v58 = vpop.eup %22961  ;;  %22230 = vmatpush3.bf16.msra.mxu1 %v24422_v14  ;;  %v18502_v14 = vld [vmem:[%s26973_s2 + $0xc] sm:$0xf] }
 0x688   :  { %v5934_v21 = vmul.f32 %v22962_v58, %v24532_v54  ;;  %v5935_v59 = vmul.f32 %v22962_v58, %v24535_v10  ;;  %20861 = vmatprep.subr.msk.mxu1 %vm40_vm0, %v18484_v28  ;;  %v24632_v54 = vld [vmem:[%s26972_s0 + $0x10] sm:$0xff]  ;;  %v24656_v10 = vld [vmem:[%s26972_s0 + $0x28] sm:$0xff] }
 0x68a   :  { %v22964_v26 = vpop.eup %22963  ;;  %20826 = vmatprep.mubr.msk.f32.mxu0 %vm1248_vm3, %v5934_v21 }
 0x68b   :  { %20827 = vmatmul.mubr.msk.f32.vlgmr.msra.gmra.mrb[112].mxu0 %vm1248_vm3, %v5935_v59  ;;  %v5932_v43 = vmul.f32 %v22964_v26, %v24543_v6  ;;  %v5933_v53 = vmul.f32 %v22964_v26, %v24546_v27  ;;  %v24698_v6 = vld [vmem:[%s26972_s0 + $0x58] sm:$0xff]  ;;  %v24712_v27 = vld [vmem:[%s26972_s0 + $0x68] sm:$0xff] }
 0x68c   :  { %22240 = vmatpush3.bf16.xpose.msk.msra.mxu0 %vm23529_vm2, %v22235_v22 }
 0x68d   :  { %20819 = vmatprep.mubr.msk.f32.mxu1 %vm1248_vm3, %v5932_v43  ;;  %22243 = vmatprep.subr.msk.bf16.mxu0 %vm23529_vm2, %v22241_v31 }
 0x68e   :  { %20820 = vmatmul.mubr.msk.f32.vlgmr.msra.gmra.mrb[140].mxu1 %vm1248_vm3, %v5933_v53 }
 0x68f   :  { %20863 = vmatprep.mubr.msk.f32.mxu1 %vm40_vm0, %v24616_v48 }
 0x690   :  { %20862 = vmatpush3.xpose.msk.msra.mxu1 %vm40_vm0, %v18484_v28 }
 0x691   :  { %20887 = vmatprep.subr.msk.mxu1 %vm40_vm0, %v18502_v14 }
 0x693   :  { %20864 = vmatmul.mubr.msk.f32.vlgmr.msra.gmra.mrb[142].mxu1 %vm40_vm0, %v24625_v38 }
 0x694   :  { %20866 = vmatprep.mubr.msk.f32.mxu1 %vm40_vm0, %v24632_v54  ;;  %20888 = vmatpush3.xpose.msk.msra.mxu1 %vm40_vm0, %v18502_v14 }
 0x695   :  { %22246 = vmatpush3.bf16.xpose.msk.msra.mxu0 %vm23529_vm2, %v22241_v31 }
 0x696   :  { %20913 = vmatprep.subr.msk.mxu0 %vm40_vm0, %v18520_v4 }
 0x697   :  { %20867 = vmatmul.mubr.msk.f32.gmra.mrb[144].mxu1 %vm40_vm0, %v24642_v41 }
 0x698   :  { %20869 = vmatprep.mubr.msk.f32.mxu1 %vm40_vm0, %v24649_v42 }
 0x69b   :  { %20870 = vmatmul.mubr.msk.f32.gmra.mrb[146].mxu1 %vm40_vm0, %v24656_v10 }
 0x69c   :  { %20872 = vmatprep.mubr.msk.f32.mxu1 %vm40_vm0, %v24663_v47 }
 0x69f   :  { %20873 = vmatmul.mubr.msk.f32.gmra.mrb[148].mxu1 %vm40_vm0, %v24670_v36 }
 0x6a0   :  { %20875 = vmatprep.mubr.msk.f32.mxu1 %vm40_vm0, %v24677_v2 }
 0x6a3   :  { %20876 = vmatmul.mubr.msk.f32.gmra.mrb[150].mxu1 %vm40_vm0, %v24684_v46 }
 0x6a4   :  { %20878 = vmatprep.mubr.msk.f32.mxu1 %vm40_vm0, %v24691_v63 }
 0x6a7   :  { %20879 = vmatmul.mubr.msk.f32.gmra.mrb[152].mxu1 %vm40_vm0, %v24698_v6 }
 0x6a8   :  { %20881 = vmatprep.mubr.msk.f32.mxu1 %vm40_vm0, %v24705_v45 }
 0x6ab   :  { %20882 = vmatmul.mubr.msk.f32.gmra.mrb[154].mxu1 %vm40_vm0, %v24712_v27 }
 0x6ac   :  { %20884 = vmatprep.mubr.msk.f32.mxu1 %vm40_vm0, %v24719_v49 }
 0x6af   :  { %20885 = vmatmul.mubr.msk.f32.gmra.mrb[156].mxu1 %vm40_vm0, %v24726_v24 }
 0x6b0   :  { %20889 = vmatprep.mubr.msk.f32.mxu1 %vm40_vm0, %v24616_v48 }
 0x6b3   :  { %20890 = vmatmul.mubr.msk.f32.vlgmr.msra.gmra.mrb[158].mxu1 %vm40_vm0, %v24625_v38 }
 0x6b4   :  { %20892 = vmatprep.mubr.msk.f32.mxu1 %vm40_vm0, %v24632_v54 }
 0x6b7   :  { %20893 = vmatmul.mubr.msk.f32.gmra.mrb[160].mxu1 %vm40_vm0, %v24642_v41 }
 0x6b8   :  { %20895 = vmatprep.mubr.msk.f32.mxu1 %vm40_vm0, %v24649_v42 }
 0x6bb   :  { %20896 = vmatmul.mubr.msk.f32.gmra.mrb[162].mxu1 %vm40_vm0, %v24656_v10 }
 0x6bc   :  { %20898 = vmatprep.mubr.msk.f32.mxu1 %vm40_vm0, %v24663_v47 }
 0x6bf   :  { %20899 = vmatmul.mubr.msk.f32.gmra.mrb[164].mxu1 %vm40_vm0, %v24670_v36 }
 0x6c0   :  { %20901 = vmatprep.mubr.msk.f32.mxu1 %vm40_vm0, %v24677_v2 }
 0x6c3   :  { %20902 = vmatmul.mubr.msk.f32.gmra.mrb[166].mxu1 %vm40_vm0, %v24684_v46 }
 0x6c4   :  { %20904 = vmatprep.mubr.msk.f32.mxu1 %vm40_vm0, %v24691_v63 }
 0x6c7   :  { %20905 = vmatmul.mubr.msk.f32.gmra.mrb[168].mxu1 %vm40_vm0, %v24698_v6 }
 0x6c8   :  { %20907 = vmatprep.mubr.msk.f32.mxu1 %vm40_vm0, %v24705_v45 }
 0x6cb   :  { %20908 = vmatmul.mubr.msk.f32.gmra.mrb[170].mxu1 %vm40_vm0, %v24712_v27 }
 0x6cc   :  { %20910 = vmatprep.mubr.msk.f32.mxu1 %vm40_vm0, %v24719_v49 }
 0x6cf   :  { %20911 = vmatmul.mubr.msk.f32.gmra.mrb[172].mxu1 %vm40_vm0, %v24726_v24 }
 0x740   :  { %v20779_v30 = vpop.f32.mrb[104].mxu0 }
 0x741   :  { %v6008_v57 = vpop.f32.mrb[105].mxu0 }
 0x742   :  { %20837 = vmatprep.mubr.msk.f32.mxu0 %vm551_vm1, %v6008_v57 }
 0x743   :  { %20838 = vmatmul.mubr.msk.f32.vlgmr.msra.gmra.mrb[78].mxu0 %vm551_vm1, %v20779_v30 }
 0x744   :  { %20914 = vmatpush3.xpose.msk.msra.mxu0 %vm40_vm0, %v18520_v4 }
 0x748   :  { %v20786_v23 = vpop.f32.mrb[106].mxu0 }
 0x749   :  { %v6089_v37 = vpop.f32.mrb[107].mxu0 }
 0x74a   :  { %20840 = vmatprep.mubr.msk.f32.mxu0 %vm551_vm1, %v6089_v37 }
 0x74b   :  { %20841 = vmatmul.mubr.msk.f32.gmra.mrb[80].mxu0 %vm551_vm1, %v20786_v23 }
 0x74c   :  { %v20800_v39 = vpop.f32.mrb[108].mxu0 }
 0x74d   :  { %v6251_v35 = vpop.f32.mrb[109].mxu0 }
 0x750   :  { %v20793_v8 = vpop.f32.mrb[136].mxu1 }
 0x751   :  { %v6170_v61 = vpop.f32.mrb[137].mxu1 }
 0x752   :  { %20843 = vmatprep.mubr.msk.f32.mxu0 %vm551_vm1, %v6170_v61 }
 0x753   :  { %20844 = vmatmul.mubr.msk.f32.gmra.mrb[82].mxu0 %vm551_vm1, %v20793_v8 }
 0x754   :  { %v20814_v62 = vpop.f32.mrb[110].mxu0  ;;  %20846 = vmatprep.mubr.msk.f32.mxu0 %vm551_vm1, %v6251_v35 }
 0x755   :  { %v6413_v18 = vpop.f32.mrb[111].mxu0 }
 0x757   :  { %20847 = vmatmul.mubr.msk.f32.gmra.mrb[84].mxu0 %vm551_vm1, %v20800_v39 }
 0x759   :  { %v20807_v3 = vpop.f32.mrb[138].mxu1 }
 0x75a   :  { %v6332_v1 = vpop.f32.mrb[139].mxu1 }
 0x75b   :  { %20849 = vmatprep.mubr.msk.f32.mxu0 %vm551_vm1, %v6332_v1 }
 0x75c   :  { %20850 = vmatmul.mubr.msk.f32.gmra.mrb[86].mxu0 %vm551_vm1, %v20807_v3 }
 0x75d   :  { %20852 = vmatprep.mubr.msk.f32.mxu0 %vm551_vm1, %v6413_v18 }
 0x75e   :  { %v20828_v34 = vpop.f32.mrb[112].mxu0 }
 0x75f   :  { %v6575_v7 = vpop.f32.mrb[113].mxu0 }
 0x760   :  { %20853 = vmatmul.mubr.msk.f32.gmra.mrb[88].mxu0 %vm551_vm1, %v20814_v62 }
 0x761   :  { %v20821_v9 = vpop.f32.mrb[140].mxu1 }
 0x762   :  { %v6494_v33 = vpop.f32.mrb[141].mxu1 }
 0x763   :  { %20855 = vmatprep.mubr.msk.f32.mxu0 %vm551_vm1, %v6494_v33 }
 0x764   :  { %20856 = vmatmul.mubr.msk.f32.gmra.mrb[90].mxu0 %vm551_vm1, %v20821_v9 }
 0x765   :  { %20858 = vmatprep.mubr.msk.f32.mxu0 %vm551_vm1, %v6575_v7 }
 0x766   :  { %v20865_v13 = vpop.f32.mrb[142].mxu1 }
 0x767   :  { %v6881_v12 = vpop.f32.mrb[143].mxu1  ;;  %v6961_v26 = vmul.f32 0.5, %v20865_v13 }
 0x768   :  { %v6960_v44 = vmul.f32 0.5, %v6881_v12  ;;  %20859 = vmatmul.mubr.msk.f32.gmra.mrb[92].mxu0 %vm551_vm1, %v20828_v34 }
 0x769   :  { %20915 = vmatprep.mubr.msk.f32.mxu0 %vm40_vm0, %v24616_v48 }
 0x76a   :  { %v20868_v5 = vpop.f32.mrb[144].mxu1  ;;  %20943 = vmatprep.mubr.msk.f32.mxu1 %vm551_vm1, %v6960_v44 }
 0x76b   :  { %v6891_v11 = vpop.f32.mrb[145].mxu1  ;;  %v6963_v37 = vmul.f32 0.5, %v20868_v5 }
 0x76c   :  { %20916 = vmatmul.mubr.msk.f32.vlgmr.msra.gmra.mrb[114].mxu0 %vm40_vm0, %v24625_v38  ;;  %v6962_v53 = vmul.f32 0.5, %v6891_v11 }
 0x76d   :  { %20918 = vmatprep.mubr.msk.f32.mxu0 %vm40_vm0, %v24632_v54 }
 0x76e   :  { %v20871_v17 = vpop.f32.mrb[146].mxu1 }
 0x76f   :  { %v6901_v32 = vpop.f32.mrb[147].mxu1  ;;  %v6965_v35 = vmul.f32 0.5, %v20871_v17 }
 0x770   :  { %20919 = vmatmul.mubr.msk.f32.gmra.mrb[116].mxu0 %vm40_vm0, %v24642_v41  ;;  %v6964_v15 = vmul.f32 0.5, %v6901_v32 }
 0x771   :  { %20921 = vmatprep.mubr.msk.f32.mxu0 %vm40_vm0, %v24649_v42 }
 0x772   :  { %v24794_v20 = vpop.f32.mrb[148].mxu1 }
 0x773   :  { %v6911_v55 = vpop.f32.mrb[149].mxu1  ;;  %v6967_v7 = vmul.f32 0.5, %v24794_v20 }
 0x774   :  { %20922 = vmatmul.mubr.msk.f32.gmra.mrb[118].mxu0 %vm40_vm0, %v24656_v10  ;;  %v6966_v8 = vmul.f32 0.5, %v6911_v55 }
 0x775   :  { %20924 = vmatprep.mubr.msk.f32.mxu0 %vm40_vm0, %v24663_v47 }
 0x776   :  { %v24800_v50 = vpop.f32.mrb[150].mxu1 }
 0x777   :  { %v6921_v52 = vpop.f32.mrb[151].mxu1  ;;  %v6969_v33 = vmul.f32 0.5, %v24800_v50 }
 0x778   :  { %20925 = vmatmul.mubr.msk.f32.gmra.mrb[120].mxu0 %vm40_vm0, %v24670_v36  ;;  %v6968_v62 = vmul.f32 0.5, %v6921_v52 }
 0x779   :  { %20927 = vmatprep.mubr.msk.f32.mxu0 %vm40_vm0, %v24677_v2 }
 0x77a   :  { %v24806_v29 = vpop.f32.mrb[152].mxu1 }
 0x77b   :  { %v6931_v16 = vpop.f32.mrb[153].mxu1  ;;  %v6971_v17 = vmul.f32 0.5, %v24806_v29 }
 0x77c   :  { %20928 = vmatmul.mubr.msk.f32.gmra.mrb[122].mxu0 %vm40_vm0, %v24684_v46  ;;  %v6970_v13 = vmul.f32 0.5, %v6931_v16 }
 0x77d   :  { %20930 = vmatprep.mubr.msk.f32.mxu0 %vm40_vm0, %v24691_v63 }
 0x77e   :  { %v24812_v56 = vpop.f32.mrb[154].mxu1 }
 0x77f   :  { %v6941_v25 = vpop.f32.mrb[155].mxu1  ;;  %v6973_v32 = vmul.f32 0.5, %v24812_v56 }
 0x780   :  { %20931 = vmatmul.mubr.msk.f32.gmra.mrb[124].mxu0 %vm40_vm0, %v24698_v6  ;;  %v6972_v44 = vmul.f32 0.5, %v6941_v25 }
 0x781   :  { %20933 = vmatprep.mubr.msk.f32.mxu0 %vm40_vm0, %v24705_v45 }
 0x782   :  { %v24818_v22 = vpop.f32.mrb[156].mxu1 }
 0x783   :  { %v24820_v0 = vpop.f32.mrb[157].mxu1  ;;  %v6975_v55 = vmul.f32 0.5, %v24818_v22 }
 0x784   :  { %20934 = vmatmul.mubr.msk.f32.gmra.mrb[126].mxu0 %vm40_vm0, %v24712_v27  ;;  %v6974_v20 = vmul.f32 0.5, %v24820_v0 }
 0x785   :  { %20936 = vmatprep.mubr.msk.f32.mxu0 %vm40_vm0, %v24719_v49 }
 0x786   :  { %v20891_v19 = vpop.f32.mrb[158].mxu1 }
 0x787   :  { %v7047_v28 = vpop.f32.mrb[159].mxu1 }
 0x788   :  { %v22247_v51 = vpack.c.bf16 %v20891_v19, %v7047_v28  ;;  %20937 = vmatmul.mubr.msk.f32.gmra.mrb[128].mxu0 %vm40_vm0, %v24726_v24 }
 0x789   :  { %20957 = vmatprep.mubr.msk.f32.mxu0 %vm551_vm1, %v6964_v15 }
 0x78a   :  { %22249 = vmatprep.subr.msk.bf16.mxu1 %vm23529_vm2, %v22247_v51  ;;  %v20894_v60 = vpop.f32.mrb[160].mxu1 }
 0x78b   :  { %22252 = vmatpush3.bf16.xpose.msk.msra.mxu1 %vm23529_vm2, %v22247_v51  ;;  %v7057_v58 = vpop.f32.mrb[161].mxu1 }
 0x78c   :  { %v22253_v21 = vpack.c.bf16 %v20894_v60, %v7057_v58 }
 0x78e   :  { %v20897_v59 = vpop.f32.mrb[162].mxu1  ;;  %22255 = vmatprep.subr.msk.bf16.mxu1 %vm23529_vm2, %v22253_v21 }
 0x78f   :  { %v7067_v31 = vpop.f32.mrb[163].mxu1 }
 0x790   :  { %v22259_v43 = vpack.c.bf16 %v20897_v59, %v7067_v31 }
 0x792   :  { %20944 = vmatmul.mubr.msk.f32.vlgmr.msra.gmra.mrb[174].mxu1 %vm551_vm1, %v6961_v26  ;;  %22261 = vmatprep.subr.msk.bf16.mxu0 %vm23529_vm2, %v22259_v43  ;;  %v20900_v14 = vpop.f32.mrb[164].mxu1 }
 0x793   :  { %22258 = vmatpush3.bf16.xpose.msk.msra.mxu1 %vm23529_vm2, %v22253_v21  ;;  %20950 = vmatprep.mubr.msk.f32.mxu1 %vm551_vm1, %v6962_v53  ;;  %v7077_v4 = vpop.f32.mrb[165].mxu1 }
 0x794   :  { %22264 = vmatpush3.bf16.xpose.msk.msra.mxu0 %vm23529_vm2, %v22259_v43  ;;  %v22265_v30 = vpack.c.bf16 %v20900_v14, %v7077_v4 }
 0x796   :  { %v20903_v57 = vpop.f32.mrb[166].mxu1  ;;  %22267 = vmatprep.subr.msk.bf16.mxu1 %vm23529_vm2, %v22265_v30 }
 0x797   :  { %v7087_v23 = vpop.f32.mrb[167].mxu1 }
 0x798   :  { %v22271_v39 = vpack.c.bf16 %v20903_v57, %v7087_v23 }
 0x79a   :  { %20951 = vmatmul.mubr.msk.f32.vlgmr.msra.gmra.mrb[176].mxu1 %vm551_vm1, %v6963_v37  ;;  %22273 = vmatprep.subr.msk.bf16.mxu0 %vm23529_vm2, %v22271_v39  ;;  %v20906_v61 = vpop.f32.mrb[168].mxu1 }
 0x79b   :  { %20958 = vmatmul.mubr.msk.f32.vlgmr.msra.gmra.mrb[130].mxu0 %vm551_vm1, %v6965_v35  ;;  %22270 = vmatpush3.bf16.xpose.msk.msra.mxu1 %vm23529_vm2, %v22265_v30  ;;  %v7097_v18 = vpop.f32.mrb[169].mxu1 }
 0x79c   :  { %20964 = vmatprep.mubr.msk.f32.mxu1 %vm551_vm1, %v6966_v8  ;;  %22276 = vmatpush3.bf16.xpose.msk.msra.mxu0 %vm23529_vm2, %v22271_v39  ;;  %v22277_v3 = vpack.c.bf16 %v20906_v61, %v7097_v18 }
 0x79d   :  { %20971 = vmatprep.mubr.msk.f32.mxu0 %vm551_vm1, %v6968_v62 }
 0x79e   :  { %v20909_v1 = vpop.f32.mrb[170].mxu1  ;;  %22279 = vmatprep.subr.msk.bf16.mxu1 %vm23529_vm2, %v22277_v3 }
 0x79f   :  { %v7107_v34 = vpop.f32.mrb[171].mxu1 }
 0x7a0   :  { %v22283_v9 = vpack.c.bf16 %v20909_v1, %v7107_v34 }
 0x7a2   :  { %20965 = vmatmul.mubr.msk.f32.vlgmr.msra.gmra.mrb[178].mxu1 %vm551_vm1, %v6967_v7  ;;  %22285 = vmatprep.subr.msk.bf16.mxu0 %vm23529_vm2, %v22283_v9  ;;  %v20912_v12 = vpop.f32.mrb[172].mxu1 }
 0x7a3   :  { %20972 = vmatmul.mubr.msk.f32.vlgmr.msra.gmra.mrb[132].mxu0 %vm551_vm1, %v6969_v33  ;;  %22282 = vmatpush3.bf16.xpose.msk.msra.mxu1 %vm23529_vm2, %v22277_v3  ;;  %v7117_v5 = vpop.f32.mrb[173].mxu1 }
 0x7a4   :  { %20978 = vmatprep.mubr.msk.f32.mxu1 %vm551_vm1, %v6970_v13  ;;  %22288 = vmatpush3.bf16.xpose.msk.msra.mxu0 %vm23529_vm2, %v22283_v9  ;;  %v22289_v11 = vpack.c.bf16 %v20912_v12, %v7117_v5 }
 0x7a5   :  { %20985 = vmatprep.mubr.msk.f32.mxu0 %vm551_vm1, %v6972_v44 }
 0x7a6   :  { %22291 = vmatprep.subr.msk.bf16.mxu1 %vm23529_vm2, %v22289_v11 }
 0x7aa   :  { %20979 = vmatmul.mubr.msk.f32.vlgmr.msra.gmra.mrb[180].mxu1 %vm551_vm1, %v6971_v17 }
 0x7ab   :  { %20986 = vmatmul.mubr.msk.f32.vlgmr.msra.gmra.mrb[134].mxu0 %vm551_vm1, %v6973_v32  ;;  %22294 = vmatpush3.bf16.xpose.msk.msra.mxu1 %vm23529_vm2, %v22289_v11 }
 0x7ac   :  { %20992 = vmatprep.mubr.msk.f32.mxu1 %vm551_vm1, %v6974_v20 }
 0x7b2   :  { %20993 = vmatmul.mubr.msk.f32.vlgmr.msra.gmra.mrb[182].mxu1 %vm551_vm1, %v6975_v55 }
 0x83f   :  { %v20917_v50 = vpop.f32.mrb[114].mxu0 }
 0x840   :  { %v7197_v52 = vpop.f32.mrb[115].mxu0 }
 0x841   :  { %v22295_v29 = vpack.c.bf16 %v20917_v50, %v7197_v52 }
 0x843   :  { %v20920_v16 = vpop.f32.mrb[116].mxu0  ;;  %22296 = vmatprep.subr.bf16.mxu0 %v22295_v29 }
 0x844   :  { %v7207_v56 = vpop.f32.mrb[117].mxu0  ;;  %22298 = vmatpush3.bf16.msra.mxu0 %v22295_v29 }
 0x845   :  { %v22299_v25 = vpack.c.bf16 %v20920_v16, %v7207_v56 }
 0x847   :  { %v20923_v0 = vpop.f32.mrb[118].mxu0  ;;  %22300 = vmatprep.subr.bf16.mxu1 %v22299_v25 }
 0x848   :  { %v7217_v19 = vpop.f32.mrb[119].mxu0  ;;  %22302 = vmatpush3.bf16.msra.mxu1 %v22299_v25 }
 0x849   :  { %v24881_v15 = vpack.c.bf16 %v20923_v0, %v7217_v19 }
 0x84b   :  { %v20926_v28 = vpop.f32.mrb[120].mxu0  ;;  %22304 = vmatprep.subr.bf16.mxu0 %v24881_v15 }
 0x84c   :  { %v7227_v22 = vpop.f32.mrb[121].mxu0 }
 0x84d   :  { %v24884_v51 = vpack.c.bf16 %v20926_v28, %v7227_v22 }
 0x84f   :  { %v20929_v60 = vpop.f32.mrb[122].mxu0  ;;  %22308 = vmatprep.subr.bf16.mxu1 %v24884_v51 }
 0x850   :  { %v7237_v58 = vpop.f32.mrb[123].mxu0 }
 0x851   :  { %v24887_v21 = vpack.c.bf16 %v20929_v60, %v7237_v58 }
 0x853   :  { %v20932_v59 = vpop.f32.mrb[124].mxu0 }
 0x854   :  { %v7247_v31 = vpop.f32.mrb[125].mxu0 }
 0x855   :  { %v24889_v26 = vpack.c.bf16 %v20932_v59, %v7247_v31 }
 0x857   :  { %v20935_v43 = vpop.f32.mrb[126].mxu0 }
 0x858   :  { %v7257_v53 = vpop.f32.mrb[127].mxu0 }
 0x859   :  { %v24891_v14 = vpack.c.bf16 %v20935_v43, %v7257_v53 }
 0x85b   :  { %v20938_v4 = vpop.f32.mrb[128].mxu0 }
 0x85c   :  { %v7267_v30 = vpop.f32.mrb[129].mxu0 }
 0x85d   :  { %v24893_v57 = vpack.c.bf16 %v20938_v4, %v7267_v30 }
 0x865   :  { %v20945_v23 = vpop.f32.mrb[174].mxu1 }
 0x866   :  { %v7973_v37 = vsel %vm1248_vm3, %v20945_v23, -inf  ;;  %v7354_v39 = vpop.f32.mrb[175].mxu1 }
 0x867   :  { %v7972_v35 = vsel %vm1248_vm3, %v7354_v39, -inf }
 0x868   :  { %v7974_v8 = vmax.f32 %v7972_v35, %v7973_v37 }
 0x86a   :  { %v7975_v61 = vrot.slane %v7974_v8, 4 }
 0x86c   :  { %v7976_v62 = vmax.f32 %v7974_v8, %v7975_v61 }
 0x86d   :  { %v20952_v18 = vpop.f32.mrb[176].mxu1 }
 0x86e   :  { %v7977_v3 = vrot.slane %v7976_v62, 2  ;;  %v7982_v1 = vsel %vm1248_vm3, %v20952_v18, -inf  ;;  %v20959_v34 = vpop.f32.mrb[130].mxu0  ;;  %v7441_v7 = vpop.f32.mrb[177].mxu1 }
 0x86f   :  { %v7991_v9 = vsel %vm1248_vm3, %v20959_v34, -inf  ;;  %v7981_v33 = vsel %vm1248_vm3, %v7441_v7, -inf  ;;  %v7528_v13 = vpop.f32.mrb[131].mxu0 }
 0x870   :  { %v7978_v12 = vmax.f32 %v7976_v62, %v7977_v3  ;;  %v7983_v44 = vmax.f32 %v7981_v33, %v7982_v1  ;;  %v7990_v5 = vsel %vm1248_vm3, %v7528_v13, -inf }
 0x871   :  { %v7992_v11 = vmax.f32 %v7990_v5, %v7991_v9 }
 0x872   :  { %v7979_v17 = vrot.slane %v7978_v12, 1  ;;  %v7984_v32 = vrot.slane %v7983_v44, 4 }
 0x873   :  { %v7993_v20 = vrot.slane %v7992_v11, 4 }
 0x874   :  { %v7980_v55 = vmax.f32 %v7978_v12, %v7979_v17  ;;  %v7985_v50 = vmax.f32 %v7983_v44, %v7984_v32 }
 0x875   :  { %v7994_v52 = vmax.f32 %v7992_v11, %v7993_v20  ;;  %v24901_v29 = vpop.f32.mrb[178].mxu1 }
 0x876   :  { %v8044_v16 = vsub.f32 %v7354_v39, %v7980_v55  ;;  %v8045_v56 = vsub.f32 %v20945_v23, %v7980_v55  ;;  %v7986_v25 = vrot.slane %v7985_v50, 2  ;;  %v8000_v0 = vsel %vm1248_vm3, %v24901_v29, -inf  ;;  %v24905_v19 = vpop.f32.mrb[132].mxu0  ;;  %v24907_v28 = vpop.f32.mrb[179].mxu1 }
 0x877   :  { %v7995_v22 = vrot.slane %v7994_v52, 2  ;;  %v8009_v60 = vsel %vm1248_vm3, %v24905_v19, -inf  ;;  %v7999_v58 = vsel %vm1248_vm3, %v24907_v28, -inf  ;;  %v24913_v59 = vpop.f32.mrb[133].mxu0 }
 0x878   :  { %v8060_v31 = vmul.f32 1.442695, %v8044_v16  ;;  %v8062_v43 = vmul.f32 1.442695, %v8045_v56  ;;  %v7987_v53 = vmax.f32 %v7985_v50, %v7986_v25  ;;  %v8001_v4 = vmax.f32 %v7999_v58, %v8000_v0 }
 0x879   :  { %v7996_v30 = vmax.f32 %v7994_v52, %v7995_v22  ;;  %v8008_v23 = vsel %vm1248_vm3, %v24913_v59, -inf }
 0x87a   :  { %22965 = vpow2.f32 %v8060_v31  ;;  %v7988_v37 = vrot.slane %v7987_v53, 1  ;;  %v8002_v39 = vrot.slane %v8001_v4, 4  ;;  %v8010_v35 = vmax.f32 %v8008_v23, %v8009_v60 }
 0x87b   :  { %22967 = vpow2.f32 %v8062_v43  ;;  %v7997_v8 = vrot.slane %v7996_v30, 1 }
 0x87c   :  { %v7989_v61 = vmax.f32 %v7987_v53, %v7988_v37  ;;  %v8003_v62 = vmax.f32 %v8001_v4, %v8002_v39  ;;  %v8011_v3 = vrot.slane %v8010_v35, 4 }
 0x87d   :  { %v7998_v1 = vmax.f32 %v7996_v30, %v7997_v8  ;;  %v24917_v9 = vpop.f32.mrb[180].mxu1 }
 0x87e   :  { %v8046_v33 = vsub.f32 %v7441_v7, %v7989_v61  ;;  %v8047_v12 = vsub.f32 %v20952_v18, %v7989_v61  ;;  %v8004_v44 = vrot.slane %v8003_v62, 2  ;;  %v8012_v5 = vmax.f32 %v8010_v35, %v8011_v3  ;;  %v24919_v11 = vpop.f32.mrb[134].mxu0  ;;  %v24921_v17 = vpop.f32.mrb[181].mxu1 }
 0x87f   :  { %v8048_v32 = vsub.f32 %v7528_v13, %v7998_v1  ;;  %v8049_v20 = vsub.f32 %v20959_v34, %v7998_v1  ;;  %v8018_v55 = vsel %vm1248_vm3, %v24917_v9, -inf  ;;  %v8027_v50 = vsel %vm1248_vm3, %v24919_v11, -inf  ;;  %v24927_v52 = vpop.f32.mrb[135].mxu0 }
 0x880   :  { %v8064_v16 = vmul.f32 1.442695, %v8046_v33  ;;  %v8066_v56 = vmul.f32 1.442695, %v8047_v12  ;;  %v8005_v7 = vmax.f32 %v8003_v62, %v8004_v44  ;;  %v8013_v18 = vrot.slane %v8012_v5, 2 }
 0x881   :  { %v8068_v25 = vmul.f32 1.442695, %v8048_v32  ;;  %v8070_v0 = vmul.f32 1.442695, %v8049_v20  ;;  %v8017_v22 = vsel %vm1248_vm3, %v24921_v17, -inf  ;;  %v8026_v34 = vsel %vm1248_vm3, %v24927_v52, -inf }
 0x882   :  { %22969 = vpow2.f32 %v8064_v16  ;;  %v8006_v13 = vrot.slane %v8005_v7, 1  ;;  %v8014_v60 = vmax.f32 %v8012_v5, %v8013_v18  ;;  %v8019_v58 = vmax.f32 %v8017_v22, %v8018_v55 }
 0x883   :  { %22971 = vpow2.f32 %v8066_v56  ;;  %v8028_v31 = vmax.f32 %v8026_v34, %v8027_v50 }
 0x884   :  { %v24933_v43 = vpop.eup %22965  ;;  %22973 = vpow2.f32 %v8068_v25  ;;  %v8007_v53 = vmax.f32 %v8005_v7, %v8006_v13  ;;  %v8015_v4 = vrot.slane %v8014_v60, 1  ;;  %v8020_v30 = vrot.slane %v8019_v58, 4 }
 0x885   :  { %v24935_v23 = vpop.eup %22967  ;;  %v8092_v37 = vsel %vm1248_vm3, %v24933_v43, 0.0  ;;  %22975 = vpow2.f32 %v8070_v0  ;;  %v8029_v39 = vrot.slane %v8028_v31, 4  ;;  %v24939_v35 = vpop.f32.mrb[182].mxu1 }
 0x886   :  { %v8093_v8 = vsel %vm1248_vm3, %v24935_v23, 0.0  ;;  %v8050_v61 = vsub.f32 %v24907_v28, %v8007_v53  ;;  %v8051_v62 = vsub.f32 %v24901_v29, %v8007_v53  ;;  %v8016_v3 = vmax.f32 %v8014_v60, %v8015_v4  ;;  %v24945_v1 = vpop.f32.mrb[183].mxu1 }
 0x887   :  { %v8094_v33 = vadd.f32 %v8093_v8, %v8092_v37  ;;  %v8021_v12 = vmax.f32 %v8019_v58, %v8020_v30  ;;  %v8030_v44 = vmax.f32 %v8028_v31, %v8029_v39  ;;  %v8036_v5 = vsel %vm1248_vm3, %v24939_v35, -inf }
 0x888   :  { %v8072_v32 = vmul.f32 1.442695, %v8050_v61  ;;  %v8074_v20 = vmul.f32 1.442695, %v8051_v62  ;;  %v8052_v55 = vsub.f32 %v24913_v59, %v8016_v3  ;;  %v8053_v50 = vsub.f32 %v24905_v19, %v8016_v3 }
 0x889   :  { %v8095_v16 = vrot.slane %v8094_v33, 4  ;;  %v8022_v56 = vrot.slane %v8021_v12, 2  ;;  %v8031_v28 = vrot.slane %v8030_v44, 2  ;;  %v8035_v29 = vsel %vm1248_vm3, %v24945_v1, -inf }
 0x88a   :  { %22977 = vpow2.f32 %v8072_v32  ;;  %v8076_v7 = vmul.f32 1.442695, %v8052_v55  ;;  %v8078_v18 = vmul.f32 1.442695, %v8053_v50  ;;  %v8037_v25 = vmax.f32 %v8035_v29, %v8036_v5 }
 0x88b   :  { %v8096_v0 = vadd.f32 %v8095_v16, %v8094_v33  ;;  %22979 = vpow2.f32 %v8074_v20  ;;  %v8023_v22 = vmax.f32 %v8021_v12, %v8022_v56  ;;  %v8032_v34 = vmax.f32 %v8030_v44, %v8031_v28 }
 0x88c   :  { %v24953_v13 = vpop.eup %22969  ;;  %22981 = vpow2.f32 %v8076_v7  ;;  %v8038_v59 = vrot.slane %v8037_v25, 4 }
 0x88d   :  { %v24955_v60 = vpop.eup %22971  ;;  %v8097_v19 = vrot.slane %v8096_v0, 2  ;;  %v8101_v58 = vsel %vm1248_vm3, %v24953_v13, 0.0  ;;  %22983 = vpow2.f32 %v8078_v18  ;;  %v8024_v31 = vrot.slane %v8023_v22, 1 }
 0x88e   :  { %v24959_v53 = vpop.eup %22973  ;;  %v8102_v4 = vsel %vm1248_vm3, %v24955_v60, 0.0  ;;  %v8033_v30 = vrot.slane %v8032_v34, 1  ;;  %v8039_v37 = vmax.f32 %v8037_v25, %v8038_v59 }
 0x88f   :  { %v24963_v39 = vpop.eup %22975  ;;  %v8098_v8 = vadd.f32 %v8097_v19, %v8096_v0  ;;  %v8103_v61 = vadd.f32 %v8102_v4, %v8101_v58  ;;  %v8110_v62 = vsel %vm1248_vm3, %v24959_v53, 0.0  ;;  %v8025_v3 = vmax.f32 %v8023_v22, %v8024_v31 }
 0x890   :  { %v8111_v33 = vsel %vm1248_vm3, %v24963_v39, 0.0  ;;  %v8034_v12 = vmax.f32 %v8032_v34, %v8033_v30  ;;  %v8040_v44 = vrot.slane %v8039_v37, 2 }
 0x891   :  { %v8099_v5 = vrot.slane %v8098_v8, 1  ;;  %v8104_v32 = vrot.slane %v8103_v61, 4  ;;  %v8112_v20 = vadd.f32 %v8111_v33, %v8110_v62  ;;  %v8054_v55 = vsub.f32 %v24921_v17, %v8025_v3 }
 0x892   :  { %v8055_v50 = vsub.f32 %v24917_v9, %v8025_v3  ;;  %v8056_v16 = vsub.f32 %v24927_v52, %v8034_v12  ;;  %v8057_v56 = vsub.f32 %v24919_v11, %v8034_v12  ;;  %v8041_v28 = vmax.f32 %v8039_v37, %v8040_v44 }
 0x893   :  { %v8105_v29 = vadd.f32 %v8104_v32, %v8103_v61  ;;  %v8113_v7 = vrot.slane %v8112_v20, 4  ;;  %v8080_v18 = vmul.f32 1.442695, %v8054_v55  ;;  %v8100_v34 = vadd.f32 %v8099_v5, %v8098_v8 }
 0x894   :  { %v24973_v25 = vpop.eup %22977  ;;  %v8082_v0 = vmul.f32 1.442695, %v8055_v50  ;;  %v8084_v22 = vmul.f32 1.442695, %v8056_v16  ;;  %v8086_v52 = vmul.f32 1.442695, %v8057_v56 }
 0x895   :  { %v24975_v59 = vpop.eup %22979  ;;  %v8106_v19 = vrot.slane %v8105_v29, 2  ;;  %v8114_v58 = vadd.f32 %v8113_v7, %v8112_v20  ;;  %v8119_v9 = vsel %vm1248_vm3, %v24973_v25, 0.0  ;;  %22985 = vpow2.f32 %v8080_v18 }
 0x896   :  { %v24979_v17 = vpop.eup %22981  ;;  %v8120_v11 = vsel %vm1248_vm3, %v24975_v59, 0.0  ;;  %22987 = vpow2.f32 %v8082_v0  ;;  %v8042_v31 = vrot.slane %v8041_v28, 1 }
 0x897   :  { %v24983_v4 = vpop.eup %22983  ;;  %v8107_v30 = vadd.f32 %v8106_v19, %v8105_v29  ;;  %v8115_v37 = vrot.slane %v8114_v58, 2  ;;  %v8121_v8 = vadd.f32 %v8120_v11, %v8119_v9  ;;  %v8128_v61 = vsel %vm1248_vm3, %v24979_v17, 0.0 }
 0x898   :  { %v8129_v62 = vsel %vm1248_vm3, %v24983_v4, 0.0  ;;  %22989 = vpow2.f32 %v8084_v22  ;;  %v8043_v3 = vmax.f32 %v8041_v28, %v8042_v31 }
 0x899   :  { %v8108_v33 = vrot.slane %v8107_v30, 1  ;;  %v8116_v12 = vadd.f32 %v8115_v37, %v8114_v58  ;;  %v8122_v44 = vrot.slane %v8121_v8, 4  ;;  %v8130_v5 = vadd.f32 %v8129_v62, %v8128_v61 }
 0x89a   :  { %22991 = vpow2.f32 %v8086_v52  ;;  %v8058_v32 = vsub.f32 %v24945_v1, %v8043_v3  ;;  %v8059_v20 = vsub.f32 %v24939_v35, %v8043_v3 }
 0x89b   :  { %v8117_v55 = vrot.slane %v8116_v12, 1  ;;  %v8123_v50 = vadd.f32 %v8122_v44, %v8121_v8  ;;  %v8131_v16 = vrot.slane %v8130_v5, 4  ;;  %22993 = vrcp.f32 %v8100_v34 }
 0x89c   :  { %v8088_v56 = vmul.f32 1.442695, %v8058_v32  ;;  %v8090_v29 = vmul.f32 1.442695, %v8059_v20  ;;  %v8109_v7 = vadd.f32 %v8108_v33, %v8107_v30 }
 0x89d   :  { %v8124_v18 = vrot.slane %v8123_v50, 2  ;;  %v8132_v0 = vadd.f32 %v8131_v16, %v8130_v5  ;;  %v8118_v22 = vadd.f32 %v8117_v55, %v8116_v12 }
 0x89e   :  { %22995 = vpow2.f32 %v8088_v56 }
 0x89f   :  { %v24991_v28 = vpop.eup %22985  ;;  %v8125_v19 = vadd.f32 %v8124_v18, %v8123_v50  ;;  %v8133_v58 = vrot.slane %v8132_v0, 2  ;;  %22997 = vpow2.f32 %v8090_v29 }
 0x8a0   :  { %v24993_v9 = vpop.eup %22987  ;;  %v8137_v35 = vsel %vm1248_vm3, %v24991_v28, 0.0  ;;  %22999 = vrcp.f32 %v8109_v7 }
 0x8a1   :  { %v8126_v1 = vrot.slane %v8125_v19, 1  ;;  %v8134_v34 = vadd.f32 %v8133_v58, %v8132_v0  ;;  %v8138_v11 = vsel %vm1248_vm3, %v24993_v9, 0.0  ;;  %23001 = vrcp.f32 %v8118_v22 }
 0x8a2   :  { %v24999_v52 = vpop.eup %22989  ;;  %v8139_v31 = vadd.f32 %v8138_v11, %v8137_v35 }
 0x8a3   :  { %v8135_v30 = vrot.slane %v8134_v34, 1  ;;  %v8146_v37 = vsel %vm1248_vm3, %v24999_v52, 0.0  ;;  %v8127_v8 = vadd.f32 %v8126_v1, %v8125_v19 }
 0x8a4   :  { %v25003_v61 = vpop.eup %22991  ;;  %v8140_v62 = vrot.slane %v8139_v31, 4 }
 0x8a5   :  { %v22994_v3 = vpop.eup %22993  ;;  %v8147_v33 = vsel %vm1248_vm3, %v25003_v61, 0.0  ;;  %23003 = vrcp.f32 %v8127_v8  ;;  %v8136_v12 = vadd.f32 %v8135_v30, %v8134_v34 }
 0x8a6   :  { %v8141_v44 = vadd.f32 %v8140_v62, %v8139_v31  ;;  %v8148_v5 = vadd.f32 %v8147_v33, %v8146_v37  ;;  %v8172_v32 = vmul.f32 %v22994_v3, %v24933_v43  ;;  %v8173_v20 = vmul.f32 %v22994_v3, %v24935_v23  ;;  %v18587_v62 = vld [vmem:[%s26975_s4 + $0x68] sm:$0xff] }
 0x8a7   :  { %23005 = vrcp.f32 %v8136_v12 }
 0x8a8   :  { %v25009_v55 = vpop.eup %22995  ;;  %v8142_v50 = vrot.slane %v8141_v44, 2  ;;  %v8149_v16 = vrot.slane %v8148_v5, 4  ;;  %20999 = vmatprep.mubr.msk.f32.mxu0 %vm1248_vm3, %v8172_v32 }
 0x8a9   :  { %v25012_v56 = vpop.eup %22997  ;;  %v8155_v29 = vsel %vm1248_vm3, %v25009_v55, 0.0  ;;  %21000 = vmatmul.mubr.msk.f32.vlgmr.msra.gmra.mrb[136].mxu0 %vm1248_vm3, %v8173_v20  ;;  %v18589_v20 = vld [vmem:[%s26975_s4 + $0x78] sm:$0xff] }
 0x8aa   :  { %v23000_v7 = vpop.eup %22999  ;;  %v8143_v18 = vadd.f32 %v8142_v50, %v8141_v44  ;;  %v8150_v0 = vadd.f32 %v8149_v16, %v8148_v5  ;;  %v8156_v43 = vsel %vm1248_vm3, %v25012_v56, 0.0  ;;  %22306 = vmatpush3.bf16.msra.mxu0 %v24881_v15 }
 0x8ab   :  { %v23002_v23 = vpop.eup %23001  ;;  %v8157_v22 = vadd.f32 %v8156_v43, %v8155_v29  ;;  %22312 = vmatprep.subr.bf16.mxu0 %v24887_v21  ;;  %v8174_v19 = vmul.f32 %v23000_v7, %v24953_v13  ;;  %v8175_v58 = vmul.f32 %v23000_v7, %v24955_v60 }
 0x8ac   :  { %v8144_v35 = vrot.slane %v8143_v18, 1  ;;  %v8151_v1 = vrot.slane %v8150_v0, 2  ;;  %v8176_v34 = vmul.f32 %v23002_v23, %v24959_v53  ;;  %v8177_v11 = vmul.f32 %v23002_v23, %v24963_v39  ;;  %v18586_v39 = vld [vmem:[%s26975_s4 + $0x60] sm:$0xff] }
 0x8ad   :  { %v8158_v31 = vrot.slane %v8157_v22, 4  ;;  %21006 = vmatprep.mubr.msk.f32.mxu1 %vm1248_vm3, %v8174_v19  ;;  %v22327_v12 = vpack.c.bf16 %v18587_v62, %v18586_v39 }
 0x8ae   :  { %v8152_v30 = vadd.f32 %v8151_v1, %v8150_v0  ;;  %21013 = vmatprep.mubr.msk.f32.mxu0 %vm1248_vm3, %v8176_v34  ;;  %21007 = vmatmul.mubr.msk.f32.vlgmr.msra.gmra.mrb[184].mxu1 %vm1248_vm3, %v8175_v58  ;;  %v8145_v15 = vadd.f32 %v8144_v35, %v8143_v18 }
 0x8af   :  { %v23004_v37 = vpop.eup %23003  ;;  %v8159_v8 = vadd.f32 %v8158_v31, %v8157_v22  ;;  %21014 = vmatmul.mubr.msk.f32.vlgmr.msra.gmra.mrb[138].mxu0 %vm1248_vm3, %v8177_v11  ;;  %22310 = vmatpush3.bf16.msra.mxu1 %v24884_v51 }
 0x8b0   :  { %v8153_v13 = vrot.slane %v8152_v30, 1  ;;  %22314 = vmatpush3.bf16.msra.mxu0 %v24887_v21  ;;  %22316 = vmatprep.subr.bf16.mxu1 %v24889_v26  ;;  %v8178_v60 = vmul.f32 %v23004_v37, %v24973_v25  ;;  %v8179_v53 = vmul.f32 %v23004_v37, %v24975_v59  ;;  %23007 = vrcp.f32 %v8145_v15 }
 0x8b1   :  { %v23006_v3 = vpop.eup %23005  ;;  %v8160_v51 = vrot.slane %v8159_v8, 2  ;;  %22320 = vmatprep.subr.bf16.mxu0 %v24891_v14 }
 0x8b2   :  { %21020 = vmatprep.mubr.msk.f32.mxu1 %vm1248_vm3, %v8178_v60  ;;  %v8180_v21 = vmul.f32 %v23006_v3, %v24979_v17  ;;  %v8181_v25 = vmul.f32 %v23006_v3, %v24983_v4  ;;  %v8154_v59 = vadd.f32 %v8153_v13, %v8152_v30 }
 0x8b3   :  { %v8161_v33 = vadd.f32 %v8160_v51, %v8159_v8  ;;  %21021 = vmatmul.mubr.msk.f32.vlgmr.msra.gmra.mrb[186].mxu1 %vm1248_vm3, %v8179_v53 }
 0x8b4   :  { %21027 = vmatprep.mubr.msk.f32.mxu0 %vm1248_vm3, %v8180_v21  ;;  %22318 = vmatpush3.bf16.msra.mxu1 %v24889_v26  ;;  %23009 = vrcp.f32 %v8154_v59  ;;  %v18610_v26 = vld [vmem:[%s26971_s1 + $0x10] sm:$0xf] }
 0x8b5   :  { %v8162_v44 = vrot.slane %v8161_v33, 1  ;;  %21028 = vmatmul.mubr.msk.f32.vlgmr.msra.gmra.mrb[140].mxu0 %vm1248_vm3, %v8181_v25  ;;  %22324 = vmatprep.subr.bf16.mxu1 %v24893_v57 }
 0x8b6   :  { %22322 = vmatpush3.bf16.msra.mxu0 %v24891_v14  ;;  %v18588_v14 = vld [vmem:[%s26975_s4 + $0x70] sm:$0xff] }
 0x8b7   :  { %v8163_v17 = vadd.f32 %v8162_v44, %v8161_v33  ;;  %22329 = vmatprep.subr.msk.bf16.mxu0 %vm23529_vm2, %v22327_v12  ;;  %v22333_v16 = vpack.c.bf16 %v18589_v20, %v18588_v14 }
 0x8b9   :  { %23011 = vrcp.f32 %v8163_v17 }
 0x8ba   :  { %v23008_v4 = vpop.eup %23007 }
 0x8bb   :  { %v8182_v5 = vmul.f32 %v23008_v4, %v24991_v28  ;;  %v8183_v32 = vmul.f32 %v23008_v4, %v24993_v9 }
 0x8bd   :  { %21034 = vmatprep.mubr.msk.f32.mxu1 %vm1248_vm3, %v8182_v5 }
 0x8be   :  { %v23010_v50 = vpop.eup %23009  ;;  %21035 = vmatmul.mubr.msk.f32.vlgmr.msra.gmra.mrb[188].mxu1 %vm1248_vm3, %v8183_v32 }
 0x8bf   :  { %v8184_v28 = vmul.f32 %v23010_v50, %v24999_v52  ;;  %v8185_v9 = vmul.f32 %v23010_v50, %v25003_v61  ;;  %22326 = vmatpush3.bf16.msra.mxu1 %v24893_v57  ;;  %v18628_v57 = vld [vmem:[%s26973_s2 + $0x10] sm:$0xf] }
 0x8c0   :  { %21083 = vmatprep.subr.msk.mxu1 %vm40_vm0, %v18610_v26  ;;  %v18646_v52 = vld [vmem:[%s26974_s3 + $0x10] sm:$0xf] }
 0x8c1   :  { %21041 = vmatprep.mubr.msk.f32.mxu0 %vm1248_vm3, %v8184_v28 }
 0x8c2   :  { %21042 = vmatmul.mubr.msk.f32.vlgmr.msra.gmra.mrb[142].mxu0 %vm1248_vm3, %v8185_v9 }
 0x8c3   :  { %v23012_v29 = vpop.eup %23011  ;;  %22332 = vmatpush3.bf16.xpose.msk.msra.mxu0 %vm23529_vm2, %v22327_v12 }
 0x8c4   :  { %v8186_v7 = vmul.f32 %v23012_v29, %v25009_v55  ;;  %v8187_v18 = vmul.f32 %v23012_v29, %v25012_v56  ;;  %22335 = vmatprep.subr.msk.bf16.mxu0 %vm23529_vm2, %v22333_v16 }
 0x8c6   :  { %21048 = vmatprep.mubr.msk.f32.mxu1 %vm1248_vm3, %v8186_v7 }
 0x8c7   :  { %21049 = vmatmul.mubr.msk.f32.vlgmr.msra.gmra.mrb[190].mxu1 %vm1248_vm3, %v8187_v18 }
 0x8c8   :  { %21084 = vmatpush3.xpose.msk.msra.mxu1 %vm40_vm0, %v18610_v26  ;;  %21085 = vmatprep.mubr.msk.f32.mxu1 %vm40_vm0, %v24616_v48  ;;  %v25122_v48 = vld [vmem:[%s26972_s0] sm:$0xff] }
 0x8c9   :  { %21109 = vmatprep.subr.msk.mxu1 %vm40_vm0, %v18628_v57 }
 0x8cb   :  { %21086 = vmatmul.mubr.msk.f32.vlgmr.msra.gmra.mrb[192].mxu1 %vm40_vm0, %v24625_v38  ;;  %22338 = vmatpush3.bf16.xpose.msk.msra.mxu0 %vm23529_vm2, %v22333_v16  ;;  %v25129_v38 = vld [vmem:[%s26972_s0 + $0x8] sm:$0xff] }
 0x8cc   :  { %21088 = vmatprep.mubr.msk.f32.mxu1 %vm40_vm0, %v24632_v54  ;;  %21110 = vmatpush3.xpose.msk.msra.mxu1 %vm40_vm0, %v18628_v57  ;;  %v25136_v54 = vld [vmem:[%s26972_s0 + $0x10] sm:$0xff] }
 0x8cd   :  { %21135 = vmatprep.subr.msk.mxu0 %vm40_vm0, %v18646_v52 }
 0x8cf   :  { %21089 = vmatmul.mubr.msk.f32.gmra.mrb[194].mxu1 %vm40_vm0, %v24642_v41  ;;  %v25143_v41 = vld [vmem:[%s26972_s0 + $0x18] sm:$0xff] }
 0x8d0   :  { %21091 = vmatprep.mubr.msk.f32.mxu1 %vm40_vm0, %v24649_v42  ;;  %v25150_v42 = vld [vmem:[%s26972_s0 + $0x20] sm:$0xff] }
 0x8d3   :  { %21092 = vmatmul.mubr.msk.f32.gmra.mrb[196].mxu1 %vm40_vm0, %v24656_v10  ;;  %v25157_v10 = vld [vmem:[%s26972_s0 + $0x28] sm:$0xff] }
 0x8d4   :  { %21094 = vmatprep.mubr.msk.f32.mxu1 %vm40_vm0, %v24663_v47  ;;  %v25164_v47 = vld [vmem:[%s26972_s0 + $0x30] sm:$0xff] }
 0x8d7   :  { %21095 = vmatmul.mubr.msk.f32.gmra.mrb[198].mxu1 %vm40_vm0, %v24670_v36  ;;  %v25171_v36 = vld [vmem:[%s26972_s0 + $0x38] sm:$0xff] }
 0x8d8   :  { %21097 = vmatprep.mubr.msk.f32.mxu1 %vm40_vm0, %v24677_v2  ;;  %v25178_v2 = vld [vmem:[%s26972_s0 + $0x40] sm:$0xff] }
 0x8db   :  { %21098 = vmatmul.mubr.msk.f32.gmra.mrb[200].mxu1 %vm40_vm0, %v24684_v46  ;;  %v25185_v46 = vld [vmem:[%s26972_s0 + $0x48] sm:$0xff] }
 0x8dc   :  { %21100 = vmatprep.mubr.msk.f32.mxu1 %vm40_vm0, %v24691_v63  ;;  %v25192_v63 = vld [vmem:[%s26972_s0 + $0x50] sm:$0xff] }
 0x8df   :  { %21101 = vmatmul.mubr.msk.f32.gmra.mrb[202].mxu1 %vm40_vm0, %v24698_v6  ;;  %v25199_v6 = vld [vmem:[%s26972_s0 + $0x58] sm:$0xff] }
 0x8e0   :  { %21103 = vmatprep.mubr.msk.f32.mxu1 %vm40_vm0, %v24705_v45  ;;  %v25206_v45 = vld [vmem:[%s26972_s0 + $0x60] sm:$0xff] }
 0x8e3   :  { %21104 = vmatmul.mubr.msk.f32.gmra.mrb[204].mxu1 %vm40_vm0, %v24712_v27  ;;  %v25213_v27 = vld [vmem:[%s26972_s0 + $0x68] sm:$0xff] }
 0x8e4   :  { %21106 = vmatprep.mubr.msk.f32.mxu1 %vm40_vm0, %v24719_v49  ;;  %v25220_v49 = vld [vmem:[%s26972_s0 + $0x70] sm:$0xff] }
 0x8e7   :  { %21107 = vmatmul.mubr.msk.f32.gmra.mrb[206].mxu1 %vm40_vm0, %v24726_v24  ;;  %v25227_v24 = vld [vmem:[%s26972_s0 + $0x78] sm:$0xff] }
 0x8e8   :  { %21111 = vmatprep.mubr.msk.f32.mxu1 %vm40_vm0, %v25122_v48 }
 0x8eb   :  { %21112 = vmatmul.mubr.msk.f32.vlgmr.msra.gmra.mrb[208].mxu1 %vm40_vm0, %v25129_v38 }
 0x8ec   :  { %21114 = vmatprep.mubr.msk.f32.mxu1 %vm40_vm0, %v25136_v54 }
 0x8ef   :  { %21115 = vmatmul.mubr.msk.f32.gmra.mrb[210].mxu1 %vm40_vm0, %v25143_v41 }
 0x8f0   :  { %21117 = vmatprep.mubr.msk.f32.mxu1 %vm40_vm0, %v25150_v42 }
 0x8f3   :  { %21118 = vmatmul.mubr.msk.f32.gmra.mrb[212].mxu1 %vm40_vm0, %v25157_v10 }
 0x8f4   :  { %21120 = vmatprep.mubr.msk.f32.mxu1 %vm40_vm0, %v25164_v47 }
 0x8f7   :  { %21121 = vmatmul.mubr.msk.f32.gmra.mrb[214].mxu1 %vm40_vm0, %v25171_v36 }
 0x8f8   :  { %21123 = vmatprep.mubr.msk.f32.mxu1 %vm40_vm0, %v25178_v2 }
 0x8fb   :  { %21124 = vmatmul.mubr.msk.f32.gmra.mrb[216].mxu1 %vm40_vm0, %v25185_v46 }
 0x8fc   :  { %21126 = vmatprep.mubr.msk.f32.mxu1 %vm40_vm0, %v25192_v63 }
 0x8ff   :  { %21127 = vmatmul.mubr.msk.f32.gmra.mrb[218].mxu1 %vm40_vm0, %v25199_v6 }
 0x900   :  { %21129 = vmatprep.mubr.msk.f32.mxu1 %vm40_vm0, %v25206_v45 }
 0x903   :  { %21130 = vmatmul.mubr.msk.f32.gmra.mrb[220].mxu1 %vm40_vm0, %v25213_v27 }
 0x904   :  { %21132 = vmatprep.mubr.msk.f32.mxu1 %vm40_vm0, %v25220_v49 }
 0x907   :  { %21133 = vmatmul.mubr.msk.f32.gmra.mrb[222].mxu1 %vm40_vm0, %v25227_v24 }
 0x97c   :  { %v21001_v61 = vpop.f32.mrb[136].mxu0 }
 0x97d   :  { %v8260_v55 = vpop.f32.mrb[137].mxu0 }
 0x97e   :  { %21059 = vmatprep.mubr.msk.f32.mxu0 %vm551_vm1, %v8260_v55 }
 0x97f   :  { %21060 = vmatmul.mubr.msk.f32.vlgmr.msra.gmra.mrb[78].mxu0 %vm551_vm1, %v21001_v61 }
 0x980   :  { %21136 = vmatpush3.xpose.msk.msra.mxu0 %vm40_vm0, %v18646_v52 }
 0x981   :  { %v21008_v56 = vpop.f32.mrb[184].mxu1 }
 0x982   :  { %v21015_v0 = vpop.f32.mrb[138].mxu0  ;;  %v8341_v43 = vpop.f32.mrb[185].mxu1 }
 0x983   :  { %v8422_v23 = vpop.f32.mrb[139].mxu0  ;;  %21062 = vmatprep.mubr.msk.f32.mxu0 %vm551_vm1, %v8341_v43 }
 0x984   :  { %21063 = vmatmul.mubr.msk.f32.gmra.mrb[80].mxu0 %vm551_vm1, %v21008_v56 }
 0x985   :  { %21065 = vmatprep.mubr.msk.f32.mxu0 %vm551_vm1, %v8422_v23 }
 0x986   :  { %v21022_v22 = vpop.f32.mrb[186].mxu1 }
 0x987   :  { %v8503_v19 = vpop.f32.mrb[187].mxu1 }
 0x988   :  { %21066 = vmatmul.mubr.msk.f32.gmra.mrb[82].mxu0 %vm551_vm1, %v21015_v0  ;;  %v21029_v58 = vpop.f32.mrb[140].mxu0 }
 0x989   :  { %v8584_v35 = vpop.f32.mrb[141].mxu0  ;;  %21068 = vmatprep.mubr.msk.f32.mxu0 %vm551_vm1, %v8503_v19 }
 0x98c   :  { %21069 = vmatmul.mubr.msk.f32.gmra.mrb[84].mxu0 %vm551_vm1, %v21022_v22 }
 0x98d   :  { %21071 = vmatprep.mubr.msk.f32.mxu0 %vm551_vm1, %v8584_v35 }
 0x990   :  { %21072 = vmatmul.mubr.msk.f32.gmra.mrb[86].mxu0 %vm551_vm1, %v21029_v58 }
 0x991   :  { %v21036_v1 = vpop.f32.mrb[188].mxu1 }
 0x992   :  { %v8665_v34 = vpop.f32.mrb[189].mxu1 }
 0x993   :  { %21074 = vmatprep.mubr.msk.f32.mxu0 %vm551_vm1, %v8665_v34 }
 0x994   :  { %21075 = vmatmul.mubr.msk.f32.gmra.mrb[88].mxu0 %vm551_vm1, %v21036_v1 }
 0x995   :  { %v21043_v11 = vpop.f32.mrb[142].mxu0 }
 0x996   :  { %v8746_v31 = vpop.f32.mrb[143].mxu0 }
 0x997   :  { %21077 = vmatprep.mubr.msk.f32.mxu0 %vm551_vm1, %v8746_v31 }
 0x998   :  { %21078 = vmatmul.mubr.msk.f32.gmra.mrb[90].mxu0 %vm551_vm1, %v21043_v11 }
 0x99a   :  { %v21050_v30 = vpop.f32.mrb[190].mxu1 }
 0x99b   :  { %v8827_v15 = vpop.f32.mrb[191].mxu1 }
 0x99c   :  { %21080 = vmatprep.mubr.msk.f32.mxu0 %vm551_vm1, %v8827_v15 }
 0x99d   :  { %21081 = vmatmul.mubr.msk.f32.gmra.mrb[92].mxu0 %vm551_vm1, %v21050_v30 }
 0x99e   :  { %v21087_v37 = vpop.f32.mrb[192].mxu1  ;;  %21137 = vmatprep.mubr.msk.f32.mxu0 %vm40_vm0, %v25122_v48 }
 0x99f   :  { %v9133_v8 = vpop.f32.mrb[193].mxu1  ;;  %v9213_v29 = vmul.f32 0.5, %v21087_v37 }
 0x9a0   :  { %v9212_v13 = vmul.f32 0.5, %v9133_v8 }
 0x9a1   :  { %21138 = vmatmul.mubr.msk.f32.vlgmr.msra.gmra.mrb[144].mxu0 %vm40_vm0, %v25129_v38 }
 0x9a2   :  { %v21090_v60 = vpop.f32.mrb[194].mxu1  ;;  %21165 = vmatprep.mubr.msk.f32.mxu1 %vm551_vm1, %v9212_v13  ;;  %21140 = vmatprep.mubr.msk.f32.mxu0 %vm40_vm0, %v25136_v54 }
 0x9a3   :  { %v9143_v53 = vpop.f32.mrb[195].mxu1  ;;  %v9215_v0 = vmul.f32 0.5, %v21090_v60 }
 0x9a4   :  { %v9214_v18 = vmul.f32 0.5, %v9143_v53 }
 0x9a5   :  { %21141 = vmatmul.mubr.msk.f32.gmra.mrb[146].mxu0 %vm40_vm0, %v25143_v41 }
 0x9a6   :  { %v21093_v39 = vpop.f32.mrb[196].mxu1  ;;  %21143 = vmatprep.mubr.msk.f32.mxu0 %vm40_vm0, %v25150_v42 }
 0x9a7   :  { %v9153_v62 = vpop.f32.mrb[197].mxu1  ;;  %v9217_v23 = vmul.f32 0.5, %v21093_v39 }
 0x9a8   :  { %v9216_v5 = vmul.f32 0.5, %v9153_v62 }
 0x9a9   :  { %21144 = vmatmul.mubr.msk.f32.gmra.mrb[148].mxu0 %vm40_vm0, %v25157_v10 }
 0x9aa   :  { %v25265_v3 = vpop.f32.mrb[198].mxu1  ;;  %21146 = vmatprep.mubr.msk.f32.mxu0 %vm40_vm0, %v25164_v47 }
 0x9ab   :  { %v9163_v51 = vpop.f32.mrb[199].mxu1  ;;  %v9219_v31 = vmul.f32 0.5, %v25265_v3 }
 0x9ac   :  { %v9218_v22 = vmul.f32 0.5, %v9163_v51 }
 0x9ad   :  { %21147 = vmatmul.mubr.msk.f32.gmra.mrb[150].mxu0 %vm40_vm0, %v25171_v36 }
 0x9ae   :  { %v25271_v21 = vpop.f32.mrb[200].mxu1  ;;  %21149 = vmatprep.mubr.msk.f32.mxu0 %vm40_vm0, %v25178_v2 }
 0x9af   :  { %v9173_v25 = vpop.f32.mrb[201].mxu1  ;;  %v9221_v15 = vmul.f32 0.5, %v25271_v21 }
 0x9b0   :  { %v9220_v58 = vmul.f32 0.5, %v9173_v25 }
 0x9b1   :  { %21150 = vmatmul.mubr.msk.f32.gmra.mrb[152].mxu0 %vm40_vm0, %v25185_v46 }
 0x9b2   :  { %v25277_v59 = vpop.f32.mrb[202].mxu1  ;;  %21152 = vmatprep.mubr.msk.f32.mxu0 %vm40_vm0, %v25192_v63 }
 0x9b3   :  { %v9183_v33 = vpop.f32.mrb[203].mxu1  ;;  %v9223_v39 = vmul.f32 0.5, %v25277_v59 }
 0x9b4   :  { %v9222_v37 = vmul.f32 0.5, %v9183_v33 }
 0x9b5   :  { %21153 = vmatmul.mubr.msk.f32.gmra.mrb[154].mxu0 %vm40_vm0, %v25199_v6 }
 0x9b6   :  { %v25283_v12 = vpop.f32.mrb[204].mxu1  ;;  %21155 = vmatprep.mubr.msk.f32.mxu0 %vm40_vm0, %v25206_v45 }
 0x9b7   :  { %v9193_v44 = vpop.f32.mrb[205].mxu1  ;;  %v9225_v62 = vmul.f32 0.5, %v25283_v12 }
 0x9b8   :  { %v9224_v13 = vmul.f32 0.5, %v9193_v44 }
 0x9b9   :  { %21156 = vmatmul.mubr.msk.f32.gmra.mrb[156].mxu0 %vm40_vm0, %v25213_v27 }
 0x9ba   :  { %v25289_v17 = vpop.f32.mrb[206].mxu1  ;;  %21158 = vmatprep.mubr.msk.f32.mxu0 %vm40_vm0, %v25220_v49 }
 0x9bb   :  { %v25293_v4 = vpop.f32.mrb[207].mxu1  ;;  %v9227_v51 = vmul.f32 0.5, %v25289_v17 }
 0x9bc   :  { %v9226_v3 = vmul.f32 0.5, %v25293_v4 }
 0x9bd   :  { %21159 = vmatmul.mubr.msk.f32.gmra.mrb[158].mxu0 %vm40_vm0, %v25227_v24 }
 0x9be   :  { %v21113_v32 = vpop.f32.mrb[208].mxu1  ;;  %21179 = vmatprep.mubr.msk.f32.mxu0 %vm551_vm1, %v9216_v5 }
 0x9bf   :  { %v9299_v26 = vpop.f32.mrb[209].mxu1 }
 0x9c0   :  { %v22339_v14 = vpack.c.bf16 %v21113_v32, %v9299_v26 }
 0x9c2   :  { %v21116_v20 = vpop.f32.mrb[210].mxu1  ;;  %22341 = vmatprep.subr.msk.bf16.mxu1 %vm23529_vm2, %v22339_v14 }
 0x9c3   :  { %v9309_v50 = vpop.f32.mrb[211].mxu1  ;;  %22344 = vmatpush3.bf16.xpose.msk.msra.mxu1 %vm23529_vm2, %v22339_v14 }
 0x9c4   :  { %v22345_v28 = vpack.c.bf16 %v21116_v20, %v9309_v50 }
 0x9c6   :  { %v21119_v9 = vpop.f32.mrb[212].mxu1  ;;  %22347 = vmatprep.subr.msk.bf16.mxu1 %vm23529_vm2, %v22345_v28 }
 0x9c7   :  { %v9319_v16 = vpop.f32.mrb[213].mxu1 }
 0x9c8   :  { %v22351_v7 = vpack.c.bf16 %v21119_v9, %v9319_v16 }
 0x9ca   :  { %v21122_v57 = vpop.f32.mrb[214].mxu1  ;;  %21166 = vmatmul.mubr.msk.f32.vlgmr.msra.gmra.mrb[224].mxu1 %vm551_vm1, %v9213_v29  ;;  %22353 = vmatprep.subr.msk.bf16.mxu0 %vm23529_vm2, %v22351_v7 }
 0x9cb   :  { %v9329_v52 = vpop.f32.mrb[215].mxu1  ;;  %22350 = vmatpush3.bf16.xpose.msk.msra.mxu1 %vm23529_vm2, %v22345_v28  ;;  %21172 = vmatprep.mubr.msk.f32.mxu1 %vm551_vm1, %v9214_v18 }
 0x9cc   :  { %v22357_v61 = vpack.c.bf16 %v21122_v57, %v9329_v52  ;;  %22356 = vmatpush3.bf16.xpose.msk.msra.mxu0 %vm23529_vm2, %v22351_v7 }
 0x9ce   :  { %v21125_v55 = vpop.f32.mrb[216].mxu1  ;;  %22359 = vmatprep.subr.msk.bf16.mxu1 %vm23529_vm2, %v22357_v61 }
 0x9cf   :  { %v9339_v56 = vpop.f32.mrb[217].mxu1 }
 0x9d0   :  { %v22363_v43 = vpack.c.bf16 %v21125_v55, %v9339_v56 }
 0x9d2   :  { %v21128_v19 = vpop.f32.mrb[218].mxu1  ;;  %21173 = vmatmul.mubr.msk.f32.vlgmr.msra.gmra.mrb[226].mxu1 %vm551_vm1, %v9215_v0  ;;  %22365 = vmatprep.subr.msk.bf16.mxu0 %vm23529_vm2, %v22363_v43 }
 0x9d3   :  { %21180 = vmatmul.mubr.msk.f32.vlgmr.msra.gmra.mrb[160].mxu0 %vm551_vm1, %v9217_v23  ;;  %v9349_v35 = vpop.f32.mrb[219].mxu1  ;;  %22362 = vmatpush3.bf16.xpose.msk.msra.mxu1 %vm23529_vm2, %v22357_v61 }
 0x9d4   :  { %v22369_v1 = vpack.c.bf16 %v21128_v19, %v9349_v35  ;;  %21186 = vmatprep.mubr.msk.f32.mxu1 %vm551_vm1, %v9218_v22  ;;  %22368 = vmatpush3.bf16.xpose.msk.msra.mxu0 %vm23529_vm2, %v22363_v43 }
 0x9d5   :  { %21193 = vmatprep.mubr.msk.f32.mxu0 %vm551_vm1, %v9220_v58 }
 0x9d6   :  { %v21131_v34 = vpop.f32.mrb[220].mxu1  ;;  %22371 = vmatprep.subr.msk.bf16.mxu1 %vm23529_vm2, %v22369_v1 }
 0x9d7   :  { %v9359_v11 = vpop.f32.mrb[221].mxu1 }
 0x9d8   :  { %v22375_v30 = vpack.c.bf16 %v21131_v34, %v9359_v11 }
 0x9da   :  { %21187 = vmatmul.mubr.msk.f32.vlgmr.msra.gmra.mrb[228].mxu1 %vm551_vm1, %v9219_v31  ;;  %22377 = vmatprep.subr.msk.bf16.mxu0 %vm23529_vm2, %v22375_v30  ;;  %v21134_v8 = vpop.f32.mrb[222].mxu1 }
 0x9db   :  { %21194 = vmatmul.mubr.msk.f32.vlgmr.msra.gmra.mrb[162].mxu0 %vm551_vm1, %v9221_v15  ;;  %22374 = vmatpush3.bf16.xpose.msk.msra.mxu1 %vm23529_vm2, %v22369_v1  ;;  %v9369_v60 = vpop.f32.mrb[223].mxu1 }
 0x9dc   :  { %21200 = vmatprep.mubr.msk.f32.mxu1 %vm551_vm1, %v9222_v37  ;;  %22380 = vmatpush3.bf16.xpose.msk.msra.mxu0 %vm23529_vm2, %v22375_v30  ;;  %v22381_v53 = vpack.c.bf16 %v21134_v8, %v9369_v60 }
 0x9dd   :  { %21207 = vmatprep.mubr.msk.f32.mxu0 %vm551_vm1, %v9224_v13 }
 0x9de   :  { %22383 = vmatprep.subr.msk.bf16.mxu1 %vm23529_vm2, %v22381_v53 }
 0x9e2   :  { %21201 = vmatmul.mubr.msk.f32.vlgmr.msra.gmra.mrb[230].mxu1 %vm551_vm1, %v9223_v39 }
 0x9e3   :  { %21208 = vmatmul.mubr.msk.f32.vlgmr.msra.gmra.mrb[164].mxu0 %vm551_vm1, %v9225_v62  ;;  %22386 = vmatpush3.bf16.xpose.msk.msra.mxu1 %vm23529_vm2, %v22381_v53 }
 0x9e4   :  { %21214 = vmatprep.mubr.msk.f32.mxu1 %vm551_vm1, %v9226_v3 }
 0x9ea   :  { %21215 = vmatmul.mubr.msk.f32.vlgmr.msra.gmra.mrb[232].mxu1 %vm551_vm1, %v9227_v51 }
 0xa74   :  { %v21139_v21 = vpop.f32.mrb[144].mxu0 }
 0xa75   :  { %v9449_v25 = vpop.f32.mrb[145].mxu0 }
 0xa76   :  { %v22387_v59 = vpack.c.bf16 %v21139_v21, %v9449_v25 }
 0xa78   :  { %22388 = vmatprep.subr.bf16.mxu0 %v22387_v59  ;;  %v21142_v33 = vpop.f32.mrb[146].mxu0 }
 0xa79   :  { %22390 = vmatpush3.bf16.msra.mxu0 %v22387_v59  ;;  %v9459_v12 = vpop.f32.mrb[147].mxu0 }
 0xa7a   :  { %v25350_v44 = vpack.c.bf16 %v21142_v33, %v9459_v12 }
 0xa7c   :  { %v21145_v4 = vpop.f32.mrb[148].mxu0  ;;  %22392 = vmatprep.subr.bf16.mxu0 %v25350_v44 }
 0xa7d   :  { %v9469_v5 = vpop.f32.mrb[149].mxu0 }
 0xa7e   :  { %v22395_v32 = vpack.c.bf16 %v21145_v4, %v9469_v5 }
 0xa80   :  { %22396 = vmatprep.subr.bf16.mxu1 %v22395_v32  ;;  %v21148_v26 = vpop.f32.mrb[150].mxu0 }
 0xa81   :  { %22398 = vmatpush3.bf16.msra.mxu1 %v22395_v32  ;;  %v9479_v17 = vpop.f32.mrb[151].mxu0 }
 0xa82   :  { %v25353_v14 = vpack.c.bf16 %v21148_v26, %v9479_v17 }
 0xa84   :  { %v21151_v20 = vpop.f32.mrb[152].mxu0 }
 0xa85   :  { %v9489_v50 = vpop.f32.mrb[153].mxu0 }
 0xa86   :  { %v25355_v28 = vpack.c.bf16 %v21151_v20, %v9489_v50 }
 0xa88   :  { %v21154_v9 = vpop.f32.mrb[154].mxu0  ;;  %22404 = vmatprep.subr.bf16.mxu1 %v25355_v28 }
 0xa89   :  { %v9499_v16 = vpop.f32.mrb[155].mxu0 }
 0xa8a   :  { %v25358_v29 = vpack.c.bf16 %v21154_v9, %v9499_v16 }
 0xa8c   :  { %v21157_v7 = vpop.f32.mrb[156].mxu0 }
 0xa8d   :  { %v9509_v18 = vpop.f32.mrb[157].mxu0 }
 0xa8e   :  { %v25360_v57 = vpack.c.bf16 %v21157_v7, %v9509_v18 }
 0xa90   :  { %v21160_v52 = vpop.f32.mrb[158].mxu0 }
 0xa91   :  { %v9519_v61 = vpop.f32.mrb[159].mxu0 }
 0xa92   :  { %v25362_v55 = vpack.c.bf16 %v21160_v52, %v9519_v61 }
 0xa9d   :  { %v21167_v56 = vpop.f32.mrb[224].mxu1 }
 0xa9e   :  { %v10225_v0 = vsel %vm1248_vm3, %v21167_v56, -inf  ;;  %v9606_v43 = vpop.f32.mrb[225].mxu1 }
 0xa9f   :  { %v10224_v23 = vsel %vm1248_vm3, %v9606_v43, -inf }
 0xaa0   :  { %v10226_v22 = vmax.f32 %v10224_v23, %v10225_v0 }
 0xaa2   :  { %v10227_v19 = vrot.slane %v10226_v22, 4 }
 0xaa4   :  { %v10228_v58 = vmax.f32 %v10226_v22, %v10227_v19 }
 0xaa5   :  { %v21174_v35 = vpop.f32.mrb[226].mxu1 }
 0xaa6   :  { %v10229_v1 = vrot.slane %v10228_v58, 2  ;;  %v10234_v34 = vsel %vm1248_vm3, %v21174_v35, -inf  ;;  %v21181_v11 = vpop.f32.mrb[160].mxu0  ;;  %v9693_v31 = vpop.f32.mrb[227].mxu1 }
 0xaa7   :  { %v10243_v30 = vsel %vm1248_vm3, %v21181_v11, -inf  ;;  %v10233_v15 = vsel %vm1248_vm3, %v9693_v31, -inf  ;;  %v9780_v37 = vpop.f32.mrb[161].mxu0 }
 0xaa8   :  { %v10230_v8 = vmax.f32 %v10228_v58, %v10229_v1  ;;  %v10235_v13 = vmax.f32 %v10233_v15, %v10234_v34  ;;  %v10242_v60 = vsel %vm1248_vm3, %v9780_v37, -inf }
 0xaa9   :  { %v10244_v53 = vmax.f32 %v10242_v60, %v10243_v30 }
 0xaaa   :  { %v10231_v39 = vrot.slane %v10230_v8, 1  ;;  %v10236_v62 = vrot.slane %v10235_v13, 4 }
 0xaab   :  { %v10245_v3 = vrot.slane %v10244_v53, 4 }
 0xaac   :  { %v10232_v51 = vmax.f32 %v10230_v8, %v10231_v39  ;;  %v10237_v21 = vmax.f32 %v10235_v13, %v10236_v62 }
 0xaad   :  { %v10246_v25 = vmax.f32 %v10244_v53, %v10245_v3  ;;  %v25370_v59 = vpop.f32.mrb[228].mxu1 }
 0xaae   :  { %v10296_v33 = vsub.f32 %v9606_v43, %v10232_v51  ;;  %v10297_v12 = vsub.f32 %v21167_v56, %v10232_v51  ;;  %v10238_v4 = vrot.slane %v10237_v21, 2  ;;  %v10252_v5 = vsel %vm1248_vm3, %v25370_v59, -inf  ;;  %v25374_v32 = vpop.f32.mrb[162].mxu0  ;;  %v25376_v26 = vpop.f32.mrb[229].mxu1 }
 0xaaf   :  { %v10247_v17 = vrot.slane %v10246_v25, 2  ;;  %v10261_v20 = vsel %vm1248_vm3, %v25374_v32, -inf  ;;  %v10251_v50 = vsel %vm1248_vm3, %v25376_v26, -inf  ;;  %v25382_v9 = vpop.f32.mrb[163].mxu0 }
 0xab0   :  { %v10312_v16 = vmul.f32 1.442695, %v10296_v33  ;;  %v10314_v7 = vmul.f32 1.442695, %v10297_v12  ;;  %v10239_v18 = vmax.f32 %v10237_v21, %v10238_v4  ;;  %v10253_v52 = vmax.f32 %v10251_v50, %v10252_v5 }
 0xab1   :  { %v10248_v61 = vmax.f32 %v10246_v25, %v10247_v17  ;;  %v10260_v56 = vsel %vm1248_vm3, %v25382_v9, -inf }
 0xab2   :  { %23013 = vpow2.f32 %v10312_v16  ;;  %v10240_v0 = vrot.slane %v10239_v18, 1  ;;  %v10254_v43 = vrot.slane %v10253_v52, 4  ;;  %v10262_v23 = vmax.f32 %v10260_v56, %v10261_v20 }
 0xab3   :  { %23015 = vpow2.f32 %v10314_v7  ;;  %v10249_v22 = vrot.slane %v10248_v61, 1 }
 0xab4   :  { %v10241_v19 = vmax.f32 %v10239_v18, %v10240_v0  ;;  %v10255_v58 = vmax.f32 %v10253_v52, %v10254_v43  ;;  %v10263_v1 = vrot.slane %v10262_v23, 4 }
 0xab5   :  { %v10250_v34 = vmax.f32 %v10248_v61, %v10249_v22  ;;  %v25386_v30 = vpop.f32.mrb[230].mxu1 }
 0xab6   :  { %v10298_v15 = vsub.f32 %v9693_v31, %v10241_v19  ;;  %v10299_v8 = vsub.f32 %v21174_v35, %v10241_v19  ;;  %v10256_v13 = vrot.slane %v10255_v58, 2  ;;  %v10264_v60 = vmax.f32 %v10262_v23, %v10263_v1  ;;  %v25388_v53 = vpop.f32.mrb[164].mxu0  ;;  %v25390_v39 = vpop.f32.mrb[231].mxu1 }
 0xab7   :  { %v10300_v62 = vsub.f32 %v9780_v37, %v10250_v34  ;;  %v10301_v3 = vsub.f32 %v21181_v11, %v10250_v34  ;;  %v10270_v51 = vsel %vm1248_vm3, %v25386_v30, -inf  ;;  %v10279_v21 = vsel %vm1248_vm3, %v25388_v53, -inf  ;;  %v25396_v25 = vpop.f32.mrb[165].mxu0 }
 0xab8   :  { %v10316_v33 = vmul.f32 1.442695, %v10298_v15  ;;  %v10318_v12 = vmul.f32 1.442695, %v10299_v8  ;;  %v10257_v31 = vmax.f32 %v10255_v58, %v10256_v13  ;;  %v10265_v35 = vrot.slane %v10264_v60, 2 }
 0xab9   :  { %v10320_v4 = vmul.f32 1.442695, %v10300_v62  ;;  %v10322_v5 = vmul.f32 1.442695, %v10301_v3  ;;  %v10269_v17 = vsel %vm1248_vm3, %v25390_v39, -inf  ;;  %v10278_v11 = vsel %vm1248_vm3, %v25396_v25, -inf }
 0xaba   :  { %23017 = vpow2.f32 %v10316_v33  ;;  %v10258_v37 = vrot.slane %v10257_v31, 1  ;;  %v10266_v20 = vmax.f32 %v10264_v60, %v10265_v35  ;;  %v10271_v50 = vmax.f32 %v10269_v17, %v10270_v51 }
 0xabb   :  { %23019 = vpow2.f32 %v10318_v12  ;;  %v10280_v16 = vmax.f32 %v10278_v11, %v10279_v21 }
 0xabc   :  { %v25402_v7 = vpop.eup %23013  ;;  %23021 = vpow2.f32 %v10320_v4  ;;  %v10259_v18 = vmax.f32 %v10257_v31, %v10258_v37  ;;  %v10267_v52 = vrot.slane %v10266_v20, 1  ;;  %v10272_v61 = vrot.slane %v10271_v50, 4 }
 0xabd   :  { %v25404_v56 = vpop.eup %23015  ;;  %v10344_v0 = vsel %vm1248_vm3, %v25402_v7, 0.0  ;;  %23023 = vpow2.f32 %v10322_v5  ;;  %v10281_v43 = vrot.slane %v10280_v16, 4  ;;  %v25408_v23 = vpop.f32.mrb[232].mxu1 }
 0xabe   :  { %v10345_v22 = vsel %vm1248_vm3, %v25404_v56, 0.0  ;;  %v10302_v19 = vsub.f32 %v25376_v26, %v10259_v18  ;;  %v10303_v58 = vsub.f32 %v25370_v59, %v10259_v18  ;;  %v10268_v1 = vmax.f32 %v10266_v20, %v10267_v52  ;;  %v25414_v34 = vpop.f32.mrb[233].mxu1 }
 0xabf   :  { %v10346_v15 = vadd.f32 %v10345_v22, %v10344_v0  ;;  %v10273_v8 = vmax.f32 %v10271_v50, %v10272_v61  ;;  %v10282_v13 = vmax.f32 %v10280_v16, %v10281_v43  ;;  %v10288_v60 = vsel %vm1248_vm3, %v25408_v23, -inf }
 0xac0   :  { %v10324_v62 = vmul.f32 1.442695, %v10302_v19  ;;  %v10326_v3 = vmul.f32 1.442695, %v10303_v58  ;;  %v10304_v51 = vsub.f32 %v25382_v9, %v10268_v1  ;;  %v10305_v21 = vsub.f32 %v25374_v32, %v10268_v1 }
 0xac1   :  { %v10347_v33 = vrot.slane %v10346_v15, 4  ;;  %v10274_v12 = vrot.slane %v10273_v8, 2  ;;  %v10283_v26 = vrot.slane %v10282_v13, 2  ;;  %v10287_v59 = vsel %vm1248_vm3, %v25414_v34, -inf }
 0xac2   :  { %23025 = vpow2.f32 %v10324_v62  ;;  %v10328_v31 = vmul.f32 1.442695, %v10304_v51  ;;  %v10330_v35 = vmul.f32 1.442695, %v10305_v21  ;;  %v10289_v4 = vmax.f32 %v10287_v59, %v10288_v60 }
 0xac3   :  { %v10348_v5 = vadd.f32 %v10347_v33, %v10346_v15  ;;  %23027 = vpow2.f32 %v10326_v3  ;;  %v10275_v17 = vmax.f32 %v10273_v8, %v10274_v12  ;;  %v10284_v11 = vmax.f32 %v10282_v13, %v10283_v26 }
 0xac4   :  { %v25422_v37 = vpop.eup %23017  ;;  %23029 = vpow2.f32 %v10328_v31  ;;  %v10290_v9 = vrot.slane %v10289_v4, 4 }
 0xac5   :  { %v25424_v20 = vpop.eup %23019  ;;  %v10349_v32 = vrot.slane %v10348_v5, 2  ;;  %v10353_v50 = vsel %vm1248_vm3, %v25422_v37, 0.0  ;;  %23031 = vpow2.f32 %v10330_v35  ;;  %v10276_v16 = vrot.slane %v10275_v17, 1 }
 0xac6   :  { %v25428_v18 = vpop.eup %23021  ;;  %v10354_v52 = vsel %vm1248_vm3, %v25424_v20, 0.0  ;;  %v10285_v61 = vrot.slane %v10284_v11, 1  ;;  %v10291_v0 = vmax.f32 %v10289_v4, %v10290_v9 }
 0xac7   :  { %v25432_v43 = vpop.eup %23023  ;;  %v10350_v22 = vadd.f32 %v10349_v32, %v10348_v5  ;;  %v10355_v19 = vadd.f32 %v10354_v52, %v10353_v50  ;;  %v10362_v58 = vsel %vm1248_vm3, %v25428_v18, 0.0  ;;  %v10277_v1 = vmax.f32 %v10275_v17, %v10276_v16 }
 0xac8   :  { %v10363_v15 = vsel %vm1248_vm3, %v25432_v43, 0.0  ;;  %v10286_v8 = vmax.f32 %v10284_v11, %v10285_v61  ;;  %v10292_v13 = vrot.slane %v10291_v0, 2 }
 0xac9   :  { %v10351_v60 = vrot.slane %v10350_v22, 1  ;;  %v10356_v62 = vrot.slane %v10355_v19, 4  ;;  %v10364_v3 = vadd.f32 %v10363_v15, %v10362_v58  ;;  %v10306_v51 = vsub.f32 %v25390_v39, %v10277_v1 }
 0xaca   :  { %v10307_v21 = vsub.f32 %v25386_v30, %v10277_v1  ;;  %v10308_v33 = vsub.f32 %v25396_v25, %v10286_v8  ;;  %v10309_v12 = vsub.f32 %v25388_v53, %v10286_v8  ;;  %v10293_v26 = vmax.f32 %v10291_v0, %v10292_v13 }
 0xacb   :  { %v10357_v59 = vadd.f32 %v10356_v62, %v10355_v19  ;;  %v10365_v31 = vrot.slane %v10364_v3, 4  ;;  %v10332_v35 = vmul.f32 1.442695, %v10306_v51  ;;  %v10352_v11 = vadd.f32 %v10351_v60, %v10350_v22 }
 0xacc   :  { %v25442_v4 = vpop.eup %23025  ;;  %v10334_v5 = vmul.f32 1.442695, %v10307_v21  ;;  %v10336_v17 = vmul.f32 1.442695, %v10308_v33  ;;  %v10338_v25 = vmul.f32 1.442695, %v10309_v12 }
 0xacd   :  { %v25444_v9 = vpop.eup %23027  ;;  %v10358_v32 = vrot.slane %v10357_v59, 2  ;;  %v10366_v50 = vadd.f32 %v10365_v31, %v10364_v3  ;;  %v10371_v30 = vsel %vm1248_vm3, %v25442_v4, 0.0  ;;  %23033 = vpow2.f32 %v10332_v35 }
 0xace   :  { %v25448_v39 = vpop.eup %23029  ;;  %v10372_v53 = vsel %vm1248_vm3, %v25444_v9, 0.0  ;;  %23035 = vpow2.f32 %v10334_v5  ;;  %v10294_v16 = vrot.slane %v10293_v26, 1 }
 0xacf   :  { %v25452_v52 = vpop.eup %23031  ;;  %v10359_v61 = vadd.f32 %v10358_v32, %v10357_v59  ;;  %v10367_v0 = vrot.slane %v10366_v50, 2  ;;  %v10373_v22 = vadd.f32 %v10372_v53, %v10371_v30  ;;  %v10380_v19 = vsel %vm1248_vm3, %v25448_v39, 0.0 }
 0xad0   :  { %v10381_v58 = vsel %vm1248_vm3, %v25452_v52, 0.0  ;;  %23037 = vpow2.f32 %v10336_v17  ;;  %v10295_v1 = vmax.f32 %v10293_v26, %v10294_v16 }
 0xad1   :  { %v10360_v15 = vrot.slane %v10359_v61, 1  ;;  %v10368_v8 = vadd.f32 %v10367_v0, %v10366_v50  ;;  %v10374_v13 = vrot.slane %v10373_v22, 4  ;;  %v10382_v60 = vadd.f32 %v10381_v58, %v10380_v19 }
 0xad2   :  { %23039 = vpow2.f32 %v10338_v25  ;;  %v10310_v62 = vsub.f32 %v25414_v34, %v10295_v1  ;;  %v10311_v3 = vsub.f32 %v25408_v23, %v10295_v1 }
 0xad3   :  { %v10369_v51 = vrot.slane %v10368_v8, 1  ;;  %v10375_v21 = vadd.f32 %v10374_v13, %v10373_v22  ;;  %v10383_v33 = vrot.slane %v10382_v60, 4  ;;  %23041 = vrcp.f32 %v10352_v11 }
 0xad4   :  { %v10340_v12 = vmul.f32 1.442695, %v10310_v62  ;;  %v10342_v59 = vmul.f32 1.442695, %v10311_v3  ;;  %v10361_v31 = vadd.f32 %v10360_v15, %v10359_v61 }
 0xad5   :  { %v10376_v35 = vrot.slane %v10375_v21, 2  ;;  %v10384_v5 = vadd.f32 %v10383_v33, %v10382_v60  ;;  %v10370_v17 = vadd.f32 %v10369_v51, %v10368_v8 }
 0xad6   :  { %23043 = vpow2.f32 %v10340_v12 }
 0xad7   :  { %v25460_v26 = vpop.eup %23033  ;;  %v10377_v32 = vadd.f32 %v10376_v35, %v10375_v21  ;;  %v10385_v50 = vrot.slane %v10384_v5, 2  ;;  %23045 = vpow2.f32 %v10342_v59 }
 0xad8   :  { %v25462_v30 = vpop.eup %23035  ;;  %v10389_v23 = vsel %vm1248_vm3, %v25460_v26, 0.0  ;;  %23047 = vrcp.f32 %v10361_v31 }
 0xad9   :  { %v10378_v34 = vrot.slane %v10377_v32, 1  ;;  %v10386_v11 = vadd.f32 %v10385_v50, %v10384_v5  ;;  %v10390_v53 = vsel %vm1248_vm3, %v25462_v30, 0.0  ;;  %23049 = vrcp.f32 %v10370_v17 }
 0xada   :  { %v25468_v25 = vpop.eup %23037  ;;  %v10391_v16 = vadd.f32 %v10390_v53, %v10389_v23 }
 0xadb   :  { %v10387_v61 = vrot.slane %v10386_v11, 1  ;;  %v10398_v0 = vsel %vm1248_vm3, %v25468_v25, 0.0  ;;  %v10379_v22 = vadd.f32 %v10378_v34, %v10377_v32 }
 0xadc   :  { %v25472_v19 = vpop.eup %23039  ;;  %v10392_v58 = vrot.slane %v10391_v16, 4 }
 0xadd   :  { %v23042_v1 = vpop.eup %23041  ;;  %v10399_v15 = vsel %vm1248_vm3, %v25472_v19, 0.0  ;;  %23051 = vrcp.f32 %v10379_v22  ;;  %v10388_v8 = vadd.f32 %v10387_v61, %v10386_v11 }
 0xade   :  { %v10393_v13 = vadd.f32 %v10392_v58, %v10391_v16  ;;  %v10400_v60 = vadd.f32 %v10399_v15, %v10398_v0  ;;  %v10424_v62 = vmul.f32 %v23042_v1, %v25402_v7  ;;  %v10425_v3 = vmul.f32 %v23042_v1, %v25404_v56 }
 0xadf   :  { %23053 = vrcp.f32 %v10388_v8 }
 0xae0   :  { %v25478_v51 = vpop.eup %23043  ;;  %v10394_v21 = vrot.slane %v10393_v13, 2  ;;  %v10401_v33 = vrot.slane %v10400_v60, 4  ;;  %21221 = vmatprep.mubr.msk.f32.mxu0 %vm1248_vm3, %v10424_v62 }
 0xae1   :  { %v25481_v12 = vpop.eup %23045  ;;  %v10407_v59 = vsel %vm1248_vm3, %v25478_v51, 0.0  ;;  %21222 = vmatmul.mubr.msk.f32.vlgmr.msra.gmra.mrb[166].mxu0 %vm1248_vm3, %v10425_v3 }
 0xae2   :  { %v23048_v31 = vpop.eup %23047  ;;  %v10395_v35 = vadd.f32 %v10394_v21, %v10393_v13  ;;  %v10402_v5 = vadd.f32 %v10401_v33, %v10400_v60  ;;  %v10408_v7 = vsel %vm1248_vm3, %v25481_v12, 0.0  ;;  %22394 = vmatpush3.bf16.msra.mxu0 %v25350_v44 }
 0xae3   :  { %v23050_v56 = vpop.eup %23049  ;;  %v10409_v17 = vadd.f32 %v10408_v7, %v10407_v59  ;;  %22400 = vmatprep.subr.bf16.mxu0 %v25353_v14  ;;  %v10426_v32 = vmul.f32 %v23048_v31, %v25422_v37  ;;  %v10427_v50 = vmul.f32 %v23048_v31, %v25424_v20 }
 0xae4   :  { %v10396_v23 = vrot.slane %v10395_v35, 1  ;;  %v10403_v34 = vrot.slane %v10402_v5, 2  ;;  %v10428_v11 = vmul.f32 %v23050_v56, %v25428_v18  ;;  %v10429_v53 = vmul.f32 %v23050_v56, %v25432_v43  ;;  %v25649_v56 = vld [vmem:[%s26972_s0] sm:$0xff] }
 0xae5   :  { %v10410_v16 = vrot.slane %v10409_v17, 4  ;;  %21228 = vmatprep.mubr.msk.f32.mxu0 %vm1248_vm3, %v10426_v32  ;;  %v25658_v32 = vld [vmem:[%s26972_s0 + $0x8] sm:$0xff] }
 0xae6   :  { %v10404_v61 = vadd.f32 %v10403_v34, %v10402_v5  ;;  %21235 = vmatprep.mubr.msk.f32.mxu1 %vm1248_vm3, %v10428_v11  ;;  %21229 = vmatmul.mubr.msk.f32.vlgmr.msra.gmra.mrb[168].mxu0 %vm1248_vm3, %v10427_v50  ;;  %v10397_v44 = vadd.f32 %v10396_v23, %v10395_v35  ;;  %v25665_v23 = vld [vmem:[%s26972_s0 + $0x10] sm:$0xff]  ;;  %v25674_v11 = vld [vmem:[%s26972_s0 + $0x18] sm:$0xff] }
 0xae7   :  { %v23052_v0 = vpop.eup %23051  ;;  %v10411_v22 = vadd.f32 %v10410_v16, %v10409_v17  ;;  %21236 = vmatmul.mubr.msk.f32.vlgmr.msra.gmra.mrb[234].mxu1 %vm1248_vm3, %v10429_v53  ;;  %22402 = vmatpush3.bf16.msra.mxu0 %v25353_v14  ;;  %v25681_v16 = vld [vmem:[%s26972_s0 + $0x20] sm:$0xff] }
 0xae8   :  { %v10405_v37 = vrot.slane %v10404_v61, 1  ;;  %22406 = vmatpush3.bf16.msra.mxu1 %v25355_v28  ;;  %22408 = vmatprep.subr.bf16.mxu0 %v25358_v29  ;;  %v10430_v20 = vmul.f32 %v23052_v0, %v25442_v4  ;;  %v10431_v18 = vmul.f32 %v23052_v0, %v25444_v9  ;;  %23055 = vrcp.f32 %v10397_v44  ;;  %v18736_v28 = vld [vmem:[%s26971_s1 + $0x14] sm:$0xf]  ;;  %v25690_v44 = vld [vmem:[%s26972_s0 + $0x28] sm:$0xff] }
 0xae9   :  { %v23054_v43 = vpop.eup %23053  ;;  %v10412_v58 = vrot.slane %v10411_v22, 2  ;;  %22412 = vmatprep.subr.bf16.mxu1 %v25360_v57 }
 0xaea   :  { %21242 = vmatprep.mubr.msk.f32.mxu0 %vm1248_vm3, %v10430_v20  ;;  %v10432_v1 = vmul.f32 %v23054_v43, %v25448_v39  ;;  %v10433_v14 = vmul.f32 %v23054_v43, %v25452_v52  ;;  %v10406_v15 = vadd.f32 %v10405_v37, %v10404_v61  ;;  %v18713_v39 = vld [vmem:[%s26975_s4 + $0x88] sm:$0xff]  ;;  %v25706_v20 = vld [vmem:[%s26972_s0 + $0x38] sm:$0xff]  ;;  %v25715_v43 = vld [vmem:[%s26972_s0 + $0x40] sm:$0xff] }
 0xaeb   :  { %v10413_v8 = vadd.f32 %v10412_v58, %v10411_v22  ;;  %21243 = vmatmul.mubr.msk.f32.vlgmr.msra.gmra.mrb[170].mxu0 %vm1248_vm3, %v10431_v18  ;;  %v25697_v22 = vld [vmem:[%s26972_s0 + $0x30] sm:$0xff] }
 0xaec   :  { %21249 = vmatprep.mubr.msk.f32.mxu1 %vm1248_vm3, %v10432_v1  ;;  %22410 = vmatpush3.bf16.msra.mxu0 %v25358_v29  ;;  %23057 = vrcp.f32 %v10406_v15  ;;  %v18712_v29 = vld [vmem:[%s26975_s4 + $0x80] sm:$0xff]  ;;  %v25724_v1 = vld [vmem:[%s26972_s0 + $0x48] sm:$0xff]  ;;  %v25733_v15 = vld [vmem:[%s26972_s0 + $0x50] sm:$0xff] }
 0xaed   :  { %v10414_v4 = vrot.slane %v10413_v8, 1  ;;  %21250 = vmatmul.mubr.msk.f32.vlgmr.msra.gmra.mrb[236].mxu1 %vm1248_vm3, %v10433_v14  ;;  %22416 = vmatprep.subr.bf16.mxu0 %v25362_v55  ;;  %v22419_v62 = vpack.c.bf16 %v18713_v39, %v18712_v29  ;;  %v25758_v39 = vld [vmem:[%s26972_s0 + $0x68] sm:$0xff] }
 0xaee   :  { %22414 = vmatpush3.bf16.msra.mxu1 %v25360_v57 }
 0xaef   :  { %21305 = vmatprep.subr.msk.mxu1 %vm40_vm0, %v18736_v28  ;;  %v10415_v9 = vadd.f32 %v10414_v4, %v10413_v8 }
 0xaf1   :  { %23059 = vrcp.f32 %v10415_v9  ;;  %v25751_v9 = vld [vmem:[%s26972_s0 + $0x60] sm:$0xff] }
 0xaf2   :  { %v23056_v52 = vpop.eup %23055 }
 0xaf3   :  { %v10434_v13 = vmul.f32 %v23056_v52, %v25460_v26  ;;  %v10435_v60 = vmul.f32 %v23056_v52, %v25462_v30  ;;  %v18754_v26 = vld [vmem:[%s26973_s2 + $0x14] sm:$0xf] }
 0xaf4   :  { %v18714_v30 = vld [vmem:[%s26975_s4 + $0x90] sm:$0xff] }
 0xaf5   :  { %21256 = vmatprep.mubr.msk.f32.mxu0 %vm1248_vm3, %v10434_v13  ;;  %v25765_v13 = vld [vmem:[%s26972_s0 + $0x70] sm:$0xff] }
 0xaf6   :  { %v23058_v57 = vpop.eup %23057  ;;  %21257 = vmatmul.mubr.msk.f32.vlgmr.msra.gmra.mrb[172].mxu0 %vm1248_vm3, %v10435_v60 }
 0xaf7   :  { %v10436_v3 = vmul.f32 %v23058_v57, %v25468_v25  ;;  %v10437_v21 = vmul.f32 %v23058_v57, %v25472_v19  ;;  %22418 = vmatpush3.bf16.msra.mxu0 %v25362_v55  ;;  %v18715_v25 = vld [vmem:[%s26975_s4 + $0x98] sm:$0xff] }
 0xaf8   :  { %22421 = vmatprep.subr.msk.bf16.mxu0 %vm23529_vm2, %v22419_v62  ;;  %v22425_v59 = vpack.c.bf16 %v18715_v25, %v18714_v30 }
 0xaf9   :  { %21263 = vmatprep.mubr.msk.f32.mxu1 %vm1248_vm3, %v10436_v3  ;;  %v25774_v3 = vld [vmem:[%s26972_s0 + $0x78] sm:$0xff] }
 0xafa   :  { %21264 = vmatmul.mubr.msk.f32.vlgmr.msra.gmra.mrb[238].mxu1 %vm1248_vm3, %v10437_v21 }
 0xafb   :  { %v23060_v55 = vpop.eup %23059  ;;  %21306 = vmatpush3.xpose.msk.msra.mxu1 %vm40_vm0, %v18736_v28  ;;  %21307 = vmatprep.mubr.msk.f32.mxu1 %vm40_vm0, %v25122_v48  ;;  %v25742_v28 = vld [vmem:[%s26972_s0 + $0x58] sm:$0xff] }
 0xafc   :  { %v10438_v19 = vmul.f32 %v23060_v55, %v25478_v51  ;;  %v10439_v33 = vmul.f32 %v23060_v55, %v25481_v12  ;;  %21331 = vmatprep.subr.msk.mxu1 %vm40_vm0, %v18754_v26 }
 0xafe   :  { %21308 = vmatmul.mubr.msk.f32.vlgmr.msra.gmra.mrb[240].mxu1 %vm40_vm0, %v25129_v38  ;;  %21270 = vmatprep.mubr.msk.f32.mxu0 %vm1248_vm3, %v10438_v19 }
 0xaff   :  { %21310 = vmatprep.mubr.msk.f32.mxu1 %vm40_vm0, %v25136_v54  ;;  %21271 = vmatmul.mubr.msk.f32.vlgmr.msra.gmra.mrb[174].mxu0 %vm1248_vm3, %v10439_v33 }
 0xb00   :  { %21332 = vmatpush3.xpose.msk.msra.mxu1 %vm40_vm0, %v18754_v26  ;;  %22424 = vmatpush3.bf16.xpose.msk.msra.mxu0 %vm23529_vm2, %v22419_v62 }
 0xb01   :  { %22427 = vmatprep.subr.msk.bf16.mxu0 %vm23529_vm2, %v22425_v59 }
 0xb02   :  { %21311 = vmatmul.mubr.msk.f32.gmra.mrb[242].mxu1 %vm40_vm0, %v25143_v41 }
 0xb03   :  { %21313 = vmatprep.mubr.msk.f32.mxu1 %vm40_vm0, %v25150_v42 }
 0xb06   :  { %21314 = vmatmul.mubr.msk.f32.gmra.mrb[244].mxu1 %vm40_vm0, %v25157_v10 }
 0xb07   :  { %21316 = vmatprep.mubr.msk.f32.mxu1 %vm40_vm0, %v25164_v47 }
 0xb08   :  { %22430 = vmatpush3.bf16.xpose.msk.msra.mxu0 %vm23529_vm2, %v22425_v59 }
 0xb0a   :  { %21317 = vmatmul.mubr.msk.f32.gmra.mrb[246].mxu1 %vm40_vm0, %v25171_v36 }
 0xb0b   :  { %21319 = vmatprep.mubr.msk.f32.mxu1 %vm40_vm0, %v25178_v2 }
 0xb0e   :  { %21320 = vmatmul.mubr.msk.f32.gmra.mrb[248].mxu1 %vm40_vm0, %v25185_v46 }
 0xb0f   :  { %21322 = vmatprep.mubr.msk.f32.mxu1 %vm40_vm0, %v25192_v63 }
 0xb12   :  { %21323 = vmatmul.mubr.msk.f32.gmra.mrb[250].mxu1 %vm40_vm0, %v25199_v6 }
 0xb13   :  { %21325 = vmatprep.mubr.msk.f32.mxu1 %vm40_vm0, %v25206_v45 }
 0xb16   :  { %21326 = vmatmul.mubr.msk.f32.gmra.mrb[252].mxu1 %vm40_vm0, %v25213_v27 }
 0xb17   :  { %21328 = vmatprep.mubr.msk.f32.mxu1 %vm40_vm0, %v25220_v49 }
 0xb1a   :  { %21329 = vmatmul.mubr.msk.f32.gmra.mrb[254].mxu1 %vm40_vm0, %v25227_v24 }
 0xb1b   :  { %21333 = vmatprep.mubr.msk.f32.mxu1 %vm40_vm0, %v25122_v48  ;;  %v18772_v48 = vld [vmem:[%s26974_s3 + $0x14] sm:$0xf] }
 0xb1c   :  { %21357 = vmatprep.subr.msk.mxu0 %vm40_vm0, %v18772_v48 }
 0xb1e   :  { %21334 = vmatmul.mubr.msk.f32.vlgmr.msra.gmra.mrb[0].mxu1 %vm40_vm0, %v25129_v38 }
 0xb1f   :  { %21336 = vmatprep.mubr.msk.f32.mxu1 %vm40_vm0, %v25136_v54 }
 0xb22   :  { %21337 = vmatmul.mubr.msk.f32.gmra.mrb[2].mxu1 %vm40_vm0, %v25143_v41 }
 0xb23   :  { %21339 = vmatprep.mubr.msk.f32.mxu1 %vm40_vm0, %v25150_v42 }
 0xb26   :  { %21340 = vmatmul.mubr.msk.f32.gmra.mrb[4].mxu1 %vm40_vm0, %v25157_v10 }
 0xb27   :  { %21342 = vmatprep.mubr.msk.f32.mxu1 %vm40_vm0, %v25164_v47 }
 0xb2a   :  { %21343 = vmatmul.mubr.msk.f32.gmra.mrb[6].mxu1 %vm40_vm0, %v25171_v36 }
 0xb2b   :  { %21345 = vmatprep.mubr.msk.f32.mxu1 %vm40_vm0, %v25178_v2 }
 0xb2e   :  { %21346 = vmatmul.mubr.msk.f32.gmra.mrb[8].mxu1 %vm40_vm0, %v25185_v46 }
 0xb2f   :  { %21348 = vmatprep.mubr.msk.f32.mxu1 %vm40_vm0, %v25192_v63 }
 0xb32   :  { %21349 = vmatmul.mubr.msk.f32.gmra.mrb[10].mxu1 %vm40_vm0, %v25199_v6 }
 0xb33   :  { %21351 = vmatprep.mubr.msk.f32.mxu1 %vm40_vm0, %v25206_v45 }
 0xb36   :  { %21352 = vmatmul.mubr.msk.f32.gmra.mrb[12].mxu1 %vm40_vm0, %v25213_v27 }
 0xb37   :  { %21354 = vmatprep.mubr.msk.f32.mxu1 %vm40_vm0, %v25220_v49 }
 0xb3a   :  { %21355 = vmatmul.mubr.msk.f32.gmra.mrb[14].mxu1 %vm40_vm0, %v25227_v24 }
 0xbb4   :  { %v21223_v38 = vpop.f32.mrb[166].mxu0 }
 0xbb5   :  { %v10512_v54 = vpop.f32.mrb[167].mxu0 }
 0xbb6   :  { %21281 = vmatprep.mubr.msk.f32.mxu0 %vm551_vm1, %v10512_v54 }
 0xbb7   :  { %21282 = vmatmul.mubr.msk.f32.vlgmr.msra.gmra.mrb[78].mxu0 %vm551_vm1, %v21223_v38 }
 0xbb8   :  { %21358 = vmatpush3.xpose.msk.msra.mxu0 %vm40_vm0, %v18772_v48 }
 0xbb9   :  { %v21230_v41 = vpop.f32.mrb[168].mxu0 }
 0xbba   :  { %v21237_v42 = vpop.f32.mrb[234].mxu1  ;;  %v10593_v10 = vpop.f32.mrb[169].mxu0 }
 0xbbb   :  { %v10674_v47 = vpop.f32.mrb[235].mxu1  ;;  %21284 = vmatprep.mubr.msk.f32.mxu0 %vm551_vm1, %v10593_v10 }
 0xbbc   :  { %21285 = vmatmul.mubr.msk.f32.gmra.mrb[80].mxu0 %vm551_vm1, %v21230_v41 }
 0xbbd   :  { %21287 = vmatprep.mubr.msk.f32.mxu0 %vm551_vm1, %v10674_v47 }
 0xbbe   :  { %v21244_v36 = vpop.f32.mrb[170].mxu0 }
 0xbbf   :  { %v10755_v2 = vpop.f32.mrb[171].mxu0 }
 0xbc0   :  { %21288 = vmatmul.mubr.msk.f32.gmra.mrb[82].mxu0 %vm551_vm1, %v21237_v42  ;;  %v21251_v46 = vpop.f32.mrb[236].mxu1 }
 0xbc1   :  { %v10836_v63 = vpop.f32.mrb[237].mxu1  ;;  %21290 = vmatprep.mubr.msk.f32.mxu0 %vm551_vm1, %v10755_v2 }
 0xbc4   :  { %21291 = vmatmul.mubr.msk.f32.gmra.mrb[84].mxu0 %vm551_vm1, %v21244_v36 }
 0xbc5   :  { %21293 = vmatprep.mubr.msk.f32.mxu0 %vm551_vm1, %v10836_v63 }
 0xbc8   :  { %21294 = vmatmul.mubr.msk.f32.gmra.mrb[86].mxu0 %vm551_vm1, %v21251_v46 }
 0xbc9   :  { %v21258_v6 = vpop.f32.mrb[172].mxu0 }
 0xbca   :  { %v10917_v45 = vpop.f32.mrb[173].mxu0 }
 0xbcb   :  { %21296 = vmatprep.mubr.msk.f32.mxu0 %vm551_vm1, %v10917_v45 }
 0xbcc   :  { %21297 = vmatmul.mubr.msk.f32.gmra.mrb[88].mxu0 %vm551_vm1, %v21258_v6 }
 0xbcd   :  { %v21265_v27 = vpop.f32.mrb[238].mxu1 }
 0xbce   :  { %v10998_v49 = vpop.f32.mrb[239].mxu1 }
 0xbcf   :  { %21299 = vmatprep.mubr.msk.f32.mxu0 %vm551_vm1, %v10998_v49 }
 0xbd0   :  { %21300 = vmatmul.mubr.msk.f32.gmra.mrb[90].mxu0 %vm551_vm1, %v21265_v27 }
 0xbd1   :  { %v25639_v24 = vpop.f32.mrb[240].mxu1 }
 0xbd2   :  { %v11385_v51 = vpop.f32.mrb[241].mxu1  ;;  %v21272_v12 = vpop.f32.mrb[174].mxu0  ;;  %v11465_v55 = vmul.f32 0.5, %v25639_v24 }
 0xbd3   :  { %v11464_v31 = vmul.f32 0.5, %v11385_v51  ;;  %v11079_v35 = vpop.f32.mrb[175].mxu0 }
 0xbd4   :  { %21302 = vmatprep.mubr.msk.f32.mxu0 %vm551_vm1, %v11079_v35 }
 0xbd5   :  { %v25642_v5 = vpop.f32.mrb[242].mxu1  ;;  %21387 = vmatprep.mubr.msk.f32.mxu1 %vm551_vm1, %v11464_v31  ;;  %21303 = vmatmul.mubr.msk.f32.gmra.mrb[92].mxu0 %vm551_vm1, %v21272_v12 }
 0xbd6   :  { %v11395_v7 = vpop.f32.mrb[243].mxu1  ;;  %21359 = vmatprep.mubr.msk.f32.mxu0 %vm40_vm0, %v25649_v56  ;;  %v11467_v42 = vmul.f32 0.5, %v25642_v5 }
 0xbd7   :  { %v11466_v33 = vmul.f32 0.5, %v11395_v7 }
 0xbd9   :  { %v25653_v17 = vpop.f32.mrb[244].mxu1  ;;  %21360 = vmatmul.mubr.msk.f32.vlgmr.msra.gmra.mrb[176].mxu0 %vm40_vm0, %v25658_v32 }
 0xbda   :  { %v11405_v50 = vpop.f32.mrb[245].mxu1  ;;  %21362 = vmatprep.mubr.msk.f32.mxu0 %vm40_vm0, %v25665_v23  ;;  %v11469_v47 = vmul.f32 0.5, %v25653_v17 }
 0xbdb   :  { %v11468_v62 = vmul.f32 0.5, %v11405_v50 }
 0xbdd   :  { %v25669_v34 = vpop.f32.mrb[246].mxu1  ;;  %21363 = vmatmul.mubr.msk.f32.gmra.mrb[178].mxu0 %vm40_vm0, %v25674_v11 }
 0xbde   :  { %v11415_v53 = vpop.f32.mrb[247].mxu1  ;;  %21365 = vmatprep.mubr.msk.f32.mxu0 %vm40_vm0, %v25681_v16  ;;  %v11471_v49 = vmul.f32 0.5, %v25669_v34 }
 0xbdf   :  { %v11470_v36 = vmul.f32 0.5, %v11415_v53 }
 0xbe1   :  { %v25685_v61 = vpop.f32.mrb[248].mxu1  ;;  %21366 = vmatmul.mubr.msk.f32.gmra.mrb[180].mxu0 %vm40_vm0, %v25690_v44 }
 0xbe2   :  { %v11425_v0 = vpop.f32.mrb[249].mxu1  ;;  %21368 = vmatprep.mubr.msk.f32.mxu0 %vm40_vm0, %v25697_v22  ;;  %v11473_v51 = vmul.f32 0.5, %v25685_v61 }
 0xbe3   :  { %v11472_v46 = vmul.f32 0.5, %v11425_v0 }
 0xbe5   :  { %v25701_v37 = vpop.f32.mrb[250].mxu1  ;;  %21369 = vmatmul.mubr.msk.f32.gmra.mrb[182].mxu0 %vm40_vm0, %v25706_v20 }
 0xbe6   :  { %v25710_v18 = vpop.f32.mrb[251].mxu1  ;;  %21371 = vmatprep.mubr.msk.f32.mxu0 %vm40_vm0, %v25715_v43  ;;  %v11475_v17 = vmul.f32 0.5, %v25701_v37 }
 0xbe7   :  { %v11474_v12 = vmul.f32 0.5, %v25710_v18 }
 0xbe9   :  { %v25719_v58 = vpop.f32.mrb[252].mxu1  ;;  %21372 = vmatmul.mubr.msk.f32.gmra.mrb[184].mxu0 %vm40_vm0, %v25724_v1 }
 0xbea   :  { %v25728_v14 = vpop.f32.mrb[253].mxu1  ;;  %21374 = vmatprep.mubr.msk.f32.mxu0 %vm40_vm0, %v25733_v15  ;;  %v11477_v50 = vmul.f32 0.5, %v25719_v58 }
 0xbeb   :  { %v11476_v35 = vmul.f32 0.5, %v25728_v14 }
 0xbed   :  { %v25737_v8 = vpop.f32.mrb[254].mxu1  ;;  %21375 = vmatmul.mubr.msk.f32.gmra.mrb[186].mxu0 %vm40_vm0, %v25742_v28 }
 0xbee   :  { %v25746_v4 = vpop.f32.mrb[255].mxu1  ;;  %21377 = vmatprep.mubr.msk.f32.mxu0 %vm40_vm0, %v25751_v9  ;;  %v11479_v53 = vmul.f32 0.5, %v25737_v8 }
 0xbef   :  { %v11478_v34 = vmul.f32 0.5, %v25746_v4 }
 0xbf1   :  { %v21335_v29 = vpop.f32.mrb[0].mxu1  ;;  %21378 = vmatmul.mubr.msk.f32.gmra.mrb[188].mxu0 %vm40_vm0, %v25758_v39 }
 0xbf2   :  { %v11551_v52 = vpop.f32.mrb[1].mxu1  ;;  %21380 = vmatprep.mubr.msk.f32.mxu0 %vm40_vm0, %v25765_v13 }
 0xbf3   :  { %v22431_v60 = vpack.c.bf16 %v21335_v29, %v11551_v52 }
 0xbf5   :  { %22433 = vmatprep.subr.msk.bf16.mxu1 %vm23529_vm2, %v22431_v60  ;;  %v21338_v57 = vpop.f32.mrb[2].mxu1  ;;  %21381 = vmatmul.mubr.msk.f32.gmra.mrb[190].mxu0 %vm40_vm0, %v25774_v3 }
 0xbf6   :  { %22436 = vmatpush3.bf16.xpose.msk.msra.mxu1 %vm23529_vm2, %v22431_v60  ;;  %v11561_v21 = vpop.f32.mrb[3].mxu1  ;;  %21401 = vmatprep.mubr.msk.f32.mxu0 %vm551_vm1, %v11468_v62 }
 0xbf7   :  { %v22437_v26 = vpack.c.bf16 %v21338_v57, %v11561_v21 }
 0xbf9   :  { %v21341_v30 = vpop.f32.mrb[4].mxu1  ;;  %22439 = vmatprep.subr.msk.bf16.mxu1 %vm23529_vm2, %v22437_v26 }
 0xbfa   :  { %v11571_v25 = vpop.f32.mrb[5].mxu1 }
 0xbfb   :  { %v22443_v19 = vpack.c.bf16 %v21341_v30, %v11571_v25 }
 0xbfd   :  { %21388 = vmatmul.mubr.msk.f32.vlgmr.msra.gmra.mrb[16].mxu1 %vm551_vm1, %v11465_v55  ;;  %22445 = vmatprep.subr.msk.bf16.mxu0 %vm23529_vm2, %v22443_v19  ;;  %v21344_v59 = vpop.f32.mrb[6].mxu1 }
 0xbfe   :  { %22442 = vmatpush3.bf16.xpose.msk.msra.mxu1 %vm23529_vm2, %v22437_v26  ;;  %21394 = vmatprep.mubr.msk.f32.mxu1 %vm551_vm1, %v11466_v33  ;;  %v11581_v48 = vpop.f32.mrb[7].mxu1 }
 0xbff   :  { %22448 = vmatpush3.bf16.xpose.msk.msra.mxu0 %vm23529_vm2, %v22443_v19  ;;  %v22449_v38 = vpack.c.bf16 %v21344_v59, %v11581_v48 }
 0xc01   :  { %v21347_v54 = vpop.f32.mrb[8].mxu1  ;;  %22451 = vmatprep.subr.msk.bf16.mxu1 %vm23529_vm2, %v22449_v38 }
 0xc02   :  { %v11591_v41 = vpop.f32.mrb[9].mxu1 }
 0xc03   :  { %v22455_v10 = vpack.c.bf16 %v21347_v54, %v11591_v41 }
 0xc05   :  { %21395 = vmatmul.mubr.msk.f32.vlgmr.msra.gmra.mrb[18].mxu1 %vm551_vm1, %v11467_v42  ;;  %22457 = vmatprep.subr.msk.bf16.mxu0 %vm23529_vm2, %v22455_v10  ;;  %v21350_v2 = vpop.f32.mrb[10].mxu1 }
 0xc06   :  { %21402 = vmatmul.mubr.msk.f32.vlgmr.msra.gmra.mrb[192].mxu0 %vm551_vm1, %v11469_v47  ;;  %22454 = vmatpush3.bf16.xpose.msk.msra.mxu1 %vm23529_vm2, %v22449_v38  ;;  %v11601_v63 = vpop.f32.mrb[11].mxu1 }
 0xc07   :  { %21408 = vmatprep.mubr.msk.f32.mxu1 %vm551_vm1, %v11470_v36  ;;  %22460 = vmatpush3.bf16.xpose.msk.msra.mxu0 %vm23529_vm2, %v22455_v10  ;;  %v22461_v6 = vpack.c.bf16 %v21350_v2, %v11601_v63 }
 0xc08   :  { %21415 = vmatprep.mubr.msk.f32.mxu0 %vm551_vm1, %v11472_v46 }
 0xc09   :  { %v21353_v45 = vpop.f32.mrb[12].mxu1  ;;  %22463 = vmatprep.subr.msk.bf16.mxu1 %vm23529_vm2, %v22461_v6 }
 0xc0a   :  { %v11611_v27 = vpop.f32.mrb[13].mxu1 }
 0xc0b   :  { %v22467_v24 = vpack.c.bf16 %v21353_v45, %v11611_v27 }
 0xc0d   :  { %21409 = vmatmul.mubr.msk.f32.vlgmr.msra.gmra.mrb[20].mxu1 %vm551_vm1, %v11471_v49  ;;  %22469 = vmatprep.subr.msk.bf16.mxu0 %vm23529_vm2, %v22467_v24  ;;  %v21356_v31 = vpop.f32.mrb[14].mxu1 }
 0xc0e   :  { %21416 = vmatmul.mubr.msk.f32.vlgmr.msra.gmra.mrb[194].mxu0 %vm551_vm1, %v11473_v51  ;;  %22466 = vmatpush3.bf16.xpose.msk.msra.mxu1 %vm23529_vm2, %v22461_v6  ;;  %v11621_v5 = vpop.f32.mrb[15].mxu1 }
 0xc0f   :  { %21422 = vmatprep.mubr.msk.f32.mxu1 %vm551_vm1, %v11474_v12  ;;  %22472 = vmatpush3.bf16.xpose.msk.msra.mxu0 %vm23529_vm2, %v22467_v24  ;;  %v22473_v7 = vpack.c.bf16 %v21356_v31, %v11621_v5 }
 0xc10   :  { %21429 = vmatprep.mubr.msk.f32.mxu0 %vm551_vm1, %v11476_v35 }
 0xc11   :  { %22475 = vmatprep.subr.msk.bf16.mxu1 %vm23529_vm2, %v22473_v7 }
 0xc15   :  { %21423 = vmatmul.mubr.msk.f32.vlgmr.msra.gmra.mrb[22].mxu1 %vm551_vm1, %v11475_v17 }
 0xc16   :  { %21430 = vmatmul.mubr.msk.f32.vlgmr.msra.gmra.mrb[196].mxu0 %vm551_vm1, %v11477_v50  ;;  %22478 = vmatpush3.bf16.xpose.msk.msra.mxu1 %vm23529_vm2, %v22473_v7 }
 0xc17   :  { %21436 = vmatprep.mubr.msk.f32.mxu1 %vm551_vm1, %v11478_v34 }
 0xc1d   :  { %21437 = vmatmul.mubr.msk.f32.vlgmr.msra.gmra.mrb[24].mxu1 %vm551_vm1, %v11479_v53 }
 0xcac   :  { %v21361_v61 = vpop.f32.mrb[176].mxu0 }
 0xcad   :  { %v11701_v0 = vpop.f32.mrb[177].mxu0 }
 0xcae   :  { %v22479_v37 = vpack.c.bf16 %v21361_v61, %v11701_v0 }
 0xcb0   :  { %v21364_v18 = vpop.f32.mrb[178].mxu0  ;;  %22480 = vmatprep.subr.bf16.mxu0 %v22479_v37 }
 0xcb1   :  { %v11711_v58 = vpop.f32.mrb[179].mxu0  ;;  %22482 = vmatpush3.bf16.msra.mxu0 %v22479_v37 }
 0xcb2   :  { %v22483_v14 = vpack.c.bf16 %v21364_v18, %v11711_v58 }
 0xcb4   :  { %v21367_v4 = vpop.f32.mrb[180].mxu0  ;;  %22484 = vmatprep.subr.bf16.mxu1 %v22483_v14 }
 0xcb5   :  { %v11721_v29 = vpop.f32.mrb[181].mxu0  ;;  %22486 = vmatpush3.bf16.msra.mxu1 %v22483_v14 }
 0xcb6   :  { %v25834_v52 = vpack.c.bf16 %v21367_v4, %v11721_v29 }
 0xcb8   :  { %v21370_v60 = vpop.f32.mrb[182].mxu0  ;;  %22488 = vmatprep.subr.bf16.mxu0 %v25834_v52 }
 0xcb9   :  { %v11731_v8 = vpop.f32.mrb[183].mxu0 }
 0xcba   :  { %v25837_v62 = vpack.c.bf16 %v21370_v60, %v11731_v8 }
 0xcbc   :  { %v21373_v57 = vpop.f32.mrb[184].mxu0  ;;  %22492 = vmatprep.subr.bf16.mxu1 %v25837_v62 }
 0xcbd   :  { %v11741_v21 = vpop.f32.mrb[185].mxu0 }
 0xcbe   :  { %v25840_v26 = vpack.c.bf16 %v21373_v57, %v11741_v21 }
 0xcc0   :  { %v21376_v30 = vpop.f32.mrb[186].mxu0 }
 0xcc1   :  { %v11751_v25 = vpop.f32.mrb[187].mxu0 }
 0xcc2   :  { %v25842_v55 = vpack.c.bf16 %v21376_v30, %v11751_v25 }
 0xcc4   :  { %v21379_v19 = vpop.f32.mrb[188].mxu0 }
 0xcc5   :  { %v11761_v33 = vpop.f32.mrb[189].mxu0 }
 0xcc6   :  { %v25844_v59 = vpack.c.bf16 %v21379_v19, %v11761_v33 }
 0xcc8   :  { %v21382_v48 = vpop.f32.mrb[190].mxu0 }
 0xcc9   :  { %v11771_v38 = vpop.f32.mrb[191].mxu0 }
 0xcca   :  { %v25846_v54 = vpack.c.bf16 %v21382_v48, %v11771_v38 }
 0xcd0   :  { %v21389_v41 = vpop.f32.mrb[16].mxu1 }
 0xcd1   :  { %v12477_v42 = vsel %vm1248_vm3, %v21389_v41, -inf  ;;  %v11858_v10 = vpop.f32.mrb[17].mxu1 }
 0xcd2   :  { %v12476_v47 = vsel %vm1248_vm3, %v11858_v10, -inf }
 0xcd3   :  { %v12478_v36 = vmax.f32 %v12476_v47, %v12477_v42 }
 0xcd5   :  { %v12479_v2 = vrot.slane %v12478_v36, 4 }
 0xcd7   :  { %v12480_v46 = vmax.f32 %v12478_v36, %v12479_v2 }
 0xcd8   :  { %v21396_v63 = vpop.f32.mrb[18].mxu1 }
 0xcd9   :  { %v12481_v6 = vrot.slane %v12480_v46, 2  ;;  %v12486_v45 = vsel %vm1248_vm3, %v21396_v63, -inf  ;;  %v21403_v27 = vpop.f32.mrb[192].mxu0  ;;  %v11945_v49 = vpop.f32.mrb[19].mxu1 }
 0xcda   :  { %v12495_v24 = vsel %vm1248_vm3, %v21403_v27, -inf  ;;  %v12485_v51 = vsel %vm1248_vm3, %v11945_v49, -inf  ;;  %v12032_v12 = vpop.f32.mrb[193].mxu0 }
 0xcdb   :  { %v12482_v31 = vmax.f32 %v12480_v46, %v12481_v6  ;;  %v12487_v35 = vmax.f32 %v12485_v51, %v12486_v45  ;;  %v12494_v5 = vsel %vm1248_vm3, %v12032_v12, -inf }
 0xcdc   :  { %v12496_v7 = vmax.f32 %v12494_v5, %v12495_v24 }
 0xcdd   :  { %v12483_v17 = vrot.slane %v12482_v31, 1  ;;  %v12488_v50 = vrot.slane %v12487_v35, 4 }
 0xcde   :  { %v12497_v34 = vrot.slane %v12496_v7, 4 }
 0xcdf   :  { %v12484_v53 = vmax.f32 %v12482_v31, %v12483_v17  ;;  %v12489_v61 = vmax.f32 %v12487_v35, %v12488_v50 }
 0xce0   :  { %v12498_v0 = vmax.f32 %v12496_v7, %v12497_v34  ;;  %v25854_v37 = vpop.f32.mrb[20].mxu1 }
 0xce1   :  { %v12548_v18 = vsub.f32 %v11858_v10, %v12484_v53  ;;  %v12549_v58 = vsub.f32 %v21389_v41, %v12484_v53  ;;  %v12490_v14 = vrot.slane %v12489_v61, 2  ;;  %v12504_v4 = vsel %vm1248_vm3, %v25854_v37, -inf  ;;  %v25858_v29 = vpop.f32.mrb[194].mxu0  ;;  %v25860_v60 = vpop.f32.mrb[21].mxu1 }
 0xce2   :  { %v12499_v8 = vrot.slane %v12498_v0, 2  ;;  %v12513_v57 = vsel %vm1248_vm3, %v25858_v29, -inf  ;;  %v12503_v21 = vsel %vm1248_vm3, %v25860_v60, -inf  ;;  %v25866_v30 = vpop.f32.mrb[195].mxu0 }
 0xce3   :  { %v12564_v25 = vmul.f32 1.442695, %v12548_v18  ;;  %v12566_v19 = vmul.f32 1.442695, %v12549_v58  ;;  %v12491_v33 = vmax.f32 %v12489_v61, %v12490_v14  ;;  %v12505_v48 = vmax.f32 %v12503_v21, %v12504_v4 }
 0xce4   :  { %v12500_v38 = vmax.f32 %v12498_v0, %v12499_v8  ;;  %v12512_v41 = vsel %vm1248_vm3, %v25866_v30, -inf }
 0xce5   :  { %23061 = vpow2.f32 %v12564_v25  ;;  %v12492_v42 = vrot.slane %v12491_v33, 1  ;;  %v12506_v10 = vrot.slane %v12505_v48, 4  ;;  %v12514_v47 = vmax.f32 %v12512_v41, %v12513_v57 }
 0xce6   :  { %23063 = vpow2.f32 %v12566_v19  ;;  %v12501_v36 = vrot.slane %v12500_v38, 1 }
 0xce7   :  { %v12493_v2 = vmax.f32 %v12491_v33, %v12492_v42  ;;  %v12507_v46 = vmax.f32 %v12505_v48, %v12506_v10  ;;  %v12515_v6 = vrot.slane %v12514_v47, 4 }
 0xce8   :  { %v12502_v45 = vmax.f32 %v12500_v38, %v12501_v36  ;;  %v25870_v24 = vpop.f32.mrb[22].mxu1 }
 0xce9   :  { %v12550_v51 = vsub.f32 %v11945_v49, %v12493_v2  ;;  %v12551_v31 = vsub.f32 %v21396_v63, %v12493_v2  ;;  %v12508_v35 = vrot.slane %v12507_v46, 2  ;;  %v12516_v5 = vmax.f32 %v12514_v47, %v12515_v6  ;;  %v25872_v7 = vpop.f32.mrb[196].mxu0  ;;  %v25874_v17 = vpop.f32.mrb[23].mxu1 }
 0xcea   :  { %v12552_v50 = vsub.f32 %v12032_v12, %v12502_v45  ;;  %v12553_v34 = vsub.f32 %v21403_v27, %v12502_v45  ;;  %v12522_v53 = vsel %vm1248_vm3, %v25870_v24, -inf  ;;  %v12531_v61 = vsel %vm1248_vm3, %v25872_v7, -inf  ;;  %v25880_v0 = vpop.f32.mrb[197].mxu0 }
 0xceb   :  { %v12568_v18 = vmul.f32 1.442695, %v12550_v51  ;;  %v12570_v58 = vmul.f32 1.442695, %v12551_v31  ;;  %v12509_v49 = vmax.f32 %v12507_v46, %v12508_v35  ;;  %v12517_v63 = vrot.slane %v12516_v5, 2 }
 0xcec   :  { %v12572_v14 = vmul.f32 1.442695, %v12552_v50  ;;  %v12574_v4 = vmul.f32 1.442695, %v12553_v34  ;;  %v12521_v8 = vsel %vm1248_vm3, %v25874_v17, -inf  ;;  %v12530_v27 = vsel %vm1248_vm3, %v25880_v0, -inf }
 0xced   :  { %23065 = vpow2.f32 %v12568_v18  ;;  %v12510_v12 = vrot.slane %v12509_v49, 1  ;;  %v12518_v57 = vmax.f32 %v12516_v5, %v12517_v63  ;;  %v12523_v21 = vmax.f32 %v12521_v8, %v12522_v53 }
 0xcee   :  { %23067 = vpow2.f32 %v12570_v58  ;;  %v12532_v25 = vmax.f32 %v12530_v27, %v12531_v61 }
 0xcef   :  { %v25886_v19 = vpop.eup %23061  ;;  %23069 = vpow2.f32 %v12572_v14  ;;  %v12511_v33 = vmax.f32 %v12509_v49, %v12510_v12  ;;  %v12519_v48 = vrot.slane %v12518_v57, 1  ;;  %v12524_v38 = vrot.slane %v12523_v21, 4 }
 0xcf0   :  { %v25888_v41 = vpop.eup %23063  ;;  %v12596_v42 = vsel %vm1248_vm3, %v25886_v19, 0.0  ;;  %23071 = vpow2.f32 %v12574_v4  ;;  %v12533_v10 = vrot.slane %v12532_v25, 4  ;;  %v25892_v47 = vpop.f32.mrb[24].mxu1 }
 0xcf1   :  { %v12597_v36 = vsel %vm1248_vm3, %v25888_v41, 0.0  ;;  %v12554_v2 = vsub.f32 %v25860_v60, %v12511_v33  ;;  %v12555_v46 = vsub.f32 %v25854_v37, %v12511_v33  ;;  %v12520_v6 = vmax.f32 %v12518_v57, %v12519_v48  ;;  %v25898_v45 = vpop.f32.mrb[25].mxu1 }
 0xcf2   :  { %v12598_v51 = vadd.f32 %v12597_v36, %v12596_v42  ;;  %v12525_v31 = vmax.f32 %v12523_v21, %v12524_v38  ;;  %v12534_v35 = vmax.f32 %v12532_v25, %v12533_v10  ;;  %v12540_v5 = vsel %vm1248_vm3, %v25892_v47, -inf }
 0xcf3   :  { %v12576_v50 = vmul.f32 1.442695, %v12554_v2  ;;  %v12578_v34 = vmul.f32 1.442695, %v12555_v46  ;;  %v12556_v53 = vsub.f32 %v25866_v30, %v12520_v6  ;;  %v12557_v61 = vsub.f32 %v25858_v29, %v12520_v6 }
 0xcf4   :  { %v12599_v18 = vrot.slane %v12598_v51, 4  ;;  %v12526_v58 = vrot.slane %v12525_v31, 2  ;;  %v12535_v60 = vrot.slane %v12534_v35, 2  ;;  %v12539_v37 = vsel %vm1248_vm3, %v25898_v45, -inf }
 0xcf5   :  { %23073 = vpow2.f32 %v12576_v50  ;;  %v12580_v49 = vmul.f32 1.442695, %v12556_v53  ;;  %v12582_v63 = vmul.f32 1.442695, %v12557_v61  ;;  %v12541_v14 = vmax.f32 %v12539_v37, %v12540_v5 }
 0xcf6   :  { %v12600_v4 = vadd.f32 %v12599_v18, %v12598_v51  ;;  %23075 = vpow2.f32 %v12578_v34  ;;  %v12527_v8 = vmax.f32 %v12525_v31, %v12526_v58  ;;  %v12536_v27 = vmax.f32 %v12534_v35, %v12535_v60 }
 0xcf7   :  { %v25906_v12 = vpop.eup %23065  ;;  %23077 = vpow2.f32 %v12580_v49  ;;  %v12542_v30 = vrot.slane %v12541_v14, 4 }
 0xcf8   :  { %v25908_v57 = vpop.eup %23067  ;;  %v12601_v29 = vrot.slane %v12600_v4, 2  ;;  %v12605_v21 = vsel %vm1248_vm3, %v25906_v12, 0.0  ;;  %23079 = vpow2.f32 %v12582_v63  ;;  %v12528_v25 = vrot.slane %v12527_v8, 1 }
 0xcf9   :  { %v25912_v33 = vpop.eup %23069  ;;  %v12606_v48 = vsel %vm1248_vm3, %v25908_v57, 0.0  ;;  %v12537_v38 = vrot.slane %v12536_v27, 1  ;;  %v12543_v42 = vmax.f32 %v12541_v14, %v12542_v30 }
 0xcfa   :  { %v25916_v10 = vpop.eup %23071  ;;  %v12607_v36 = vadd.f32 %v12606_v48, %v12605_v21  ;;  %v12614_v2 = vsel %vm1248_vm3, %v25912_v33, 0.0  ;;  %v12529_v46 = vmax.f32 %v12527_v8, %v12528_v25  ;;  %v12602_v6 = vadd.f32 %v12601_v29, %v12600_v4 }
 0xcfb   :  { %v12615_v51 = vsel %vm1248_vm3, %v25916_v10, 0.0  ;;  %v12538_v31 = vmax.f32 %v12536_v27, %v12537_v38  ;;  %v12544_v35 = vrot.slane %v12543_v42, 2 }
 0xcfc   :  { %v12608_v5 = vrot.slane %v12607_v36, 4  ;;  %v12616_v50 = vadd.f32 %v12615_v51, %v12614_v2  ;;  %v12558_v34 = vsub.f32 %v25874_v17, %v12529_v46  ;;  %v12559_v53 = vsub.f32 %v25870_v24, %v12529_v46 }
 0xcfd   :  { %v12560_v61 = vsub.f32 %v25880_v0, %v12538_v31  ;;  %v12561_v18 = vsub.f32 %v25872_v7, %v12538_v31  ;;  %v12545_v58 = vmax.f32 %v12543_v42, %v12544_v35  ;;  %v12603_v14 = vrot.slane %v12602_v6, 1 }
 0xcfe   :  { %v12609_v60 = vadd.f32 %v12608_v5, %v12607_v36  ;;  %v12617_v37 = vrot.slane %v12616_v50, 4  ;;  %v12584_v49 = vmul.f32 1.442695, %v12558_v34  ;;  %v12586_v4 = vmul.f32 1.442695, %v12559_v53 }
 0xcff   :  { %v25926_v63 = vpop.eup %23073  ;;  %v12588_v8 = vmul.f32 1.442695, %v12560_v61  ;;  %v12590_v0 = vmul.f32 1.442695, %v12561_v18  ;;  %v12546_v21 = vrot.slane %v12545_v58, 1  ;;  %v12604_v51 = vadd.f32 %v12603_v14, %v12602_v6 }
 0xd00   :  { %v25928_v27 = vpop.eup %23075  ;;  %v12610_v30 = vrot.slane %v12609_v60, 2  ;;  %v12618_v29 = vadd.f32 %v12617_v37, %v12616_v50  ;;  %v12623_v24 = vsel %vm1248_vm3, %v25926_v63, 0.0  ;;  %23081 = vpow2.f32 %v12584_v49 }
 0xd01   :  { %v25932_v17 = vpop.eup %23077  ;;  %v12624_v7 = vsel %vm1248_vm3, %v25928_v27, 0.0  ;;  %23083 = vpow2.f32 %v12586_v4  ;;  %v12547_v46 = vmax.f32 %v12545_v58, %v12546_v21 }
 0xd02   :  { %v25936_v25 = vpop.eup %23079  ;;  %v12611_v48 = vadd.f32 %v12610_v30, %v12609_v60  ;;  %v12619_v38 = vrot.slane %v12618_v29, 2  ;;  %v12625_v42 = vadd.f32 %v12624_v7, %v12623_v24  ;;  %v12632_v36 = vsel %vm1248_vm3, %v25932_v17, 0.0 }
 0xd03   :  { %v12633_v2 = vsel %vm1248_vm3, %v25936_v25, 0.0  ;;  %23085 = vpow2.f32 %v12588_v8  ;;  %v12562_v34 = vsub.f32 %v25898_v45, %v12547_v46  ;;  %v12563_v53 = vsub.f32 %v25892_v47, %v12547_v46 }
 0xd04   :  { %v12612_v31 = vrot.slane %v12611_v48, 1  ;;  %v12620_v35 = vadd.f32 %v12619_v38, %v12618_v29  ;;  %v12626_v5 = vrot.slane %v12625_v42, 4  ;;  %v12634_v50 = vadd.f32 %v12633_v2, %v12632_v36 }
 0xd05   :  { %23087 = vpow2.f32 %v12590_v0  ;;  %v12592_v49 = vmul.f32 1.442695, %v12562_v34  ;;  %v12594_v4 = vmul.f32 1.442695, %v12563_v53 }
 0xd06   :  { %v12613_v61 = vadd.f32 %v12612_v31, %v12611_v48  ;;  %v12621_v18 = vrot.slane %v12620_v35, 1  ;;  %v12627_v60 = vadd.f32 %v12626_v5, %v12625_v42  ;;  %v12635_v37 = vrot.slane %v12634_v50, 4 }
 0xd07   :  { %23089 = vrcp.f32 %v12604_v51 }
 0xd08   :  { %23091 = vrcp.f32 %v12613_v61  ;;  %v12628_v8 = vrot.slane %v12627_v60, 2  ;;  %v12636_v58 = vadd.f32 %v12635_v37, %v12634_v50  ;;  %v12622_v6 = vadd.f32 %v12621_v18, %v12620_v35 }
 0xd09   :  { %23093 = vpow2.f32 %v12592_v49 }
 0xd0a   :  { %v25944_v14 = vpop.eup %23081  ;;  %v12629_v30 = vadd.f32 %v12628_v8, %v12627_v60  ;;  %v12637_v29 = vrot.slane %v12636_v58, 2  ;;  %23095 = vpow2.f32 %v12594_v4 }
 0xd0b   :  { %v25946_v45 = vpop.eup %23083  ;;  %v12641_v47 = vsel %vm1248_vm3, %v25944_v14, 0.0  ;;  %23097 = vrcp.f32 %v12622_v6 }
 0xd0c   :  { %v12630_v24 = vrot.slane %v12629_v30, 1  ;;  %v12638_v7 = vadd.f32 %v12637_v29, %v12636_v58  ;;  %v12642_v0 = vsel %vm1248_vm3, %v25946_v45, 0.0 }
 0xd0d   :  { %v25952_v21 = vpop.eup %23085  ;;  %v12643_v48 = vadd.f32 %v12642_v0, %v12641_v47 }
 0xd0e   :  { %v12631_v38 = vadd.f32 %v12630_v24, %v12629_v30  ;;  %v12639_v42 = vrot.slane %v12638_v7, 1  ;;  %v12650_v36 = vsel %vm1248_vm3, %v25952_v21, 0.0 }
 0xd0f   :  { %v25956_v2 = vpop.eup %23087  ;;  %v12644_v46 = vrot.slane %v12643_v48, 4 }
 0xd10   :  { %23099 = vrcp.f32 %v12631_v38  ;;  %v12651_v51 = vsel %vm1248_vm3, %v25956_v2, 0.0  ;;  %v12640_v31 = vadd.f32 %v12639_v42, %v12638_v7  ;;  %v18838_v42 = vld [vmem:[%s26975_s4 + $0xa0] sm:$0xff] }
 0xd11   :  { %v23090_v35 = vpop.eup %23089  ;;  %v12645_v5 = vadd.f32 %v12644_v46, %v12643_v48  ;;  %v12652_v50 = vadd.f32 %v12651_v51, %v12650_v36  ;;  %v18839_v36 = vld [vmem:[%s26975_s4 + $0xa8] sm:$0xff] }
 0xd12   :  { %v23092_v34 = vpop.eup %23091  ;;  %v12676_v53 = vmul.f32 %v23090_v35, %v25886_v19  ;;  %v12677_v61 = vmul.f32 %v23090_v35, %v25888_v41  ;;  %23101 = vrcp.f32 %v12640_v31 }
 0xd13   :  { %v25962_v18 = vpop.eup %23093  ;;  %v12679_v60 = vmul.f32 %v23092_v34, %v25908_v57  ;;  %v12646_v37 = vrot.slane %v12645_v5, 2  ;;  %v12653_v49 = vrot.slane %v12652_v50, 4  ;;  %v12678_v4 = vmul.f32 %v23092_v34, %v25906_v12 }
 0xd14   :  { %v25966_v8 = vpop.eup %23095  ;;  %v12659_v58 = vsel %vm1248_vm3, %v25962_v18, 0.0  ;;  %21443 = vmatprep.mubr.msk.f32.mxu0 %vm1248_vm3, %v12676_v53  ;;  %v18841_v53 = vld [vmem:[%s26975_s4 + $0xb8] sm:$0xff] }
 0xd15   :  { %v23098_v6 = vpop.eup %23097  ;;  %v12647_v19 = vadd.f32 %v12646_v37, %v12645_v5  ;;  %v12654_v30 = vadd.f32 %v12653_v49, %v12652_v50  ;;  %v12660_v41 = vsel %vm1248_vm3, %v25966_v8, 0.0  ;;  %21444 = vmatmul.mubr.msk.f32.vlgmr.msra.gmra.mrb[198].mxu0 %vm1248_vm3, %v12677_v61  ;;  %21450 = vmatprep.mubr.msk.f32.mxu1 %vm1248_vm3, %v12678_v4 }
 0xd16   :  { %v12661_v57 = vadd.f32 %v12660_v41, %v12659_v58  ;;  %22490 = vmatpush3.bf16.msra.mxu0 %v25834_v52  ;;  %v12680_v12 = vmul.f32 %v23098_v6, %v25912_v33  ;;  %21451 = vmatmul.mubr.msk.f32.vlgmr.msra.gmra.mrb[26].mxu1 %vm1248_vm3, %v12679_v60  ;;  %v12681_v29 = vmul.f32 %v23098_v6, %v25916_v10 }
 0xd17   :  { %v12648_v47 = vrot.slane %v12647_v19, 1  ;;  %v12655_v24 = vrot.slane %v12654_v30, 2  ;;  %22496 = vmatprep.subr.bf16.mxu0 %v25840_v26  ;;  %22494 = vmatpush3.bf16.msra.mxu1 %v25837_v62 }
 0xd18   :  { %v12662_v7 = vrot.slane %v12661_v57, 4  ;;  %21457 = vmatprep.mubr.msk.f32.mxu0 %vm1248_vm3, %v12680_v12  ;;  %22500 = vmatprep.subr.bf16.mxu1 %v25842_v55 }
 0xd19   :  { %v12649_v0 = vadd.f32 %v12648_v47, %v12647_v19  ;;  %v12656_v48 = vadd.f32 %v12655_v24, %v12654_v30  ;;  %21458 = vmatmul.mubr.msk.f32.vlgmr.msra.gmra.mrb[200].mxu0 %vm1248_vm3, %v12681_v29 }
 0xd1a   :  { %v23100_v52 = vpop.eup %23099  ;;  %v12663_v33 = vadd.f32 %v12662_v7, %v12661_v57  ;;  %22498 = vmatpush3.bf16.msra.mxu0 %v25840_v26 }
 0xd1b   :  { %v12683_v10 = vmul.f32 %v23100_v52, %v25928_v27  ;;  %23103 = vrcp.f32 %v12649_v0  ;;  %v12657_v38 = vrot.slane %v12656_v48, 1  ;;  %22504 = vmatprep.subr.bf16.mxu0 %v25844_v59  ;;  %v12682_v62 = vmul.f32 %v23100_v52, %v25926_v63 }
 0xd1c   :  { %v23102_v46 = vpop.eup %23101  ;;  %v12664_v51 = vrot.slane %v12663_v33, 2  ;;  %v22511_v63 = vpack.c.bf16 %v18839_v36, %v18838_v42 }
 0xd1d   :  { %21464 = vmatprep.mubr.msk.f32.mxu1 %vm1248_vm3, %v12682_v62  ;;  %v12684_v26 = vmul.f32 %v23102_v46, %v25932_v17  ;;  %v12685_v27 = vmul.f32 %v23102_v46, %v25936_v25  ;;  %v12658_v31 = vadd.f32 %v12657_v38, %v12656_v48 }
 0xd1e   :  { %v12665_v35 = vadd.f32 %v12664_v51, %v12663_v33  ;;  %21465 = vmatmul.mubr.msk.f32.vlgmr.msra.gmra.mrb[28].mxu1 %vm1248_vm3, %v12683_v10 }
 0xd1f   :  { %21471 = vmatprep.mubr.msk.f32.mxu0 %vm1248_vm3, %v12684_v26  ;;  %22502 = vmatpush3.bf16.msra.mxu1 %v25842_v55  ;;  %23105 = vrcp.f32 %v12658_v31  ;;  %v18862_v55 = vld [vmem:[%s26971_s1 + $0x18] sm:$0xf] }
 0xd20   :  { %v12666_v5 = vrot.slane %v12665_v35, 1  ;;  %21472 = vmatmul.mubr.msk.f32.vlgmr.msra.gmra.mrb[202].mxu0 %vm1248_vm3, %v12685_v27  ;;  %22508 = vmatprep.subr.bf16.mxu1 %v25846_v54 }
 0xd21   :  { %22506 = vmatpush3.bf16.msra.mxu0 %v25844_v59  ;;  %v18840_v59 = vld [vmem:[%s26975_s4 + $0xb0] sm:$0xff] }
 0xd22   :  { %v12667_v17 = vadd.f32 %v12666_v5, %v12665_v35  ;;  %22513 = vmatprep.subr.msk.bf16.mxu0 %vm23529_vm2, %v22511_v63  ;;  %v22517_v60 = vpack.c.bf16 %v18841_v53, %v18840_v59 }
 0xd24   :  { %23107 = vrcp.f32 %v12667_v17 }
 0xd25   :  { %v23104_v25 = vpop.eup %23103 }
 0xd26   :  { %v12687_v50 = vmul.f32 %v23104_v25, %v25946_v45  ;;  %v12686_v34 = vmul.f32 %v23104_v25, %v25944_v14 }
 0xd28   :  { %21478 = vmatprep.mubr.msk.f32.mxu1 %vm1248_vm3, %v12686_v34 }
 0xd29   :  { %v23106_v61 = vpop.eup %23105  ;;  %21479 = vmatmul.mubr.msk.f32.vlgmr.msra.gmra.mrb[30].mxu1 %vm1248_vm3, %v12687_v50 }
 0xd2a   :  { %v12688_v45 = vmul.f32 %v23106_v61, %v25952_v21  ;;  %v12689_v14 = vmul.f32 %v23106_v61, %v25956_v2  ;;  %22510 = vmatpush3.bf16.msra.mxu1 %v25846_v54  ;;  %v18880_v54 = vld [vmem:[%s26973_s2 + $0x18] sm:$0xf] }
 0xd2b   :  { %21527 = vmatprep.subr.msk.mxu1 %vm40_vm0, %v18862_v55  ;;  %v18898_v21 = vld [vmem:[%s26974_s3 + $0x18] sm:$0xf] }
 0xd2c   :  { %21485 = vmatprep.mubr.msk.f32.mxu0 %vm1248_vm3, %v12688_v45 }
 0xd2d   :  { %21486 = vmatmul.mubr.msk.f32.vlgmr.msra.gmra.mrb[204].mxu0 %vm1248_vm3, %v12689_v14 }
 0xd2e   :  { %v23108_v37 = vpop.eup %23107  ;;  %22516 = vmatpush3.bf16.xpose.msk.msra.mxu0 %vm23529_vm2, %v22511_v63 }
 0xd2f   :  { %v12691_v49 = vmul.f32 %v23108_v37, %v25966_v8  ;;  %v12690_v4 = vmul.f32 %v23108_v37, %v25962_v18  ;;  %22519 = vmatprep.subr.msk.bf16.mxu0 %vm23529_vm2, %v22517_v60 }
 0xd31   :  { %21492 = vmatprep.mubr.msk.f32.mxu1 %vm1248_vm3, %v12690_v4 }
 0xd32   :  { %21493 = vmatmul.mubr.msk.f32.vlgmr.msra.gmra.mrb[32].mxu1 %vm1248_vm3, %v12691_v49 }
 0xd33   :  { %21528 = vmatpush3.xpose.msk.msra.mxu1 %vm40_vm0, %v18862_v55  ;;  %21529 = vmatprep.mubr.msk.f32.mxu1 %vm40_vm0, %v25649_v56 }
 0xd34   :  { %21553 = vmatprep.subr.msk.mxu1 %vm40_vm0, %v18880_v54 }
 0xd36   :  { %21530 = vmatmul.mubr.msk.f32.vlgmr.msra.gmra.mrb[34].mxu1 %vm40_vm0, %v25658_v32  ;;  %22522 = vmatpush3.bf16.xpose.msk.msra.mxu0 %vm23529_vm2, %v22517_v60 }
 0xd37   :  { %21532 = vmatprep.mubr.msk.f32.mxu1 %vm40_vm0, %v25665_v23  ;;  %21554 = vmatpush3.xpose.msk.msra.mxu1 %vm40_vm0, %v18880_v54 }
 0xd38   :  { %21579 = vmatprep.subr.msk.mxu0 %vm40_vm0, %v18898_v21 }
 0xd3a   :  { %21533 = vmatmul.mubr.msk.f32.gmra.mrb[36].mxu1 %vm40_vm0, %v25674_v11 }
 0xd3b   :  { %21535 = vmatprep.mubr.msk.f32.mxu1 %vm40_vm0, %v25681_v16 }
 0xd3e   :  { %21536 = vmatmul.mubr.msk.f32.gmra.mrb[38].mxu1 %vm40_vm0, %v25690_v44 }
 0xd3f   :  { %21538 = vmatprep.mubr.msk.f32.mxu1 %vm40_vm0, %v25697_v22 }
 0xd42   :  { %21539 = vmatmul.mubr.msk.f32.gmra.mrb[40].mxu1 %vm40_vm0, %v25706_v20 }
 0xd43   :  { %21541 = vmatprep.mubr.msk.f32.mxu1 %vm40_vm0, %v25715_v43 }
 0xd46   :  { %21542 = vmatmul.mubr.msk.f32.gmra.mrb[42].mxu1 %vm40_vm0, %v25724_v1 }
 0xd47   :  { %21544 = vmatprep.mubr.msk.f32.mxu1 %vm40_vm0, %v25733_v15 }
 0xd4a   :  { %21545 = vmatmul.mubr.msk.f32.gmra.mrb[44].mxu1 %vm40_vm0, %v25742_v28 }
 0xd4b   :  { %21547 = vmatprep.mubr.msk.f32.mxu1 %vm40_vm0, %v25751_v9 }
 0xd4e   :  { %21548 = vmatmul.mubr.msk.f32.gmra.mrb[46].mxu1 %vm40_vm0, %v25758_v39 }
 0xd4f   :  { %21550 = vmatprep.mubr.msk.f32.mxu1 %vm40_vm0, %v25765_v13 }
 0xd52   :  { %21551 = vmatmul.mubr.msk.f32.gmra.mrb[48].mxu1 %vm40_vm0, %v25774_v3 }
 0xd53   :  { %21555 = vmatprep.mubr.msk.f32.mxu1 %vm40_vm0, %v25649_v56 }
 0xd56   :  { %21556 = vmatmul.mubr.msk.f32.vlgmr.msra.gmra.mrb[50].mxu1 %vm40_vm0, %v25658_v32 }
 0xd57   :  { %21558 = vmatprep.mubr.msk.f32.mxu1 %vm40_vm0, %v25665_v23 }
 0xd5a   :  { %21559 = vmatmul.mubr.msk.f32.gmra.mrb[52].mxu1 %vm40_vm0, %v25674_v11 }
 0xd5b   :  { %21561 = vmatprep.mubr.msk.f32.mxu1 %vm40_vm0, %v25681_v16 }
 0xd5e   :  { %21562 = vmatmul.mubr.msk.f32.gmra.mrb[54].mxu1 %vm40_vm0, %v25690_v44 }
 0xd5f   :  { %21564 = vmatprep.mubr.msk.f32.mxu1 %vm40_vm0, %v25697_v22 }
 0xd62   :  { %21565 = vmatmul.mubr.msk.f32.gmra.mrb[56].mxu1 %vm40_vm0, %v25706_v20 }
 0xd63   :  { %21567 = vmatprep.mubr.msk.f32.mxu1 %vm40_vm0, %v25715_v43 }
 0xd66   :  { %21568 = vmatmul.mubr.msk.f32.gmra.mrb[58].mxu1 %vm40_vm0, %v25724_v1 }
 0xd67   :  { %21570 = vmatprep.mubr.msk.f32.mxu1 %vm40_vm0, %v25733_v15 }
 0xd6a   :  { %21571 = vmatmul.mubr.msk.f32.gmra.mrb[60].mxu1 %vm40_vm0, %v25742_v28 }
 0xd6b   :  { %21573 = vmatprep.mubr.msk.f32.mxu1 %vm40_vm0, %v25751_v9 }
 0xd6e   :  { %21574 = vmatmul.mubr.msk.f32.gmra.mrb[62].mxu1 %vm40_vm0, %v25758_v39 }
 0xd6f   :  { %21576 = vmatprep.mubr.msk.f32.mxu1 %vm40_vm0, %v25765_v13 }
 0xd72   :  { %21577 = vmatmul.mubr.msk.f32.gmra.mrb[64].mxu1 %vm40_vm0, %v25774_v3 }
 0xde8   :  { %v21445_v2 = vpop.f32.mrb[198].mxu0 }
 0xde9   :  { %v12764_v18 = vpop.f32.mrb[199].mxu0  ;;  %v21452_v8 = vpop.f32.mrb[26].mxu1 }
 0xdea   :  { %21503 = vmatprep.mubr.msk.f32.mxu0 %vm551_vm1, %v12764_v18  ;;  %v12845_v58 = vpop.f32.mrb[27].mxu1 }
 0xdeb   :  { %21504 = vmatmul.mubr.msk.f32.vlgmr.msra.gmra.mrb[78].mxu0 %vm551_vm1, %v21445_v2 }
 0xdec   :  { %v21459_v6 = vpop.f32.mrb[200].mxu0  ;;  %21506 = vmatprep.mubr.msk.f32.mxu0 %vm551_vm1, %v12845_v58  ;;  %21580 = vmatpush3.xpose.msk.msra.mxu0 %vm40_vm0, %v18898_v21 }
 0xded   :  { %v12926_v19 = vpop.f32.mrb[201].mxu0 }
 0xdef   :  { %21507 = vmatmul.mubr.msk.f32.gmra.mrb[80].mxu0 %vm551_vm1, %v21452_v8 }
 0xdf0   :  { %21509 = vmatprep.mubr.msk.f32.mxu0 %vm551_vm1, %v12926_v19 }
 0xdf1   :  { %v21466_v30 = vpop.f32.mrb[28].mxu1 }
 0xdf2   :  { %v13007_v41 = vpop.f32.mrb[29].mxu1 }
 0xdf3   :  { %21510 = vmatmul.mubr.msk.f32.gmra.mrb[82].mxu0 %vm551_vm1, %v21459_v6  ;;  %v21473_v57 = vpop.f32.mrb[202].mxu0 }
 0xdf4   :  { %v13088_v12 = vpop.f32.mrb[203].mxu0  ;;  %21512 = vmatprep.mubr.msk.f32.mxu0 %vm551_vm1, %v13007_v41 }
 0xdf7   :  { %21513 = vmatmul.mubr.msk.f32.gmra.mrb[84].mxu0 %vm551_vm1, %v21466_v30 }
 0xdf8   :  { %21515 = vmatprep.mubr.msk.f32.mxu0 %vm551_vm1, %v13088_v12 }
 0xdfb   :  { %21516 = vmatmul.mubr.msk.f32.gmra.mrb[86].mxu0 %vm551_vm1, %v21473_v57 }
 0xdfc   :  { %v21480_v29 = vpop.f32.mrb[30].mxu1 }
 0xdfd   :  { %v13169_v47 = vpop.f32.mrb[31].mxu1 }
 0xdfe   :  { %21518 = vmatprep.mubr.msk.f32.mxu0 %vm551_vm1, %v13169_v47 }
 0xdff   :  { %21519 = vmatmul.mubr.msk.f32.gmra.mrb[88].mxu0 %vm551_vm1, %v21480_v29 }
 0xe00   :  { %v21487_v24 = vpop.f32.mrb[204].mxu0 }
 0xe01   :  { %v13250_v7 = vpop.f32.mrb[205].mxu0 }
 0xe02   :  { %21521 = vmatprep.mubr.msk.f32.mxu0 %vm551_vm1, %v13250_v7 }
 0xe03   :  { %21522 = vmatmul.mubr.msk.f32.gmra.mrb[90].mxu0 %vm551_vm1, %v21487_v24 }
 0xe05   :  { %v21494_v0 = vpop.f32.mrb[32].mxu1 }
 0xe06   :  { %v13331_v48 = vpop.f32.mrb[33].mxu1 }
 0xe07   :  { %21524 = vmatprep.mubr.msk.f32.mxu0 %vm551_vm1, %v13331_v48 }
 0xe08   :  { %21525 = vmatmul.mubr.msk.f32.gmra.mrb[92].mxu0 %vm551_vm1, %v21494_v0 }
 0xe09   :  { %v21531_v52 = vpop.f32.mrb[34].mxu1  ;;  %21581 = vmatprep.mubr.msk.f32.mxu0 %vm40_vm0, %v25649_v56 }
 0xe0a   :  { %v13637_v33 = vpop.f32.mrb[35].mxu1 }
 0xe0b   :  { %v13716_v10 = vmul.f32 0.5, %v13637_v33 }
 0xe0c   :  { %21582 = vmatmul.mubr.msk.f32.vlgmr.msra.gmra.mrb[206].mxu0 %vm40_vm0, %v25658_v32 }
 0xe0d   :  { %v21534_v38 = vpop.f32.mrb[36].mxu1  ;;  %21609 = vmatprep.mubr.msk.f32.mxu1 %vm551_vm1, %v13716_v10  ;;  %21584 = vmatprep.mubr.msk.f32.mxu0 %vm40_vm0, %v25665_v23 }
 0xe0e   :  { %v13647_v62 = vpop.f32.mrb[37].mxu1  ;;  %v13719_v34 = vmul.f32 0.5, %v21534_v38 }
 0xe0f   :  { %v13718_v35 = vmul.f32 0.5, %v13647_v62 }
 0xe10   :  { %21585 = vmatmul.mubr.msk.f32.gmra.mrb[208].mxu0 %vm40_vm0, %v25674_v11 }
 0xe11   :  { %v21537_v42 = vpop.f32.mrb[38].mxu1  ;;  %21587 = vmatprep.mubr.msk.f32.mxu0 %vm40_vm0, %v25681_v16 }
 0xe12   :  { %v13657_v56 = vpop.f32.mrb[39].mxu1  ;;  %v13721_v59 = vmul.f32 0.5, %v21537_v42 }
 0xe14   :  { %21588 = vmatmul.mubr.msk.f32.gmra.mrb[210].mxu0 %vm40_vm0, %v25690_v44 }
 0xe15   :  { %v26138_v36 = vpop.f32.mrb[40].mxu1  ;;  %21590 = vmatprep.mubr.msk.f32.mxu0 %vm40_vm0, %v25697_v22 }
 0xe16   :  { %v13667_v32 = vpop.f32.mrb[41].mxu1  ;;  %v13723_v4 = vmul.f32 0.5, %v26138_v36 }
 0xe17   :  { %v13722_v53 = vmul.f32 0.5, %v13667_v32 }
 0xe18   :  { %21591 = vmatmul.mubr.msk.f32.gmra.mrb[212].mxu0 %vm40_vm0, %v25706_v20 }
 0xe19   :  { %v26144_v23 = vpop.f32.mrb[42].mxu1  ;;  %21593 = vmatprep.mubr.msk.f32.mxu0 %vm40_vm0, %v25715_v43 }
 0xe1a   :  { %v13677_v11 = vpop.f32.mrb[43].mxu1  ;;  %v13725_v21 = vmul.f32 0.5, %v26144_v23 }
 0xe1b   :  { %v13724_v45 = vmul.f32 0.5, %v13677_v11 }
 0xe1c   :  { %21594 = vmatmul.mubr.msk.f32.gmra.mrb[214].mxu0 %vm40_vm0, %v25724_v1 }
 0xe1d   :  { %v26150_v16 = vpop.f32.mrb[44].mxu1  ;;  %21596 = vmatprep.mubr.msk.f32.mxu0 %vm40_vm0, %v25733_v15  ;;  %v13720_v15 = vmul.f32 0.5, %v13657_v56 }
 0xe1e   :  { %v13687_v44 = vpop.f32.mrb[45].mxu1  ;;  %v13727_v19 = vmul.f32 0.5, %v26150_v16 }
 0xe1f   :  { %v13726_v2 = vmul.f32 0.5, %v13687_v44 }
 0xe20   :  { %21597 = vmatmul.mubr.msk.f32.gmra.mrb[216].mxu0 %vm40_vm0, %v25742_v28 }
 0xe21   :  { %v26156_v22 = vpop.f32.mrb[46].mxu1  ;;  %21599 = vmatprep.mubr.msk.f32.mxu0 %vm40_vm0, %v25751_v9 }
 0xe22   :  { %v13697_v20 = vpop.f32.mrb[47].mxu1  ;;  %v13729_v30 = vmul.f32 0.5, %v26156_v22 }
 0xe23   :  { %v13728_v8 = vmul.f32 0.5, %v13697_v20 }
 0xe24   :  { %21600 = vmatmul.mubr.msk.f32.gmra.mrb[218].mxu0 %vm40_vm0, %v25758_v39 }
 0xe25   :  { %v26162_v43 = vpop.f32.mrb[48].mxu1  ;;  %21602 = vmatprep.mubr.msk.f32.mxu0 %vm40_vm0, %v25765_v13 }
 0xe26   :  { %v26166_v1 = vpop.f32.mrb[49].mxu1  ;;  %v13731_v57 = vmul.f32 0.5, %v26162_v43 }
 0xe27   :  { %v13730_v41 = vmul.f32 0.5, %v26166_v1 }
 0xe28   :  { %21603 = vmatmul.mubr.msk.f32.gmra.mrb[220].mxu0 %vm40_vm0, %v25774_v3  ;;  %v13717_v3 = vmul.f32 0.5, %v21531_v52 }
 0xe29   :  { %v21557_v28 = vpop.f32.mrb[50].mxu1  ;;  %21623 = vmatprep.mubr.msk.f32.mxu0 %vm551_vm1, %v13720_v15 }
 0xe2a   :  { %v13803_v46 = vpop.f32.mrb[51].mxu1 }
 0xe2b   :  { %v22523_v9 = vpack.c.bf16 %v21557_v28, %v13803_v46 }
 0xe2d   :  { %v21560_v51 = vpop.f32.mrb[52].mxu1  ;;  %22525 = vmatprep.subr.msk.bf16.mxu1 %vm23529_vm2, %v22523_v9 }
 0xe2e   :  { %v13813_v39 = vpop.f32.mrb[53].mxu1  ;;  %22528 = vmatpush3.bf16.xpose.msk.msra.mxu1 %vm23529_vm2, %v22523_v9 }
 0xe2f   :  { %v22529_v13 = vpack.c.bf16 %v21560_v51, %v13813_v39 }
 0xe31   :  { %v21563_v26 = vpop.f32.mrb[54].mxu1  ;;  %22531 = vmatprep.subr.msk.bf16.mxu1 %vm23529_vm2, %v22529_v13 }
 0xe32   :  { %v13823_v27 = vpop.f32.mrb[55].mxu1 }
 0xe33   :  { %v22535_v31 = vpack.c.bf16 %v21563_v26, %v13823_v27 }
 0xe35   :  { %v21566_v63 = vpop.f32.mrb[56].mxu1  ;;  %21610 = vmatmul.mubr.msk.f32.vlgmr.msra.gmra.mrb[66].mxu1 %vm551_vm1, %v13717_v3  ;;  %22537 = vmatprep.subr.msk.bf16.mxu0 %vm23529_vm2, %v22535_v31 }
 0xe36   :  { %v13833_v5 = vpop.f32.mrb[57].mxu1  ;;  %22534 = vmatpush3.bf16.xpose.msk.msra.mxu1 %vm23529_vm2, %v22529_v13  ;;  %21616 = vmatprep.mubr.msk.f32.mxu1 %vm551_vm1, %v13718_v35 }
 0xe37   :  { %v22541_v17 = vpack.c.bf16 %v21566_v63, %v13833_v5  ;;  %22540 = vmatpush3.bf16.xpose.msk.msra.mxu0 %vm23529_vm2, %v22535_v31 }
 0xe39   :  { %v21569_v25 = vpop.f32.mrb[58].mxu1  ;;  %22543 = vmatprep.subr.msk.bf16.mxu1 %vm23529_vm2, %v22541_v17 }
 0xe3a   :  { %v13843_v50 = vpop.f32.mrb[59].mxu1 }
 0xe3b   :  { %v22547_v55 = vpack.c.bf16 %v21569_v25, %v13843_v50 }
 0xe3d   :  { %v21572_v61 = vpop.f32.mrb[60].mxu1  ;;  %21617 = vmatmul.mubr.msk.f32.vlgmr.msra.gmra.mrb[68].mxu1 %vm551_vm1, %v13719_v34  ;;  %22549 = vmatprep.subr.msk.bf16.mxu0 %vm23529_vm2, %v22547_v55 }
 0xe3e   :  { %21624 = vmatmul.mubr.msk.f32.vlgmr.msra.gmra.mrb[222].mxu0 %vm551_vm1, %v13721_v59  ;;  %v13853_v14 = vpop.f32.mrb[61].mxu1  ;;  %22546 = vmatpush3.bf16.xpose.msk.msra.mxu1 %vm23529_vm2, %v22541_v17 }
 0xe3f   :  { %v22553_v60 = vpack.c.bf16 %v21572_v61, %v13853_v14  ;;  %21630 = vmatprep.mubr.msk.f32.mxu1 %vm551_vm1, %v13722_v53  ;;  %22552 = vmatpush3.bf16.xpose.msk.msra.mxu0 %vm23529_vm2, %v22547_v55 }
 0xe40   :  { %21637 = vmatprep.mubr.msk.f32.mxu0 %vm551_vm1, %v13724_v45 }
 0xe41   :  { %v21575_v37 = vpop.f32.mrb[62].mxu1  ;;  %22555 = vmatprep.subr.msk.bf16.mxu1 %vm23529_vm2, %v22553_v60 }
 0xe42   :  { %v13863_v49 = vpop.f32.mrb[63].mxu1 }
 0xe43   :  { %v22559_v54 = vpack.c.bf16 %v21575_v37, %v13863_v49 }
 0xe45   :  { %21631 = vmatmul.mubr.msk.f32.vlgmr.msra.gmra.mrb[70].mxu1 %vm551_vm1, %v13723_v4  ;;  %22561 = vmatprep.subr.msk.bf16.mxu0 %vm23529_vm2, %v22559_v54  ;;  %v21578_v18 = vpop.f32.mrb[64].mxu1 }
 0xe46   :  { %21638 = vmatmul.mubr.msk.f32.vlgmr.msra.gmra.mrb[224].mxu0 %vm551_vm1, %v13725_v21  ;;  %22558 = vmatpush3.bf16.xpose.msk.msra.mxu1 %vm23529_vm2, %v22553_v60  ;;  %v13873_v58 = vpop.f32.mrb[65].mxu1 }
 0xe47   :  { %21644 = vmatprep.mubr.msk.f32.mxu1 %vm551_vm1, %v13726_v2  ;;  %22564 = vmatpush3.bf16.xpose.msk.msra.mxu0 %vm23529_vm2, %v22559_v54  ;;  %v22565_v6 = vpack.c.bf16 %v21578_v18, %v13873_v58 }
 0xe48   :  { %21651 = vmatprep.mubr.msk.f32.mxu0 %vm551_vm1, %v13728_v8 }
 0xe49   :  { %22567 = vmatprep.subr.msk.bf16.mxu1 %vm23529_vm2, %v22565_v6 }
 0xe4d   :  { %21645 = vmatmul.mubr.msk.f32.vlgmr.msra.gmra.mrb[72].mxu1 %vm551_vm1, %v13727_v19 }
 0xe4e   :  { %21652 = vmatmul.mubr.msk.f32.vlgmr.msra.gmra.mrb[226].mxu0 %vm551_vm1, %v13729_v30  ;;  %22570 = vmatpush3.bf16.xpose.msk.msra.mxu1 %vm23529_vm2, %v22565_v6 }
 0xe4f   :  { %21658 = vmatprep.mubr.msk.f32.mxu1 %vm551_vm1, %v13730_v41 }
 0xe55   :  { %21659 = vmatmul.mubr.msk.f32.vlgmr.msra.gmra.mrb[74].mxu1 %vm551_vm1, %v13731_v57 }
 0xedf   :  { %v21583_v12 = vpop.f32.mrb[206].mxu0 }
 0xee0   :  { %v13953_v29 = vpop.f32.mrb[207].mxu0 }
 0xee1   :  { %v22571_v47 = vpack.c.bf16 %v21583_v12, %v13953_v29 }
 0xee3   :  { %22572 = vmatprep.subr.bf16.mxu0 %v22571_v47  ;;  %v21586_v24 = vpop.f32.mrb[208].mxu0 }
 0xee4   :  { %22574 = vmatpush3.bf16.msra.mxu0 %v22571_v47  ;;  %v13963_v7 = vpop.f32.mrb[209].mxu0 }
 0xee5   :  { %v26223_v0 = vpack.c.bf16 %v21586_v24, %v13963_v7 }
 0xee7   :  { %v21589_v48 = vpop.f32.mrb[210].mxu0  ;;  %22576 = vmatprep.subr.bf16.mxu0 %v26223_v0 }
 0xee8   :  { %v13973_v52 = vpop.f32.mrb[211].mxu0 }
 0xee9   :  { %v22579_v33 = vpack.c.bf16 %v21589_v48, %v13973_v52 }
 0xeeb   :  { %22580 = vmatprep.subr.bf16.mxu1 %v22579_v33  ;;  %v21592_v10 = vpop.f32.mrb[212].mxu0 }
 0xeec   :  { %22582 = vmatpush3.bf16.msra.mxu1 %v22579_v33  ;;  %v13983_v38 = vpop.f32.mrb[213].mxu0 }
 0xeed   :  { %v26226_v62 = vpack.c.bf16 %v21592_v10, %v13983_v38 }
 0xeef   :  { %v21595_v42 = vpop.f32.mrb[214].mxu0 }
 0xef0   :  { %v13993_v56 = vpop.f32.mrb[215].mxu0 }
 0xef1   :  { %v26228_v36 = vpack.c.bf16 %v21595_v42, %v13993_v56 }
 0xef3   :  { %v21598_v32 = vpop.f32.mrb[216].mxu0  ;;  %22588 = vmatprep.subr.bf16.mxu1 %v26228_v36 }
 0xef4   :  { %v14003_v23 = vpop.f32.mrb[217].mxu0 }
 0xef5   :  { %v26231_v11 = vpack.c.bf16 %v21598_v32, %v14003_v23 }
 0xef7   :  { %v21601_v16 = vpop.f32.mrb[218].mxu0 }
 0xef8   :  { %v14013_v44 = vpop.f32.mrb[219].mxu0 }
 0xef9   :  { %v26233_v22 = vpack.c.bf16 %v21601_v16, %v14013_v44 }
 0xefb   :  { %v21604_v20 = vpop.f32.mrb[220].mxu0 }
 0xefc   :  { %v14023_v43 = vpop.f32.mrb[221].mxu0 }
 0xefd   :  { %v26235_v1 = vpack.c.bf16 %v21604_v20, %v14023_v43 }
 0xf08   :  { %v21611_v15 = vpop.f32.mrb[66].mxu1 }
 0xf09   :  { %v14729_v28 = vsel %vm1248_vm3, %v21611_v15, -inf  ;;  %v14110_v46 = vpop.f32.mrb[67].mxu1 }
 0xf0a   :  { %v14728_v9 = vsel %vm1248_vm3, %v14110_v46, -inf }
 0xf0b   :  { %v14730_v51 = vmax.f32 %v14728_v9, %v14729_v28 }
 0xf0d   :  { %v14731_v39 = vrot.slane %v14730_v51, 4 }
 0xf0f   :  { %v14732_v13 = vmax.f32 %v14730_v51, %v14731_v39 }
 0xf10   :  { %v21618_v26 = vpop.f32.mrb[68].mxu1 }
 0xf11   :  { %v14733_v27 = vrot.slane %v14732_v13, 2  ;;  %v14738_v3 = vsel %vm1248_vm3, %v21618_v26, -inf  ;;  %v21625_v31 = vpop.f32.mrb[222].mxu0  ;;  %v14197_v35 = vpop.f32.mrb[69].mxu1 }
 0xf12   :  { %v14747_v63 = vsel %vm1248_vm3, %v21625_v31, -inf  ;;  %v14737_v5 = vsel %vm1248_vm3, %v14197_v35, -inf  ;;  %v14284_v17 = vpop.f32.mrb[223].mxu0 }
 0xf13   :  { %v14734_v25 = vmax.f32 %v14732_v13, %v14733_v27  ;;  %v14739_v50 = vmax.f32 %v14737_v5, %v14738_v3  ;;  %v14746_v34 = vsel %vm1248_vm3, %v14284_v17, -inf }
 0xf14   :  { %v14748_v55 = vmax.f32 %v14746_v34, %v14747_v63 }
 0xf15   :  { %v14735_v59 = vrot.slane %v14734_v25, 1  ;;  %v14740_v53 = vrot.slane %v14739_v50, 4 }
 0xf16   :  { %v14749_v61 = vrot.slane %v14748_v55, 4 }
 0xf17   :  { %v14736_v45 = vmax.f32 %v14734_v25, %v14735_v59  ;;  %v14741_v14 = vmax.f32 %v14739_v50, %v14740_v53 }
 0xf18   :  { %v14750_v60 = vmax.f32 %v14748_v55, %v14749_v61  ;;  %v26243_v37 = vpop.f32.mrb[70].mxu1 }
 0xf19   :  { %v14800_v49 = vsub.f32 %v14110_v46, %v14736_v45  ;;  %v14801_v4 = vsub.f32 %v21611_v15, %v14736_v45  ;;  %v14742_v54 = vrot.slane %v14741_v14, 2  ;;  %v14756_v21 = vsel %vm1248_vm3, %v26243_v37, -inf  ;;  %v26247_v2 = vpop.f32.mrb[224].mxu0  ;;  %v26249_v18 = vpop.f32.mrb[71].mxu1 }
 0xf1a   :  { %v14751_v8 = vrot.slane %v14750_v60, 2  ;;  %v14765_v58 = vsel %vm1248_vm3, %v26247_v2, -inf  ;;  %v14755_v6 = vsel %vm1248_vm3, %v26249_v18, -inf  ;;  %v26255_v19 = vpop.f32.mrb[225].mxu0 }
 0xf1b   :  { %v14816_v30 = vmul.f32 1.442695, %v14800_v49  ;;  %v14818_v41 = vmul.f32 1.442695, %v14801_v4  ;;  %v14743_v57 = vmax.f32 %v14741_v14, %v14742_v54  ;;  %v14757_v12 = vmax.f32 %v14755_v6, %v14756_v21 }
 0xf1c   :  { %v14752_v29 = vmax.f32 %v14750_v60, %v14751_v8  ;;  %v14764_v47 = vsel %vm1248_vm3, %v26255_v19, -inf }
 0xf1d   :  { %23109 = vpow2.f32 %v14816_v30  ;;  %v14744_v24 = vrot.slane %v14743_v57, 1  ;;  %v14758_v7 = vrot.slane %v14757_v12, 4  ;;  %v14766_v48 = vmax.f32 %v14764_v47, %v14765_v58 }
 0xf1e   :  { %23111 = vpow2.f32 %v14818_v41  ;;  %v14753_v52 = vrot.slane %v14752_v29, 1 }
 0xf1f   :  { %v14745_v33 = vmax.f32 %v14743_v57, %v14744_v24  ;;  %v14759_v10 = vmax.f32 %v14757_v12, %v14758_v7  ;;  %v14767_v38 = vrot.slane %v14766_v48, 4 }
 0xf20   :  { %v14754_v42 = vmax.f32 %v14752_v29, %v14753_v52  ;;  %v26259_v56 = vpop.f32.mrb[72].mxu1 }
 0xf21   :  { %v14802_v32 = vsub.f32 %v14197_v35, %v14745_v33  ;;  %v14803_v23 = vsub.f32 %v21618_v26, %v14745_v33  ;;  %v14760_v16 = vrot.slane %v14759_v10, 2  ;;  %v14768_v44 = vmax.f32 %v14766_v48, %v14767_v38  ;;  %v26261_v20 = vpop.f32.mrb[226].mxu0  ;;  %v26263_v43 = vpop.f32.mrb[73].mxu1 }
 0xf22   :  { %v14804_v15 = vsub.f32 %v14284_v17, %v14754_v42  ;;  %v14805_v28 = vsub.f32 %v21625_v31, %v14754_v42  ;;  %v14774_v46 = vsel %vm1248_vm3, %v26259_v56, -inf  ;;  %v14783_v9 = vsel %vm1248_vm3, %v26261_v20, -inf  ;;  %v26269_v51 = vpop.f32.mrb[227].mxu0 }
 0xf23   :  { %v14820_v39 = vmul.f32 1.442695, %v14802_v32  ;;  %v14822_v13 = vmul.f32 1.442695, %v14803_v23  ;;  %v14761_v27 = vmax.f32 %v14759_v10, %v14760_v16  ;;  %v14769_v26 = vrot.slane %v14768_v44, 2 }
 0xf24   :  { %v14824_v3 = vmul.f32 1.442695, %v14804_v15  ;;  %v14826_v35 = vmul.f32 1.442695, %v14805_v28  ;;  %v14773_v63 = vsel %vm1248_vm3, %v26263_v43, -inf  ;;  %v14782_v31 = vsel %vm1248_vm3, %v26269_v51, -inf }
 0xf25   :  { %23113 = vpow2.f32 %v14820_v39  ;;  %v14762_v5 = vrot.slane %v14761_v27, 1  ;;  %v14770_v17 = vmax.f32 %v14768_v44, %v14769_v26  ;;  %v14775_v25 = vmax.f32 %v14773_v63, %v14774_v46 }
 0xf26   :  { %23115 = vpow2.f32 %v14822_v13  ;;  %v14784_v50 = vmax.f32 %v14782_v31, %v14783_v9 }
 0xf27   :  { %v26275_v34 = vpop.eup %23109  ;;  %23117 = vpow2.f32 %v14824_v3  ;;  %v14763_v55 = vmax.f32 %v14761_v27, %v14762_v5  ;;  %v14771_v59 = vrot.slane %v14770_v17, 1  ;;  %v14776_v53 = vrot.slane %v14775_v25, 4 }
 0xf28   :  { %v26277_v61 = vpop.eup %23111  ;;  %v14848_v45 = vsel %vm1248_vm3, %v26275_v34, 0.0  ;;  %23119 = vpow2.f32 %v14826_v35  ;;  %v14785_v14 = vrot.slane %v14784_v50, 4  ;;  %v26281_v60 = vpop.f32.mrb[74].mxu1 }
 0xf29   :  { %v14849_v49 = vsel %vm1248_vm3, %v26277_v61, 0.0  ;;  %v14806_v4 = vsub.f32 %v26249_v18, %v14763_v55  ;;  %v14807_v54 = vsub.f32 %v26243_v37, %v14763_v55  ;;  %v14772_v21 = vmax.f32 %v14770_v17, %v14771_v59  ;;  %v26287_v8 = vpop.f32.mrb[75].mxu1 }
 0xf2a   :  { %v14850_v58 = vadd.f32 %v14849_v49, %v14848_v45  ;;  %v14777_v6 = vmax.f32 %v14775_v25, %v14776_v53  ;;  %v14786_v30 = vmax.f32 %v14784_v50, %v14785_v14  ;;  %v14792_v41 = vsel %vm1248_vm3, %v26281_v60, -inf }
 0xf2b   :  { %v14828_v57 = vmul.f32 1.442695, %v14806_v4  ;;  %v14830_v12 = vmul.f32 1.442695, %v14807_v54  ;;  %v14808_v29 = vsub.f32 %v26255_v19, %v14772_v21  ;;  %v14809_v47 = vsub.f32 %v26247_v2, %v14772_v21 }
 0xf2c   :  { %v14851_v24 = vrot.slane %v14850_v58, 4  ;;  %v14778_v7 = vrot.slane %v14777_v6, 2  ;;  %v14787_v18 = vrot.slane %v14786_v30, 2  ;;  %v14791_v37 = vsel %vm1248_vm3, %v26287_v8, -inf }
 0xf2d   :  { %23121 = vpow2.f32 %v14828_v57  ;;  %v14832_v48 = vmul.f32 1.442695, %v14808_v29  ;;  %v14834_v52 = vmul.f32 1.442695, %v14809_v47  ;;  %v14793_v33 = vmax.f32 %v14791_v37, %v14792_v41 }
 0xf2e   :  { %v14852_v10 = vadd.f32 %v14851_v24, %v14850_v58  ;;  %23123 = vpow2.f32 %v14830_v12  ;;  %v14779_v38 = vmax.f32 %v14777_v6, %v14778_v7  ;;  %v14788_v42 = vmax.f32 %v14786_v30, %v14787_v18 }
 0xf2f   :  { %v26295_v32 = vpop.eup %23113  ;;  %23125 = vpow2.f32 %v14832_v48  ;;  %v14794_v19 = vrot.slane %v14793_v33, 4 }
 0xf30   :  { %v26297_v23 = vpop.eup %23115  ;;  %v14853_v2 = vrot.slane %v14852_v10, 2  ;;  %v14857_v16 = vsel %vm1248_vm3, %v26295_v32, 0.0  ;;  %23127 = vpow2.f32 %v14834_v52  ;;  %v14780_v44 = vrot.slane %v14779_v38, 1 }
 0xf31   :  { %v26301_v15 = vpop.eup %23117  ;;  %v14858_v28 = vsel %vm1248_vm3, %v26297_v23, 0.0  ;;  %v14789_v46 = vrot.slane %v14788_v42, 1  ;;  %v14795_v9 = vmax.f32 %v14793_v33, %v14794_v19 }
 0xf32   :  { %v26305_v39 = vpop.eup %23119  ;;  %v14854_v13 = vadd.f32 %v14853_v2, %v14852_v10  ;;  %v14859_v27 = vadd.f32 %v14858_v28, %v14857_v16  ;;  %v14866_v26 = vsel %vm1248_vm3, %v26301_v15, 0.0  ;;  %v14781_v3 = vmax.f32 %v14779_v38, %v14780_v44 }
 0xf33   :  { %v14867_v35 = vsel %vm1248_vm3, %v26305_v39, 0.0  ;;  %v14790_v63 = vmax.f32 %v14788_v42, %v14789_v46  ;;  %v14796_v31 = vrot.slane %v14795_v9, 2 }
 0xf34   :  { %v14855_v5 = vrot.slane %v14854_v13, 1  ;;  %v14860_v17 = vrot.slane %v14859_v27, 4  ;;  %v14868_v25 = vadd.f32 %v14867_v35, %v14866_v26  ;;  %v14810_v50 = vsub.f32 %v26263_v43, %v14781_v3 }
 0xf35   :  { %v14811_v55 = vsub.f32 %v26259_v56, %v14781_v3  ;;  %v14812_v59 = vsub.f32 %v26269_v51, %v14790_v63  ;;  %v14813_v53 = vsub.f32 %v26261_v20, %v14790_v63  ;;  %v14797_v45 = vmax.f32 %v14795_v9, %v14796_v31 }
 0xf36   :  { %v14861_v14 = vadd.f32 %v14860_v17, %v14859_v27  ;;  %v14869_v49 = vrot.slane %v14868_v25, 4  ;;  %v14836_v4 = vmul.f32 1.442695, %v14810_v50  ;;  %v14856_v6 = vadd.f32 %v14855_v5, %v14854_v13 }
 0xf37   :  { %v26315_v54 = vpop.eup %23121  ;;  %v14838_v21 = vmul.f32 1.442695, %v14811_v55  ;;  %v14840_v58 = vmul.f32 1.442695, %v14812_v59  ;;  %v14842_v51 = vmul.f32 1.442695, %v14813_v53 }
 0xf38   :  { %v26317_v30 = vpop.eup %23123  ;;  %v14862_v41 = vrot.slane %v14861_v14, 2  ;;  %v14870_v57 = vadd.f32 %v14869_v49, %v14868_v25  ;;  %v14875_v56 = vsel %vm1248_vm3, %v26315_v54, 0.0  ;;  %23129 = vpow2.f32 %v14836_v4 }
 0xf39   :  { %v26321_v43 = vpop.eup %23125  ;;  %v14876_v20 = vsel %vm1248_vm3, %v26317_v30, 0.0  ;;  %23131 = vpow2.f32 %v14838_v21  ;;  %v14798_v12 = vrot.slane %v14797_v45, 1 }
 0xf3a   :  { %v26325_v29 = vpop.eup %23127  ;;  %v14863_v47 = vadd.f32 %v14862_v41, %v14861_v14  ;;  %v14871_v24 = vrot.slane %v14870_v57, 2  ;;  %v14877_v7 = vadd.f32 %v14876_v20, %v14875_v56  ;;  %v14884_v18 = vsel %vm1248_vm3, %v26321_v43, 0.0 }
 0xf3b   :  { %v14885_v37 = vsel %vm1248_vm3, %v26325_v29, 0.0  ;;  %23133 = vpow2.f32 %v14840_v58  ;;  %v14799_v48 = vmax.f32 %v14797_v45, %v14798_v12 }
 0xf3c   :  { %v14864_v52 = vrot.slane %v14863_v47, 1  ;;  %v14872_v33 = vadd.f32 %v14871_v24, %v14870_v57  ;;  %v14878_v10 = vrot.slane %v14877_v7, 4  ;;  %v14886_v38 = vadd.f32 %v14885_v37, %v14884_v18 }
 0xf3d   :  { %23135 = vpow2.f32 %v14842_v51  ;;  %v14814_v42 = vsub.f32 %v26287_v8, %v14799_v48  ;;  %v14815_v19 = vsub.f32 %v26281_v60, %v14799_v48 }
 0xf3e   :  { %v14873_v2 = vrot.slane %v14872_v33, 1  ;;  %v14879_v16 = vadd.f32 %v14878_v10, %v14877_v7  ;;  %v14887_v44 = vrot.slane %v14886_v38, 4  ;;  %23137 = vrcp.f32 %v14856_v6 }
 0xf3f   :  { %v14844_v28 = vmul.f32 1.442695, %v14814_v42  ;;  %v14846_v46 = vmul.f32 1.442695, %v14815_v19  ;;  %v14865_v26 = vadd.f32 %v14864_v52, %v14863_v47 }
 0xf40   :  { %v14874_v9 = vadd.f32 %v14873_v2, %v14872_v33  ;;  %v14880_v13 = vrot.slane %v14879_v16, 2  ;;  %v14888_v27 = vadd.f32 %v14887_v44, %v14886_v38 }
 0xf41   :  { %23139 = vpow2.f32 %v14844_v28 }
 0xf42   :  { %v26333_v3 = vpop.eup %23129  ;;  %23141 = vrcp.f32 %v14874_v9  ;;  %v14881_v35 = vadd.f32 %v14880_v13, %v14879_v16  ;;  %v14889_v63 = vrot.slane %v14888_v27, 2 }
 0xf43   :  { %v26335_v31 = vpop.eup %23131  ;;  %v14893_v60 = vsel %vm1248_vm3, %v26333_v3, 0.0  ;;  %23143 = vpow2.f32 %v14846_v46 }
 0xf44   :  { %v14882_v8 = vrot.slane %v14881_v35, 1  ;;  %v14890_v5 = vadd.f32 %v14889_v63, %v14888_v27  ;;  %v14894_v17 = vsel %vm1248_vm3, %v26335_v31, 0.0  ;;  %23145 = vrcp.f32 %v14865_v26 }
 0xf45   :  { %v26341_v25 = vpop.eup %23133  ;;  %v14895_v50 = vadd.f32 %v14894_v17, %v14893_v60 }
 0xf46   :  { %v14891_v55 = vrot.slane %v14890_v5, 1  ;;  %v14902_v59 = vsel %vm1248_vm3, %v26341_v25, 0.0  ;;  %v14883_v53 = vadd.f32 %v14882_v8, %v14881_v35  ;;  %v18967_v8 = vld [vmem:[%s26975_s4 + $0xd8] sm:$0xff] }
 0xf47   :  { %v26345_v45 = vpop.eup %23135  ;;  %v14896_v14 = vrot.slane %v14895_v50, 4 }
 0xf48   :  { %v23138_v49 = vpop.eup %23137  ;;  %v14892_v4 = vadd.f32 %v14891_v55, %v14890_v5  ;;  %v14903_v21 = vsel %vm1248_vm3, %v26345_v45, 0.0  ;;  %23147 = vrcp.f32 %v14883_v53  ;;  %v26449_v53 = vld [vmem:[%s26972_s0 + $0x18] sm:$0xff] }
 0xf49   :  { %v14897_v58 = vadd.f32 %v14896_v14, %v14895_v50  ;;  %v14904_v6 = vadd.f32 %v14903_v21, %v14902_v59  ;;  %v14928_v41 = vmul.f32 %v23138_v49, %v26275_v34  ;;  %v14929_v57 = vmul.f32 %v23138_v49, %v26277_v61  ;;  %v26430_v50 = vld [vmem:[%s26972_s0 + $0x8] sm:$0xff]  ;;  %v26438_v59 = vld [vmem:[%s26972_s0 + $0x10] sm:$0xff]  ;;  %v26488_v21 = vld [vmem:[%s26972_s0 + $0x40] sm:$0xff] }
 0xf4a   :  { %23149 = vrcp.f32 %v14892_v4  ;;  %v26465_v14 = vld [vmem:[%s26972_s0 + $0x28] sm:$0xff]  ;;  %v26472_v49 = vld [vmem:[%s26972_s0 + $0x30] sm:$0xff]  ;;  %v26481_v4 = vld [vmem:[%s26972_s0 + $0x38] sm:$0xff] }
 0xf4b   :  { %v26351_v56 = vpop.eup %23139  ;;  %v14898_v20 = vrot.slane %v14897_v58, 2  ;;  %v14905_v51 = vrot.slane %v14904_v6, 4  ;;  %21665 = vmatprep.mubr.msk.f32.mxu0 %vm1248_vm3, %v14928_v41  ;;  %v26509_v41 = vld [vmem:[%s26972_s0 + $0x58] sm:$0xff] }
 0xf4c   :  { %v23142_v12 = vpop.eup %23141  ;;  %v14911_v47 = vsel %vm1248_vm3, %v26351_v56, 0.0  ;;  %21666 = vmatmul.mubr.msk.f32.vlgmr.msra.gmra.mrb[228].mxu0 %vm1248_vm3, %v14929_v57  ;;  %v26516_v57 = vld [vmem:[%s26972_s0 + $0x60] sm:$0xff] }
 0xf4d   :  { %v26357_v24 = vpop.eup %23143  ;;  %v14933_v7 = vmul.f32 %v23142_v12, %v26305_v39  ;;  %v14899_v34 = vadd.f32 %v14898_v20, %v14897_v58  ;;  %v14906_v18 = vadd.f32 %v14905_v51, %v14904_v6  ;;  %22578 = vmatpush3.bf16.msra.mxu0 %v26223_v0  ;;  %v14932_v61 = vmul.f32 %v23142_v12, %v26301_v15  ;;  %v26495_v58 = vld [vmem:[%s26972_s0 + $0x48] sm:$0xff]  ;;  %v26502_v6 = vld [vmem:[%s26972_s0 + $0x50] sm:$0xff]  ;;  %v26537_v51 = vld [vmem:[%s26972_s0 + $0x78] sm:$0xff] }
 0xf4e   :  { %v23146_v37 = vpop.eup %23145  ;;  %v14912_v48 = vsel %vm1248_vm3, %v26357_v24, 0.0  ;;  %22584 = vmatprep.subr.bf16.mxu0 %v26226_v62  ;;  %v26530_v20 = vld [vmem:[%s26972_s0 + $0x70] sm:$0xff]  ;;  %v19024_v12 = vld [vmem:[%s26974_s3 + $0x1c] sm:$0xf] }
 0xf4f   :  { %v14900_v52 = vrot.slane %v14899_v34, 1  ;;  %v14907_v33 = vrot.slane %v14906_v18, 2  ;;  %v14913_v10 = vadd.f32 %v14912_v48, %v14911_v47  ;;  %v14930_v38 = vmul.f32 %v23146_v37, %v26295_v32  ;;  %21679 = vmatprep.mubr.msk.f32.mxu1 %vm1248_vm3, %v14932_v61 }
 0xf50   :  { %v14931_v39 = vmul.f32 %v23146_v37, %v26297_v23  ;;  %21680 = vmatmul.mubr.msk.f32.vlgmr.msra.gmra.mrb[76].mxu1 %vm1248_vm3, %v14933_v7 }
 0xf51   :  { %v14908_v0 = vadd.f32 %v14907_v33, %v14906_v18  ;;  %v14914_v42 = vrot.slane %v14913_v10, 4  ;;  %21672 = vmatprep.mubr.msk.f32.mxu0 %vm1248_vm3, %v14930_v38  ;;  %22590 = vmatpush3.bf16.msra.mxu1 %v26228_v36  ;;  %v14901_v15 = vadd.f32 %v14900_v52, %v14899_v34 }
 0xf52   :  { %v23148_v19 = vpop.eup %23147  ;;  %21673 = vmatmul.mubr.msk.f32.vlgmr.msra.gmra.mrb[230].mxu0 %vm1248_vm3, %v14931_v39  ;;  %22596 = vmatprep.subr.bf16.mxu1 %v26233_v22 }
 0xf53   :  { %v14909_v2 = vrot.slane %v14908_v0, 1  ;;  %v14915_v32 = vadd.f32 %v14914_v42, %v14913_v10  ;;  %22586 = vmatpush3.bf16.msra.mxu0 %v26226_v62  ;;  %v14934_v23 = vmul.f32 %v23148_v19, %v26315_v54  ;;  %v14935_v16 = vmul.f32 %v23148_v19, %v26317_v30  ;;  %v18988_v54 = vld [vmem:[%s26971_s1 + $0x1c] sm:$0xf] }
 0xf54   :  { %v23150_v44 = vpop.eup %23149  ;;  %22592 = vmatprep.subr.bf16.mxu0 %v26231_v11  ;;  %23151 = vrcp.f32 %v14901_v15 }
 0xf55   :  { %v14937_v36 = vmul.f32 %v23150_v44, %v26325_v29  ;;  %v14910_v28 = vadd.f32 %v14909_v2, %v14908_v0  ;;  %v14916_v46 = vrot.slane %v14915_v32, 2  ;;  %21686 = vmatprep.mubr.msk.f32.mxu0 %vm1248_vm3, %v14934_v23  ;;  %v14936_v9 = vmul.f32 %v23150_v44, %v26321_v43  ;;  %v18964_v29 = vld [vmem:[%s26975_s4 + $0xc0] sm:$0xff] }
 0xf56   :  { %21687 = vmatmul.mubr.msk.f32.vlgmr.msra.gmra.mrb[232].mxu0 %vm1248_vm3, %v14935_v16 }
 0xf57   :  { %23153 = vrcp.f32 %v14910_v28  ;;  %v14917_v62 = vadd.f32 %v14916_v46, %v14915_v32  ;;  %21693 = vmatprep.mubr.msk.f32.mxu1 %vm1248_vm3, %v14936_v9  ;;  %22594 = vmatpush3.bf16.msra.mxu0 %v26231_v11  ;;  %v18965_v11 = vld [vmem:[%s26975_s4 + $0xc8] sm:$0xff] }
 0xf58   :  { %21694 = vmatmul.mubr.msk.f32.vlgmr.msra.gmra.mrb[78].mxu1 %vm1248_vm3, %v14937_v36  ;;  %22600 = vmatprep.subr.bf16.mxu0 %v26235_v1  ;;  %v22603_v35 = vpack.c.bf16 %v18965_v11, %v18964_v29 }
 0xf59   :  { %v14918_v30 = vrot.slane %v14917_v62, 1  ;;  %22598 = vmatpush3.bf16.msra.mxu1 %v26233_v22 }
 0xf5a   :  { %21749 = vmatprep.subr.msk.mxu1 %vm40_vm0, %v18988_v54 }
 0xf5b   :  { %v14919_v43 = vadd.f32 %v14918_v30, %v14917_v62 }
 0xf5d   :  { %23155 = vrcp.f32 %v14919_v43 }
 0xf5e   :  { %v23152_v13 = vpop.eup %23151 }
 0xf5f   :  { %v14938_v27 = vmul.f32 %v23152_v13, %v26333_v3  ;;  %v14939_v26 = vmul.f32 %v23152_v13, %v26335_v31  ;;  %v19006_v3 = vld [vmem:[%s26973_s2 + $0x1c] sm:$0xf]  ;;  %v26414_v31 = vld [vmem:[%s26972_s0] sm:$0xff] }
 0xf61   :  { %v23154_v63 = vpop.eup %23153  ;;  %21700 = vmatprep.mubr.msk.f32.mxu0 %vm1248_vm3, %v14938_v27 }
 0xf62   :  { %v14941_v22 = vmul.f32 %v23154_v63, %v26345_v45  ;;  %v14940_v60 = vmul.f32 %v23154_v63, %v26341_v25  ;;  %21701 = vmatmul.mubr.msk.f32.vlgmr.msra.gmra.mrb[234].mxu0 %vm1248_vm3, %v14939_v26  ;;  %v26458_v45 = vld [vmem:[%s26972_s0 + $0x20] sm:$0xff] }
 0xf63   :  { %22602 = vmatpush3.bf16.msra.mxu0 %v26235_v1  ;;  %v18966_v1 = vld [vmem:[%s26975_s4 + $0xd0] sm:$0xff] }
 0xf64   :  { %21707 = vmatprep.mubr.msk.f32.mxu1 %vm1248_vm3, %v14940_v60  ;;  %22605 = vmatprep.subr.msk.bf16.mxu0 %vm23529_vm2, %v22603_v35  ;;  %v22609_v55 = vpack.c.bf16 %v18967_v8, %v18966_v1 }
 0xf65   :  { %21708 = vmatmul.mubr.msk.f32.vlgmr.msra.gmra.mrb[80].mxu1 %vm1248_vm3, %v14941_v22 }
 0xf66   :  { %21750 = vmatpush3.xpose.msk.msra.mxu1 %vm40_vm0, %v18988_v54  ;;  %21751 = vmatprep.mubr.msk.f32.mxu1 %vm40_vm0, %v26414_v31 }
 0xf67   :  { %v23156_v5 = vpop.eup %23155  ;;  %21775 = vmatprep.subr.msk.mxu1 %vm40_vm0, %v19006_v3 }
 0xf68   :  { %v14942_v17 = vmul.f32 %v23156_v5, %v26351_v56  ;;  %v14943_v25 = vmul.f32 %v23156_v5, %v26357_v24  ;;  %v26523_v56 = vld [vmem:[%s26972_s0 + $0x68] sm:$0xff] }
 0xf69   :  { %21752 = vmatmul.mubr.msk.f32.vlgmr.msra.gmra.mrb[82].mxu1 %vm40_vm0, %v26430_v50 }
 0xf6a   :  { %21714 = vmatprep.mubr.msk.f32.mxu0 %vm1248_vm3, %v14942_v17  ;;  %21754 = vmatprep.mubr.msk.f32.mxu1 %vm40_vm0, %v26438_v59 }
 0xf6b   :  { %21715 = vmatmul.mubr.msk.f32.vlgmr.msra.gmra.mrb[236].mxu0 %vm1248_vm3, %v14943_v25  ;;  %21776 = vmatpush3.xpose.msk.msra.mxu1 %vm40_vm0, %v19006_v3 }
 0xf6c   :  { %22608 = vmatpush3.bf16.xpose.msk.msra.mxu0 %vm23529_vm2, %v22603_v35 }
 0xf6d   :  { %21755 = vmatmul.mubr.msk.f32.gmra.mrb[84].mxu1 %vm40_vm0, %v26449_v53  ;;  %22611 = vmatprep.subr.msk.bf16.mxu0 %vm23529_vm2, %v22609_v55 }
 0xf6e   :  { %21757 = vmatprep.mubr.msk.f32.mxu1 %vm40_vm0, %v26458_v45 }
 0xf71   :  { %21758 = vmatmul.mubr.msk.f32.gmra.mrb[86].mxu1 %vm40_vm0, %v26465_v14 }
 0xf72   :  { %21760 = vmatprep.mubr.msk.f32.mxu1 %vm40_vm0, %v26472_v49 }
 0xf74   :  { %22614 = vmatpush3.bf16.xpose.msk.msra.mxu0 %vm23529_vm2, %v22609_v55 }
 0xf75   :  { %21761 = vmatmul.mubr.msk.f32.gmra.mrb[88].mxu1 %vm40_vm0, %v26481_v4  ;;  %21801 = vmatprep.subr.msk.mxu0 %vm40_vm0, %v19024_v12 }
 0xf76   :  { %21763 = vmatprep.mubr.msk.f32.mxu1 %vm40_vm0, %v26488_v21 }
 0xf79   :  { %21764 = vmatmul.mubr.msk.f32.gmra.mrb[90].mxu1 %vm40_vm0, %v26495_v58 }
 0xf7a   :  { %21766 = vmatprep.mubr.msk.f32.mxu1 %vm40_vm0, %v26502_v6 }
 0xf7d   :  { %21767 = vmatmul.mubr.msk.f32.gmra.mrb[92].mxu1 %vm40_vm0, %v26509_v41 }
 0xf7e   :  { %21769 = vmatprep.mubr.msk.f32.mxu1 %vm40_vm0, %v26516_v57 }
 0xf81   :  { %21770 = vmatmul.mubr.msk.f32.gmra.mrb[94].mxu1 %vm40_vm0, %v26523_v56 }
 0xf82   :  { %21772 = vmatprep.mubr.msk.f32.mxu1 %vm40_vm0, %v26530_v20 }
 0xf85   :  { %21773 = vmatmul.mubr.msk.f32.gmra.mrb[96].mxu1 %vm40_vm0, %v26537_v51 }
 0xf86   :  { %21777 = vmatprep.mubr.msk.f32.mxu1 %vm40_vm0, %v26414_v31 }
 0xf89   :  { %21778 = vmatmul.mubr.msk.f32.vlgmr.msra.gmra.mrb[98].mxu1 %vm40_vm0, %v26430_v50 }
 0xf8a   :  { %21780 = vmatprep.mubr.msk.f32.mxu1 %vm40_vm0, %v26438_v59 }
 0xf8d   :  { %21781 = vmatmul.mubr.msk.f32.gmra.mrb[100].mxu1 %vm40_vm0, %v26449_v53 }
 0xf8e   :  { %21783 = vmatprep.mubr.msk.f32.mxu1 %vm40_vm0, %v26458_v45 }
 0xf91   :  { %21784 = vmatmul.mubr.msk.f32.gmra.mrb[102].mxu1 %vm40_vm0, %v26465_v14 }
 0xf92   :  { %21786 = vmatprep.mubr.msk.f32.mxu1 %vm40_vm0, %v26472_v49 }
 0xf95   :  { %21787 = vmatmul.mubr.msk.f32.gmra.mrb[104].mxu1 %vm40_vm0, %v26481_v4 }
 0xf96   :  { %21789 = vmatprep.mubr.msk.f32.mxu1 %vm40_vm0, %v26488_v21 }
 0xf99   :  { %21790 = vmatmul.mubr.msk.f32.gmra.mrb[106].mxu1 %vm40_vm0, %v26495_v58 }
 0xf9a   :  { %21792 = vmatprep.mubr.msk.f32.mxu1 %vm40_vm0, %v26502_v6 }
 0xf9d   :  { %21793 = vmatmul.mubr.msk.f32.gmra.mrb[108].mxu1 %vm40_vm0, %v26509_v41 }
 0xf9e   :  { %21795 = vmatprep.mubr.msk.f32.mxu1 %vm40_vm0, %v26516_v57 }
 0xfa1   :  { %21796 = vmatmul.mubr.msk.f32.gmra.mrb[110].mxu1 %vm40_vm0, %v26523_v56 }
 0xfa2   :  { %21798 = vmatprep.mubr.msk.f32.mxu1 %vm40_vm0, %v26530_v20 }
 0xfa5   :  { %21799 = vmatmul.mubr.msk.f32.gmra.mrb[112].mxu1 %vm40_vm0, %v26537_v51 }
0x101f   :  { %v21667_v47 = vpop.f32.mrb[228].mxu0 }
0x1020   :  { %v15016_v24 = vpop.f32.mrb[229].mxu0 }
0x1021   :  { %21725 = vmatprep.mubr.msk.f32.mxu0 %vm551_vm1, %v15016_v24 }
0x1022   :  { %21726 = vmatmul.mubr.msk.f32.vlgmr.msra.gmra.mrb[78].mxu0 %vm551_vm1, %v21667_v47 }
0x1023   :  { %v21681_v7 = vpop.f32.mrb[76].mxu1  ;;  %21802 = vmatpush3.xpose.msk.msra.mxu0 %vm40_vm0, %v19024_v12 }
0x1024   :  { %v15178_v34 = vpop.f32.mrb[77].mxu1 }
0x1025   :  { %v21674_v18 = vpop.f32.mrb[230].mxu0 }
0x1026   :  { %v15097_v61 = vpop.f32.mrb[231].mxu0 }
0x1027   :  { %21728 = vmatprep.mubr.msk.f32.mxu0 %vm551_vm1, %v15097_v61 }
0x1028   :  { %21729 = vmatmul.mubr.msk.f32.gmra.mrb[80].mxu0 %vm551_vm1, %v21674_v18 }
0x1029   :  { %21731 = vmatprep.mubr.msk.f32.mxu0 %vm551_vm1, %v15178_v34  ;;  %v21688_v37 = vpop.f32.mrb[232].mxu0 }
0x102a   :  { %v15259_v48 = vpop.f32.mrb[233].mxu0 }
0x102b   :  { %v21695_v52 = vpop.f32.mrb[78].mxu1 }
0x102c   :  { %21732 = vmatmul.mubr.msk.f32.gmra.mrb[82].mxu0 %vm551_vm1, %v21681_v7  ;;  %v15340_v33 = vpop.f32.mrb[79].mxu1 }
0x102d   :  { %21734 = vmatprep.mubr.msk.f32.mxu0 %vm551_vm1, %v15259_v48 }
0x1030   :  { %21735 = vmatmul.mubr.msk.f32.gmra.mrb[84].mxu0 %vm551_vm1, %v21688_v37 }
0x1031   :  { %21737 = vmatprep.mubr.msk.f32.mxu0 %vm551_vm1, %v15340_v33 }
0x1034   :  { %21738 = vmatmul.mubr.msk.f32.gmra.mrb[86].mxu0 %vm551_vm1, %v21695_v52 }
0x1035   :  { %v21702_v10 = vpop.f32.mrb[234].mxu0 }
0x1036   :  { %v15421_v38 = vpop.f32.mrb[235].mxu0 }
0x1037   :  { %21740 = vmatprep.mubr.msk.f32.mxu0 %vm551_vm1, %v15421_v38 }
0x1038   :  { %v21709_v39 = vpop.f32.mrb[80].mxu1  ;;  %21741 = vmatmul.mubr.msk.f32.gmra.mrb[88].mxu0 %vm551_vm1, %v21702_v10 }
0x1039   :  { %v15502_v0 = vpop.f32.mrb[81].mxu1 }
0x103a   :  { %21743 = vmatprep.mubr.msk.f32.mxu0 %vm551_vm1, %v15502_v0 }
0x103c   :  { %v21753_v42 = vpop.f32.mrb[82].mxu1  ;;  %21744 = vmatmul.mubr.msk.f32.gmra.mrb[90].mxu0 %vm551_vm1, %v21709_v39 }
0x103d   :  { %v15889_v15 = vpop.f32.mrb[83].mxu1  ;;  %v15969_v8 = vmul.f32 0.5, %v21753_v42 }
0x103e   :  { %v15968_v19 = vmul.f32 0.5, %v15889_v15  ;;  %v21716_v2 = vpop.f32.mrb[236].mxu0 }
0x103f   :  { %v15583_v32 = vpop.f32.mrb[237].mxu0 }
0x1040   :  { %v21756_v23 = vpop.f32.mrb[84].mxu1  ;;  %21831 = vmatprep.mubr.msk.f32.mxu1 %vm551_vm1, %v15968_v19  ;;  %21746 = vmatprep.mubr.msk.f32.mxu0 %vm551_vm1, %v15583_v32 }
0x1041   :  { %v15899_v16 = vpop.f32.mrb[85].mxu1  ;;  %21747 = vmatmul.mubr.msk.f32.gmra.mrb[92].mxu0 %vm551_vm1, %v21716_v2 }
0x1042   :  { %21803 = vmatprep.mubr.msk.f32.mxu0 %vm40_vm0, %v26414_v31  ;;  %v15970_v17 = vmul.f32 0.5, %v15899_v16 }
0x1044   :  { %v21759_v44 = vpop.f32.mrb[86].mxu1 }
0x1045   :  { %v15909_v36 = vpop.f32.mrb[87].mxu1  ;;  %21804 = vmatmul.mubr.msk.f32.vlgmr.msra.gmra.mrb[238].mxu0 %vm40_vm0, %v26430_v50 }
0x1046   :  { %21806 = vmatprep.mubr.msk.f32.mxu0 %vm40_vm0, %v26438_v59  ;;  %v15972_v63 = vmul.f32 0.5, %v15909_v36 }
0x1048   :  { %v26601_v28 = vpop.f32.mrb[88].mxu1 }
0x1049   :  { %v15919_v46 = vpop.f32.mrb[89].mxu1  ;;  %21807 = vmatmul.mubr.msk.f32.gmra.mrb[240].mxu0 %vm40_vm0, %v26449_v53 }
0x104a   :  { %21809 = vmatprep.mubr.msk.f32.mxu0 %vm40_vm0, %v26458_v45  ;;  %v15971_v45 = vmul.f32 0.5, %v21756_v23 }
0x104c   :  { %v26607_v9 = vpop.f32.mrb[90].mxu1 }
0x104d   :  { %v15929_v62 = vpop.f32.mrb[91].mxu1  ;;  %21810 = vmatmul.mubr.msk.f32.gmra.mrb[242].mxu0 %vm40_vm0, %v26465_v14  ;;  %v15977_v12 = vmul.f32 0.5, %v26607_v9 }
0x104e   :  { %21812 = vmatprep.mubr.msk.f32.mxu0 %vm40_vm0, %v26472_v49  ;;  %v15973_v49 = vmul.f32 0.5, %v21759_v44 }
0x1050   :  { %v26613_v54 = vpop.f32.mrb[92].mxu1 }
0x1051   :  { %v15939_v30 = vpop.f32.mrb[93].mxu1  ;;  %21813 = vmatmul.mubr.msk.f32.gmra.mrb[244].mxu0 %vm40_vm0, %v26481_v4  ;;  %v15974_v4 = vmul.f32 0.5, %v15919_v46  ;;  %v15979_v61 = vmul.f32 0.5, %v26613_v54 }
0x1052   :  { %21815 = vmatprep.mubr.msk.f32.mxu0 %vm40_vm0, %v26488_v21  ;;  %v15978_v47 = vmul.f32 0.5, %v15939_v30 }
0x1054   :  { %v26619_v43 = vpop.f32.mrb[94].mxu1 }
0x1055   :  { %v15949_v29 = vpop.f32.mrb[95].mxu1  ;;  %21816 = vmatmul.mubr.msk.f32.gmra.mrb[246].mxu0 %vm40_vm0, %v26495_v58  ;;  %v15976_v58 = vmul.f32 0.5, %v15929_v62  ;;  %v15981_v37 = vmul.f32 0.5, %v26619_v43 }
0x1056   :  { %21818 = vmatprep.mubr.msk.f32.mxu0 %vm40_vm0, %v26502_v6  ;;  %v15980_v7 = vmul.f32 0.5, %v15949_v29 }
0x1058   :  { %v26625_v11 = vpop.f32.mrb[96].mxu1 }
0x1059   :  { %v26627_v13 = vpop.f32.mrb[97].mxu1  ;;  %21819 = vmatmul.mubr.msk.f32.gmra.mrb[248].mxu0 %vm40_vm0, %v26509_v41  ;;  %v15983_v52 = vmul.f32 0.5, %v26625_v11 }
0x105a   :  { %21821 = vmatprep.mubr.msk.f32.mxu0 %vm40_vm0, %v26516_v57  ;;  %v15982_v48 = vmul.f32 0.5, %v26627_v13 }
0x105c   :  { %v21779_v27 = vpop.f32.mrb[98].mxu1 }
0x105d   :  { %v16055_v26 = vpop.f32.mrb[99].mxu1  ;;  %21822 = vmatmul.mubr.msk.f32.gmra.mrb[250].mxu0 %vm40_vm0, %v26523_v56 }
0x105e   :  { %v22615_v35 = vpack.c.bf16 %v21779_v27, %v16055_v26  ;;  %21824 = vmatprep.mubr.msk.f32.mxu0 %vm40_vm0, %v26530_v20  ;;  %v15975_v20 = vmul.f32 0.5, %v26601_v28 }
0x1060   :  { %22617 = vmatprep.subr.msk.bf16.mxu1 %vm23529_vm2, %v22615_v35  ;;  %v21782_v22 = vpop.f32.mrb[100].mxu1 }
0x1061   :  { %22620 = vmatpush3.bf16.xpose.msk.msra.mxu1 %vm23529_vm2, %v22615_v35  ;;  %v16065_v60 = vpop.f32.mrb[101].mxu1  ;;  %21825 = vmatmul.mubr.msk.f32.gmra.mrb[252].mxu0 %vm40_vm0, %v26537_v51 }
0x1062   :  { %v22621_v3 = vpack.c.bf16 %v21782_v22, %v16065_v60  ;;  %21845 = vmatprep.mubr.msk.f32.mxu0 %vm551_vm1, %v15972_v63 }
0x1064   :  { %v21785_v31 = vpop.f32.mrb[102].mxu1  ;;  %22623 = vmatprep.subr.msk.bf16.mxu1 %vm23529_vm2, %v22621_v3 }
0x1065   :  { %v16075_v1 = vpop.f32.mrb[103].mxu1 }
0x1066   :  { %v22627_v5 = vpack.c.bf16 %v21785_v31, %v16075_v1 }
0x1068   :  { %21832 = vmatmul.mubr.msk.f32.vlgmr.msra.gmra.mrb[114].mxu1 %vm551_vm1, %v15969_v8  ;;  %22629 = vmatprep.subr.msk.bf16.mxu0 %vm23529_vm2, %v22627_v5  ;;  %v21788_v25 = vpop.f32.mrb[104].mxu1 }
0x1069   :  { %22626 = vmatpush3.bf16.xpose.msk.msra.mxu1 %vm23529_vm2, %v22621_v3  ;;  %21838 = vmatprep.mubr.msk.f32.mxu1 %vm551_vm1, %v15970_v17  ;;  %v16085_v50 = vpop.f32.mrb[105].mxu1 }
0x106a   :  { %22632 = vmatpush3.bf16.xpose.msk.msra.mxu0 %vm23529_vm2, %v22627_v5  ;;  %v22633_v55 = vpack.c.bf16 %v21788_v25, %v16085_v50 }
0x106c   :  { %v21791_v59 = vpop.f32.mrb[106].mxu1  ;;  %22635 = vmatprep.subr.msk.bf16.mxu1 %vm23529_vm2, %v22633_v55 }
0x106d   :  { %v16095_v53 = vpop.f32.mrb[107].mxu1 }
0x106e   :  { %v22639_v14 = vpack.c.bf16 %v21791_v59, %v16095_v53 }
0x1070   :  { %21839 = vmatmul.mubr.msk.f32.vlgmr.msra.gmra.mrb[116].mxu1 %vm551_vm1, %v15971_v45  ;;  %22641 = vmatprep.subr.msk.bf16.mxu0 %vm23529_vm2, %v22639_v14  ;;  %v21794_v21 = vpop.f32.mrb[108].mxu1 }
0x1071   :  { %21846 = vmatmul.mubr.msk.f32.vlgmr.msra.gmra.mrb[254].mxu0 %vm551_vm1, %v15973_v49  ;;  %22638 = vmatpush3.bf16.xpose.msk.msra.mxu1 %vm23529_vm2, %v22633_v55  ;;  %v16105_v6 = vpop.f32.mrb[109].mxu1 }
0x1072   :  { %21852 = vmatprep.mubr.msk.f32.mxu1 %vm551_vm1, %v15974_v4  ;;  %22644 = vmatpush3.bf16.xpose.msk.msra.mxu0 %vm23529_vm2, %v22639_v14  ;;  %v22645_v41 = vpack.c.bf16 %v21794_v21, %v16105_v6 }
0x1073   :  { %21859 = vmatprep.mubr.msk.f32.mxu0 %vm551_vm1, %v15976_v58 }
0x1074   :  { %v21797_v57 = vpop.f32.mrb[110].mxu1  ;;  %22647 = vmatprep.subr.msk.bf16.mxu1 %vm23529_vm2, %v22645_v41 }
0x1075   :  { %v16115_v56 = vpop.f32.mrb[111].mxu1 }
0x1076   :  { %v22651_v51 = vpack.c.bf16 %v21797_v57, %v16115_v56 }
0x1078   :  { %21853 = vmatmul.mubr.msk.f32.vlgmr.msra.gmra.mrb[118].mxu1 %vm551_vm1, %v15975_v20  ;;  %22653 = vmatprep.subr.msk.bf16.mxu0 %vm23529_vm2, %v22651_v51  ;;  %v21800_v24 = vpop.f32.mrb[112].mxu1 }
0x1079   :  { %21860 = vmatmul.mubr.msk.f32.vlgmr.msra.gmra.mrb[0].mxu0 %vm551_vm1, %v15977_v12  ;;  %22650 = vmatpush3.bf16.xpose.msk.msra.mxu1 %vm23529_vm2, %v22645_v41  ;;  %v16125_v34 = vpop.f32.mrb[113].mxu1 }
0x107a   :  { %21866 = vmatprep.mubr.msk.f32.mxu1 %vm551_vm1, %v15978_v47  ;;  %22656 = vmatpush3.bf16.xpose.msk.msra.mxu0 %vm23529_vm2, %v22651_v51  ;;  %v22657_v18 = vpack.c.bf16 %v21800_v24, %v16125_v34 }
0x107b   :  { %21873 = vmatprep.mubr.msk.f32.mxu0 %vm551_vm1, %v15980_v7 }
0x107c   :  { %22659 = vmatprep.subr.msk.bf16.mxu1 %vm23529_vm2, %v22657_v18 }
0x1080   :  { %21867 = vmatmul.mubr.msk.f32.vlgmr.msra.gmra.mrb[120].mxu1 %vm551_vm1, %v15979_v61 }
0x1081   :  { %21874 = vmatmul.mubr.msk.f32.vlgmr.msra.gmra.mrb[2].mxu0 %vm551_vm1, %v15981_v37  ;;  %22662 = vmatpush3.bf16.xpose.msk.msra.mxu1 %vm23529_vm2, %v22657_v18 }
0x1082   :  { %21880 = vmatprep.mubr.msk.f32.mxu1 %vm551_vm1, %v15982_v48 }
0x1088   :  { %21881 = vmatmul.mubr.msk.f32.vlgmr.msra.gmra.mrb[122].mxu1 %vm551_vm1, %v15983_v52 }
0x1118   :  { %v21805_v33 = vpop.f32.mrb[238].mxu0 }
0x1119   :  { %v16205_v10 = vpop.f32.mrb[239].mxu0 }
0x111a   :  { %v22663_v38 = vpack.c.bf16 %v21805_v33, %v16205_v10 }
0x111c   :  { %v21808_v39 = vpop.f32.mrb[240].mxu0  ;;  %22664 = vmatprep.subr.bf16.mxu0 %v22663_v38 }
0x111d   :  { %v16215_v0 = vpop.f32.mrb[241].mxu0  ;;  %22666 = vmatpush3.bf16.msra.mxu0 %v22663_v38 }
0x111e   :  { %v22667_v42 = vpack.c.bf16 %v21808_v39, %v16215_v0 }
0x1120   :  { %v21811_v15 = vpop.f32.mrb[242].mxu0  ;;  %22668 = vmatprep.subr.bf16.mxu1 %v22667_v42 }
0x1121   :  { %v16225_v19 = vpop.f32.mrb[243].mxu0  ;;  %22670 = vmatpush3.bf16.msra.mxu1 %v22667_v42 }
0x1122   :  { %v26692_v2 = vpack.c.bf16 %v21811_v15, %v16225_v19 }
0x1124   :  { %v21814_v32 = vpop.f32.mrb[244].mxu0  ;;  %22672 = vmatprep.subr.bf16.mxu0 %v26692_v2 }
0x1125   :  { %v16235_v23 = vpop.f32.mrb[245].mxu0 }
0x1126   :  { %v26695_v16 = vpack.c.bf16 %v21814_v32, %v16235_v23 }
0x1128   :  { %v21817_v44 = vpop.f32.mrb[246].mxu0  ;;  %22676 = vmatprep.subr.bf16.mxu1 %v26695_v16 }
0x1129   :  { %v16245_v36 = vpop.f32.mrb[247].mxu0 }
0x112a   :  { %v26698_v28 = vpack.c.bf16 %v21817_v44, %v16245_v36 }
0x112c   :  { %v21820_v46 = vpop.f32.mrb[248].mxu0 }
0x112d   :  { %v16255_v9 = vpop.f32.mrb[249].mxu0 }
0x112e   :  { %v26700_v62 = vpack.c.bf16 %v21820_v46, %v16255_v9 }
0x1130   :  { %v21823_v54 = vpop.f32.mrb[250].mxu0 }
0x1131   :  { %v16265_v30 = vpop.f32.mrb[251].mxu0 }
0x1132   :  { %v26702_v43 = vpack.c.bf16 %v21823_v54, %v16265_v30 }
0x1134   :  { %v21826_v29 = vpop.f32.mrb[252].mxu0 }
0x1135   :  { %v16275_v11 = vpop.f32.mrb[253].mxu0 }
0x1136   :  { %v26704_v13 = vpack.c.bf16 %v21826_v29, %v16275_v11 }
0x113b   :  { %v21833_v27 = vpop.f32.mrb[114].mxu1 }
0x113c   :  { %v16981_v26 = vsel %vm1248_vm3, %v21833_v27, -inf  ;;  %v16362_v35 = vpop.f32.mrb[115].mxu1 }
0x113d   :  { %v16980_v63 = vsel %vm1248_vm3, %v16362_v35, -inf }
0x113e   :  { %v16982_v22 = vmax.f32 %v16980_v63, %v16981_v26 }
0x1140   :  { %v16983_v60 = vrot.slane %v16982_v22, 4 }
0x1142   :  { %v16984_v3 = vmax.f32 %v16982_v22, %v16983_v60 }
0x1143   :  { %v21840_v31 = vpop.f32.mrb[116].mxu1 }
0x1144   :  { %v16985_v1 = vrot.slane %v16984_v3, 2  ;;  %v16990_v8 = vsel %vm1248_vm3, %v21840_v31, -inf  ;;  %v21847_v5 = vpop.f32.mrb[254].mxu0  ;;  %v16449_v17 = vpop.f32.mrb[117].mxu1 }
0x1145   :  { %v16999_v25 = vsel %vm1248_vm3, %v21847_v5, -inf  ;;  %v16989_v50 = vsel %vm1248_vm3, %v16449_v17, -inf  ;;  %v16536_v55 = vpop.f32.mrb[255].mxu0 }
0x1146   :  { %v16986_v59 = vmax.f32 %v16984_v3, %v16985_v1  ;;  %v16991_v53 = vmax.f32 %v16989_v50, %v16990_v8  ;;  %v16998_v45 = vsel %vm1248_vm3, %v16536_v55, -inf }
0x1147   :  { %v17000_v14 = vmax.f32 %v16998_v45, %v16999_v25 }
0x1148   :  { %v16987_v49 = vrot.slane %v16986_v59, 1  ;;  %v16992_v4 = vrot.slane %v16991_v53, 4 }
0x1149   :  { %v17001_v21 = vrot.slane %v17000_v14, 4 }
0x114a   :  { %v16988_v58 = vmax.f32 %v16986_v59, %v16987_v49  ;;  %v16993_v6 = vmax.f32 %v16991_v53, %v16992_v4 }
0x114b   :  { %v17002_v41 = vmax.f32 %v17000_v14, %v17001_v21  ;;  %v26712_v57 = vpop.f32.mrb[118].mxu1 }
0x114c   :  { %v17052_v56 = vsub.f32 %v16362_v35, %v16988_v58  ;;  %v17053_v20 = vsub.f32 %v21833_v27, %v16988_v58  ;;  %v16994_v51 = vrot.slane %v16993_v6, 2  ;;  %v17008_v12 = vsel %vm1248_vm3, %v26712_v57, -inf  ;;  %v26716_v47 = vpop.f32.mrb[0].mxu0  ;;  %v26718_v24 = vpop.f32.mrb[119].mxu1 }
0x114d   :  { %v17003_v7 = vrot.slane %v17002_v41, 2  ;;  %v17017_v34 = vsel %vm1248_vm3, %v26716_v47, -inf  ;;  %v17007_v18 = vsel %vm1248_vm3, %v26718_v24, -inf  ;;  %v26724_v61 = vpop.f32.mrb[1].mxu0 }
0x114e   :  { %v17068_v37 = vmul.f32 1.442695, %v17052_v56  ;;  %v17070_v48 = vmul.f32 1.442695, %v17053_v20  ;;  %v16995_v52 = vmax.f32 %v16993_v6, %v16994_v51  ;;  %v17009_v33 = vmax.f32 %v17007_v18, %v17008_v12 }
0x114f   :  { %v17004_v10 = vmax.f32 %v17002_v41, %v17003_v7  ;;  %v17016_v38 = vsel %vm1248_vm3, %v26724_v61, -inf }
0x1150   :  { %23157 = vpow2.f32 %v17068_v37  ;;  %v16996_v39 = vrot.slane %v16995_v52, 1  ;;  %v17010_v0 = vrot.slane %v17009_v33, 4  ;;  %v17018_v42 = vmax.f32 %v17016_v38, %v17017_v34 }
0x1151   :  { %23159 = vpow2.f32 %v17070_v48  ;;  %v17005_v15 = vrot.slane %v17004_v10, 1 }
0x1152   :  { %v16997_v19 = vmax.f32 %v16995_v52, %v16996_v39  ;;  %v17011_v32 = vmax.f32 %v17009_v33, %v17010_v0  ;;  %v17019_v23 = vrot.slane %v17018_v42, 4 }
0x1153   :  { %v17006_v44 = vmax.f32 %v17004_v10, %v17005_v15  ;;  %v26728_v36 = vpop.f32.mrb[120].mxu1 }
0x1154   :  { %v17054_v46 = vsub.f32 %v16449_v17, %v16997_v19  ;;  %v17055_v9 = vsub.f32 %v21840_v31, %v16997_v19  ;;  %v17012_v54 = vrot.slane %v17011_v32, 2  ;;  %v17020_v30 = vmax.f32 %v17018_v42, %v17019_v23  ;;  %v26730_v29 = vpop.f32.mrb[2].mxu0  ;;  %v26732_v11 = vpop.f32.mrb[121].mxu1 }
0x1155   :  { %v17056_v27 = vsub.f32 %v16536_v55, %v17006_v44  ;;  %v17057_v26 = vsub.f32 %v21847_v5, %v17006_v44  ;;  %v17026_v35 = vsel %vm1248_vm3, %v26728_v36, -inf  ;;  %v17035_v63 = vsel %vm1248_vm3, %v26730_v29, -inf  ;;  %v26738_v22 = vpop.f32.mrb[3].mxu0 }
0x1156   :  { %v17072_v60 = vmul.f32 1.442695, %v17054_v46  ;;  %v17074_v3 = vmul.f32 1.442695, %v17055_v9  ;;  %v17013_v1 = vmax.f32 %v17011_v32, %v17012_v54  ;;  %v17021_v31 = vrot.slane %v17020_v30, 2 }
0x1157   :  { %v17076_v8 = vmul.f32 1.442695, %v17056_v27  ;;  %v17078_v17 = vmul.f32 1.442695, %v17057_v26  ;;  %v17025_v25 = vsel %vm1248_vm3, %v26732_v11, -inf  ;;  %v17034_v5 = vsel %vm1248_vm3, %v26738_v22, -inf }
0x1158   :  { %23161 = vpow2.f32 %v17072_v60  ;;  %v17014_v50 = vrot.slane %v17013_v1, 1  ;;  %v17022_v55 = vmax.f32 %v17020_v30, %v17021_v31  ;;  %v17027_v59 = vmax.f32 %v17025_v25, %v17026_v35 }
0x1159   :  { %23163 = vpow2.f32 %v17074_v3  ;;  %v17036_v53 = vmax.f32 %v17034_v5, %v17035_v63 }
0x115a   :  { %v26744_v45 = vpop.eup %23157  ;;  %23165 = vpow2.f32 %v17076_v8  ;;  %v17015_v14 = vmax.f32 %v17013_v1, %v17014_v50  ;;  %v17023_v49 = vrot.slane %v17022_v55, 1  ;;  %v17028_v4 = vrot.slane %v17027_v59, 4 }
0x115b   :  { %v26746_v21 = vpop.eup %23159  ;;  %v17100_v58 = vsel %vm1248_vm3, %v26744_v45, 0.0  ;;  %23167 = vpow2.f32 %v17078_v17  ;;  %v17037_v6 = vrot.slane %v17036_v53, 4  ;;  %v26750_v41 = vpop.f32.mrb[122].mxu1 }
0x115c   :  { %v17101_v56 = vsel %vm1248_vm3, %v26746_v21, 0.0  ;;  %v17058_v20 = vsub.f32 %v26718_v24, %v17015_v14  ;;  %v17059_v51 = vsub.f32 %v26712_v57, %v17015_v14  ;;  %v17024_v12 = vmax.f32 %v17022_v55, %v17023_v49  ;;  %v26756_v7 = vpop.f32.mrb[123].mxu1 }
0x115d   :  { %v17102_v34 = vadd.f32 %v17101_v56, %v17100_v58  ;;  %v17029_v18 = vmax.f32 %v17027_v59, %v17028_v4  ;;  %v17038_v37 = vmax.f32 %v17036_v53, %v17037_v6  ;;  %v17044_v48 = vsel %vm1248_vm3, %v26750_v41, -inf }
0x115e   :  { %v17080_v52 = vmul.f32 1.442695, %v17058_v20  ;;  %v17082_v33 = vmul.f32 1.442695, %v17059_v51  ;;  %v17060_v10 = vsub.f32 %v26724_v61, %v17024_v12  ;;  %v17061_v38 = vsub.f32 %v26716_v47, %v17024_v12 }
0x115f   :  { %v17103_v39 = vrot.slane %v17102_v34, 4  ;;  %v17030_v0 = vrot.slane %v17029_v18, 2  ;;  %v17039_v24 = vrot.slane %v17038_v37, 2  ;;  %v17043_v57 = vsel %vm1248_vm3, %v26756_v7, -inf }
0x1160   :  { %23169 = vpow2.f32 %v17080_v52  ;;  %v17084_v42 = vmul.f32 1.442695, %v17060_v10  ;;  %v17086_v15 = vmul.f32 1.442695, %v17061_v38  ;;  %v17045_v19 = vmax.f32 %v17043_v57, %v17044_v48 }
0x1161   :  { %v17104_v32 = vadd.f32 %v17103_v39, %v17102_v34  ;;  %23171 = vpow2.f32 %v17082_v33  ;;  %v17031_v23 = vmax.f32 %v17029_v18, %v17030_v0  ;;  %v17040_v44 = vmax.f32 %v17038_v37, %v17039_v24 }
0x1162   :  { %v26764_v46 = vpop.eup %23161  ;;  %23173 = vpow2.f32 %v17084_v42  ;;  %v17046_v61 = vrot.slane %v17045_v19, 4 }
0x1163   :  { %v26766_v9 = vpop.eup %23163  ;;  %v17105_v47 = vrot.slane %v17104_v32, 2  ;;  %v17109_v54 = vsel %vm1248_vm3, %v26764_v46, 0.0  ;;  %23175 = vpow2.f32 %v17086_v15  ;;  %v17032_v30 = vrot.slane %v17031_v23, 1 }
0x1164   :  { %v26770_v27 = vpop.eup %23165  ;;  %v17110_v26 = vsel %vm1248_vm3, %v26766_v9, 0.0  ;;  %v17041_v35 = vrot.slane %v17040_v44, 1  ;;  %v17047_v63 = vmax.f32 %v17045_v19, %v17046_v61 }
0x1165   :  { %v26774_v60 = vpop.eup %23167  ;;  %v17106_v3 = vadd.f32 %v17105_v47, %v17104_v32  ;;  %v17111_v1 = vadd.f32 %v17110_v26, %v17109_v54  ;;  %v17118_v31 = vsel %vm1248_vm3, %v26770_v27, 0.0  ;;  %v17033_v8 = vmax.f32 %v17031_v23, %v17032_v30 }
0x1166   :  { %v17119_v17 = vsel %vm1248_vm3, %v26774_v60, 0.0  ;;  %v17042_v25 = vmax.f32 %v17040_v44, %v17041_v35  ;;  %v17048_v5 = vrot.slane %v17047_v63, 2 }
0x1167   :  { %v17107_v50 = vrot.slane %v17106_v3, 1  ;;  %v17112_v55 = vrot.slane %v17111_v1, 4  ;;  %v17120_v59 = vadd.f32 %v17119_v17, %v17118_v31  ;;  %v17062_v53 = vsub.f32 %v26732_v11, %v17033_v8 }
0x1168   :  { %v17063_v14 = vsub.f32 %v26728_v36, %v17033_v8  ;;  %v17064_v49 = vsub.f32 %v26738_v22, %v17042_v25  ;;  %v17065_v4 = vsub.f32 %v26730_v29, %v17042_v25  ;;  %v17049_v58 = vmax.f32 %v17047_v63, %v17048_v5 }
0x1169   :  { %v17108_v6 = vadd.f32 %v17107_v50, %v17106_v3  ;;  %v17113_v56 = vadd.f32 %v17112_v55, %v17111_v1  ;;  %v17121_v20 = vrot.slane %v17120_v59, 4  ;;  %v17088_v51 = vmul.f32 1.442695, %v17062_v53 }
0x116a   :  { %v26784_v12 = vpop.eup %23169  ;;  %v17090_v34 = vmul.f32 1.442695, %v17063_v14  ;;  %v17092_v22 = vmul.f32 1.442695, %v17064_v49  ;;  %v17050_v52 = vrot.slane %v17049_v58, 1 }
0x116b   :  { %v26786_v18 = vpop.eup %23171  ;;  %23177 = vrcp.f32 %v17108_v6  ;;  %v17114_v37 = vrot.slane %v17113_v56, 2  ;;  %v17122_v48 = vadd.f32 %v17121_v20, %v17120_v59  ;;  %v17127_v36 = vsel %vm1248_vm3, %v26784_v12, 0.0 }
0x116c   :  { %v26790_v11 = vpop.eup %23173  ;;  %v17128_v29 = vsel %vm1248_vm3, %v26786_v18, 0.0  ;;  %23179 = vpow2.f32 %v17088_v51  ;;  %v17094_v57 = vmul.f32 1.442695, %v17065_v4  ;;  %v17051_v42 = vmax.f32 %v17049_v58, %v17050_v52 }
0x116d   :  { %v26794_v33 = vpop.eup %23175  ;;  %v17115_v10 = vadd.f32 %v17114_v37, %v17113_v56  ;;  %v17123_v38 = vrot.slane %v17122_v48, 2  ;;  %v17129_v39 = vadd.f32 %v17128_v29, %v17127_v36  ;;  %v17136_v0 = vsel %vm1248_vm3, %v26790_v11, 0.0 }
0x116e   :  { %v17137_v24 = vsel %vm1248_vm3, %v26794_v33, 0.0  ;;  %23181 = vpow2.f32 %v17090_v34  ;;  %v17066_v44 = vsub.f32 %v26756_v7, %v17051_v42  ;;  %v17067_v61 = vsub.f32 %v26750_v41, %v17051_v42 }
0x116f   :  { %v17116_v15 = vrot.slane %v17115_v10, 1  ;;  %v17124_v19 = vadd.f32 %v17123_v38, %v17122_v48  ;;  %v17130_v32 = vrot.slane %v17129_v39, 4  ;;  %v17138_v23 = vadd.f32 %v17137_v24, %v17136_v0 }
0x1170   :  { %23183 = vpow2.f32 %v17092_v22  ;;  %v17096_v35 = vmul.f32 1.442695, %v17066_v44  ;;  %v17098_v63 = vmul.f32 1.442695, %v17067_v61 }
0x1171   :  { %v17117_v47 = vadd.f32 %v17116_v15, %v17115_v10  ;;  %v17125_v54 = vrot.slane %v17124_v19, 1  ;;  %v17131_v30 = vadd.f32 %v17130_v32, %v17129_v39  ;;  %v17139_v26 = vrot.slane %v17138_v23, 4 }
0x1172   :  { %23185 = vpow2.f32 %v17094_v57 }
0x1173   :  { %23187 = vrcp.f32 %v17117_v47  ;;  %v17126_v3 = vadd.f32 %v17125_v54, %v17124_v19  ;;  %v17132_v1 = vrot.slane %v17131_v30, 2  ;;  %v17140_v31 = vadd.f32 %v17139_v26, %v17138_v23  ;;  %v19090_v54 = vld [vmem:[%s26975_s4 + $0xe0] sm:$0xff] }
0x1174   :  { %23189 = vpow2.f32 %v17096_v35 }
0x1175   :  { %v23178_v8 = vpop.eup %23177  ;;  %23191 = vrcp.f32 %v17126_v3  ;;  %v17133_v17 = vadd.f32 %v17132_v1, %v17131_v30  ;;  %v17141_v25 = vrot.slane %v17140_v31, 2  ;;  %v19091_v30 = vld [vmem:[%s26975_s4 + $0xe8] sm:$0xff] }
0x1176   :  { %v26802_v5 = vpop.eup %23179  ;;  %v17181_v41 = vmul.f32 %v23178_v8, %v26746_v21  ;;  %23193 = vpow2.f32 %v17098_v63  ;;  %v17180_v7 = vmul.f32 %v23178_v8, %v26744_v45 }
0x1177   :  { %v17134_v50 = vrot.slane %v17133_v17, 1  ;;  %v17142_v55 = vadd.f32 %v17141_v25, %v17140_v31  ;;  %v17145_v59 = vsel %vm1248_vm3, %v26802_v5, 0.0 }
0x1178   :  { %v26808_v53 = vpop.eup %23181  ;;  %21887 = vmatprep.mubr.msk.f32.mxu0 %vm1248_vm3, %v17180_v7 }
0x1179   :  { %v17135_v14 = vadd.f32 %v17134_v50, %v17133_v17  ;;  %v17143_v49 = vrot.slane %v17142_v55, 1  ;;  %v17146_v4 = vsel %vm1248_vm3, %v26808_v53, 0.0  ;;  %21888 = vmatmul.mubr.msk.f32.vlgmr.msra.gmra.mrb[4].mxu0 %vm1248_vm3, %v17181_v41 }
0x117a   :  { %v26814_v21 = vpop.eup %23183  ;;  %v17147_v58 = vadd.f32 %v17146_v4, %v17145_v59  ;;  %22674 = vmatpush3.bf16.msra.mxu0 %v26692_v2 }
0x117b   :  { %23195 = vrcp.f32 %v17135_v14  ;;  %v17144_v45 = vadd.f32 %v17143_v49, %v17142_v55  ;;  %v17154_v6 = vsel %vm1248_vm3, %v26814_v21, 0.0  ;;  %22680 = vmatprep.subr.bf16.mxu0 %v26698_v28 }
0x117c   :  { %v26820_v56 = vpop.eup %23185  ;;  %v17148_v20 = vrot.slane %v17147_v58, 4 }
0x117d   :  { %v23188_v51 = vpop.eup %23187  ;;  %23197 = vrcp.f32 %v17144_v45  ;;  %v17155_v34 = vsel %vm1248_vm3, %v26820_v56, 0.0 }
0x117e   :  { %v26824_v37 = vpop.eup %23189  ;;  %v17183_v48 = vmul.f32 %v23188_v51, %v26766_v9  ;;  %v17149_v2 = vadd.f32 %v17148_v20, %v17147_v58  ;;  %v17156_v36 = vadd.f32 %v17155_v34, %v17154_v6  ;;  %v17182_v29 = vmul.f32 %v23188_v51, %v26764_v46 }
0x117f   :  { %v23192_v22 = vpop.eup %23191  ;;  %v17163_v52 = vsel %vm1248_vm3, %v26824_v37, 0.0 }
0x1180   :  { %v26830_v10 = vpop.eup %23193  ;;  %v17185_v38 = vmul.f32 %v23192_v22, %v26774_v60  ;;  %v17150_v39 = vrot.slane %v17149_v2, 2  ;;  %v17157_v0 = vrot.slane %v17156_v36, 4  ;;  %21894 = vmatprep.mubr.msk.f32.mxu1 %vm1248_vm3, %v17182_v29  ;;  %v17184_v24 = vmul.f32 %v23192_v22, %v26770_v27 }
0x1181   :  { %v17164_v9 = vsel %vm1248_vm3, %v26830_v10, 0.0  ;;  %21895 = vmatmul.mubr.msk.f32.vlgmr.msra.gmra.mrb[124].mxu1 %vm1248_vm3, %v17183_v48  ;;  %v19114_v48 = vld [vmem:[%s26976_s5] ss:$0 sm:$0xff] }
0x1182   :  { %v17151_v46 = vadd.f32 %v17150_v39, %v17149_v2  ;;  %v17158_v57 = vadd.f32 %v17157_v0, %v17156_v36  ;;  %v17165_v42 = vadd.f32 %v17164_v9, %v17163_v52  ;;  %21901 = vmatprep.mubr.msk.f32.mxu0 %vm1248_vm3, %v17184_v24  ;;  %22678 = vmatpush3.bf16.msra.mxu1 %v26695_v16 }
0x1183   :  { %21902 = vmatmul.mubr.msk.f32.vlgmr.msra.gmra.mrb[6].mxu0 %vm1248_vm3, %v17185_v38  ;;  %22684 = vmatprep.subr.bf16.mxu1 %v26700_v62 }
0x1184   :  { %v17152_v60 = vrot.slane %v17151_v46, 1  ;;  %v17159_v15 = vrot.slane %v17158_v57, 2  ;;  %v17166_v19 = vrot.slane %v17165_v42, 4  ;;  %22682 = vmatpush3.bf16.msra.mxu0 %v26698_v28 }
0x1185   :  { %v23196_v27 = vpop.eup %23195  ;;  %22688 = vmatprep.subr.bf16.mxu0 %v26702_v43 }
0x1186   :  { %v17187_v32 = vmul.f32 %v23196_v27, %v26786_v18  ;;  %v17153_v23 = vadd.f32 %v17152_v60, %v17151_v46  ;;  %v17160_v44 = vadd.f32 %v17159_v15, %v17158_v57  ;;  %v17167_v61 = vadd.f32 %v17166_v19, %v17165_v42 }
0x1187   :  { %v23198_v47 = vpop.eup %23197  ;;  %v17186_v16 = vmul.f32 %v23196_v27, %v26784_v12  ;;  %v22695_v12 = vpack.c.bf16 %v19091_v30, %v19090_v54 }
0x1188   :  { %v17189_v28 = vmul.f32 %v23198_v47, %v26794_v33  ;;  %23199 = vrcp.f32 %v17153_v23  ;;  %v17161_v26 = vrot.slane %v17160_v44, 1  ;;  %v17168_v35 = vrot.slane %v17167_v61, 2 }
0x1189   :  { %21908 = vmatprep.mubr.msk.f32.mxu1 %vm1248_vm3, %v17186_v16  ;;  %v17188_v18 = vmul.f32 %v23198_v47, %v26790_v11 }
0x118a   :  { %v17162_v63 = vadd.f32 %v17161_v26, %v17160_v44  ;;  %v17169_v3 = vadd.f32 %v17168_v35, %v17167_v61  ;;  %21909 = vmatmul.mubr.msk.f32.vlgmr.msra.gmra.mrb[126].mxu1 %vm1248_vm3, %v17187_v32 }
0x118b   :  { %21915 = vmatprep.mubr.msk.f32.mxu0 %vm1248_vm3, %v17188_v18  ;;  %22686 = vmatpush3.bf16.msra.mxu1 %v26700_v62  ;;  %v19092_v62 = vld [vmem:[%s26975_s4 + $0xf0] sm:$0xff] }
0x118c   :  { %23201 = vrcp.f32 %v17162_v63  ;;  %v17170_v1 = vrot.slane %v17169_v3, 1  ;;  %21916 = vmatmul.mubr.msk.f32.vlgmr.msra.gmra.mrb[8].mxu0 %vm1248_vm3, %v17189_v28  ;;  %22692 = vmatprep.subr.bf16.mxu1 %v26704_v13 }
0x118d   :  { %22690 = vmatpush3.bf16.msra.mxu0 %v26702_v43  ;;  %v19093_v43 = vld [vmem:[%s26975_s4 + $0xf8] sm:$0xff] }
0x118e   :  { %v17171_v33 = vadd.f32 %v17170_v1, %v17169_v3  ;;  %22697 = vmatprep.subr.msk.bf16.mxu0 %vm23529_vm2, %v22695_v12 }
0x1190   :  { %23203 = vrcp.f32 %v17171_v33 }
0x1192   :  { %v23200_v11 = vpop.eup %23199 }
0x1193   :  { %v17191_v31 = vmul.f32 %v23200_v11, %v26808_v53  ;;  %v17190_v8 = vmul.f32 %v23200_v11, %v26802_v5  ;;  %v22701_v5 = vpack.c.bf16 %v19093_v43, %v19092_v62 }
0x1195   :  { %21922 = vmatprep.mubr.msk.f32.mxu1 %vm1248_vm3, %v17190_v8 }
0x1196   :  { %v23202_v17 = vpop.eup %23201  ;;  %21923 = vmatmul.mubr.msk.f32.vlgmr.msra.gmra.mrb[128].mxu1 %vm1248_vm3, %v17191_v31 }
0x1197   :  { %v17193_v25 = vmul.f32 %v23202_v17, %v26820_v56  ;;  %v17192_v41 = vmul.f32 %v23202_v17, %v26814_v21  ;;  %22694 = vmatpush3.bf16.msra.mxu1 %v26704_v13 }
0x1199   :  { %21929 = vmatprep.mubr.msk.f32.mxu0 %vm1248_vm3, %v17192_v41 }
0x119a   :  { %v23204_v7 = vpop.eup %23203  ;;  %21930 = vmatmul.mubr.msk.f32.vlgmr.msra.gmra.mrb[10].mxu0 %vm1248_vm3, %v17193_v25 }
0x119b   :  { %v17195_v50 = vmul.f32 %v23204_v7, %v26830_v10  ;;  %v17194_v55 = vmul.f32 %v23204_v7, %v26824_v37  ;;  %22700 = vmatpush3.bf16.xpose.msk.msra.mxu0 %vm23529_vm2, %v22695_v12 }
0x119c   :  { %22703 = vmatprep.subr.msk.bf16.mxu0 %vm23529_vm2, %v22701_v5 }
0x119d   :  { %21936 = vmatprep.mubr.msk.f32.mxu1 %vm1248_vm3, %v17194_v55 }
0x119e   :  { %21937 = vmatmul.mubr.msk.f32.vlgmr.msra.gmra.mrb[130].mxu1 %vm1248_vm3, %v17195_v50 }
0x11a3   :  { %22706 = vmatpush3.bf16.xpose.msk.msra.mxu0 %vm23529_vm2, %v22701_v5 }
0x124c   :  { %v21889_v13 = vpop.f32.mrb[4].mxu0 }
0x124d   :  { %v17268_v59 = vpop.f32.mrb[5].mxu0 }
0x124e   :  { %21947 = vmatprep.mubr.msk.f32.mxu0 %vm551_vm1, %v17268_v59 }
0x124f   :  { %21948 = vmatmul.mubr.msk.f32.vlgmr.msra.gmra.mrb[78].mxu0 %vm551_vm1, %v21889_v13 }
0x1254   :  { %v21896_v53 = vpop.f32.mrb[124].mxu1 }
0x1255   :  { %v17349_v14 = vpop.f32.mrb[125].mxu1 }
0x1256   :  { %v21903_v49 = vpop.f32.mrb[6].mxu0  ;;  %21950 = vmatprep.mubr.msk.f32.mxu0 %vm551_vm1, %v17349_v14 }
0x1257   :  { %v17430_v4 = vpop.f32.mrb[7].mxu0  ;;  %21951 = vmatmul.mubr.msk.f32.gmra.mrb[80].mxu0 %vm551_vm1, %v21896_v53 }
0x1258   :  { %21953 = vmatprep.mubr.msk.f32.mxu0 %vm551_vm1, %v17430_v4 }
0x125b   :  { %21954 = vmatmul.mubr.msk.f32.gmra.mrb[82].mxu0 %vm551_vm1, %v21903_v49 }
0x125d   :  { %v21910_v40 = vpop.f32.mrb[126].mxu1 }
0x125e   :  { %v17511_v21 = vpop.f32.mrb[127].mxu1 }
0x125f   :  { %v21917_v58 = vpop.f32.mrb[8].mxu0  ;;  %21956 = vmatprep.mubr.msk.f32.mxu0 %vm551_vm1, %v17511_v21 }
0x1260   :  { %v17592_v45 = vpop.f32.mrb[9].mxu0  ;;  %21957 = vmatmul.mubr.msk.f32.gmra.mrb[84].mxu0 %vm551_vm1, %v21910_v40 }
0x1261   :  { %21959 = vmatprep.mubr.msk.f32.mxu0 %vm551_vm1, %v17592_v45 }
0x1264   :  { %21960 = vmatmul.mubr.msk.f32.gmra.mrb[86].mxu0 %vm551_vm1, %v21917_v58 }
0x1269   :  { %v21924_v6 = vpop.f32.mrb[128].mxu1 }
0x126a   :  { %v17673_v56 = vpop.f32.mrb[129].mxu1 }
0x126b   :  { %21962 = vmatprep.mubr.msk.f32.mxu0 %vm551_vm1, %v17673_v56 }
0x126c   :  { %21963 = vmatmul.mubr.msk.f32.gmra.mrb[88].mxu0 %vm551_vm1, %v21924_v6 }
0x126d   :  { %v21931_v20 = vpop.f32.mrb[10].mxu0 }
0x126e   :  { %v17754_v51 = vpop.f32.mrb[11].mxu0 }
0x126f   :  { %21965 = vmatprep.mubr.msk.f32.mxu0 %vm551_vm1, %v17754_v51 }
0x1270   :  { %21966 = vmatmul.mubr.msk.f32.gmra.mrb[90].mxu0 %vm551_vm1, %v21931_v20 }
0x1271   :  { %v21938_v34 = vpop.f32.mrb[130].mxu1 }
0x1272   :  { %v17835_v37 = vpop.f32.mrb[131].mxu1 }
0x1273   :  { %21968 = vmatprep.mubr.msk.f32.mxu0 %vm551_vm1, %v17835_v37 }
0x1274   :  { %21969 = vmatmul.mubr.msk.f32.gmra.mrb[92].mxu0 %vm551_vm1, %v21938_v34 }
0x1322   :  { %v21949_v2 = vpop.f32.mrb[78].mxu0 }
0x1323   :  { %v18078_v36 = vadd.f32 %v21949_v2, %v19114_v48  ;;  %v17975_v29 = vpop.f32.mrb[79].mxu0 }
0x1324   :  { %v18077_v22 = vadd.f32 %v19114_v48, %v17975_v29 }
0x1325   :  { %18094 = vst.msk [vmem:[%s26977_s6 + $0x8] sm:$0xff] %vm40_vm0, %v18078_v36 }
0x1326   :  { %18093 = vst.msk [vmem:[%s26977_s6] sm:$0xff] %vm40_vm0, %v18077_v22 }
0x132a   :  { %v21952_v52 = vpop.f32.mrb[80].mxu0 }
0x132b   :  { %v18080_v10 = vadd.f32 %v21952_v52, %v19114_v48  ;;  %v17985_v38 = vpop.f32.mrb[81].mxu0 }
0x132c   :  { %v18079_v39 = vadd.f32 %v19114_v48, %v17985_v38 }
0x132d   :  { %18096 = vst.msk [vmem:[%s26977_s6 + $0x18] sm:$0xff] %vm40_vm0, %v18080_v10 }
0x132e   :  { %18095 = vst.msk [vmem:[%s26977_s6 + $0x10] sm:$0xff] %vm40_vm0, %v18079_v39  ;;  %v21955_v0 = vpop.f32.mrb[82].mxu0 }
0x132f   :  { %v18082_v24 = vadd.f32 %v21955_v0, %v19114_v48  ;;  %v17995_v9 = vpop.f32.mrb[83].mxu0 }
0x1330   :  { %v18081_v46 = vadd.f32 %v19114_v48, %v17995_v9 }
0x1331   :  { %18098 = vst.msk [vmem:[%s26977_s6 + $0x28] sm:$0xff] %vm40_vm0, %v18082_v24 }
0x1332   :  { %18097 = vst.msk [vmem:[%s26977_s6 + $0x20] sm:$0xff] %vm40_vm0, %v18081_v46 }
0x1333   :  { %v21958_v57 = vpop.f32.mrb[84].mxu0 }
0x1334   :  { %v18084_v42 = vadd.f32 %v21958_v57, %v19114_v48  ;;  %v18005_v60 = vpop.f32.mrb[85].mxu0 }
0x1335   :  { %v18083_v15 = vadd.f32 %v19114_v48, %v18005_v60 }
0x1336   :  { %18100 = vst.msk [vmem:[%s26977_s6 + $0x38] sm:$0xff] %vm40_vm0, %v18084_v42 }
0x1337   :  { %18099 = vst.msk [vmem:[%s26977_s6 + $0x30] sm:$0xff] %vm40_vm0, %v18083_v15  ;;  %v21961_v19 = vpop.f32.mrb[86].mxu0 }
0x1338   :  { %v18086_v27 = vadd.f32 %v21961_v19, %v19114_v48  ;;  %v18015_v32 = vpop.f32.mrb[87].mxu0 }
0x1339   :  { %v18085_v23 = vadd.f32 %v19114_v48, %v18015_v32 }
0x133a   :  { %18102 = vst.msk [vmem:[%s26977_s6 + $0x48] sm:$0xff] %vm40_vm0, %v18086_v27 }
0x133b   :  { %18101 = vst.msk [vmem:[%s26977_s6 + $0x40] sm:$0xff] %vm40_vm0, %v18085_v23 }
0x133f   :  { %v21964_v44 = vpop.f32.mrb[88].mxu0 }
0x1340   :  { %v18088_v61 = vadd.f32 %v21964_v44, %v19114_v48  ;;  %v18025_v47 = vpop.f32.mrb[89].mxu0 }
0x1341   :  { %v18087_v16 = vadd.f32 %v19114_v48, %v18025_v47 }
0x1342   :  { %18104 = vst.msk [vmem:[%s26977_s6 + $0x58] sm:$0xff] %vm40_vm0, %v18088_v61 }
0x1343   :  { %18103 = vst.msk [vmem:[%s26977_s6 + $0x50] sm:$0xff] %vm40_vm0, %v18087_v16  ;;  %v21967_v54 = vpop.f32.mrb[90].mxu0 }
0x1344   :  { %v18090_v30 = vadd.f32 %v21967_v54, %v19114_v48  ;;  %v18035_v28 = vpop.f32.mrb[91].mxu0 }
0x1345   :  { %v18089_v26 = vadd.f32 %v19114_v48, %v18035_v28 }
0x1346   :  { %18106 = vst.msk [vmem:[%s26977_s6 + $0x68] sm:$0xff] %vm40_vm0, %v18090_v30 }
0x1347   :  { %18105 = vst.msk [vmem:[%s26977_s6 + $0x60] sm:$0xff] %vm40_vm0, %v18089_v26  ;;  %v21970_v35 = vpop.f32.mrb[92].mxu0 }
0x1348   :  { %v18092_v18 = vadd.f32 %v21970_v35, %v19114_v48  ;;  %v18045_v63 = vpop.f32.mrb[93].mxu0 }
0x1349   :  { %v18091_v3 = vadd.f32 %v19114_v48, %v18045_v63 }
0x134a   :  { %18108 = vst.msk [vmem:[%s26977_s6 + $0x78] sm:$0xff] %vm40_vm0, %v18092_v18 }
0x134b   :  { %18107 = vst.msk [vmem:[%s26977_s6 + $0x70] sm:$0xff] %vm40_vm0, %v18091_v3 }

</bundles_post_ra>
